<compile_context>
chip_gen: v6e
topology: v6e:2x2x1
jax: 0.10.0
libtpu: 0.0.40
codegen_flags: <defaults>
</compile_context>

<pallas_src>
import jax
import jax.numpy as jnp
from jax.experimental import pallas as pl
from jax.experimental.pallas import tpu as pltpu

HIDDEN_SIZE = 50
INPUT_SIZE = 1       # kernel exploits this (scalar-per-row input projection)
NUM_LAYERS = 2       # kernel is written explicitly for 2 layers (matches module)
OUTPUT_SIZE = 1
GATE_PAD = 128       # each gate's 50 columns padded to one full 128-lane tile
G4 = 4 * GATE_PAD


def _lstm_fc_kernel(x_ref,      # (B, T)      raw inputs (INPUT_SIZE==1 squeezed out)
                    wih0_ref,   # (1, 4*Gp)   layer-0 input weight row (gate-padded)
                    b0_ref,     # (1, 4*Gp)   combined layer-0 bias (b_ih + b_hh)
                    whh0_ref,   # (Gp, 4*Gp)  layer-0 recurrent weight (zero-padded)
                    wih1_ref,   # (Gp, 4*Gp)  layer-1 input weight
                    whh1_ref,   # (Gp, 4*Gp)  layer-1 recurrent weight
                    b1_ref,     # (1, 4*Gp)   combined layer-1 bias
                    wfc_ref,    # (Gp, O)
                    bfc_ref,    # (1, O)
                    out_ref):   # (B, O)
    B, T = x_ref.shape
    G4_ = b0_ref.shape[-1]
    Gp = G4_ // 4

    # Hoisted once (JAX does not CSE broadcast_in_dim across loop iterations).
    w0b = jnp.broadcast_to(wih0_ref[...], (B, G4_))
    b0b = jnp.broadcast_to(b0_ref[...], (B, G4_))
    b1b = jnp.broadcast_to(b1_ref[...], (B, G4_))

    def gates(pre):
        # lane-tile aligned slices: gate k occupies lanes [k*128, (k+1)*128)
        i = jax.nn.sigmoid(pre[:, 0 * Gp:1 * Gp])
        f = jax.nn.sigmoid(pre[:, 1 * Gp:2 * Gp])
        g = jnp.tanh(pre[:, 2 * Gp:3 * Gp])
        o = jax.nn.sigmoid(pre[:, 3 * Gp:4 * Gp])
        return i, f, g, o

    # Recurrent state carried in registers (one vreg each), never through VMEM.
    zeros = jnp.zeros((B, Gp), jnp.float32)
    h0, c0, h1, c1 = zeros, zeros, zeros, zeros

    # T is small & static: fully unroll so independent work of adjacent steps can
    # overlap in the scheduler.
    for t in range(T):
        # Layer-1 recurrent half: depends only on PREVIOUS h1, so it runs in
        # parallel with all of layer-0 below (off the step's critical path).
        r1 = jnp.dot(h1, whh1_ref[...], preferred_element_type=jnp.float32) + b1b

        # Layer 0. Input projection is a per-row scalar * weight-row broadcast
        # (INPUT_SIZE == 1) -> pure VPU work, also off the serial MXU chain.
        pre0 = x_ref[:, t:t + 1] * w0b + b0b
        g0 = pre0 + jnp.dot(h0, whh0_ref[...], preferred_element_type=jnp.float32)
        i0, f0, gg0, o0 = gates(g0)
        c0 = f0 * c0 + i0 * gg0
        h0 = o0 * jnp.tanh(c0)

        # Layer-1 input half: the only matmul that must wait for this step's h0.
        g1 = r1 + jnp.dot(h0, wih1_ref[...], preferred_element_type=jnp.float32)
        i1, f1, gg1, o1 = gates(g1)
        c1 = f1 * c1 + i1 * gg1
        h1 = o1 * jnp.tanh(c1)

    # fc applied to out[:, -1, :] == last h of the top layer.
    # Padded lanes of h1 are exactly 0 and padded rows of wfc are 0 -> exact.
    out_ref[...] = (jnp.dot(h1, wfc_ref[...], preferred_element_type=jnp.float32)
                    + bfc_ref[...]).astype(out_ref.dtype)


@jax.jit
def stock_prediction_forward(x, params):
    """x: (B, T, INPUT_SIZE) float32 -> (B, OUTPUT_SIZE) float32."""
    B, T, I = x.shape
    assert I == INPUT_SIZE == 1, "kernel specializes the input projection for input_size == 1"
    H, O, Gp = HIDDEN_SIZE, OUTPUT_SIZE, GATE_PAD

    def pad_gate_cols(w):        # (in, 4H) -> (in, 4*Gp): zero-pad each gate block to Gp lanes
        return jnp.pad(w.reshape(w.shape[0], 4, H),
                       ((0, 0), (0, 0), (0, Gp - H))).reshape(w.shape[0], 4 * Gp)

    def pad_rows(w, rows):       # zero-pad the contraction dim
        return jnp.pad(w, ((0, rows - w.shape[0]), (0, 0)))

    def pad_gate_bias(b):        # (4H,) -> (1, 4*Gp)
        return jnp.pad(b.reshape(4, H), ((0, 0), (0, Gp - H))).reshape(1, 4 * Gp)

    x_bt = x[:, :, 0].astype(jnp.float32)                             # (B, T)

    wih0 = pad_gate_cols(params["w_ih_l0"].T.astype(jnp.float32))     # (1, 4*Gp)
    b0 = pad_gate_bias((params["b_ih_l0"] + params["b_hh_l0"]).astype(jnp.float32))
    whh0 = pad_rows(pad_gate_cols(params["w_hh_l0"].T.astype(jnp.float32)), Gp)
    wih1 = pad_rows(pad_gate_cols(params["w_ih_l1"].T.astype(jnp.float32)), Gp)
    whh1 = pad_rows(pad_gate_cols(params["w_hh_l1"].T.astype(jnp.float32)), Gp)
    b1 = pad_gate_bias((params["b_ih_l1"] + params["b_hh_l1"]).astype(jnp.float32))
    wfc = pad_rows(params["fc_w"].T.astype(jnp.float32), Gp)          # (Gp, O)
    bfc = params["fc_b"].reshape(1, O).astype(jnp.float32)            # (1, O)

    full = lambda shape: pl.BlockSpec(shape, lambda i: (0,) * len(shape))

    # TODO(synk): if B/T grow, add a 'parallel' batch grid axis (2 TCs on v7x)
    # and chunk T with a BlockSpec on x instead of keeping it fully resident.
    out = pl.pallas_call(
        _lstm_fc_kernel,
        out_shape=jax.ShapeDtypeStruct((B, O), jnp.float32),
        grid_spec=pltpu.PrefetchScalarGridSpec(
            num_scalar_prefetch=0,
            grid=(1,),
            in_specs=[
                full((B, T)),
                full((1, 4 * Gp)),
                full((1, 4 * Gp)),
                full((Gp, 4 * Gp)),
                full((Gp, 4 * Gp)),
                full((Gp, 4 * Gp)),
                full((1, 4 * Gp)),
                full((Gp, O)),
                full((1, O)),
            ],
            out_specs=full((B, O)),
        ),
        compiler_params=pltpu.CompilerParams(
            dimension_semantics=("arbitrary",)),
    )(x_bt, wih0, b0, whh0, wih1, whh1, b1, wfc, bfc)
    return out


def _init_params(key):
    """Deterministic synthetic parameters matching nn.LSTM / nn.Linear shapes."""
    H, I, O = HIDDEN_SIZE, INPUT_SIZE, OUTPUT_SIZE
    bound = 1.0 / jnp.sqrt(jnp.float32(H))
    names_shapes = [
        ("w_ih_l0", (4 * H, I)), ("w_hh_l0", (4 * H, H)),
        ("b_ih_l0", (4 * H,)),   ("b_hh_l0", (4 * H,)),
        ("w_ih_l1", (4 * H, H)), ("w_hh_l1", (4 * H, H)),
        ("b_ih_l1", (4 * H,)),   ("b_hh_l1", (4 * H,)),
        ("fc_w", (O, H)),        ("fc_b", (O,)),
    ]
    params = {}
    keys = jax.random.split(key, len(names_shapes))
    for k, (name, shape) in zip(keys, names_shapes):
        params[name] = jax.random.uniform(
            k, shape, jnp.float32, minval=-bound, maxval=bound)
    return params


def _reference_forward(x, params):
    """Pure-JAX reference of the PyTorch forward (unpadded), for verification."""
    H = HIDDEN_SIZE
    B, T, _ = x.shape

    def cell(x_t, h, c, wih, whh, bih, bhh):
        gates = x_t @ wih.T + bih + h @ whh.T + bhh
        i = jax.nn.sigmoid(gates[:, 0 * H:1 * H])
        f = jax.nn.sigmoid(gates[:, 1 * H:2 * H])
        g = jnp.tanh(gates[:, 2 * H:3 * H])
        o = jax.nn.sigmoid(gates[:, 3 * H:4 * H])
        c_new = f * c + i * g
        return o * jnp.tanh(c_new), c_new

    h0 = c0 = h1 = c1 = jnp.zeros((B, H), jnp.float32)
    for t in range(T):
        x_t = x[:, t, :]
        h0, c0 = cell(x_t, h0, c0, params["w_ih_l0"], params["w_hh_l0"],
                      params["b_ih_l0"], params["b_hh_l0"])
        h1, c1 = cell(h0, h1, c1, params["w_ih_l1"], params["w_hh_l1"],
                      params["b_ih_l1"], params["b_hh_l1"])
    return h1 @ params["fc_w"].T + params["fc_b"]


if __name__ == "__main__":
    key = jax.random.PRNGKey(0)
    k_param, k_x = jax.random.split(key)

    B, T = 2, 8
    x = jax.random.normal(k_x, (B, T, INPUT_SIZE), jnp.float32)
    params = _init_params(k_param)

    out = stock_prediction_forward(x, params)
    out = jax.block_until_ready(out)

    ref = _reference_forward(x, params)
    assert out.shape == (B, OUTPUT_SIZE)
    assert jnp.allclose(out, ref, atol=2e-3, rtol=2e-3), (out, ref)

    print("KERNEL_OK")
</pallas_src>

<mosaic_0001>
module attributes {stable_mosaic.version = 11 : i64} {
  func.func @_lstm_fc_kernel(%arg0: i32, %arg1: memref<2x8xf32, #tpu.memory_space<vmem>>, %arg2: memref<1x512xf32, #tpu.memory_space<vmem>>, %arg3: memref<1x512xf32, #tpu.memory_space<vmem>>, %arg4: memref<128x512xf32, #tpu.memory_space<vmem>>, %arg5: memref<128x512xf32, #tpu.memory_space<vmem>>, %arg6: memref<128x512xf32, #tpu.memory_space<vmem>>, %arg7: memref<1x512xf32, #tpu.memory_space<vmem>>, %arg8: memref<128x1xf32, #tpu.memory_space<vmem>>, %arg9: memref<1x1xf32, #tpu.memory_space<vmem>>, %arg10: memref<2x1xf32, #tpu.memory_space<vmem>>) attributes {dimension_semantics = [#tpu.dimension_semantics<arbitrary>], iteration_bounds = array<i64: 1>, scalar_prefetch = 0 : i64, scratch_operands = 0 : i64, tpu.core_type = #tpu.core_type<tc>, window_params = [{pipeline_mode = #tpu.pipeline_mode<synchronous>, transform_indices = @transform_0, window_bounds = array<i64: 2, 8>}, {pipeline_mode = #tpu.pipeline_mode<synchronous>, transform_indices = @transform_1, window_bounds = array<i64: 1, 512>}, {pipeline_mode = #tpu.pipeline_mode<synchronous>, transform_indices = @transform_2, window_bounds = array<i64: 1, 512>}, {pipeline_mode = #tpu.pipeline_mode<synchronous>, transform_indices = @transform_3, window_bounds = array<i64: 128, 512>}, {pipeline_mode = #tpu.pipeline_mode<synchronous>, transform_indices = @transform_4, window_bounds = array<i64: 128, 512>}, {pipeline_mode = #tpu.pipeline_mode<synchronous>, transform_indices = @transform_5, window_bounds = array<i64: 128, 512>}, {pipeline_mode = #tpu.pipeline_mode<synchronous>, transform_indices = @transform_6, window_bounds = array<i64: 1, 512>}, {pipeline_mode = #tpu.pipeline_mode<synchronous>, transform_indices = @transform_7, window_bounds = array<i64: 128, 1>}, {pipeline_mode = #tpu.pipeline_mode<synchronous>, transform_indices = @transform_8, window_bounds = array<i64: 1, 1>}, {pipeline_mode = #tpu.pipeline_mode<synchronous>, transform_indices = @transform_9, window_bounds = array<i64: 2, 1>}]} {
    %c0 = arith.constant 0 : index
    %c0_0 = arith.constant 0 : index
    %0 = vector.load %arg2[%c0, %c0_0] : memref<1x512xf32, #tpu.memory_space<vmem>>, vector<1x512xf32>
    %1 = vector.shape_cast %0 : vector<1x512xf32> to vector<1x512xf32>
    %2 = vector.broadcast %1 : vector<1x512xf32> to vector<2x512xf32>
    %c0_1 = arith.constant 0 : index
    %c0_2 = arith.constant 0 : index
    %3 = vector.load %arg3[%c0_1, %c0_2] : memref<1x512xf32, #tpu.memory_space<vmem>>, vector<1x512xf32>
    %4 = vector.shape_cast %3 : vector<1x512xf32> to vector<1x512xf32>
    %5 = vector.broadcast %4 : vector<1x512xf32> to vector<2x512xf32>
    %c0_3 = arith.constant 0 : index
    %c0_4 = arith.constant 0 : index
    %6 = vector.load %arg7[%c0_3, %c0_4] : memref<1x512xf32, #tpu.memory_space<vmem>>, vector<1x512xf32>
    %7 = vector.shape_cast %6 : vector<1x512xf32> to vector<1x512xf32>
    %8 = vector.broadcast %7 : vector<1x512xf32> to vector<2x512xf32>
    %cst = arith.constant 0.000000e+00 : f32
    %9 = vector.broadcast %cst : f32 to vector<2x128xf32>
    %c0_5 = arith.constant 0 : index
    %c0_6 = arith.constant 0 : index
    %10 = vector.load %arg6[%c0_5, %c0_6] : memref<128x512xf32, #tpu.memory_space<vmem>>, vector<128x512xf32>
    %cst_7 = arith.constant dense<0.000000e+00> : vector<2x512xf32>
    %11 = tpu.matmul %9, %10, %cst_7 {dimension_numbers = #tpu.dot_dimension_numbers<[1], [0], [0], [1], [0, 0, 1, 1], [], []>} : vector<2x128xf32>, vector<128x512xf32>, vector<2x512xf32> -> vector<2x512xf32>
    %12 = arith.addf %11, %8 : vector<2x512xf32>
    %c0_8 = arith.constant 0 : index
    %c0_9 = arith.constant 0 : index
    %13 = vector.load %arg1[%c0_8, %c0_9] : memref<2x8xf32, #tpu.memory_space<vmem>>, vector<2x1xf32>
    %14 = vector.broadcast %13 : vector<2x1xf32> to vector<2x512xf32>
    %15 = arith.mulf %14, %2 : vector<2x512xf32>
    %16 = arith.addf %15, %5 : vector<2x512xf32>
    %c0_10 = arith.constant 0 : index
    %c0_11 = arith.constant 0 : index
    %17 = vector.load %arg4[%c0_10, %c0_11] : memref<128x512xf32, #tpu.memory_space<vmem>>, vector<128x512xf32>
    %cst_12 = arith.constant dense<0.000000e+00> : vector<2x512xf32>
    %18 = tpu.matmul %9, %17, %cst_12 {dimension_numbers = #tpu.dot_dimension_numbers<[1], [0], [0], [1], [0, 0, 1, 1], [], []>} : vector<2x128xf32>, vector<128x512xf32>, vector<2x512xf32> -> vector<2x512xf32>
    %19 = arith.addf %16, %18 : vector<2x512xf32>
    %20 = vector.extract_strided_slice %19 {offsets = [0, 0], sizes = [2, 128], strides = [1, 1]} : vector<2x512xf32> to vector<2x128xf32>
    %21 = arith.negf %20 : vector<2x128xf32>
    %22 = math.exp %21 : vector<2x128xf32>
    %cst_13 = arith.constant 1.000000e+00 : f32
    %23 = vector.broadcast %cst_13 : f32 to vector<2x128xf32>
    %24 = arith.addf %23, %22 : vector<2x128xf32>
    %25 = arith.divf %23, %24 : vector<2x128xf32>
    %26 = vector.extract_strided_slice %19 {offsets = [0, 128], sizes = [2, 128], strides = [1, 1]} : vector<2x512xf32> to vector<2x128xf32>
    %27 = arith.negf %26 : vector<2x128xf32>
    %28 = math.exp %27 : vector<2x128xf32>
    %cst_14 = arith.constant 1.000000e+00 : f32
    %29 = vector.broadcast %cst_14 : f32 to vector<2x128xf32>
    %30 = arith.addf %29, %28 : vector<2x128xf32>
    %31 = arith.divf %29, %30 : vector<2x128xf32>
    %32 = vector.extract_strided_slice %19 {offsets = [0, 256], sizes = [2, 128], strides = [1, 1]} : vector<2x512xf32> to vector<2x128xf32>
    %33 = math.tanh %32 : vector<2x128xf32>
    %34 = vector.extract_strided_slice %19 {offsets = [0, 384], sizes = [2, 128], strides = [1, 1]} : vector<2x512xf32> to vector<2x128xf32>
    %35 = arith.negf %34 : vector<2x128xf32>
    %36 = math.exp %35 : vector<2x128xf32>
    %cst_15 = arith.constant 1.000000e+00 : f32
    %37 = vector.broadcast %cst_15 : f32 to vector<2x128xf32>
    %38 = arith.addf %37, %36 : vector<2x128xf32>
    %39 = arith.divf %37, %38 : vector<2x128xf32>
    %40 = arith.mulf %31, %9 : vector<2x128xf32>
    %41 = arith.mulf %25, %33 : vector<2x128xf32>
    %42 = arith.addf %40, %41 : vector<2x128xf32>
    %43 = math.tanh %42 : vector<2x128xf32>
    %44 = arith.mulf %39, %43 : vector<2x128xf32>
    %c0_16 = arith.constant 0 : index
    %c0_17 = arith.constant 0 : index
    %45 = vector.load %arg5[%c0_16, %c0_17] : memref<128x512xf32, #tpu.memory_space<vmem>>, vector<128x512xf32>
    %cst_18 = arith.constant dense<0.000000e+00> : vector<2x512xf32>
    %46 = tpu.matmul %44, %45, %cst_18 {dimension_numbers = #tpu.dot_dimension_numbers<[1], [0], [0], [1], [0, 0, 1, 1], [], []>} : vector<2x128xf32>, vector<128x512xf32>, vector<2x512xf32> -> vector<2x512xf32>
    %47 = arith.addf %12, %46 : vector<2x512xf32>
    %48 = vector.extract_strided_slice %47 {offsets = [0, 0], sizes = [2, 128], strides = [1, 1]} : vector<2x512xf32> to vector<2x128xf32>
    %49 = arith.negf %48 : vector<2x128xf32>
    %50 = math.exp %49 : vector<2x128xf32>
    %cst_19 = arith.constant 1.000000e+00 : f32
    %51 = vector.broadcast %cst_19 : f32 to vector<2x128xf32>
    %52 = arith.addf %51, %50 : vector<2x128xf32>
    %53 = arith.divf %51, %52 : vector<2x128xf32>
    %54 = vector.extract_strided_slice %47 {offsets = [0, 128], sizes = [2, 128], strides = [1, 1]} : vector<2x512xf32> to vector<2x128xf32>
    %55 = arith.negf %54 : vector<2x128xf32>
    %56 = math.exp %55 : vector<2x128xf32>
    %cst_20 = arith.constant 1.000000e+00 : f32
    %57 = vector.broadcast %cst_20 : f32 to vector<2x128xf32>
    %58 = arith.addf %57, %56 : vector<2x128xf32>
    %59 = arith.divf %57, %58 : vector<2x128xf32>
    %60 = vector.extract_strided_slice %47 {offsets = [0, 256], sizes = [2, 128], strides = [1, 1]} : vector<2x512xf32> to vector<2x128xf32>
    %61 = math.tanh %60 : vector<2x128xf32>
    %62 = vector.extract_strided_slice %47 {offsets = [0, 384], sizes = [2, 128], strides = [1, 1]} : vector<2x512xf32> to vector<2x128xf32>
    %63 = arith.negf %62 : vector<2x128xf32>
    %64 = math.exp %63 : vector<2x128xf32>
    %cst_21 = arith.constant 1.000000e+00 : f32
    %65 = vector.broadcast %cst_21 : f32 to vector<2x128xf32>
    %66 = arith.addf %65, %64 : vector<2x128xf32>
    %67 = arith.divf %65, %66 : vector<2x128xf32>
    %68 = arith.mulf %59, %9 : vector<2x128xf32>
    %69 = arith.mulf %53, %61 : vector<2x128xf32>
    %70 = arith.addf %68, %69 : vector<2x128xf32>
    %71 = math.tanh %70 : vector<2x128xf32>
    %72 = arith.mulf %67, %71 : vector<2x128xf32>
    %c0_22 = arith.constant 0 : index
    %c0_23 = arith.constant 0 : index
    %73 = vector.load %arg6[%c0_22, %c0_23] : memref<128x512xf32, #tpu.memory_space<vmem>>, vector<128x512xf32>
    %cst_24 = arith.constant dense<0.000000e+00> : vector<2x512xf32>
    %74 = tpu.matmul %72, %73, %cst_24 {dimension_numbers = #tpu.dot_dimension_numbers<[1], [0], [0], [1], [0, 0, 1, 1], [], []>} : vector<2x128xf32>, vector<128x512xf32>, vector<2x512xf32> -> vector<2x512xf32>
    %75 = arith.addf %74, %8 : vector<2x512xf32>
    %c0_25 = arith.constant 0 : index
    %c1 = arith.constant 1 : index
    %76 = vector.load %arg1[%c0_25, %c1] : memref<2x8xf32, #tpu.memory_space<vmem>>, vector<2x1xf32>
    %77 = vector.broadcast %76 : vector<2x1xf32> to vector<2x512xf32>
    %78 = arith.mulf %77, %2 : vector<2x512xf32>
    %79 = arith.addf %78, %5 : vector<2x512xf32>
    %c0_26 = arith.constant 0 : index
    %c0_27 = arith.constant 0 : index
    %80 = vector.load %arg4[%c0_26, %c0_27] : memref<128x512xf32, #tpu.memory_space<vmem>>, vector<128x512xf32>
    %cst_28 = arith.constant dense<0.000000e+00> : vector<2x512xf32>
    %81 = tpu.matmul %44, %80, %cst_28 {dimension_numbers = #tpu.dot_dimension_numbers<[1], [0], [0], [1], [0, 0, 1, 1], [], []>} : vector<2x128xf32>, vector<128x512xf32>, vector<2x512xf32> -> vector<2x512xf32>
    %82 = arith.addf %79, %81 : vector<2x512xf32>
    %83 = vector.extract_strided_slice %82 {offsets = [0, 0], sizes = [2, 128], strides = [1, 1]} : vector<2x512xf32> to vector<2x128xf32>
    %84 = arith.negf %83 : vector<2x128xf32>
    %85 = math.exp %84 : vector<2x128xf32>
    %cst_29 = arith.constant 1.000000e+00 : f32
    %86 = vector.broadcast %cst_29 : f32 to vector<2x128xf32>
    %87 = arith.addf %86, %85 : vector<2x128xf32>
    %88 = arith.divf %86, %87 : vector<2x128xf32>
    %89 = vector.extract_strided_slice %82 {offsets = [0, 128], sizes = [2, 128], strides = [1, 1]} : vector<2x512xf32> to vector<2x128xf32>
    %90 = arith.negf %89 : vector<2x128xf32>
    %91 = math.exp %90 : vector<2x128xf32>
    %cst_30 = arith.constant 1.000000e+00 : f32
    %92 = vector.broadcast %cst_30 : f32 to vector<2x128xf32>
    %93 = arith.addf %92, %91 : vector<2x128xf32>
    %94 = arith.divf %92, %93 : vector<2x128xf32>
    %95 = vector.extract_strided_slice %82 {offsets = [0, 256], sizes = [2, 128], strides = [1, 1]} : vector<2x512xf32> to vector<2x128xf32>
    %96 = math.tanh %95 : vector<2x128xf32>
    %97 = vector.extract_strided_slice %82 {offsets = [0, 384], sizes = [2, 128], strides = [1, 1]} : vector<2x512xf32> to vector<2x128xf32>
    %98 = arith.negf %97 : vector<2x128xf32>
    %99 = math.exp %98 : vector<2x128xf32>
    %cst_31 = arith.constant 1.000000e+00 : f32
    %100 = vector.broadcast %cst_31 : f32 to vector<2x128xf32>
    %101 = arith.addf %100, %99 : vector<2x128xf32>
    %102 = arith.divf %100, %101 : vector<2x128xf32>
    %103 = arith.mulf %94, %42 : vector<2x128xf32>
    %104 = arith.mulf %88, %96 : vector<2x128xf32>
    %105 = arith.addf %103, %104 : vector<2x128xf32>
    %106 = math.tanh %105 : vector<2x128xf32>
    %107 = arith.mulf %102, %106 : vector<2x128xf32>
    %c0_32 = arith.constant 0 : index
    %c0_33 = arith.constant 0 : index
    %108 = vector.load %arg5[%c0_32, %c0_33] : memref<128x512xf32, #tpu.memory_space<vmem>>, vector<128x512xf32>
    %cst_34 = arith.constant dense<0.000000e+00> : vector<2x512xf32>
    %109 = tpu.matmul %107, %108, %cst_34 {dimension_numbers = #tpu.dot_dimension_numbers<[1], [0], [0], [1], [0, 0, 1, 1], [], []>} : vector<2x128xf32>, vector<128x512xf32>, vector<2x512xf32> -> vector<2x512xf32>
    %110 = arith.addf %75, %109 : vector<2x512xf32>
    %111 = vector.extract_strided_slice %110 {offsets = [0, 0], sizes = [2, 128], strides = [1, 1]} : vector<2x512xf32> to vector<2x128xf32>
    %112 = arith.negf %111 : vector<2x128xf32>
    %113 = math.exp %112 : vector<2x128xf32>
    %cst_35 = arith.constant 1.000000e+00 : f32
    %114 = vector.broadcast %cst_35 : f32 to vector<2x128xf32>
    %115 = arith.addf %114, %113 : vector<2x128xf32>
    %116 = arith.divf %114, %115 : vector<2x128xf32>
    %117 = vector.extract_strided_slice %110 {offsets = [0, 128], sizes = [2, 128], strides = [1, 1]} : vector<2x512xf32> to vector<2x128xf32>
    %118 = arith.negf %117 : vector<2x128xf32>
    %119 = math.exp %118 : vector<2x128xf32>
    %cst_36 = arith.constant 1.000000e+00 : f32
    %120 = vector.broadcast %cst_36 : f32 to vector<2x128xf32>
    %121 = arith.addf %120, %119 : vector<2x128xf32>
    %122 = arith.divf %120, %121 : vector<2x128xf32>
    %123 = vector.extract_strided_slice %110 {offsets = [0, 256], sizes = [2, 128], strides = [1, 1]} : vector<2x512xf32> to vector<2x128xf32>
    %124 = math.tanh %123 : vector<2x128xf32>
    %125 = vector.extract_strided_slice %110 {offsets = [0, 384], sizes = [2, 128], strides = [1, 1]} : vector<2x512xf32> to vector<2x128xf32>
    %126 = arith.negf %125 : vector<2x128xf32>
    %127 = math.exp %126 : vector<2x128xf32>
    %cst_37 = arith.constant 1.000000e+00 : f32
    %128 = vector.broadcast %cst_37 : f32 to vector<2x128xf32>
    %129 = arith.addf %128, %127 : vector<2x128xf32>
    %130 = arith.divf %128, %129 : vector<2x128xf32>
    %131 = arith.mulf %122, %70 : vector<2x128xf32>
    %132 = arith.mulf %116, %124 : vector<2x128xf32>
    %133 = arith.addf %131, %132 : vector<2x128xf32>
    %134 = math.tanh %133 : vector<2x128xf32>
    %135 = arith.mulf %130, %134 : vector<2x128xf32>
    %c0_38 = arith.constant 0 : index
    %c0_39 = arith.constant 0 : index
    %136 = vector.load %arg6[%c0_38, %c0_39] : memref<128x512xf32, #tpu.memory_space<vmem>>, vector<128x512xf32>
    %cst_40 = arith.constant dense<0.000000e+00> : vector<2x512xf32>
    %137 = tpu.matmul %135, %136, %cst_40 {dimension_numbers = #tpu.dot_dimension_numbers<[1], [0], [0], [1], [0, 0, 1, 1], [], []>} : vector<2x128xf32>, vector<128x512xf32>, vector<2x512xf32> -> vector<2x512xf32>
    %138 = arith.addf %137, %8 : vector<2x512xf32>
    %c0_41 = arith.constant 0 : index
    %c2 = arith.constant 2 : index
    %139 = vector.load %arg1[%c0_41, %c2] : memref<2x8xf32, #tpu.memory_space<vmem>>, vector<2x1xf32>
    %140 = vector.broadcast %139 : vector<2x1xf32> to vector<2x512xf32>
    %141 = arith.mulf %140, %2 : vector<2x512xf32>
    %142 = arith.addf %141, %5 : vector<2x512xf32>
    %c0_42 = arith.constant 0 : index
    %c0_43 = arith.constant 0 : index
    %143 = vector.load %arg4[%c0_42, %c0_43] : memref<128x512xf32, #tpu.memory_space<vmem>>, vector<128x512xf32>
    %cst_44 = arith.constant dense<0.000000e+00> : vector<2x512xf32>
    %144 = tpu.matmul %107, %143, %cst_44 {dimension_numbers = #tpu.dot_dimension_numbers<[1], [0], [0], [1], [0, 0, 1, 1], [], []>} : vector<2x128xf32>, vector<128x512xf32>, vector<2x512xf32> -> vector<2x512xf32>
    %145 = arith.addf %142, %144 : vector<2x512xf32>
    %146 = vector.extract_strided_slice %145 {offsets = [0, 0], sizes = [2, 128], strides = [1, 1]} : vector<2x512xf32> to vector<2x128xf32>
    %147 = arith.negf %146 : vector<2x128xf32>
    %148 = math.exp %147 : vector<2x128xf32>
    %cst_45 = arith.constant 1.000000e+00 : f32
    %149 = vector.broadcast %cst_45 : f32 to vector<2x128xf32>
    %150 = arith.addf %149, %148 : vector<2x128xf32>
    %151 = arith.divf %149, %150 : vector<2x128xf32>
    %152 = vector.extract_strided_slice %145 {offsets = [0, 128], sizes = [2, 128], strides = [1, 1]} : vector<2x512xf32> to vector<2x128xf32>
    %153 = arith.negf %152 : vector<2x128xf32>
    %154 = math.exp %153 : vector<2x128xf32>
    %cst_46 = arith.constant 1.000000e+00 : f32
    %155 = vector.broadcast %cst_46 : f32 to vector<2x128xf32>
    %156 = arith.addf %155, %154 : vector<2x128xf32>
    %157 = arith.divf %155, %156 : vector<2x128xf32>
    %158 = vector.extract_strided_slice %145 {offsets = [0, 256], sizes = [2, 128], strides = [1, 1]} : vector<2x512xf32> to vector<2x128xf32>
    %159 = math.tanh %158 : vector<2x128xf32>
    %160 = vector.extract_strided_slice %145 {offsets = [0, 384], sizes = [2, 128], strides = [1, 1]} : vector<2x512xf32> to vector<2x128xf32>
    %161 = arith.negf %160 : vector<2x128xf32>
    %162 = math.exp %161 : vector<2x128xf32>
    %cst_47 = arith.constant 1.000000e+00 : f32
    %163 = vector.broadcast %cst_47 : f32 to vector<2x128xf32>
    %164 = arith.addf %163, %162 : vector<2x128xf32>
    %165 = arith.divf %163, %164 : vector<2x128xf32>
    %166 = arith.mulf %157, %105 : vector<2x128xf32>
    %167 = arith.mulf %151, %159 : vector<2x128xf32>
    %168 = arith.addf %166, %167 : vector<2x128xf32>
    %169 = math.tanh %168 : vector<2x128xf32>
    %170 = arith.mulf %165, %169 : vector<2x128xf32>
    %c0_48 = arith.constant 0 : index
    %c0_49 = arith.constant 0 : index
    %171 = vector.load %arg5[%c0_48, %c0_49] : memref<128x512xf32, #tpu.memory_space<vmem>>, vector<128x512xf32>
    %cst_50 = arith.constant dense<0.000000e+00> : vector<2x512xf32>
    %172 = tpu.matmul %170, %171, %cst_50 {dimension_numbers = #tpu.dot_dimension_numbers<[1], [0], [0], [1], [0, 0, 1, 1], [], []>} : vector<2x128xf32>, vector<128x512xf32>, vector<2x512xf32> -> vector<2x512xf32>
    %173 = arith.addf %138, %172 : vector<2x512xf32>
    %174 = vector.extract_strided_slice %173 {offsets = [0, 0], sizes = [2, 128], strides = [1, 1]} : vector<2x512xf32> to vector<2x128xf32>
    %175 = arith.negf %174 : vector<2x128xf32>
    %176 = math.exp %175 : vector<2x128xf32>
    %cst_51 = arith.constant 1.000000e+00 : f32
    %177 = vector.broadcast %cst_51 : f32 to vector<2x128xf32>
    %178 = arith.addf %177, %176 : vector<2x128xf32>
    %179 = arith.divf %177, %178 : vector<2x128xf32>
    %180 = vector.extract_strided_slice %173 {offsets = [0, 128], sizes = [2, 128], strides = [1, 1]} : vector<2x512xf32> to vector<2x128xf32>
    %181 = arith.negf %180 : vector<2x128xf32>
    %182 = math.exp %181 : vector<2x128xf32>
    %cst_52 = arith.constant 1.000000e+00 : f32
    %183 = vector.broadcast %cst_52 : f32 to vector<2x128xf32>
    %184 = arith.addf %183, %182 : vector<2x128xf32>
    %185 = arith.divf %183, %184 : vector<2x128xf32>
    %186 = vector.extract_strided_slice %173 {offsets = [0, 256], sizes = [2, 128], strides = [1, 1]} : vector<2x512xf32> to vector<2x128xf32>
    %187 = math.tanh %186 : vector<2x128xf32>
    %188 = vector.extract_strided_slice %173 {offsets = [0, 384], sizes = [2, 128], strides = [1, 1]} : vector<2x512xf32> to vector<2x128xf32>
    %189 = arith.negf %188 : vector<2x128xf32>
    %190 = math.exp %189 : vector<2x128xf32>
    %cst_53 = arith.constant 1.000000e+00 : f32
    %191 = vector.broadcast %cst_53 : f32 to vector<2x128xf32>
    %192 = arith.addf %191, %190 : vector<2x128xf32>
    %193 = arith.divf %191, %192 : vector<2x128xf32>
    %194 = arith.mulf %185, %133 : vector<2x128xf32>
    %195 = arith.mulf %179, %187 : vector<2x128xf32>
    %196 = arith.addf %194, %195 : vector<2x128xf32>
    %197 = math.tanh %196 : vector<2x128xf32>
    %198 = arith.mulf %193, %197 : vector<2x128xf32>
    %c0_54 = arith.constant 0 : index
    %c0_55 = arith.constant 0 : index
    %199 = vector.load %arg6[%c0_54, %c0_55] : memref<128x512xf32, #tpu.memory_space<vmem>>, vector<128x512xf32>
    %cst_56 = arith.constant dense<0.000000e+00> : vector<2x512xf32>
    %200 = tpu.matmul %198, %199, %cst_56 {dimension_numbers = #tpu.dot_dimension_numbers<[1], [0], [0], [1], [0, 0, 1, 1], [], []>} : vector<2x128xf32>, vector<128x512xf32>, vector<2x512xf32> -> vector<2x512xf32>
    %201 = arith.addf %200, %8 : vector<2x512xf32>
    %c0_57 = arith.constant 0 : index
    %c3 = arith.constant 3 : index
    %202 = vector.load %arg1[%c0_57, %c3] : memref<2x8xf32, #tpu.memory_space<vmem>>, vector<2x1xf32>
    %203 = vector.broadcast %202 : vector<2x1xf32> to vector<2x512xf32>
    %204 = arith.mulf %203, %2 : vector<2x512xf32>
    %205 = arith.addf %204, %5 : vector<2x512xf32>
    %c0_58 = arith.constant 0 : index
    %c0_59 = arith.constant 0 : index
    %206 = vector.load %arg4[%c0_58, %c0_59] : memref<128x512xf32, #tpu.memory_space<vmem>>, vector<128x512xf32>
    %cst_60 = arith.constant dense<0.000000e+00> : vector<2x512xf32>
    %207 = tpu.matmul %170, %206, %cst_60 {dimension_numbers = #tpu.dot_dimension_numbers<[1], [0], [0], [1], [0, 0, 1, 1], [], []>} : vector<2x128xf32>, vector<128x512xf32>, vector<2x512xf32> -> vector<2x512xf32>
    %208 = arith.addf %205, %207 : vector<2x512xf32>
    %209 = vector.extract_strided_slice %208 {offsets = [0, 0], sizes = [2, 128], strides = [1, 1]} : vector<2x512xf32> to vector<2x128xf32>
    %210 = arith.negf %209 : vector<2x128xf32>
    %211 = math.exp %210 : vector<2x128xf32>
    %cst_61 = arith.constant 1.000000e+00 : f32
    %212 = vector.broadcast %cst_61 : f32 to vector<2x128xf32>
    %213 = arith.addf %212, %211 : vector<2x128xf32>
    %214 = arith.divf %212, %213 : vector<2x128xf32>
    %215 = vector.extract_strided_slice %208 {offsets = [0, 128], sizes = [2, 128], strides = [1, 1]} : vector<2x512xf32> to vector<2x128xf32>
    %216 = arith.negf %215 : vector<2x128xf32>
    %217 = math.exp %216 : vector<2x128xf32>
    %cst_62 = arith.constant 1.000000e+00 : f32
    %218 = vector.broadcast %cst_62 : f32 to vector<2x128xf32>
    %219 = arith.addf %218, %217 : vector<2x128xf32>
    %220 = arith.divf %218, %219 : vector<2x128xf32>
    %221 = vector.extract_strided_slice %208 {offsets = [0, 256], sizes = [2, 128], strides = [1, 1]} : vector<2x512xf32> to vector<2x128xf32>
    %222 = math.tanh %221 : vector<2x128xf32>
    %223 = vector.extract_strided_slice %208 {offsets = [0, 384], sizes = [2, 128], strides = [1, 1]} : vector<2x512xf32> to vector<2x128xf32>
    %224 = arith.negf %223 : vector<2x128xf32>
    %225 = math.exp %224 : vector<2x128xf32>
    %cst_63 = arith.constant 1.000000e+00 : f32
    %226 = vector.broadcast %cst_63 : f32 to vector<2x128xf32>
    %227 = arith.addf %226, %225 : vector<2x128xf32>
    %228 = arith.divf %226, %227 : vector<2x128xf32>
    %229 = arith.mulf %220, %168 : vector<2x128xf32>
    %230 = arith.mulf %214, %222 : vector<2x128xf32>
    %231 = arith.addf %229, %230 : vector<2x128xf32>
    %232 = math.tanh %231 : vector<2x128xf32>
    %233 = arith.mulf %228, %232 : vector<2x128xf32>
    %c0_64 = arith.constant 0 : index
    %c0_65 = arith.constant 0 : index
    %234 = vector.load %arg5[%c0_64, %c0_65] : memref<128x512xf32, #tpu.memory_space<vmem>>, vector<128x512xf32>
    %cst_66 = arith.constant dense<0.000000e+00> : vector<2x512xf32>
    %235 = tpu.matmul %233, %234, %cst_66 {dimension_numbers = #tpu.dot_dimension_numbers<[1], [0], [0], [1], [0, 0, 1, 1], [], []>} : vector<2x128xf32>, vector<128x512xf32>, vector<2x512xf32> -> vector<2x512xf32>
    %236 = arith.addf %201, %235 : vector<2x512xf32>
    %237 = vector.extract_strided_slice %236 {offsets = [0, 0], sizes = [2, 128], strides = [1, 1]} : vector<2x512xf32> to vector<2x128xf32>
    %238 = arith.negf %237 : vector<2x128xf32>
    %239 = math.exp %238 : vector<2x128xf32>
    %cst_67 = arith.constant 1.000000e+00 : f32
    %240 = vector.broadcast %cst_67 : f32 to vector<2x128xf32>
    %241 = arith.addf %240, %239 : vector<2x128xf32>
    %242 = arith.divf %240, %241 : vector<2x128xf32>
    %243 = vector.extract_strided_slice %236 {offsets = [0, 128], sizes = [2, 128], strides = [1, 1]} : vector<2x512xf32> to vector<2x128xf32>
    %244 = arith.negf %243 : vector<2x128xf32>
    %245 = math.exp %244 : vector<2x128xf32>
    %cst_68 = arith.constant 1.000000e+00 : f32
    %246 = vector.broadcast %cst_68 : f32 to vector<2x128xf32>
    %247 = arith.addf %246, %245 : vector<2x128xf32>
    %248 = arith.divf %246, %247 : vector<2x128xf32>
    %249 = vector.extract_strided_slice %236 {offsets = [0, 256], sizes = [2, 128], strides = [1, 1]} : vector<2x512xf32> to vector<2x128xf32>
    %250 = math.tanh %249 : vector<2x128xf32>
    %251 = vector.extract_strided_slice %236 {offsets = [0, 384], sizes = [2, 128], strides = [1, 1]} : vector<2x512xf32> to vector<2x128xf32>
    %252 = arith.negf %251 : vector<2x128xf32>
    %253 = math.exp %252 : vector<2x128xf32>
    %cst_69 = arith.constant 1.000000e+00 : f32
    %254 = vector.broadcast %cst_69 : f32 to vector<2x128xf32>
    %255 = arith.addf %254, %253 : vector<2x128xf32>
    %256 = arith.divf %254, %255 : vector<2x128xf32>
    %257 = arith.mulf %248, %196 : vector<2x128xf32>
    %258 = arith.mulf %242, %250 : vector<2x128xf32>
    %259 = arith.addf %257, %258 : vector<2x128xf32>
    %260 = math.tanh %259 : vector<2x128xf32>
    %261 = arith.mulf %256, %260 : vector<2x128xf32>
    %c0_70 = arith.constant 0 : index
    %c0_71 = arith.constant 0 : index
    %262 = vector.load %arg6[%c0_70, %c0_71] : memref<128x512xf32, #tpu.memory_space<vmem>>, vector<128x512xf32>
    %cst_72 = arith.constant dense<0.000000e+00> : vector<2x512xf32>
    %263 = tpu.matmul %261, %262, %cst_72 {dimension_numbers = #tpu.dot_dimension_numbers<[1], [0], [0], [1], [0, 0, 1, 1], [], []>} : vector<2x128xf32>, vector<128x512xf32>, vector<2x512xf32> -> vector<2x512xf32>
    %264 = arith.addf %263, %8 : vector<2x512xf32>
    %c0_73 = arith.constant 0 : index
    %c4 = arith.constant 4 : index
    %265 = vector.load %arg1[%c0_73, %c4] : memref<2x8xf32, #tpu.memory_space<vmem>>, vector<2x1xf32>
    %266 = vector.broadcast %265 : vector<2x1xf32> to vector<2x512xf32>
    %267 = arith.mulf %266, %2 : vector<2x512xf32>
    %268 = arith.addf %267, %5 : vector<2x512xf32>
    %c0_74 = arith.constant 0 : index
    %c0_75 = arith.constant 0 : index
    %269 = vector.load %arg4[%c0_74, %c0_75] : memref<128x512xf32, #tpu.memory_space<vmem>>, vector<128x512xf32>
    %cst_76 = arith.constant dense<0.000000e+00> : vector<2x512xf32>
    %270 = tpu.matmul %233, %269, %cst_76 {dimension_numbers = #tpu.dot_dimension_numbers<[1], [0], [0], [1], [0, 0, 1, 1], [], []>} : vector<2x128xf32>, vector<128x512xf32>, vector<2x512xf32> -> vector<2x512xf32>
    %271 = arith.addf %268, %270 : vector<2x512xf32>
    %272 = vector.extract_strided_slice %271 {offsets = [0, 0], sizes = [2, 128], strides = [1, 1]} : vector<2x512xf32> to vector<2x128xf32>
    %273 = arith.negf %272 : vector<2x128xf32>
    %274 = math.exp %273 : vector<2x128xf32>
    %cst_77 = arith.constant 1.000000e+00 : f32
    %275 = vector.broadcast %cst_77 : f32 to vector<2x128xf32>
    %276 = arith.addf %275, %274 : vector<2x128xf32>
    %277 = arith.divf %275, %276 : vector<2x128xf32>
    %278 = vector.extract_strided_slice %271 {offsets = [0, 128], sizes = [2, 128], strides = [1, 1]} : vector<2x512xf32> to vector<2x128xf32>
    %279 = arith.negf %278 : vector<2x128xf32>
    %280 = math.exp %279 : vector<2x128xf32>
    %cst_78 = arith.constant 1.000000e+00 : f32
    %281 = vector.broadcast %cst_78 : f32 to vector<2x128xf32>
    %282 = arith.addf %281, %280 : vector<2x128xf32>
    %283 = arith.divf %281, %282 : vector<2x128xf32>
    %284 = vector.extract_strided_slice %271 {offsets = [0, 256], sizes = [2, 128], strides = [1, 1]} : vector<2x512xf32> to vector<2x128xf32>
    %285 = math.tanh %284 : vector<2x128xf32>
    %286 = vector.extract_strided_slice %271 {offsets = [0, 384], sizes = [2, 128], strides = [1, 1]} : vector<2x512xf32> to vector<2x128xf32>
    %287 = arith.negf %286 : vector<2x128xf32>
    %288 = math.exp %287 : vector<2x128xf32>
    %cst_79 = arith.constant 1.000000e+00 : f32
    %289 = vector.broadcast %cst_79 : f32 to vector<2x128xf32>
    %290 = arith.addf %289, %288 : vector<2x128xf32>
    %291 = arith.divf %289, %290 : vector<2x128xf32>
    %292 = arith.mulf %283, %231 : vector<2x128xf32>
    %293 = arith.mulf %277, %285 : vector<2x128xf32>
    %294 = arith.addf %292, %293 : vector<2x128xf32>
    %295 = math.tanh %294 : vector<2x128xf32>
    %296 = arith.mulf %291, %295 : vector<2x128xf32>
    %c0_80 = arith.constant 0 : index
    %c0_81 = arith.constant 0 : index
    %297 = vector.load %arg5[%c0_80, %c0_81] : memref<128x512xf32, #tpu.memory_space<vmem>>, vector<128x512xf32>
    %cst_82 = arith.constant dense<0.000000e+00> : vector<2x512xf32>
    %298 = tpu.matmul %296, %297, %cst_82 {dimension_numbers = #tpu.dot_dimension_numbers<[1], [0], [0], [1], [0, 0, 1, 1], [], []>} : vector<2x128xf32>, vector<128x512xf32>, vector<2x512xf32> -> vector<2x512xf32>
    %299 = arith.addf %264, %298 : vector<2x512xf32>
    %300 = vector.extract_strided_slice %299 {offsets = [0, 0], sizes = [2, 128], strides = [1, 1]} : vector<2x512xf32> to vector<2x128xf32>
    %301 = arith.negf %300 : vector<2x128xf32>
    %302 = math.exp %301 : vector<2x128xf32>
    %cst_83 = arith.constant 1.000000e+00 : f32
    %303 = vector.broadcast %cst_83 : f32 to vector<2x128xf32>
    %304 = arith.addf %303, %302 : vector<2x128xf32>
    %305 = arith.divf %303, %304 : vector<2x128xf32>
    %306 = vector.extract_strided_slice %299 {offsets = [0, 128], sizes = [2, 128], strides = [1, 1]} : vector<2x512xf32> to vector<2x128xf32>
    %307 = arith.negf %306 : vector<2x128xf32>
    %308 = math.exp %307 : vector<2x128xf32>
    %cst_84 = arith.constant 1.000000e+00 : f32
    %309 = vector.broadcast %cst_84 : f32 to vector<2x128xf32>
    %310 = arith.addf %309, %308 : vector<2x128xf32>
    %311 = arith.divf %309, %310 : vector<2x128xf32>
    %312 = vector.extract_strided_slice %299 {offsets = [0, 256], sizes = [2, 128], strides = [1, 1]} : vector<2x512xf32> to vector<2x128xf32>
    %313 = math.tanh %312 : vector<2x128xf32>
    %314 = vector.extract_strided_slice %299 {offsets = [0, 384], sizes = [2, 128], strides = [1, 1]} : vector<2x512xf32> to vector<2x128xf32>
    %315 = arith.negf %314 : vector<2x128xf32>
    %316 = math.exp %315 : vector<2x128xf32>
    %cst_85 = arith.constant 1.000000e+00 : f32
    %317 = vector.broadcast %cst_85 : f32 to vector<2x128xf32>
    %318 = arith.addf %317, %316 : vector<2x128xf32>
    %319 = arith.divf %317, %318 : vector<2x128xf32>
    %320 = arith.mulf %311, %259 : vector<2x128xf32>
    %321 = arith.mulf %305, %313 : vector<2x128xf32>
    %322 = arith.addf %320, %321 : vector<2x128xf32>
    %323 = math.tanh %322 : vector<2x128xf32>
    %324 = arith.mulf %319, %323 : vector<2x128xf32>
    %c0_86 = arith.constant 0 : index
    %c0_87 = arith.constant 0 : index
    %325 = vector.load %arg6[%c0_86, %c0_87] : memref<128x512xf32, #tpu.memory_space<vmem>>, vector<128x512xf32>
    %cst_88 = arith.constant dense<0.000000e+00> : vector<2x512xf32>
    %326 = tpu.matmul %324, %325, %cst_88 {dimension_numbers = #tpu.dot_dimension_numbers<[1], [0], [0], [1], [0, 0, 1, 1], [], []>} : vector<2x128xf32>, vector<128x512xf32>, vector<2x512xf32> -> vector<2x512xf32>
    %327 = arith.addf %326, %8 : vector<2x512xf32>
    %c0_89 = arith.constant 0 : index
    %c5 = arith.constant 5 : index
    %328 = vector.load %arg1[%c0_89, %c5] : memref<2x8xf32, #tpu.memory_space<vmem>>, vector<2x1xf32>
    %329 = vector.broadcast %328 : vector<2x1xf32> to vector<2x512xf32>
    %330 = arith.mulf %329, %2 : vector<2x512xf32>
    %331 = arith.addf %330, %5 : vector<2x512xf32>
    %c0_90 = arith.constant 0 : index
    %c0_91 = arith.constant 0 : index
    %332 = vector.load %arg4[%c0_90, %c0_91] : memref<128x512xf32, #tpu.memory_space<vmem>>, vector<128x512xf32>
    %cst_92 = arith.constant dense<0.000000e+00> : vector<2x512xf32>
    %333 = tpu.matmul %296, %332, %cst_92 {dimension_numbers = #tpu.dot_dimension_numbers<[1], [0], [0], [1], [0, 0, 1, 1], [], []>} : vector<2x128xf32>, vector<128x512xf32>, vector<2x512xf32> -> vector<2x512xf32>
    %334 = arith.addf %331, %333 : vector<2x512xf32>
    %335 = vector.extract_strided_slice %334 {offsets = [0, 0], sizes = [2, 128], strides = [1, 1]} : vector<2x512xf32> to vector<2x128xf32>
    %336 = arith.negf %335 : vector<2x128xf32>
    %337 = math.exp %336 : vector<2x128xf32>
    %cst_93 = arith.constant 1.000000e+00 : f32
    %338 = vector.broadcast %cst_93 : f32 to vector<2x128xf32>
    %339 = arith.addf %338, %337 : vector<2x128xf32>
    %340 = arith.divf %338, %339 : vector<2x128xf32>
    %341 = vector.extract_strided_slice %334 {offsets = [0, 128], sizes = [2, 128], strides = [1, 1]} : vector<2x512xf32> to vector<2x128xf32>
    %342 = arith.negf %341 : vector<2x128xf32>
    %343 = math.exp %342 : vector<2x128xf32>
    %cst_94 = arith.constant 1.000000e+00 : f32
    %344 = vector.broadcast %cst_94 : f32 to vector<2x128xf32>
    %345 = arith.addf %344, %343 : vector<2x128xf32>
    %346 = arith.divf %344, %345 : vector<2x128xf32>
    %347 = vector.extract_strided_slice %334 {offsets = [0, 256], sizes = [2, 128], strides = [1, 1]} : vector<2x512xf32> to vector<2x128xf32>
    %348 = math.tanh %347 : vector<2x128xf32>
    %349 = vector.extract_strided_slice %334 {offsets = [0, 384], sizes = [2, 128], strides = [1, 1]} : vector<2x512xf32> to vector<2x128xf32>
    %350 = arith.negf %349 : vector<2x128xf32>
    %351 = math.exp %350 : vector<2x128xf32>
    %cst_95 = arith.constant 1.000000e+00 : f32
    %352 = vector.broadcast %cst_95 : f32 to vector<2x128xf32>
    %353 = arith.addf %352, %351 : vector<2x128xf32>
    %354 = arith.divf %352, %353 : vector<2x128xf32>
    %355 = arith.mulf %346, %294 : vector<2x128xf32>
    %356 = arith.mulf %340, %348 : vector<2x128xf32>
    %357 = arith.addf %355, %356 : vector<2x128xf32>
    %358 = math.tanh %357 : vector<2x128xf32>
    %359 = arith.mulf %354, %358 : vector<2x128xf32>
    %c0_96 = arith.constant 0 : index
    %c0_97 = arith.constant 0 : index
    %360 = vector.load %arg5[%c0_96, %c0_97] : memref<128x512xf32, #tpu.memory_space<vmem>>, vector<128x512xf32>
    %cst_98 = arith.constant dense<0.000000e+00> : vector<2x512xf32>
    %361 = tpu.matmul %359, %360, %cst_98 {dimension_numbers = #tpu.dot_dimension_numbers<[1], [0], [0], [1], [0, 0, 1, 1], [], []>} : vector<2x128xf32>, vector<128x512xf32>, vector<2x512xf32> -> vector<2x512xf32>
    %362 = arith.addf %327, %361 : vector<2x512xf32>
    %363 = vector.extract_strided_slice %362 {offsets = [0, 0], sizes = [2, 128], strides = [1, 1]} : vector<2x512xf32> to vector<2x128xf32>
    %364 = arith.negf %363 : vector<2x128xf32>
    %365 = math.exp %364 : vector<2x128xf32>
    %cst_99 = arith.constant 1.000000e+00 : f32
    %366 = vector.broadcast %cst_99 : f32 to vector<2x128xf32>
    %367 = arith.addf %366, %365 : vector<2x128xf32>
    %368 = arith.divf %366, %367 : vector<2x128xf32>
    %369 = vector.extract_strided_slice %362 {offsets = [0, 128], sizes = [2, 128], strides = [1, 1]} : vector<2x512xf32> to vector<2x128xf32>
    %370 = arith.negf %369 : vector<2x128xf32>
    %371 = math.exp %370 : vector<2x128xf32>
    %cst_100 = arith.constant 1.000000e+00 : f32
    %372 = vector.broadcast %cst_100 : f32 to vector<2x128xf32>
    %373 = arith.addf %372, %371 : vector<2x128xf32>
    %374 = arith.divf %372, %373 : vector<2x128xf32>
    %375 = vector.extract_strided_slice %362 {offsets = [0, 256], sizes = [2, 128], strides = [1, 1]} : vector<2x512xf32> to vector<2x128xf32>
    %376 = math.tanh %375 : vector<2x128xf32>
    %377 = vector.extract_strided_slice %362 {offsets = [0, 384], sizes = [2, 128], strides = [1, 1]} : vector<2x512xf32> to vector<2x128xf32>
    %378 = arith.negf %377 : vector<2x128xf32>
    %379 = math.exp %378 : vector<2x128xf32>
    %cst_101 = arith.constant 1.000000e+00 : f32
    %380 = vector.broadcast %cst_101 : f32 to vector<2x128xf32>
    %381 = arith.addf %380, %379 : vector<2x128xf32>
    %382 = arith.divf %380, %381 : vector<2x128xf32>
    %383 = arith.mulf %374, %322 : vector<2x128xf32>
    %384 = arith.mulf %368, %376 : vector<2x128xf32>
    %385 = arith.addf %383, %384 : vector<2x128xf32>
    %386 = math.tanh %385 : vector<2x128xf32>
    %387 = arith.mulf %382, %386 : vector<2x128xf32>
    %c0_102 = arith.constant 0 : index
    %c0_103 = arith.constant 0 : index
    %388 = vector.load %arg6[%c0_102, %c0_103] : memref<128x512xf32, #tpu.memory_space<vmem>>, vector<128x512xf32>
    %cst_104 = arith.constant dense<0.000000e+00> : vector<2x512xf32>
    %389 = tpu.matmul %387, %388, %cst_104 {dimension_numbers = #tpu.dot_dimension_numbers<[1], [0], [0], [1], [0, 0, 1, 1], [], []>} : vector<2x128xf32>, vector<128x512xf32>, vector<2x512xf32> -> vector<2x512xf32>
    %390 = arith.addf %389, %8 : vector<2x512xf32>
    %c0_105 = arith.constant 0 : index
    %c6 = arith.constant 6 : index
    %391 = vector.load %arg1[%c0_105, %c6] : memref<2x8xf32, #tpu.memory_space<vmem>>, vector<2x1xf32>
    %392 = vector.broadcast %391 : vector<2x1xf32> to vector<2x512xf32>
    %393 = arith.mulf %392, %2 : vector<2x512xf32>
    %394 = arith.addf %393, %5 : vector<2x512xf32>
    %c0_106 = arith.constant 0 : index
    %c0_107 = arith.constant 0 : index
    %395 = vector.load %arg4[%c0_106, %c0_107] : memref<128x512xf32, #tpu.memory_space<vmem>>, vector<128x512xf32>
    %cst_108 = arith.constant dense<0.000000e+00> : vector<2x512xf32>
    %396 = tpu.matmul %359, %395, %cst_108 {dimension_numbers = #tpu.dot_dimension_numbers<[1], [0], [0], [1], [0, 0, 1, 1], [], []>} : vector<2x128xf32>, vector<128x512xf32>, vector<2x512xf32> -> vector<2x512xf32>
    %397 = arith.addf %394, %396 : vector<2x512xf32>
    %398 = vector.extract_strided_slice %397 {offsets = [0, 0], sizes = [2, 128], strides = [1, 1]} : vector<2x512xf32> to vector<2x128xf32>
    %399 = arith.negf %398 : vector<2x128xf32>
    %400 = math.exp %399 : vector<2x128xf32>
    %cst_109 = arith.constant 1.000000e+00 : f32
    %401 = vector.broadcast %cst_109 : f32 to vector<2x128xf32>
    %402 = arith.addf %401, %400 : vector<2x128xf32>
    %403 = arith.divf %401, %402 : vector<2x128xf32>
    %404 = vector.extract_strided_slice %397 {offsets = [0, 128], sizes = [2, 128], strides = [1, 1]} : vector<2x512xf32> to vector<2x128xf32>
    %405 = arith.negf %404 : vector<2x128xf32>
    %406 = math.exp %405 : vector<2x128xf32>
    %cst_110 = arith.constant 1.000000e+00 : f32
    %407 = vector.broadcast %cst_110 : f32 to vector<2x128xf32>
    %408 = arith.addf %407, %406 : vector<2x128xf32>
    %409 = arith.divf %407, %408 : vector<2x128xf32>
    %410 = vector.extract_strided_slice %397 {offsets = [0, 256], sizes = [2, 128], strides = [1, 1]} : vector<2x512xf32> to vector<2x128xf32>
    %411 = math.tanh %410 : vector<2x128xf32>
    %412 = vector.extract_strided_slice %397 {offsets = [0, 384], sizes = [2, 128], strides = [1, 1]} : vector<2x512xf32> to vector<2x128xf32>
    %413 = arith.negf %412 : vector<2x128xf32>
    %414 = math.exp %413 : vector<2x128xf32>
    %cst_111 = arith.constant 1.000000e+00 : f32
    %415 = vector.broadcast %cst_111 : f32 to vector<2x128xf32>
    %416 = arith.addf %415, %414 : vector<2x128xf32>
    %417 = arith.divf %415, %416 : vector<2x128xf32>
    %418 = arith.mulf %409, %357 : vector<2x128xf32>
    %419 = arith.mulf %403, %411 : vector<2x128xf32>
    %420 = arith.addf %418, %419 : vector<2x128xf32>
    %421 = math.tanh %420 : vector<2x128xf32>
    %422 = arith.mulf %417, %421 : vector<2x128xf32>
    %c0_112 = arith.constant 0 : index
    %c0_113 = arith.constant 0 : index
    %423 = vector.load %arg5[%c0_112, %c0_113] : memref<128x512xf32, #tpu.memory_space<vmem>>, vector<128x512xf32>
    %cst_114 = arith.constant dense<0.000000e+00> : vector<2x512xf32>
    %424 = tpu.matmul %422, %423, %cst_114 {dimension_numbers = #tpu.dot_dimension_numbers<[1], [0], [0], [1], [0, 0, 1, 1], [], []>} : vector<2x128xf32>, vector<128x512xf32>, vector<2x512xf32> -> vector<2x512xf32>
    %425 = arith.addf %390, %424 : vector<2x512xf32>
    %426 = vector.extract_strided_slice %425 {offsets = [0, 0], sizes = [2, 128], strides = [1, 1]} : vector<2x512xf32> to vector<2x128xf32>
    %427 = arith.negf %426 : vector<2x128xf32>
    %428 = math.exp %427 : vector<2x128xf32>
    %cst_115 = arith.constant 1.000000e+00 : f32
    %429 = vector.broadcast %cst_115 : f32 to vector<2x128xf32>
    %430 = arith.addf %429, %428 : vector<2x128xf32>
    %431 = arith.divf %429, %430 : vector<2x128xf32>
    %432 = vector.extract_strided_slice %425 {offsets = [0, 128], sizes = [2, 128], strides = [1, 1]} : vector<2x512xf32> to vector<2x128xf32>
    %433 = arith.negf %432 : vector<2x128xf32>
    %434 = math.exp %433 : vector<2x128xf32>
    %cst_116 = arith.constant 1.000000e+00 : f32
    %435 = vector.broadcast %cst_116 : f32 to vector<2x128xf32>
    %436 = arith.addf %435, %434 : vector<2x128xf32>
    %437 = arith.divf %435, %436 : vector<2x128xf32>
    %438 = vector.extract_strided_slice %425 {offsets = [0, 256], sizes = [2, 128], strides = [1, 1]} : vector<2x512xf32> to vector<2x128xf32>
    %439 = math.tanh %438 : vector<2x128xf32>
    %440 = vector.extract_strided_slice %425 {offsets = [0, 384], sizes = [2, 128], strides = [1, 1]} : vector<2x512xf32> to vector<2x128xf32>
    %441 = arith.negf %440 : vector<2x128xf32>
    %442 = math.exp %441 : vector<2x128xf32>
    %cst_117 = arith.constant 1.000000e+00 : f32
    %443 = vector.broadcast %cst_117 : f32 to vector<2x128xf32>
    %444 = arith.addf %443, %442 : vector<2x128xf32>
    %445 = arith.divf %443, %444 : vector<2x128xf32>
    %446 = arith.mulf %437, %385 : vector<2x128xf32>
    %447 = arith.mulf %431, %439 : vector<2x128xf32>
    %448 = arith.addf %446, %447 : vector<2x128xf32>
    %449 = math.tanh %448 : vector<2x128xf32>
    %450 = arith.mulf %445, %449 : vector<2x128xf32>
    %c0_118 = arith.constant 0 : index
    %c0_119 = arith.constant 0 : index
    %451 = vector.load %arg6[%c0_118, %c0_119] : memref<128x512xf32, #tpu.memory_space<vmem>>, vector<128x512xf32>
    %cst_120 = arith.constant dense<0.000000e+00> : vector<2x512xf32>
    %452 = tpu.matmul %450, %451, %cst_120 {dimension_numbers = #tpu.dot_dimension_numbers<[1], [0], [0], [1], [0, 0, 1, 1], [], []>} : vector<2x128xf32>, vector<128x512xf32>, vector<2x512xf32> -> vector<2x512xf32>
    %453 = arith.addf %452, %8 : vector<2x512xf32>
    %c0_121 = arith.constant 0 : index
    %c7 = arith.constant 7 : index
    %454 = vector.load %arg1[%c0_121, %c7] : memref<2x8xf32, #tpu.memory_space<vmem>>, vector<2x1xf32>
    %455 = vector.broadcast %454 : vector<2x1xf32> to vector<2x512xf32>
    %456 = arith.mulf %455, %2 : vector<2x512xf32>
    %457 = arith.addf %456, %5 : vector<2x512xf32>
    %c0_122 = arith.constant 0 : index
    %c0_123 = arith.constant 0 : index
    %458 = vector.load %arg4[%c0_122, %c0_123] : memref<128x512xf32, #tpu.memory_space<vmem>>, vector<128x512xf32>
    %cst_124 = arith.constant dense<0.000000e+00> : vector<2x512xf32>
    %459 = tpu.matmul %422, %458, %cst_124 {dimension_numbers = #tpu.dot_dimension_numbers<[1], [0], [0], [1], [0, 0, 1, 1], [], []>} : vector<2x128xf32>, vector<128x512xf32>, vector<2x512xf32> -> vector<2x512xf32>
    %460 = arith.addf %457, %459 : vector<2x512xf32>
    %461 = vector.extract_strided_slice %460 {offsets = [0, 0], sizes = [2, 128], strides = [1, 1]} : vector<2x512xf32> to vector<2x128xf32>
    %462 = arith.negf %461 : vector<2x128xf32>
    %463 = math.exp %462 : vector<2x128xf32>
    %cst_125 = arith.constant 1.000000e+00 : f32
    %464 = vector.broadcast %cst_125 : f32 to vector<2x128xf32>
    %465 = arith.addf %464, %463 : vector<2x128xf32>
    %466 = arith.divf %464, %465 : vector<2x128xf32>
    %467 = vector.extract_strided_slice %460 {offsets = [0, 128], sizes = [2, 128], strides = [1, 1]} : vector<2x512xf32> to vector<2x128xf32>
    %468 = arith.negf %467 : vector<2x128xf32>
    %469 = math.exp %468 : vector<2x128xf32>
    %cst_126 = arith.constant 1.000000e+00 : f32
    %470 = vector.broadcast %cst_126 : f32 to vector<2x128xf32>
    %471 = arith.addf %470, %469 : vector<2x128xf32>
    %472 = arith.divf %470, %471 : vector<2x128xf32>
    %473 = vector.extract_strided_slice %460 {offsets = [0, 256], sizes = [2, 128], strides = [1, 1]} : vector<2x512xf32> to vector<2x128xf32>
    %474 = math.tanh %473 : vector<2x128xf32>
    %475 = vector.extract_strided_slice %460 {offsets = [0, 384], sizes = [2, 128], strides = [1, 1]} : vector<2x512xf32> to vector<2x128xf32>
    %476 = arith.negf %475 : vector<2x128xf32>
    %477 = math.exp %476 : vector<2x128xf32>
    %cst_127 = arith.constant 1.000000e+00 : f32
    %478 = vector.broadcast %cst_127 : f32 to vector<2x128xf32>
    %479 = arith.addf %478, %477 : vector<2x128xf32>
    %480 = arith.divf %478, %479 : vector<2x128xf32>
    %481 = arith.mulf %472, %420 : vector<2x128xf32>
    %482 = arith.mulf %466, %474 : vector<2x128xf32>
    %483 = arith.addf %481, %482 : vector<2x128xf32>
    %484 = math.tanh %483 : vector<2x128xf32>
    %485 = arith.mulf %480, %484 : vector<2x128xf32>
    %c0_128 = arith.constant 0 : index
    %c0_129 = arith.constant 0 : index
    %486 = vector.load %arg5[%c0_128, %c0_129] : memref<128x512xf32, #tpu.memory_space<vmem>>, vector<128x512xf32>
    %cst_130 = arith.constant dense<0.000000e+00> : vector<2x512xf32>
    %487 = tpu.matmul %485, %486, %cst_130 {dimension_numbers = #tpu.dot_dimension_numbers<[1], [0], [0], [1], [0, 0, 1, 1], [], []>} : vector<2x128xf32>, vector<128x512xf32>, vector<2x512xf32> -> vector<2x512xf32>
    %488 = arith.addf %453, %487 : vector<2x512xf32>
    %489 = vector.extract_strided_slice %488 {offsets = [0, 0], sizes = [2, 128], strides = [1, 1]} : vector<2x512xf32> to vector<2x128xf32>
    %490 = arith.negf %489 : vector<2x128xf32>
    %491 = math.exp %490 : vector<2x128xf32>
    %cst_131 = arith.constant 1.000000e+00 : f32
    %492 = vector.broadcast %cst_131 : f32 to vector<2x128xf32>
    %493 = arith.addf %492, %491 : vector<2x128xf32>
    %494 = arith.divf %492, %493 : vector<2x128xf32>
    %495 = vector.extract_strided_slice %488 {offsets = [0, 128], sizes = [2, 128], strides = [1, 1]} : vector<2x512xf32> to vector<2x128xf32>
    %496 = arith.negf %495 : vector<2x128xf32>
    %497 = math.exp %496 : vector<2x128xf32>
    %cst_132 = arith.constant 1.000000e+00 : f32
    %498 = vector.broadcast %cst_132 : f32 to vector<2x128xf32>
    %499 = arith.addf %498, %497 : vector<2x128xf32>
    %500 = arith.divf %498, %499 : vector<2x128xf32>
    %501 = vector.extract_strided_slice %488 {offsets = [0, 256], sizes = [2, 128], strides = [1, 1]} : vector<2x512xf32> to vector<2x128xf32>
    %502 = math.tanh %501 : vector<2x128xf32>
    %503 = vector.extract_strided_slice %488 {offsets = [0, 384], sizes = [2, 128], strides = [1, 1]} : vector<2x512xf32> to vector<2x128xf32>
    %504 = arith.negf %503 : vector<2x128xf32>
    %505 = math.exp %504 : vector<2x128xf32>
    %cst_133 = arith.constant 1.000000e+00 : f32
    %506 = vector.broadcast %cst_133 : f32 to vector<2x128xf32>
    %507 = arith.addf %506, %505 : vector<2x128xf32>
    %508 = arith.divf %506, %507 : vector<2x128xf32>
    %509 = arith.mulf %500, %448 : vector<2x128xf32>
    %510 = arith.mulf %494, %502 : vector<2x128xf32>
    %511 = arith.addf %509, %510 : vector<2x128xf32>
    %512 = math.tanh %511 : vector<2x128xf32>
    %513 = arith.mulf %508, %512 : vector<2x128xf32>
    %c0_134 = arith.constant 0 : index
    %c0_135 = arith.constant 0 : index
    %514 = vector.load %arg8[%c0_134, %c0_135] : memref<128x1xf32, #tpu.memory_space<vmem>>, vector<128x1xf32>
    %cst_136 = arith.constant dense<0.000000e+00> : vector<2x1xf32>
    %515 = tpu.matmul %513, %514, %cst_136 {dimension_numbers = #tpu.dot_dimension_numbers<[1], [0], [0], [1], [0, 0, 1, 1], [], []>} : vector<2x128xf32>, vector<128x1xf32>, vector<2x1xf32> -> vector<2x1xf32>
    %c0_137 = arith.constant 0 : index
    %c0_138 = arith.constant 0 : index
    %516 = vector.load %arg9[%c0_137, %c0_138] : memref<1x1xf32, #tpu.memory_space<vmem>>, vector<1x1xf32>
    %517 = vector.broadcast %516 : vector<1x1xf32> to vector<2x1xf32>
    %518 = arith.addf %515, %517 : vector<2x1xf32>
    %c0_139 = arith.constant 0 : index
    %c0_140 = arith.constant 0 : index
    %519 = vector.load %arg10[%c0_139, %c0_140] : memref<2x1xf32, #tpu.memory_space<vmem>>, vector<2x1xf32>
    tpu.vector_store %arg10[%c0_139, %c0_140], %518 {strides = array<i32>} : memref<2x1xf32, #tpu.memory_space<vmem>>, vector<2x1xf32>,
    return
  }
  func.func @transform_0(%arg0: i32) -> (i32, i32) {
    %c0_i32 = arith.constant 0 : i32
    %c0_i32_0 = arith.constant 0 : i32
    %c0_i32_1 = arith.constant 0 : i32
    return %c0_i32, %c0_i32_0 : i32, i32
  }
  func.func @transform_1(%arg0: i32) -> (i32, i32) {
    %c0_i32 = arith.constant 0 : i32
    %c0_i32_0 = arith.constant 0 : i32
    %c0_i32_1 = arith.constant 0 : i32
    return %c0_i32, %c0_i32_0 : i32, i32
  }
  func.func @transform_2(%arg0: i32) -> (i32, i32) {
    %c0_i32 = arith.constant 0 : i32
    %c0_i32_0 = arith.constant 0 : i32
    %c0_i32_1 = arith.constant 0 : i32
    return %c0_i32, %c0_i32_0 : i32, i32
  }
  func.func @transform_3(%arg0: i32) -> (i32, i32) {
    %c0_i32 = arith.constant 0 : i32
    %c0_i32_0 = arith.constant 0 : i32
    %c0_i32_1 = arith.constant 0 : i32
    return %c0_i32, %c0_i32_0 : i32, i32
  }
  func.func @transform_4(%arg0: i32) -> (i32, i32) {
    %c0_i32 = arith.constant 0 : i32
    %c0_i32_0 = arith.constant 0 : i32
    %c0_i32_1 = arith.constant 0 : i32
    return %c0_i32, %c0_i32_0 : i32, i32
  }
  func.func @transform_5(%arg0: i32) -> (i32, i32) {
    %c0_i32 = arith.constant 0 : i32
    %c0_i32_0 = arith.constant 0 : i32
    %c0_i32_1 = arith.constant 0 : i32
    return %c0_i32, %c0_i32_0 : i32, i32
  }
  func.func @transform_6(%arg0: i32) -> (i32, i32) {
    %c0_i32 = arith.constant 0 : i32
    %c0_i32_0 = arith.constant 0 : i32
    %c0_i32_1 = arith.constant 0 : i32
    return %c0_i32, %c0_i32_0 : i32, i32
  }
  func.func @transform_7(%arg0: i32) -> (i32, i32) {
    %c0_i32 = arith.constant 0 : i32
    %c0_i32_0 = arith.constant 0 : i32
    %c0_i32_1 = arith.constant 0 : i32
    return %c0_i32, %c0_i32_0 : i32, i32
  }
  func.func @transform_8(%arg0: i32) -> (i32, i32) {
    %c0_i32 = arith.constant 0 : i32
    %c0_i32_0 = arith.constant 0 : i32
    %c0_i32_1 = arith.constant 0 : i32
    return %c0_i32, %c0_i32_0 : i32, i32
  }
  func.func @transform_9(%arg0: i32) -> (i32, i32) {
    %c0_i32 = arith.constant 0 : i32
    %c0_i32_0 = arith.constant 0 : i32
    %c0_i32_1 = arith.constant 0 : i32
    return %c0_i32, %c0_i32_0 : i32, i32
  }
}

</mosaic_0001>

<bundles_post_ra>
// kernel: stock_prediction_forward.1
= control target key start
LH: loop header
LB: loop body
LE: loop exit
PB: predicated region body
PF: predicated region fallthrough
CT: control target
= control target key end

     0   :  { %v11240_v3 = vmov 0.0   ;;  %vm5309_vm0 = vmmov 0   ;;  %vm4339_vm1 = vcmask 1024   ;;  %s11230_s5 = inlined_call_operand.vmem [shape: f32[128,512], index: 5, kind: input, shape index: {}]   ;;  %s11231_s3 = inlined_call_operand.vmem [shape: f32[128,512], index: 3, kind: input, shape index: {}]   ;;  %s11232_s0 = inlined_call_operand.vmem [shape: f32[2,8], index: 0, kind: input, shape index: {}]   ;;  %s11233_s4 = inlined_call_operand.vmem [shape: f32[128,512], index: 4, kind: input, shape index: {}]   ;;  %s11234_s1 = inlined_call_operand.vmem [shape: f32[1,512], index: 1, kind: input, shape index: {}]   ;;  %s11235_s2 = inlined_call_operand.vmem [shape: f32[1,512], index: 2, kind: input, shape index: {}]   ;;  %s11236_s6 = inlined_call_operand.vmem [shape: f32[1,512], index: 6, kind: input, shape index: {}]   ;;  %s11237_s7 = inlined_call_operand.vmem [shape: f32[128,1], index: 7, kind: input, shape index: {}]   ;;  %s11238_s8 = inlined_call_operand.<no memory space> [shape: f32[1,1], index: 8, kind: input, shape index: {}]   ;;  %s11239_s9 = inlined_call_operand.vmem [shape: f32[2,1], index: 9, kind: output, shape index: {}]  }
   0x1   :  { %v5363_v0 = vld [vmem:[%s11230_s5 + $0x1e8] sm:$0xff]  ;;  %v5368_v1 = vld [vmem:[%s11230_s5 + $0x1f8] sm:$0xff]  ;;  %v5373_v2 = vld [vmem:[%s11230_s5 + $0x1e0] sm:$0xff]  ;;  %228 = vmatprep.mubr.f32.mxu0 %v11240_v3  ;;  %299 = vmatprep.mubr.f32.mxu1 %v11240_v3 }
   0x2   :  { %164 = vmatprep.subr.mxu0 %v5363_v0  ;;  %235 = vmatprep.subr.mxu1 %v5368_v1  ;;  %v5382_v4 = vld [vmem:[%s11230_s5 + $0x1f0] sm:$0xff]  ;;  %v5387_v5 = vld [vmem:[%s11230_s5 + $0x1c8] sm:$0xff]  ;;  %v5392_v6 = vld [vmem:[%s11230_s5 + $0x1d8] sm:$0xff] }
   0x3   :  { %165 = vmatpush1.msra.mxu0 %v5373_v2  ;;  %236 = vmatpush1.msra.mxu1 %v5382_v4  ;;  %v5399_v7 = vld [vmem:[%s11230_s5 + $0x1c0] sm:$0xff]  ;;  %v5404_v8 = vld [vmem:[%s11230_s5 + $0x1d0] sm:$0xff]  ;;  %v5409_v9 = vld [vmem:[%s11230_s5 + $0x1a8] sm:$0xff] }
   0x4   :  { %166 = vmatprep.subr.mxu0 %v5387_v5  ;;  %237 = vmatprep.subr.mxu1 %v5392_v6  ;;  %v5416_v10 = vld [vmem:[%s11230_s5 + $0x1b8] sm:$0xff]  ;;  %v5421_v11 = vld [vmem:[%s11230_s5 + $0x1a0] sm:$0xff]  ;;  %v5426_v12 = vld [vmem:[%s11230_s5 + $0x1b0] sm:$0xff] }
   0x5   :  { %167 = vmatpush1.msra.mxu0 %v5399_v7  ;;  %238 = vmatpush1.msra.mxu1 %v5404_v8  ;;  %v5433_v13 = vld [vmem:[%s11230_s5 + $0x188] sm:$0xff]  ;;  %v5438_v14 = vld [vmem:[%s11230_s5 + $0x198] sm:$0xff]  ;;  %v5445_v15 = vld [vmem:[%s11230_s5 + $0x180] sm:$0xff] }
   0x6   :  { %168 = vmatprep.subr.mxu0 %v5409_v9  ;;  %239 = vmatprep.subr.mxu1 %v5416_v10  ;;  %v5450_v16 = vld [vmem:[%s11230_s5 + $0x190] sm:$0xff]  ;;  %v5457_v17 = vld [vmem:[%s11230_s5 + $0x168] sm:$0xff]  ;;  %v5462_v18 = vld [vmem:[%s11230_s5 + $0x178] sm:$0xff] }
   0x7   :  { %169 = vmatpush1.msra.mxu0 %v5421_v11  ;;  %240 = vmatpush1.msra.mxu1 %v5426_v12  ;;  %v5469_v19 = vld [vmem:[%s11230_s5 + $0x160] sm:$0xff]  ;;  %v5474_v20 = vld [vmem:[%s11230_s5 + $0x170] sm:$0xff]  ;;  %v5481_v21 = vld [vmem:[%s11230_s5 + $0x148] sm:$0xff] }
   0x8   :  { %170 = vmatprep.subr.mxu0 %v5433_v13  ;;  %241 = vmatprep.subr.mxu1 %v5438_v14  ;;  %v5486_v22 = vld [vmem:[%s11230_s5 + $0x158] sm:$0xff]  ;;  %v5493_v23 = vld [vmem:[%s11230_s5 + $0x140] sm:$0xff]  ;;  %v5498_v24 = vld [vmem:[%s11230_s5 + $0x150] sm:$0xff] }
   0x9   :  { %171 = vmatpush1.msra.mxu0 %v5445_v15  ;;  %242 = vmatpush1.msra.mxu1 %v5450_v16  ;;  %v5505_v25 = vld [vmem:[%s11230_s5 + $0x128] sm:$0xff]  ;;  %v5510_v26 = vld [vmem:[%s11230_s5 + $0x138] sm:$0xff]  ;;  %v5517_v27 = vld [vmem:[%s11230_s5 + $0x120] sm:$0xff] }
   0xa   :  { %172 = vmatprep.subr.mxu0 %v5457_v17  ;;  %243 = vmatprep.subr.mxu1 %v5462_v18  ;;  %v5522_v28 = vld [vmem:[%s11230_s5 + $0x130] sm:$0xff]  ;;  %v5529_v29 = vld [vmem:[%s11230_s5 + $0x108] sm:$0xff]  ;;  %v5534_v30 = vld [vmem:[%s11230_s5 + $0x118] sm:$0xff] }
   0xb   :  { %173 = vmatpush1.msra.mxu0 %v5469_v19  ;;  %244 = vmatpush1.msra.mxu1 %v5474_v20  ;;  %v5541_v31 = vld [vmem:[%s11230_s5 + $0x100] sm:$0xff]  ;;  %v5546_v32 = vld [vmem:[%s11230_s5 + $0x110] sm:$0xff]  ;;  %v5553_v33 = vld [vmem:[%s11230_s5 + $0xe8] sm:$0xff] }
   0xc   :  { %174 = vmatprep.subr.mxu0 %v5481_v21  ;;  %245 = vmatprep.subr.mxu1 %v5486_v22  ;;  %v5558_v34 = vld [vmem:[%s11230_s5 + $0xf8] sm:$0xff]  ;;  %v5565_v35 = vld [vmem:[%s11230_s5 + $0xe0] sm:$0xff]  ;;  %v5570_v36 = vld [vmem:[%s11230_s5 + $0xf0] sm:$0xff] }
   0xd   :  { %175 = vmatpush1.msra.mxu0 %v5493_v23  ;;  %246 = vmatpush1.msra.mxu1 %v5498_v24  ;;  %v5577_v37 = vld [vmem:[%s11230_s5 + $0xc8] sm:$0xff]  ;;  %v5582_v38 = vld [vmem:[%s11230_s5 + $0xd8] sm:$0xff]  ;;  %v5589_v39 = vld [vmem:[%s11230_s5 + $0xc0] sm:$0xff] }
   0xe   :  { %176 = vmatprep.subr.mxu0 %v5505_v25  ;;  %247 = vmatprep.subr.mxu1 %v5510_v26  ;;  %v5594_v40 = vld [vmem:[%s11230_s5 + $0xd0] sm:$0xff]  ;;  %v5601_v41 = vld [vmem:[%s11230_s5 + $0xa8] sm:$0xff]  ;;  %v5606_v42 = vld [vmem:[%s11230_s5 + $0xb8] sm:$0xff] }
   0xf   :  { %177 = vmatpush1.msra.mxu0 %v5517_v27  ;;  %248 = vmatpush1.msra.mxu1 %v5522_v28  ;;  %v5613_v43 = vld [vmem:[%s11230_s5 + $0xa0] sm:$0xff]  ;;  %v5618_v44 = vld [vmem:[%s11230_s5 + $0xb0] sm:$0xff]  ;;  %v5625_v45 = vld [vmem:[%s11230_s5 + $0x88] sm:$0xff] }
  0x10   :  { %178 = vmatprep.subr.mxu0 %v5529_v29  ;;  %249 = vmatprep.subr.mxu1 %v5534_v30  ;;  %v5630_v46 = vld [vmem:[%s11230_s5 + $0x98] sm:$0xff]  ;;  %v5637_v47 = vld [vmem:[%s11230_s5 + $0x80] sm:$0xff]  ;;  %v5642_v48 = vld [vmem:[%s11230_s5 + $0x90] sm:$0xff] }
  0x11   :  { %179 = vmatpush1.msra.mxu0 %v5541_v31  ;;  %250 = vmatpush1.msra.mxu1 %v5546_v32  ;;  %11903 = vst [vmem:[#allocation3_spill] sm:$0xff] %v5630_v46  ;;  %11904 = vst [vmem:[#allocation4_spill] sm:$0xff] %v5637_v47  ;;  %v5649_v49 = vld [vmem:[%s11230_s5 + $0x68] sm:$0xff]  ;;  %v5654_v50 = vld [vmem:[%s11230_s5 + $0x78] sm:$0xff] }
  0x12   :  { %180 = vmatprep.subr.mxu0 %v5553_v33  ;;  %251 = vmatprep.subr.mxu1 %v5558_v34  ;;  %11905 = vst [vmem:[#allocation5_spill] sm:$0xff] %v5642_v48  ;;  %11906 = vst [vmem:[#allocation6_spill] sm:$0xff] %v5649_v49  ;;  %v5661_v51 = vld [vmem:[%s11230_s5 + $0x60] sm:$0xff]  ;;  %v5666_v52 = vld [vmem:[%s11230_s5 + $0x70] sm:$0xff] }
  0x13   :  { %181 = vmatpush1.msra.mxu0 %v5565_v35  ;;  %252 = vmatpush1.msra.mxu1 %v5570_v36  ;;  %11907 = vst [vmem:[#allocation7_spill] sm:$0xff] %v5654_v50  ;;  %11908 = vst [vmem:[#allocation8_spill] sm:$0xff] %v5661_v51  ;;  %v5673_v53 = vld [vmem:[%s11230_s5 + $0x48] sm:$0xff]  ;;  %v5678_v54 = vld [vmem:[%s11230_s5 + $0x58] sm:$0xff] }
  0x14   :  { %182 = vmatprep.subr.mxu0 %v5577_v37  ;;  %253 = vmatprep.subr.mxu1 %v5582_v38  ;;  %11909 = vst [vmem:[#allocation9_spill] sm:$0xff] %v5666_v52  ;;  %11910 = vst [vmem:[#allocation10_spill] sm:$0xff] %v5673_v53  ;;  %v5685_v55 = vld [vmem:[%s11230_s5 + $0x40] sm:$0xff]  ;;  %v5690_v56 = vld [vmem:[%s11230_s5 + $0x50] sm:$0xff] }
  0x15   :  { %183 = vmatpush1.msra.mxu0 %v5589_v39  ;;  %254 = vmatpush1.msra.mxu1 %v5594_v40  ;;  %11911 = vst [vmem:[#allocation11_spill] sm:$0xff] %v5678_v54  ;;  %11912 = vst [vmem:[#allocation12_spill] sm:$0xff] %v5685_v55  ;;  %v5697_v57 = vld [vmem:[%s11230_s5 + $0x28] sm:$0xff]  ;;  %v5702_v58 = vld [vmem:[%s11230_s5 + $0x38] sm:$0xff] }
  0x16   :  { %184 = vmatprep.subr.mxu0 %v5601_v41  ;;  %255 = vmatprep.subr.mxu1 %v5606_v42  ;;  %11913 = vst [vmem:[#allocation13_spill] sm:$0xff] %v5690_v56  ;;  %11914 = vst [vmem:[#allocation14_spill] sm:$0xff] %v5697_v57  ;;  %v5709_v59 = vld [vmem:[%s11230_s5 + $0x20] sm:$0xff]  ;;  %v5714_v60 = vld [vmem:[%s11230_s5 + $0x30] sm:$0xff] }
  0x17   :  { %185 = vmatpush1.msra.mxu0 %v5613_v43  ;;  %256 = vmatpush1.msra.mxu1 %v5618_v44  ;;  %11915 = vst [vmem:[#allocation15_spill] sm:$0xff] %v5702_v58  ;;  %11916 = vst [vmem:[#allocation16_spill] sm:$0xff] %v5709_v59  ;;  %v5721_v61 = vld [vmem:[%s11230_s5 + $0x8] sm:$0xff]  ;;  %v5726_v62 = vld [vmem:[%s11230_s5 + $0x18] sm:$0xff] }
  0x18   :  { %186 = vmatprep.subr.mxu0 %v5625_v45  ;;  %257 = vmatprep.subr.mxu1 %v5630_v46  ;;  %11917 = vst [vmem:[#allocation17_spill] sm:$0xff] %v5714_v60  ;;  %11918 = vst [vmem:[#allocation18_spill] sm:$0xff] %v5721_v61  ;;  %v5733_v63 = vld [vmem:[%s11230_s5] sm:$0xff]  ;;  %v5738_v3 = vld [vmem:[%s11230_s5 + $0x10] sm:$0xff] }
  0x19   :  { %187 = vmatpush1.msra.mxu0 %v5637_v47  ;;  %258 = vmatpush1.msra.mxu1 %v5642_v48  ;;  %11919 = vst [vmem:[#allocation19_spill] sm:$0xff] %v5726_v62  ;;  %11920 = vst [vmem:[#allocation20_spill] sm:$0xff] %v5733_v63 }
  0x1a   :  { %188 = vmatprep.subr.mxu0 %v5649_v49  ;;  %259 = vmatprep.subr.mxu1 %v5654_v50  ;;  %11921 = vst [vmem:[#allocation21_spill] sm:$0xff] %v5738_v3 }
  0x1b   :  { %189 = vmatpush1.msra.mxu0 %v5661_v51  ;;  %260 = vmatpush1.msra.mxu1 %v5666_v52 }
  0x1c   :  { %190 = vmatprep.subr.mxu0 %v5673_v53  ;;  %261 = vmatprep.subr.mxu1 %v5678_v54 }
  0x1d   :  { %191 = vmatpush1.msra.mxu0 %v5685_v55  ;;  %262 = vmatpush1.msra.mxu1 %v5690_v56  ;;  %v5800_v56 = vld [vmem:[%s11231_s3 + $0x1b8] sm:$0xff] }
  0x1e   :  { %192 = vmatprep.subr.mxu0 %v5697_v57  ;;  %263 = vmatprep.subr.mxu1 %v5702_v58  ;;  %v5745_v57 = vld [vmem:[%s11231_s3 + $0x1e8] sm:$0xff]  ;;  %v5752_v58 = vld [vmem:[%s11231_s3 + $0x1f8] sm:$0xff]  ;;  %11932 = vst [vmem:[#allocation31_spill] sm:$0xff] %v5800_v56 }
  0x1f   :  { %193 = vmatpush1.msra.mxu0 %v5709_v59  ;;  %264 = vmatpush1.msra.mxu1 %v5714_v60  ;;  %11922 = vst [vmem:[#allocation22_spill] sm:$0xff] %v5745_v57  ;;  %11923 = vst [vmem:[#allocation23_spill] sm:$0xff] %v5752_v58  ;;  %v5759_v60 = vld [vmem:[%s11231_s3 + $0x1e0] sm:$0xff] }
  0x20   :  { %194 = vmatprep.subr.mxu0 %v5721_v61  ;;  %265 = vmatprep.subr.mxu1 %v5726_v62  ;;  %11924 = vst [vmem:[#allocation24_spill] sm:$0xff] %v5759_v60  ;;  %v5764_v61 = vld [vmem:[%s11231_s3 + $0x1f0] sm:$0xff]  ;;  %v11926_v62 = vmov 0.0   ;;  %v5783_v59 = vld [vmem:[%s11231_s3 + $0x1c0] sm:$0xff] }
  0x21   :  { %195 = vmatpush1.msra.mxu0 %v5733_v63  ;;  %266 = vmatpush1.msra.mxu1 %v5738_v3  ;;  %11925 = vst [vmem:[#allocation25_spill] sm:$0xff] %v5764_v61  ;;  %v5771_v63 = vld [vmem:[%s11231_s3 + $0x1c8] sm:$0xff]  ;;  %v5776_v3 = vld [vmem:[%s11231_s3 + $0x1d8] sm:$0xff]  ;;  %11929 = vst [vmem:[#allocation28_spill] sm:$0xff] %v5783_v59 }
  0x22   :  { %229 = vmatmul.mubr.f32.vlgmr.msra.gmra.mxu0 %v11926_v62  ;;  %384 = vmatprep.subr.mxu0 %v5745_v57  ;;  %11927 = vst [vmem:[#allocation26_spill] sm:$0xff] %v5771_v63  ;;  %11928 = vst [vmem:[#allocation27_spill] sm:$0xff] %v5776_v3  ;;  %v5788_v57 = vld [vmem:[%s11231_s3 + $0x1d0] sm:$0xff] }
  0x23   :  { %455 = vmatprep.subr.mxu1 %v5752_v58  ;;  %300 = vmatmul.mubr.f32.vlgmr.msra.gmra.mxu1 %v11926_v62  ;;  %11930 = vst [vmem:[#allocation29_spill] sm:$0xff] %v5788_v57  ;;  %v5795_v58 = vld [vmem:[%s11231_s3 + $0x1a8] sm:$0xff] }
  0x24   :  { %385 = vmatpush1.msra.mxu0 %v5759_v60  ;;  %456 = vmatpush1.msra.mxu1 %v5764_v61  ;;  %11931 = vst [vmem:[#allocation30_spill] sm:$0xff] %v5795_v58  ;;  %v5807_v60 = vld [vmem:[%s11231_s3 + $0x1a0] sm:$0xff]  ;;  %v5812_v61 = vld [vmem:[%s11231_s3 + $0x1b0] sm:$0xff] }
  0x25   :  { %386 = vmatprep.subr.mxu0 %v5771_v63  ;;  %457 = vmatprep.subr.mxu1 %v5776_v3  ;;  %11933 = vst [vmem:[#allocation32_spill] sm:$0xff] %v5807_v60  ;;  %11934 = vst [vmem:[#allocation33_spill] sm:$0xff] %v5812_v61  ;;  %v5819_v63 = vld [vmem:[%s11231_s3 + $0x188] sm:$0xff]  ;;  %v5824_v3 = vld [vmem:[%s11231_s3 + $0x198] sm:$0xff] }
  0x26   :  { %387 = vmatpush1.msra.mxu0 %v5783_v59  ;;  %458 = vmatpush1.msra.mxu1 %v5788_v57  ;;  %11935 = vst [vmem:[#allocation34_spill] sm:$0xff] %v5819_v63  ;;  %11936 = vst [vmem:[#allocation35_spill] sm:$0xff] %v5824_v3  ;;  %v5831_v59 = vld [vmem:[%s11231_s3 + $0x180] sm:$0xff]  ;;  %v5836_v57 = vld [vmem:[%s11231_s3 + $0x190] sm:$0xff] }
  0x27   :  { %388 = vmatprep.subr.mxu0 %v5795_v58  ;;  %459 = vmatprep.subr.mxu1 %v5800_v56  ;;  %11937 = vst [vmem:[#allocation36_spill] sm:$0xff] %v5831_v59  ;;  %11938 = vst [vmem:[#allocation37_spill] sm:$0xff] %v5836_v57  ;;  %v5843_v58 = vld [vmem:[%s11231_s3 + $0x168] sm:$0xff]  ;;  %v5848_v56 = vld [vmem:[%s11231_s3 + $0x178] sm:$0xff] }
  0x28   :  { %389 = vmatpush1.msra.mxu0 %v5807_v60  ;;  %460 = vmatpush1.msra.mxu1 %v5812_v61  ;;  %11939 = vst [vmem:[#allocation38_spill] sm:$0xff] %v5843_v58  ;;  %11940 = vst [vmem:[#allocation39_spill] sm:$0xff] %v5848_v56  ;;  %v5855_v60 = vld [vmem:[%s11231_s3 + $0x160] sm:$0xff]  ;;  %v5860_v61 = vld [vmem:[%s11231_s3 + $0x170] sm:$0xff] }
  0x29   :  { %390 = vmatprep.subr.mxu0 %v5819_v63  ;;  %461 = vmatprep.subr.mxu1 %v5824_v3  ;;  %11941 = vst [vmem:[#allocation40_spill] sm:$0xff] %v5855_v60  ;;  %11942 = vst [vmem:[#allocation41_spill] sm:$0xff] %v5860_v61  ;;  %v5867_v63 = vld [vmem:[%s11231_s3 + $0x148] sm:$0xff]  ;;  %v5872_v3 = vld [vmem:[%s11231_s3 + $0x158] sm:$0xff] }
  0x2a   :  { %391 = vmatpush1.msra.mxu0 %v5831_v59  ;;  %462 = vmatpush1.msra.mxu1 %v5836_v57  ;;  %11943 = vst [vmem:[#allocation42_spill] sm:$0xff] %v5867_v63  ;;  %11944 = vst [vmem:[#allocation43_spill] sm:$0xff] %v5872_v3  ;;  %v5879_v59 = vld [vmem:[%s11231_s3 + $0x140] sm:$0xff]  ;;  %v5884_v57 = vld [vmem:[%s11231_s3 + $0x150] sm:$0xff] }
  0x2b   :  { %392 = vmatprep.subr.mxu0 %v5843_v58  ;;  %463 = vmatprep.subr.mxu1 %v5848_v56  ;;  %11945 = vst [vmem:[#allocation44_spill] sm:$0xff] %v5879_v59  ;;  %11946 = vst [vmem:[#allocation45_spill] sm:$0xff] %v5884_v57  ;;  %v5891_v58 = vld [vmem:[%s11231_s3 + $0x128] sm:$0xff]  ;;  %v5896_v56 = vld [vmem:[%s11231_s3 + $0x138] sm:$0xff] }
  0x2c   :  { %393 = vmatpush1.msra.mxu0 %v5855_v60  ;;  %464 = vmatpush1.msra.mxu1 %v5860_v61  ;;  %11947 = vst [vmem:[#allocation46_spill] sm:$0xff] %v5891_v58  ;;  %11948 = vst [vmem:[#allocation47_spill] sm:$0xff] %v5896_v56  ;;  %v5903_v60 = vld [vmem:[%s11231_s3 + $0x120] sm:$0xff]  ;;  %v5908_v61 = vld [vmem:[%s11231_s3 + $0x130] sm:$0xff] }
  0x2d   :  { %394 = vmatprep.subr.mxu0 %v5867_v63  ;;  %465 = vmatprep.subr.mxu1 %v5872_v3  ;;  %11949 = vst [vmem:[#allocation48_spill] sm:$0xff] %v5903_v60  ;;  %11950 = vst [vmem:[#allocation49_spill] sm:$0xff] %v5908_v61  ;;  %v5915_v63 = vld [vmem:[%s11231_s3 + $0x108] sm:$0xff]  ;;  %v5920_v3 = vld [vmem:[%s11231_s3 + $0x118] sm:$0xff] }
  0x2e   :  { %395 = vmatpush1.msra.mxu0 %v5879_v59  ;;  %466 = vmatpush1.msra.mxu1 %v5884_v57  ;;  %11951 = vst [vmem:[#allocation50_spill] sm:$0xff] %v5915_v63  ;;  %11952 = vst [vmem:[#allocation51_spill] sm:$0xff] %v5920_v3  ;;  %v5927_v59 = vld [vmem:[%s11231_s3 + $0x100] sm:$0xff]  ;;  %v5932_v57 = vld [vmem:[%s11231_s3 + $0x110] sm:$0xff] }
  0x2f   :  { %396 = vmatprep.subr.mxu0 %v5891_v58  ;;  %467 = vmatprep.subr.mxu1 %v5896_v56  ;;  %11953 = vst [vmem:[#allocation52_spill] sm:$0xff] %v5927_v59  ;;  %11954 = vst [vmem:[#allocation53_spill] sm:$0xff] %v5932_v57  ;;  %v5939_v58 = vld [vmem:[%s11231_s3 + $0xe8] sm:$0xff]  ;;  %v5944_v56 = vld [vmem:[%s11231_s3 + $0xf8] sm:$0xff] }
  0x30   :  { %397 = vmatpush1.msra.mxu0 %v5903_v60  ;;  %468 = vmatpush1.msra.mxu1 %v5908_v61  ;;  %11955 = vst [vmem:[#allocation54_spill] sm:$0xff] %v5939_v58  ;;  %11956 = vst [vmem:[#allocation55_spill] sm:$0xff] %v5944_v56  ;;  %v5951_v60 = vld [vmem:[%s11231_s3 + $0xe0] sm:$0xff]  ;;  %v5956_v61 = vld [vmem:[%s11231_s3 + $0xf0] sm:$0xff] }
  0x31   :  { %398 = vmatprep.subr.mxu0 %v5915_v63  ;;  %469 = vmatprep.subr.mxu1 %v5920_v3  ;;  %11957 = vst [vmem:[#allocation56_spill] sm:$0xff] %v5951_v60  ;;  %11958 = vst [vmem:[#allocation57_spill] sm:$0xff] %v5956_v61  ;;  %v5963_v63 = vld [vmem:[%s11231_s3 + $0xc8] sm:$0xff]  ;;  %v5968_v3 = vld [vmem:[%s11231_s3 + $0xd8] sm:$0xff] }
  0x32   :  { %399 = vmatpush1.msra.mxu0 %v5927_v59  ;;  %470 = vmatpush1.msra.mxu1 %v5932_v57  ;;  %11959 = vst [vmem:[#allocation58_spill] sm:$0xff] %v5963_v63  ;;  %11960 = vst [vmem:[#allocation59_spill] sm:$0xff] %v5968_v3  ;;  %v5975_v59 = vld [vmem:[%s11231_s3 + $0xc0] sm:$0xff]  ;;  %v5980_v57 = vld [vmem:[%s11231_s3 + $0xd0] sm:$0xff] }
  0x33   :  { %400 = vmatprep.subr.mxu0 %v5939_v58  ;;  %471 = vmatprep.subr.mxu1 %v5944_v56  ;;  %11961 = vst [vmem:[#allocation60_spill] sm:$0xff] %v5975_v59  ;;  %11962 = vst [vmem:[#allocation61_spill] sm:$0xff] %v5980_v57  ;;  %v5987_v58 = vld [vmem:[%s11231_s3 + $0xa8] sm:$0xff]  ;;  %v5992_v56 = vld [vmem:[%s11231_s3 + $0xb8] sm:$0xff] }
  0x34   :  { %401 = vmatpush1.msra.mxu0 %v5951_v60  ;;  %472 = vmatpush1.msra.mxu1 %v5956_v61  ;;  %11963 = vst [vmem:[#allocation62_spill] sm:$0xff] %v5987_v58  ;;  %11964 = vst [vmem:[#allocation63_spill] sm:$0xff] %v5992_v56  ;;  %v5999_v60 = vld [vmem:[%s11231_s3 + $0xa0] sm:$0xff]  ;;  %v6004_v61 = vld [vmem:[%s11231_s3 + $0xb0] sm:$0xff] }
  0x35   :  { %402 = vmatprep.subr.mxu0 %v5963_v63  ;;  %473 = vmatprep.subr.mxu1 %v5968_v3  ;;  %11965 = vst [vmem:[#allocation64_spill] sm:$0xff] %v5999_v60  ;;  %11966 = vst [vmem:[#allocation65_spill] sm:$0xff] %v6004_v61  ;;  %v6011_v63 = vld [vmem:[%s11231_s3 + $0x88] sm:$0xff]  ;;  %v6016_v3 = vld [vmem:[%s11231_s3 + $0x98] sm:$0xff] }
  0x36   :  { %403 = vmatpush1.msra.mxu0 %v5975_v59  ;;  %474 = vmatpush1.msra.mxu1 %v5980_v57  ;;  %11967 = vst [vmem:[#allocation66_spill] sm:$0xff] %v6011_v63  ;;  %11968 = vst [vmem:[#allocation67_spill] sm:$0xff] %v6016_v3  ;;  %v6023_v59 = vld [vmem:[%s11231_s3 + $0x80] sm:$0xff]  ;;  %v6028_v57 = vld [vmem:[%s11231_s3 + $0x90] sm:$0xff] }
  0x37   :  { %404 = vmatprep.subr.mxu0 %v5987_v58  ;;  %475 = vmatprep.subr.mxu1 %v5992_v56  ;;  %11969 = vst [vmem:[#allocation68_spill] sm:$0xff] %v6023_v59  ;;  %11970 = vst [vmem:[#allocation69_spill] sm:$0xff] %v6028_v57  ;;  %v6035_v58 = vld [vmem:[%s11231_s3 + $0x68] sm:$0xff]  ;;  %v6040_v56 = vld [vmem:[%s11231_s3 + $0x78] sm:$0xff] }
  0x38   :  { %405 = vmatpush1.msra.mxu0 %v5999_v60  ;;  %476 = vmatpush1.msra.mxu1 %v6004_v61  ;;  %11971 = vst [vmem:[#allocation70_spill] sm:$0xff] %v6035_v58  ;;  %11972 = vst [vmem:[#allocation71_spill] sm:$0xff] %v6040_v56  ;;  %v6047_v60 = vld [vmem:[%s11231_s3 + $0x60] sm:$0xff]  ;;  %v6052_v61 = vld [vmem:[%s11231_s3 + $0x70] sm:$0xff] }
  0x39   :  { %406 = vmatprep.subr.mxu0 %v6011_v63  ;;  %477 = vmatprep.subr.mxu1 %v6016_v3  ;;  %11973 = vst [vmem:[#allocation72_spill] sm:$0xff] %v6047_v60  ;;  %11974 = vst [vmem:[#allocation73_spill] sm:$0xff] %v6052_v61  ;;  %v6059_v63 = vld [vmem:[%s11231_s3 + $0x48] sm:$0xff]  ;;  %v6064_v3 = vld [vmem:[%s11231_s3 + $0x58] sm:$0xff] }
  0x3a   :  { %407 = vmatpush1.msra.mxu0 %v6023_v59  ;;  %478 = vmatpush1.msra.mxu1 %v6028_v57  ;;  %11975 = vst [vmem:[#allocation74_spill] sm:$0xff] %v6059_v63  ;;  %11976 = vst [vmem:[#allocation75_spill] sm:$0xff] %v6064_v3  ;;  %v6071_v59 = vld [vmem:[%s11231_s3 + $0x40] sm:$0xff]  ;;  %v6076_v57 = vld [vmem:[%s11231_s3 + $0x50] sm:$0xff] }
  0x3b   :  { %408 = vmatprep.subr.mxu0 %v6035_v58  ;;  %479 = vmatprep.subr.mxu1 %v6040_v56  ;;  %11977 = vst [vmem:[#allocation76_spill] sm:$0xff] %v6071_v59  ;;  %11978 = vst [vmem:[#allocation77_spill] sm:$0xff] %v6076_v57  ;;  %v6083_v58 = vld [vmem:[%s11231_s3 + $0x28] sm:$0xff]  ;;  %v6088_v56 = vld [vmem:[%s11231_s3 + $0x38] sm:$0xff] }
  0x3c   :  { %409 = vmatpush1.msra.mxu0 %v6047_v60  ;;  %480 = vmatpush1.msra.mxu1 %v6052_v61  ;;  %11979 = vst [vmem:[#allocation78_spill] sm:$0xff] %v6083_v58  ;;  %11980 = vst [vmem:[#allocation79_spill] sm:$0xff] %v6088_v56  ;;  %v6095_v60 = vld [vmem:[%s11231_s3 + $0x20] sm:$0xff]  ;;  %v6100_v61 = vld [vmem:[%s11231_s3 + $0x30] sm:$0xff] }
  0x3d   :  { %410 = vmatprep.subr.mxu0 %v6059_v63  ;;  %481 = vmatprep.subr.mxu1 %v6064_v3  ;;  %11981 = vst [vmem:[#allocation80_spill] sm:$0xff] %v6095_v60  ;;  %11982 = vst [vmem:[#allocation81_spill] sm:$0xff] %v6100_v61  ;;  %v6107_v63 = vld [vmem:[%s11231_s3 + $0x8] sm:$0xff]  ;;  %v6112_v3 = vld [vmem:[%s11231_s3 + $0x18] sm:$0xff] }
  0x3e   :  { %411 = vmatpush1.msra.mxu0 %v6071_v59  ;;  %482 = vmatpush1.msra.mxu1 %v6076_v57  ;;  %11983 = vst [vmem:[#allocation82_spill] sm:$0xff] %v6107_v63  ;;  %11984 = vst [vmem:[#allocation83_spill] sm:$0xff] %v6112_v3  ;;  %v6119_v59 = vld [vmem:[%s11231_s3] sm:$0xff]  ;;  %v6126_v57 = vld [vmem:[%s11231_s3 + $0x10] sm:$0xff] }
  0x3f   :  { %412 = vmatprep.subr.mxu0 %v6083_v58  ;;  %483 = vmatprep.subr.mxu1 %v6088_v56  ;;  %11985 = vst [vmem:[#allocation84_spill] sm:$0xff] %v6119_v59  ;;  %11986 = vst [vmem:[#allocation85_spill] sm:$0xff] %v6126_v57  ;;  %v6366_v56 = vld [vmem:[%s11233_s4 + $0xd8] sm:$0xff]  ;;  %v6383_v58 = vld [vmem:[%s11233_s4 + $0xa8] sm:$0xff] }
  0x40   :  { %413 = vmatpush1.msra.mxu0 %v6095_v60  ;;  %484 = vmatpush1.msra.mxu1 %v6100_v61  ;;  %v6137_v61 = vld [vmem:[%s11232_s0] sm:$0x3]  ;;  %12025 = vst [vmem:[#allocation124_spill] sm:$0xff] %v6366_v56  ;;  %12028 = vst [vmem:[#allocation127_spill] sm:$0xff] %v6383_v58 }
  0x41   :  { %414 = vmatprep.subr.mxu0 %v6107_v63  ;;  %485 = vmatprep.subr.mxu1 %v6112_v3  ;;  %11987 = vst [vmem:[#allocation86_spill] sm:$0xff] %v6137_v61  ;;  %v5301_v63 = vmov 0   ;;  %v6164_v3 = vld [vmem:[%s11233_s4 + $0x1f0] sm:$0xff]  ;;  %v6349_v60 = vld [vmem:[%s11233_s4 + $0xe0] sm:$0xff] }
  0x42   :  { %415 = vmatpush1.msra.mxu0 %v6119_v59  ;;  %448 = vmatprep.mubr.f32.mxu0 %v11926_v62  ;;  %v6152_v59 = vld [vmem:[%s11233_s4 + $0x1f8] sm:$0xff]  ;;  %11991 = vst [vmem:[#allocation90_spill] sm:$0xff] %v6164_v3  ;;  %12022 = vst [vmem:[#allocation121_spill] sm:$0xff] %v6349_v60 }
  0x43   :  { %486 = vmatpush1.msra.mxu1 %v6126_v57  ;;  %519 = vmatprep.mubr.f32.mxu1 %v11926_v62  ;;  %v6147_v57 = vld [vmem:[%s11233_s4 + $0x1e8] sm:$0xff]  ;;  %11989 = vst [vmem:[#allocation88_spill] sm:$0xff] %v6152_v59 }
  0x44   :  { %449 = vmatmul.mubr.f32.vlgmr.msra.gmra.mxu0 %v11926_v62  ;;  %520 = vmatmul.mubr.f32.vlgmr.msra.gmra.mxu1 %v11926_v62  ;;  %11988 = vst [vmem:[#allocation87_spill] sm:$0xff] %v6147_v57 }
  0x45   :  { %4456 = vset.pattern.permute.xlu0 %v5301_v63  ;;  %682 = vmatprep.mubr.f32.mxu0 %v11926_v62  ;;  %v6159_v63 = vld [vmem:[%s11233_s4 + $0x1e0] sm:$0xff] }
  0x46   :  { %309 = vperm.xlu0 %4456, %v6137_v61   ;;  %753 = vmatprep.mubr.f32.mxu1 %v11926_v62  ;;  %11990 = vst [vmem:[#allocation89_spill] sm:$0xff] %v6159_v63  ;;  %v6400_v61 = vld [vmem:[%s11233_s4 + $0xb0] sm:$0xff] }
  0x47   :  { %618 = vmatprep.subr.mxu0 %v6147_v57  ;;  %689 = vmatprep.subr.mxu1 %v6152_v59  ;;  %v6171_v57 = vld [vmem:[%s11233_s4 + $0x1c8] sm:$0xff]  ;;  %v6176_v59 = vld [vmem:[%s11233_s4 + $0x1d8] sm:$0xff]  ;;  %12031 = vst [vmem:[#allocation130_spill] sm:$0xff] %v6400_v61 }
  0x48   :  { %619 = vmatpush1.msra.mxu0 %v6159_v63  ;;  %690 = vmatpush1.msra.mxu1 %v6164_v3  ;;  %11992 = vst [vmem:[#allocation91_spill] sm:$0xff] %v6171_v57  ;;  %11993 = vst [vmem:[#allocation92_spill] sm:$0xff] %v6176_v59  ;;  %v6183_v63 = vld [vmem:[%s11233_s4 + $0x1c0] sm:$0xff]  ;;  %v6188_v3 = vld [vmem:[%s11233_s4 + $0x1d0] sm:$0xff] }
  0x49   :  { %620 = vmatprep.subr.mxu0 %v6171_v57  ;;  %691 = vmatprep.subr.mxu1 %v6176_v59  ;;  %11994 = vst [vmem:[#allocation93_spill] sm:$0xff] %v6183_v63  ;;  %11995 = vst [vmem:[#allocation94_spill] sm:$0xff] %v6188_v3  ;;  %v6195_v57 = vld [vmem:[%s11233_s4 + $0x1a8] sm:$0xff]  ;;  %v6200_v59 = vld [vmem:[%s11233_s4 + $0x1b8] sm:$0xff] }
  0x4a   :  { %621 = vmatpush1.msra.mxu0 %v6183_v63  ;;  %692 = vmatpush1.msra.mxu1 %v6188_v3  ;;  %11996 = vst [vmem:[#allocation95_spill] sm:$0xff] %v6195_v57  ;;  %11997 = vst [vmem:[#allocation96_spill] sm:$0xff] %v6200_v59  ;;  %v6207_v63 = vld [vmem:[%s11233_s4 + $0x1a0] sm:$0xff]  ;;  %v6212_v3 = vld [vmem:[%s11233_s4 + $0x1b0] sm:$0xff] }
  0x4b   :  { %622 = vmatprep.subr.mxu0 %v6195_v57  ;;  %693 = vmatprep.subr.mxu1 %v6200_v59  ;;  %11998 = vst [vmem:[#allocation97_spill] sm:$0xff] %v6207_v63  ;;  %11999 = vst [vmem:[#allocation98_spill] sm:$0xff] %v6212_v3  ;;  %v6219_v57 = vld [vmem:[%s11233_s4 + $0x188] sm:$0xff]  ;;  %v6224_v59 = vld [vmem:[%s11233_s4 + $0x198] sm:$0xff] }
  0x4c   :  { %623 = vmatpush1.msra.mxu0 %v6207_v63  ;;  %694 = vmatpush1.msra.mxu1 %v6212_v3  ;;  %12000 = vst [vmem:[#allocation99_spill] sm:$0xff] %v6219_v57  ;;  %12001 = vst [vmem:[#allocation100_spill] sm:$0xff] %v6224_v59  ;;  %v6231_v63 = vld [vmem:[%s11233_s4 + $0x180] sm:$0xff]  ;;  %v6236_v3 = vld [vmem:[%s11233_s4 + $0x190] sm:$0xff] }
  0x4d   :  { %624 = vmatprep.subr.mxu0 %v6219_v57  ;;  %695 = vmatprep.subr.mxu1 %v6224_v59  ;;  %12002 = vst [vmem:[#allocation101_spill] sm:$0xff] %v6231_v63  ;;  %12003 = vst [vmem:[#allocation102_spill] sm:$0xff] %v6236_v3  ;;  %v6243_v57 = vld [vmem:[%s11233_s4 + $0x168] sm:$0xff]  ;;  %v6248_v59 = vld [vmem:[%s11233_s4 + $0x178] sm:$0xff] }
  0x4e   :  { %625 = vmatpush1.msra.mxu0 %v6231_v63  ;;  %696 = vmatpush1.msra.mxu1 %v6236_v3  ;;  %12004 = vst [vmem:[#allocation103_spill] sm:$0xff] %v6243_v57  ;;  %12005 = vst [vmem:[#allocation104_spill] sm:$0xff] %v6248_v59  ;;  %v6255_v63 = vld [vmem:[%s11233_s4 + $0x160] sm:$0xff]  ;;  %v6260_v3 = vld [vmem:[%s11233_s4 + $0x170] sm:$0xff] }
  0x4f   :  { %626 = vmatprep.subr.mxu0 %v6243_v57  ;;  %697 = vmatprep.subr.mxu1 %v6248_v59  ;;  %12006 = vst [vmem:[#allocation105_spill] sm:$0xff] %v6255_v63  ;;  %12007 = vst [vmem:[#allocation106_spill] sm:$0xff] %v6260_v3  ;;  %v6267_v57 = vld [vmem:[%s11233_s4 + $0x148] sm:$0xff]  ;;  %v6272_v59 = vld [vmem:[%s11233_s4 + $0x158] sm:$0xff] }
  0x50   :  { %627 = vmatpush1.msra.mxu0 %v6255_v63  ;;  %698 = vmatpush1.msra.mxu1 %v6260_v3  ;;  %12008 = vst [vmem:[#allocation107_spill] sm:$0xff] %v6267_v57  ;;  %12009 = vst [vmem:[#allocation108_spill] sm:$0xff] %v6272_v59  ;;  %v6279_v63 = vld [vmem:[%s11233_s4 + $0x140] sm:$0xff]  ;;  %v6284_v3 = vld [vmem:[%s11233_s4 + $0x150] sm:$0xff] }
  0x51   :  { %628 = vmatprep.subr.mxu0 %v6267_v57  ;;  %699 = vmatprep.subr.mxu1 %v6272_v59  ;;  %12010 = vst [vmem:[#allocation109_spill] sm:$0xff] %v6279_v63  ;;  %12011 = vst [vmem:[#allocation110_spill] sm:$0xff] %v6284_v3  ;;  %v6291_v57 = vld [vmem:[%s11233_s4 + $0x128] sm:$0xff]  ;;  %v6296_v59 = vld [vmem:[%s11233_s4 + $0x138] sm:$0xff] }
  0x52   :  { %629 = vmatpush1.msra.mxu0 %v6279_v63  ;;  %700 = vmatpush1.msra.mxu1 %v6284_v3  ;;  %12012 = vst [vmem:[#allocation111_spill] sm:$0xff] %v6291_v57  ;;  %12013 = vst [vmem:[#allocation112_spill] sm:$0xff] %v6296_v59  ;;  %v6303_v63 = vld [vmem:[%s11233_s4 + $0x120] sm:$0xff]  ;;  %v6308_v3 = vld [vmem:[%s11233_s4 + $0x130] sm:$0xff] }
  0x53   :  { %630 = vmatprep.subr.mxu0 %v6291_v57  ;;  %701 = vmatprep.subr.mxu1 %v6296_v59  ;;  %12014 = vst [vmem:[#allocation113_spill] sm:$0xff] %v6303_v63  ;;  %12015 = vst [vmem:[#allocation114_spill] sm:$0xff] %v6308_v3  ;;  %v6315_v57 = vld [vmem:[%s11233_s4 + $0x108] sm:$0xff]  ;;  %v6320_v59 = vld [vmem:[%s11233_s4 + $0x118] sm:$0xff] }
  0x54   :  { %631 = vmatpush1.msra.mxu0 %v6303_v63  ;;  %702 = vmatpush1.msra.mxu1 %v6308_v3  ;;  %12016 = vst [vmem:[#allocation115_spill] sm:$0xff] %v6315_v57  ;;  %12017 = vst [vmem:[#allocation116_spill] sm:$0xff] %v6320_v59  ;;  %v6327_v63 = vld [vmem:[%s11233_s4 + $0x100] sm:$0xff]  ;;  %v6332_v3 = vld [vmem:[%s11233_s4 + $0x110] sm:$0xff] }
  0x55   :  { %632 = vmatprep.subr.mxu0 %v6315_v57  ;;  %703 = vmatprep.subr.mxu1 %v6320_v59  ;;  %12018 = vst [vmem:[#allocation117_spill] sm:$0xff] %v6327_v63  ;;  %12019 = vst [vmem:[#allocation118_spill] sm:$0xff] %v6332_v3  ;;  %v6339_v57 = vld [vmem:[%s11233_s4 + $0xe8] sm:$0xff]  ;;  %v6344_v59 = vld [vmem:[%s11233_s4 + $0xf8] sm:$0xff] }
  0x56   :  { %633 = vmatpush1.msra.mxu0 %v6327_v63  ;;  %704 = vmatpush1.msra.mxu1 %v6332_v3  ;;  %12020 = vst [vmem:[#allocation119_spill] sm:$0xff] %v6339_v57  ;;  %12021 = vst [vmem:[#allocation120_spill] sm:$0xff] %v6344_v59  ;;  %v6356_v3 = vld [vmem:[%s11233_s4 + $0xf0] sm:$0xff]  ;;  %v6361_v63 = vld [vmem:[%s11233_s4 + $0xc8] sm:$0xff] }
  0x57   :  { %634 = vmatprep.subr.mxu0 %v6339_v57  ;;  %705 = vmatprep.subr.mxu1 %v6344_v59  ;;  %12023 = vst [vmem:[#allocation122_spill] sm:$0xff] %v6356_v3  ;;  %12024 = vst [vmem:[#allocation123_spill] sm:$0xff] %v6361_v63  ;;  %v6373_v59 = vld [vmem:[%s11233_s4 + $0xc0] sm:$0xff]  ;;  %v6378_v57 = vld [vmem:[%s11233_s4 + $0xd0] sm:$0xff] }
  0x58   :  { %635 = vmatpush1.msra.mxu0 %v6349_v60  ;;  %706 = vmatpush1.msra.mxu1 %v6356_v3  ;;  %12026 = vst [vmem:[#allocation125_spill] sm:$0xff] %v6373_v59  ;;  %12027 = vst [vmem:[#allocation126_spill] sm:$0xff] %v6378_v57  ;;  %v6390_v3 = vld [vmem:[%s11233_s4 + $0xb8] sm:$0xff]  ;;  %v6395_v60 = vld [vmem:[%s11233_s4 + $0xa0] sm:$0xff] }
  0x59   :  { %636 = vmatprep.subr.mxu0 %v6361_v63  ;;  %707 = vmatprep.subr.mxu1 %v6366_v56  ;;  %12029 = vst [vmem:[#allocation128_spill] sm:$0xff] %v6390_v3  ;;  %12030 = vst [vmem:[#allocation129_spill] sm:$0xff] %v6395_v60  ;;  %v6407_v56 = vld [vmem:[%s11233_s4 + $0x88] sm:$0xff]  ;;  %v6412_v63 = vld [vmem:[%s11233_s4 + $0x98] sm:$0xff] }
  0x5a   :  { %637 = vmatpush1.msra.mxu0 %v6373_v59  ;;  %708 = vmatpush1.msra.mxu1 %v6378_v57  ;;  %12032 = vst [vmem:[#allocation131_spill] sm:$0xff] %v6407_v56  ;;  %12033 = vst [vmem:[#allocation132_spill] sm:$0xff] %v6412_v63  ;;  %v6419_v59 = vld [vmem:[%s11233_s4 + $0x80] sm:$0xff]  ;;  %v6424_v57 = vld [vmem:[%s11233_s4 + $0x90] sm:$0xff] }
  0x5b   :  { %638 = vmatprep.subr.mxu0 %v6383_v58  ;;  %709 = vmatprep.subr.mxu1 %v6390_v3  ;;  %12034 = vst [vmem:[#allocation133_spill] sm:$0xff] %v6419_v59  ;;  %12035 = vst [vmem:[#allocation134_spill] sm:$0xff] %v6424_v57  ;;  %v6431_v58 = vld [vmem:[%s11233_s4 + $0x68] sm:$0xff]  ;;  %v6436_v3 = vld [vmem:[%s11233_s4 + $0x78] sm:$0xff] }
  0x5c   :  { %639 = vmatpush1.msra.mxu0 %v6395_v60  ;;  %710 = vmatpush1.msra.mxu1 %v6400_v61  ;;  %12036 = vst [vmem:[#allocation135_spill] sm:$0xff] %v6431_v58  ;;  %12037 = vst [vmem:[#allocation136_spill] sm:$0xff] %v6436_v3  ;;  %v6443_v60 = vld [vmem:[%s11233_s4 + $0x60] sm:$0xff]  ;;  %v6448_v61 = vld [vmem:[%s11233_s4 + $0x70] sm:$0xff] }
  0x5d   :  { %640 = vmatprep.subr.mxu0 %v6407_v56  ;;  %711 = vmatprep.subr.mxu1 %v6412_v63  ;;  %12038 = vst [vmem:[#allocation137_spill] sm:$0xff] %v6443_v60  ;;  %12039 = vst [vmem:[#allocation138_spill] sm:$0xff] %v6448_v61  ;;  %v6455_v56 = vld [vmem:[%s11233_s4 + $0x48] sm:$0xff]  ;;  %v6460_v63 = vld [vmem:[%s11233_s4 + $0x58] sm:$0xff] }
  0x5e   :  { %641 = vmatpush1.msra.mxu0 %v6419_v59  ;;  %712 = vmatpush1.msra.mxu1 %v6424_v57  ;;  %12040 = vst [vmem:[#allocation139_spill] sm:$0xff] %v6455_v56  ;;  %12041 = vst [vmem:[#allocation140_spill] sm:$0xff] %v6460_v63  ;;  %v6467_v59 = vld [vmem:[%s11233_s4 + $0x40] sm:$0xff]  ;;  %v6472_v57 = vld [vmem:[%s11233_s4 + $0x50] sm:$0xff] }
  0x5f   :  { %642 = vmatprep.subr.mxu0 %v6431_v58  ;;  %713 = vmatprep.subr.mxu1 %v6436_v3  ;;  %12042 = vst [vmem:[#allocation141_spill] sm:$0xff] %v6467_v59  ;;  %12043 = vst [vmem:[#allocation142_spill] sm:$0xff] %v6472_v57  ;;  %v6479_v58 = vld [vmem:[%s11233_s4 + $0x28] sm:$0xff]  ;;  %v6484_v3 = vld [vmem:[%s11233_s4 + $0x38] sm:$0xff] }
  0x60   :  { %643 = vmatpush1.msra.mxu0 %v6443_v60  ;;  %714 = vmatpush1.msra.mxu1 %v6448_v61  ;;  %12044 = vst [vmem:[#allocation143_spill] sm:$0xff] %v6479_v58  ;;  %12045 = vst [vmem:[#allocation144_spill] sm:$0xff] %v6484_v3  ;;  %v6491_v60 = vld [vmem:[%s11233_s4 + $0x20] sm:$0xff]  ;;  %v6496_v61 = vld [vmem:[%s11233_s4 + $0x30] sm:$0xff] }
  0x61   :  { %644 = vmatprep.subr.mxu0 %v6455_v56  ;;  %715 = vmatprep.subr.mxu1 %v6460_v63  ;;  %12046 = vst [vmem:[#allocation145_spill] sm:$0xff] %v6491_v60  ;;  %12047 = vst [vmem:[#allocation146_spill] sm:$0xff] %v6496_v61  ;;  %v6503_v56 = vld [vmem:[%s11233_s4 + $0x8] sm:$0xff]  ;;  %v6508_v63 = vld [vmem:[%s11233_s4 + $0x18] sm:$0xff] }
  0x62   :  { %645 = vmatpush1.msra.mxu0 %v6467_v59  ;;  %716 = vmatpush1.msra.mxu1 %v6472_v57  ;;  %12048 = vst [vmem:[#allocation147_spill] sm:$0xff] %v6503_v56  ;;  %12049 = vst [vmem:[#allocation148_spill] sm:$0xff] %v6508_v63  ;;  %v6515_v59 = vld [vmem:[%s11233_s4] sm:$0xff]  ;;  %v6520_v57 = vld [vmem:[%s11233_s4 + $0x10] sm:$0xff] }
  0x63   :  { %646 = vmatprep.subr.mxu0 %v6479_v58  ;;  %717 = vmatprep.subr.mxu1 %v6484_v3  ;;  %12050 = vst [vmem:[#allocation149_spill] sm:$0xff] %v6515_v59  ;;  %12051 = vst [vmem:[#allocation150_spill] sm:$0xff] %v6520_v57  ;;  %v36_v3 = vlaneseq }
  0x64   :  { %647 = vmatpush1.msra.mxu0 %v6491_v60  ;;  %718 = vmatpush1.msra.mxu1 %v6496_v61  ;;  %v34_v60 = vld [vmem:[%s11234_s1] sm:$0xf] }
  0x65   :  { %648 = vmatprep.subr.mxu0 %v6503_v56  ;;  %719 = vmatprep.subr.mxu1 %v6508_v63  ;;  %v37_v58 = vshrl.u32 %v36_v3, 7 }
  0x66   :  { %649 = vmatpush1.msra.mxu0 %v6515_v59  ;;  %720 = vmatpush1.msra.mxu1 %v6520_v57 }
  0x67   :  { %788 = vmatprep.subr.mxu0 %v5363_v0  ;;  %859 = vmatprep.subr.mxu1 %v5368_v1  ;;  %v6533_v62 = vsub.s32 0, %v37_v58  ;;  %v6535_v61 = vsub.s32 1, %v37_v58  ;;  %v56_v0 = vld [vmem:[%s11235_s2] sm:$0xf]  ;;  %v6559_v51 = vsub.s32 3, %v37_v58  ;;  %v6569_v46 = vsub.s32 2, %v37_v58 }
  0x69   :  { %12052 = vst [vmem:[#allocation151_spill] sm:$0xff] %v6533_v62  ;;  %12053 = vst [vmem:[#allocation152_spill] sm:$0xff] %v6535_v61  ;;  %v6538_v63 = vrot.slane %v34_v60, %v6533_v62  ;;  %v6544_v1 = vrot.slane %v34_v60, %v6535_v61  ;;  %v6547_v3 = vrot.slane %v56_v0, %v6533_v62 }
  0x6a   :  { %v6553_v55 = vrot.slane %v56_v0, %v6535_v61  ;;  %12060 = vst [vmem:[#allocation159_spill] sm:$0xff] %v6559_v51  ;;  %12064 = vst [vmem:[#allocation163_spill] sm:$0xff] %v6569_v46 }
  0x6b   :  { %12054 = vst [vmem:[#allocation153_spill] sm:$0xff] %v6538_v63  ;;  %12055 = vst [vmem:[#allocation154_spill] sm:$0xff] %v6544_v1 }
  0x6c   :  { %12056 = vst [vmem:[#allocation155_spill] sm:$0xff] %v6547_v3  ;;  %12058 = vst [vmem:[#allocation157_spill] sm:$0xff] %v6553_v55 }
  0xc1   :  { %v310_v59 = vpop.permute.xlu0 %309 }
  0xc2   :  { %v312_v57 = vmul.f32 %v310_v59, %v6538_v63  ;;  %v313_v54 = vmul.f32 %v310_v59, %v6544_v1  ;;  %v6565_v63 = vrot.slane %v34_v60, %v6559_v51 }
  0xc4   :  { %v316_v53 = vadd.f32 %v312_v57, %v6547_v3  ;;  %v317_v62 = vadd.f32 %v313_v54, %v6553_v55  ;;  %12062 = vst [vmem:[#allocation161_spill] sm:$0xff] %v6565_v63  ;;  %v6572_v57 = vrot.slane %v56_v0, %v6559_v51  ;;  %v315_v3 = vmul.f32 %v310_v59, %v6565_v63 }
  0xc5   :  { %v6576_v55 = vrot.slane %v34_v60, %v6569_v46 }
  0xc6   :  { %12065 = vst [vmem:[#allocation164_spill] sm:$0xff] %v6572_v57 }
  0xe2   :  { %v6550_v56 = vpop.f32.mrf.mxu0 }
  0xe3   :  { %12057 = vst [vmem:[#allocation156_spill] sm:$0xff] %v6550_v56  ;;  %v6561_v50 = vpop.f32.mrf.mxu1 }
  0xe4   :  { %v6557_v52 = vpop.f32.mrf.mxu0  ;;  %12061 = vst [vmem:[#allocation160_spill] sm:$0xff] %v6561_v50 }
  0xe5   :  { %12059 = vst [vmem:[#allocation158_spill] sm:$0xff] %v6557_v52  ;;  %v6567_v61 = vpop.f32.mrf.mxu1 }
  0xe6   :  { %12063 = vst [vmem:[#allocation162_spill] sm:$0xff] %v6567_v61 }
 0x104   :  { %v450_v49 = vpop.f32.mrf.mxu0  ;;  %v521_v50 = vpop.f32.mrf.mxu1 }
 0x105   :  { %v526_v56 = vadd.f32 %v450_v49, %v316_v53  ;;  %v319_v49 = vadd.f32 %v315_v3, %v6572_v57 }
 0x106   :  { %v452_v48 = vpop.f32.mrf.mxu0  ;;  %v523_v53 = vpop.f32.mrf.mxu1 }
 0x107   :  { %v4345_v47 = vmul.f32 -1.442695, %v526_v56  ;;  %v527_v1 = vadd.f32 %v452_v48, %v317_v62  ;;  %v6580_v56 = vrot.slane %v56_v0, %v6569_v46  ;;  %v314_v48 = vmul.f32 %v310_v59, %v6576_v55 }
 0x108   :  { %v529_v58 = vadd.f32 %v523_v53, %v319_v49 }
 0x109   :  { %4465 = vpow2.f32 %v4345_v47  ;;  %v4346_v54 = vmul.f32 -1.442695, %v527_v1  ;;  %v318_v62 = vadd.f32 %v314_v48, %v6580_v56  ;;  %v12097_v48 = vld [vmem:[#allocation160_spill] sm:$0xff] }
 0x10a   :  { %v4347_v61 = vmul.f32 -1.442695, %v529_v58 }
 0x10b   :  { %4467 = vpow2.f32 %v4346_v54  ;;  %v528_v47 = vadd.f32 %v521_v50, %v318_v62 }
 0x10c   :  { %4469 = vpow2.f32 %v4347_v61 }
 0x116   :  { %v4466_v63 = vpop.eup %4465 }
 0x117   :  { %v533_v51 = vadd.f32 1.0, %v4466_v63 }
 0x118   :  { %v4468_v1 = vpop.eup %4467 }
 0x119   :  { %4471 = vrcp.f32 %v533_v51  ;;  %v539_v60 = vadd.f32 1.0, %v4468_v1  ;;  %v4470_v3 = vpop.eup %4469 }
 0x11a   :  { %4473 = vtanh.f32 %v528_v47  ;;  %v546_v46 = vadd.f32 1.0, %v4470_v3 }
 0x11b   :  { %4475 = vrcp.f32 %v539_v60 }
 0x11c   :  { %4477 = vrcp.f32 %v546_v46 }
 0x126   :  { %v4472_v54 = vpop.eup %4471 }
 0x127   :  { %v4474_v57 = vpop.eup %4473 }
 0x128   :  { %v4476_v0 = vpop.eup %4475  ;;  %v550_v59 = vmul.f32 %v4474_v57, %v4472_v54 }
 0x129   :  { %v549_v52 = vmul.f32 0.0, %v4476_v0  ;;  %v4478_v50 = vpop.eup %4477 }
 0x12b   :  { %v6584_v49 = vadd.f32 %v550_v59, %v549_v52  ;;  %v12096_v52 = vld [vmem:[#allocation162_spill] sm:$0xff] }
 0x12d   :  { %4479 = vtanh.f32 %v6584_v49 }
 0x13a   :  { %v4480_v63 = vpop.eup %4479 }
 0x13b   :  { %v6587_v53 = vmul.f32 %v4480_v63, %v4478_v50 }
 0x13d   :  { %683 = vmatmul.mubr.f32.vlgmr.msra.gmra.mxu0 %v6587_v53  ;;  %754 = vmatmul.mubr.f32.vlgmr.msra.gmra.mxu1 %v6587_v53 }
 0x13e   :  { %789 = vmatpush1.msra.mxu0 %v5373_v2  ;;  %860 = vmatpush1.msra.mxu1 %v5382_v4  ;;  %v12066_v2 = vld [vmem:[#allocation3_spill] sm:$0xff]  ;;  %v12067_v4 = vld [vmem:[#allocation4_spill] sm:$0xff] }
 0x13f   :  { %790 = vmatprep.subr.mxu0 %v5387_v5  ;;  %861 = vmatprep.subr.mxu1 %v5392_v6  ;;  %v12068_v5 = vld [vmem:[#allocation5_spill] sm:$0xff]  ;;  %v12069_v6 = vld [vmem:[#allocation6_spill] sm:$0xff] }
 0x140   :  { %791 = vmatpush1.msra.mxu0 %v5399_v7  ;;  %862 = vmatpush1.msra.mxu1 %v5404_v8  ;;  %v12070_v7 = vld [vmem:[#allocation7_spill] sm:$0xff]  ;;  %v12071_v8 = vld [vmem:[#allocation8_spill] sm:$0xff] }
 0x141   :  { %792 = vmatprep.subr.mxu0 %v5409_v9  ;;  %863 = vmatprep.subr.mxu1 %v5416_v10  ;;  %v12072_v9 = vld [vmem:[#allocation9_spill] sm:$0xff]  ;;  %v12073_v10 = vld [vmem:[#allocation10_spill] sm:$0xff] }
 0x142   :  { %793 = vmatpush1.msra.mxu0 %v5421_v11  ;;  %864 = vmatpush1.msra.mxu1 %v5426_v12  ;;  %v12074_v11 = vld [vmem:[#allocation11_spill] sm:$0xff]  ;;  %v12075_v12 = vld [vmem:[#allocation12_spill] sm:$0xff] }
 0x143   :  { %794 = vmatprep.subr.mxu0 %v5433_v13  ;;  %865 = vmatprep.subr.mxu1 %v5438_v14  ;;  %v12076_v13 = vld [vmem:[#allocation13_spill] sm:$0xff]  ;;  %v12077_v14 = vld [vmem:[#allocation14_spill] sm:$0xff] }
 0x144   :  { %795 = vmatpush1.msra.mxu0 %v5445_v15  ;;  %866 = vmatpush1.msra.mxu1 %v5450_v16  ;;  %v12078_v15 = vld [vmem:[#allocation15_spill] sm:$0xff]  ;;  %v12079_v16 = vld [vmem:[#allocation16_spill] sm:$0xff] }
 0x145   :  { %796 = vmatprep.subr.mxu0 %v5457_v17  ;;  %867 = vmatprep.subr.mxu1 %v5462_v18  ;;  %v12080_v17 = vld [vmem:[#allocation17_spill] sm:$0xff]  ;;  %v12081_v18 = vld [vmem:[#allocation18_spill] sm:$0xff] }
 0x146   :  { %797 = vmatpush1.msra.mxu0 %v5469_v19  ;;  %868 = vmatpush1.msra.mxu1 %v5474_v20  ;;  %v12082_v19 = vld [vmem:[#allocation19_spill] sm:$0xff]  ;;  %v12083_v20 = vld [vmem:[#allocation20_spill] sm:$0xff] }
 0x147   :  { %798 = vmatprep.subr.mxu0 %v5481_v21  ;;  %869 = vmatprep.subr.mxu1 %v5486_v22  ;;  %v12084_v21 = vld [vmem:[#allocation21_spill] sm:$0xff]  ;;  %v12085_v22 = vmov 0.0  }
 0x148   :  { %799 = vmatpush1.msra.mxu0 %v5493_v23  ;;  %870 = vmatpush1.msra.mxu1 %v5498_v24  ;;  %v12086_v23 = vld [vmem:[#allocation22_spill] sm:$0xff]  ;;  %v12087_v24 = vld [vmem:[#allocation23_spill] sm:$0xff] }
 0x149   :  { %800 = vmatprep.subr.mxu0 %v5505_v25  ;;  %871 = vmatprep.subr.mxu1 %v5510_v26  ;;  %v5302_v25 = vmov 1   ;;  %v12088_v26 = vld [vmem:[#allocation86_spill] sm:$0xff] }
 0x14a   :  { %801 = vmatpush1.msra.mxu0 %v5517_v27  ;;  %872 = vmatpush1.msra.mxu1 %v5522_v28  ;;  %v78_v27 = vld [vmem:[%s11236_s6] sm:$0xf] }
 0x14b   :  { %802 = vmatprep.subr.mxu0 %v5529_v29  ;;  %873 = vmatprep.subr.mxu1 %v5534_v30  ;;  %v12089_v28 = vld [vmem:[#allocation151_spill] sm:$0xff]  ;;  %v12091_v30 = vld [vmem:[#allocation152_spill] sm:$0xff] }
 0x14c   :  { %803 = vmatpush1.msra.mxu0 %v5541_v31  ;;  %874 = vmatpush1.msra.mxu1 %v5546_v32  ;;  %v6662_v29 = vrot.slane %v78_v27, %v12089_v28  ;;  %v6665_v31 = vrot.slane %v78_v27, %v12091_v30  ;;  %v12092_v32 = vld [vmem:[#allocation156_spill] sm:$0xff]  ;;  %v12115_v28 = vld [vmem:[#allocation41_spill] sm:$0xff]  ;;  %v12116_v30 = vld [vmem:[#allocation42_spill] sm:$0xff] }
 0x14d   :  { %804 = vmatprep.subr.mxu0 %v5553_v33  ;;  %875 = vmatprep.subr.mxu1 %v5558_v34 }
 0x14e   :  { %805 = vmatpush1.msra.mxu0 %v5565_v35  ;;  %876 = vmatpush1.msra.mxu1 %v5570_v36  ;;  %12090 = vst [vmem:[#allocation3_spill] sm:$0xff] %v6662_v29  ;;  %v231_v33 = vadd.f32 %v12092_v32, %v6662_v29  ;;  %v12093_v35 = vld [vmem:[#allocation158_spill] sm:$0xff]  ;;  %v12117_v32 = vld [vmem:[#allocation43_spill] sm:$0xff] }
 0x14f   :  { %806 = vmatprep.subr.mxu0 %v5577_v37  ;;  %877 = vmatprep.subr.mxu1 %v5582_v38  ;;  %v233_v36 = vadd.f32 %v12093_v35, %v6665_v31  ;;  %v12120_v35 = vld [vmem:[#allocation46_spill] sm:$0xff] }
 0x150   :  { %807 = vmatpush1.msra.mxu0 %v5589_v39  ;;  %878 = vmatpush1.msra.mxu1 %v5594_v40 }
 0x151   :  { %808 = vmatprep.subr.mxu0 %v5601_v41  ;;  %879 = vmatprep.subr.mxu1 %v5606_v42 }
 0x152   :  { %809 = vmatpush1.msra.mxu0 %v5613_v43  ;;  %880 = vmatpush1.msra.mxu1 %v5618_v44  ;;  %v12094_v43 = vld [vmem:[#allocation159_spill] sm:$0xff] }
 0x153   :  { %810 = vmatprep.subr.mxu0 %v5625_v45  ;;  %881 = vmatprep.subr.mxu1 %v12066_v2  ;;  %v6672_v44 = vrot.slane %v78_v27, %v12094_v43  ;;  %v12095_v45 = vld [vmem:[#allocation163_spill] sm:$0xff]  ;;  %v12128_v43 = vld [vmem:[#allocation54_spill] sm:$0xff] }
 0x154   :  { %811 = vmatpush1.msra.mxu0 %v12067_v4  ;;  %882 = vmatpush1.msra.mxu1 %v12068_v5  ;;  %v6675_v46 = vrot.slane %v78_v27, %v12095_v45  ;;  %v12114_v27 = vld [vmem:[#allocation40_spill] sm:$0xff]  ;;  %v12129_v45 = vld [vmem:[#allocation55_spill] sm:$0xff] }
 0x155   :  { %812 = vmatprep.subr.mxu0 %v12069_v6  ;;  %883 = vmatprep.subr.mxu1 %v12070_v7  ;;  %v304_v61 = vadd.f32 %v12096_v52, %v6672_v44  ;;  %v12131_v52 = vld [vmem:[#allocation57_spill] sm:$0xff] }
 0x156   :  { %813 = vmatpush1.msra.mxu0 %v12071_v8  ;;  %884 = vmatpush1.msra.mxu1 %v12072_v9  ;;  %v302_v58 = vadd.f32 %v12097_v48, %v6675_v46  ;;  %v12134_v48 = vld [vmem:[#allocation60_spill] sm:$0xff] }
 0x157   :  { %814 = vmatprep.subr.mxu0 %v12073_v10  ;;  %885 = vmatprep.subr.mxu1 %v12074_v11  ;;  %v12098_v10 = vld [vmem:[#allocation24_spill] sm:$0xff]  ;;  %v12099_v11 = vld [vmem:[#allocation25_spill] sm:$0xff] }
 0x158   :  { %815 = vmatpush1.msra.mxu0 %v12075_v12  ;;  %886 = vmatpush1.msra.mxu1 %v12076_v13  ;;  %v12100_v12 = vld [vmem:[#allocation26_spill] sm:$0xff]  ;;  %v12101_v13 = vld [vmem:[#allocation27_spill] sm:$0xff] }
 0x159   :  { %816 = vmatprep.subr.mxu0 %v12077_v14  ;;  %887 = vmatprep.subr.mxu1 %v12078_v15  ;;  %v12102_v14 = vld [vmem:[#allocation28_spill] sm:$0xff]  ;;  %v12103_v15 = vld [vmem:[#allocation29_spill] sm:$0xff] }
 0x15a   :  { %817 = vmatpush1.msra.mxu0 %v12079_v16  ;;  %888 = vmatpush1.msra.mxu1 %v12080_v17  ;;  %v12104_v16 = vld [vmem:[#allocation30_spill] sm:$0xff]  ;;  %v12105_v17 = vld [vmem:[#allocation31_spill] sm:$0xff] }
 0x15b   :  { %818 = vmatprep.subr.mxu0 %v12081_v18  ;;  %889 = vmatprep.subr.mxu1 %v12082_v19  ;;  %v12106_v18 = vld [vmem:[#allocation32_spill] sm:$0xff]  ;;  %v12107_v19 = vld [vmem:[#allocation33_spill] sm:$0xff] }
 0x15c   :  { %819 = vmatpush1.msra.mxu0 %v12083_v20  ;;  %890 = vmatpush1.msra.mxu1 %v12084_v21  ;;  %v12108_v20 = vld [vmem:[#allocation34_spill] sm:$0xff]  ;;  %v12109_v21 = vld [vmem:[#allocation35_spill] sm:$0xff] }
 0x15d   :  { %852 = vmatprep.mubr.f32.mxu0 %v12085_v22  ;;  %923 = vmatprep.mubr.f32.mxu1 %v12085_v22 }
 0x15e   :  { %942 = vmatprep.subr.mxu0 %v12086_v23  ;;  %1013 = vmatprep.subr.mxu1 %v12087_v24  ;;  %v12110_v23 = vld [vmem:[#allocation36_spill] sm:$0xff]  ;;  %v12111_v24 = vld [vmem:[#allocation37_spill] sm:$0xff] }
 0x15f   :  { %4457 = vset.pattern.permute.xlu0 %v5302_v25  ;;  %v12112_v25 = vld [vmem:[#allocation38_spill] sm:$0xff] }
 0x160   :  { %931 = vperm.xlu0 %4457, %v12088_v26   ;;  %v12113_v26 = vld [vmem:[#allocation39_spill] sm:$0xff] }
 0x1fd   :  { %v684_v34 = vpop.f32.mrf.mxu0  ;;  %v755_v41 = vpop.f32.mrf.mxu1 }
 0x1fe   :  { %v760_v37 = vadd.f32 %v684_v34, %v231_v33  ;;  %v762_v62 = vadd.f32 %v755_v41, %v302_v58  ;;  %v12118_v33 = vld [vmem:[#allocation44_spill] sm:$0xff]  ;;  %v12119_v34 = vld [vmem:[#allocation45_spill] sm:$0xff] }
 0x1ff   :  { %v686_v38 = vpop.f32.mrf.mxu0  ;;  %v757_v51 = vpop.f32.mrf.mxu1  ;;  %v12126_v41 = vld [vmem:[#allocation52_spill] sm:$0xff]  ;;  %v12135_v58 = vld [vmem:[#allocation61_spill] sm:$0xff] }
 0x200   :  { %v4348_v39 = vmul.f32 -1.442695, %v760_v37  ;;  %v761_v40 = vadd.f32 %v686_v38, %v233_v36  ;;  %v763_v57 = vadd.f32 %v757_v51, %v304_v61  ;;  %v12121_v36 = vld [vmem:[#allocation47_spill] sm:$0xff]  ;;  %v12122_v37 = vld [vmem:[#allocation48_spill] sm:$0xff]  ;;  %v12123_v38 = vld [vmem:[#allocation49_spill] sm:$0xff] }
 0x201   :  { %v12130_v51 = vld [vmem:[#allocation56_spill] sm:$0xff]  ;;  %v12132_v61 = vld [vmem:[#allocation58_spill] sm:$0xff] }
 0x202   :  { %4481 = vpow2.f32 %v4348_v39  ;;  %v4349_v42 = vmul.f32 -1.442695, %v761_v40  ;;  %v4350_v47 = vmul.f32 -1.442695, %v763_v57  ;;  %v12124_v39 = vld [vmem:[#allocation50_spill] sm:$0xff]  ;;  %v12125_v40 = vld [vmem:[#allocation51_spill] sm:$0xff] }
 0x203   :  { %v12133_v57 = vld [vmem:[#allocation59_spill] sm:$0xff] }
 0x204   :  { %4483 = vpow2.f32 %v4349_v42  ;;  %v12127_v42 = vld [vmem:[#allocation53_spill] sm:$0xff] }
 0x205   :  { %4485 = vtanh.f32 %v762_v62  ;;  %v12136_v62 = vld [vmem:[#allocation62_spill] sm:$0xff] }
 0x206   :  { %4487 = vpow2.f32 %v4350_v47  ;;  %v12137_v47 = vld [vmem:[#allocation63_spill] sm:$0xff] }
 0x20f   :  { %v4482_v1 = vpop.eup %4481 }
 0x210   :  { %v767_v60 = vadd.f32 1.0, %v4482_v1  ;;  %v12138_v1 = vld [vmem:[#allocation64_spill] sm:$0xff] }
 0x211   :  { %v4484_v3 = vpop.eup %4483 }
 0x212   :  { %4489 = vrcp.f32 %v767_v60  ;;  %v773_v54 = vadd.f32 1.0, %v4484_v3  ;;  %v4486_v0 = vpop.eup %4485  ;;  %v12139_v60 = vld [vmem:[#allocation65_spill] sm:$0xff]  ;;  %v12140_v3 = vld [vmem:[#allocation66_spill] sm:$0xff] }
 0x213   :  { %v4488_v59 = vpop.eup %4487 }
 0x214   :  { %4491 = vrcp.f32 %v773_v54  ;;  %v780_v4 = vadd.f32 1.0, %v4488_v59  ;;  %v12141_v54 = vld [vmem:[#allocation67_spill] sm:$0xff]  ;;  %v12143_v59 = vld [vmem:[#allocation69_spill] sm:$0xff] }
 0x216   :  { %4493 = vrcp.f32 %v780_v4  ;;  %v12147_v4 = vld [vmem:[#allocation73_spill] sm:$0xff] }
 0x21f   :  { %v4490_v50 = vpop.eup %4489 }
 0x220   :  { %v784_v63 = vmul.f32 %v4490_v50, %v4486_v0  ;;  %v12142_v0 = vld [vmem:[#allocation68_spill] sm:$0xff]  ;;  %v12144_v50 = vld [vmem:[#allocation70_spill] sm:$0xff] }
 0x221   :  { %v4492_v2 = vpop.eup %4491 }
 0x222   :  { %v783_v5 = vmul.f32 0.0, %v4492_v2  ;;  %v12146_v2 = vld [vmem:[#allocation72_spill] sm:$0xff] }
 0x223   :  { %v4494_v7 = vpop.eup %4493 }
 0x224   :  { %v6681_v6 = vadd.f32 %v784_v63, %v783_v5  ;;  %v12145_v63 = vld [vmem:[#allocation71_spill] sm:$0xff]  ;;  %v12148_v5 = vld [vmem:[#allocation74_spill] sm:$0xff] }
 0x226   :  { %4495 = vtanh.f32 %v6681_v6 }
 0x233   :  { %v4496_v8 = vpop.eup %4495 }
 0x234   :  { %v787_v9 = vmul.f32 %v4496_v8, %v4494_v7  ;;  %v12149_v7 = vld [vmem:[#allocation75_spill] sm:$0xff]  ;;  %v12150_v8 = vld [vmem:[#allocation76_spill] sm:$0xff] }
 0x236   :  { %853 = vmatmul.mubr.f32.vlgmr.msra.gmra.mxu0 %v787_v9  ;;  %924 = vmatmul.mubr.f32.vlgmr.msra.gmra.mxu1 %v787_v9  ;;  %v12151_v9 = vld [vmem:[#allocation77_spill] sm:$0xff] }
 0x237   :  { %943 = vmatpush1.msra.mxu0 %v12098_v10  ;;  %1014 = vmatpush1.msra.mxu1 %v12099_v11  ;;  %v12152_v10 = vld [vmem:[#allocation78_spill] sm:$0xff]  ;;  %v12153_v11 = vld [vmem:[#allocation79_spill] sm:$0xff] }
 0x238   :  { %944 = vmatprep.subr.mxu0 %v12100_v12  ;;  %1015 = vmatprep.subr.mxu1 %v12101_v13  ;;  %v12154_v12 = vld [vmem:[#allocation80_spill] sm:$0xff]  ;;  %v12155_v13 = vld [vmem:[#allocation81_spill] sm:$0xff] }
 0x239   :  { %945 = vmatpush1.msra.mxu0 %v12102_v14  ;;  %1016 = vmatpush1.msra.mxu1 %v12103_v15  ;;  %v12156_v14 = vld [vmem:[#allocation82_spill] sm:$0xff]  ;;  %v12157_v15 = vld [vmem:[#allocation83_spill] sm:$0xff] }
 0x23a   :  { %946 = vmatprep.subr.mxu0 %v12104_v16  ;;  %1017 = vmatprep.subr.mxu1 %v12105_v17  ;;  %v12158_v16 = vld [vmem:[#allocation84_spill] sm:$0xff]  ;;  %v12159_v17 = vld [vmem:[#allocation85_spill] sm:$0xff] }
 0x23b   :  { %947 = vmatpush1.msra.mxu0 %v12106_v18  ;;  %1018 = vmatpush1.msra.mxu1 %v12107_v19  ;;  %v12160_v18 = vld [vmem:[#allocation87_spill] sm:$0xff]  ;;  %v12161_v19 = vld [vmem:[#allocation88_spill] sm:$0xff] }
 0x23c   :  { %948 = vmatprep.subr.mxu0 %v12108_v20  ;;  %1019 = vmatprep.subr.mxu1 %v12109_v21  ;;  %v12162_v20 = vld [vmem:[#allocation89_spill] sm:$0xff]  ;;  %v12163_v21 = vld [vmem:[#allocation90_spill] sm:$0xff] }
 0x23d   :  { %949 = vmatpush1.msra.mxu0 %v12110_v23  ;;  %1020 = vmatpush1.msra.mxu1 %v12111_v24  ;;  %v12164_v23 = vld [vmem:[#allocation91_spill] sm:$0xff]  ;;  %v12165_v24 = vld [vmem:[#allocation92_spill] sm:$0xff] }
 0x23e   :  { %950 = vmatprep.subr.mxu0 %v12112_v25  ;;  %1021 = vmatprep.subr.mxu1 %v12113_v26  ;;  %v12166_v25 = vld [vmem:[#allocation93_spill] sm:$0xff]  ;;  %v12167_v26 = vld [vmem:[#allocation94_spill] sm:$0xff] }
 0x23f   :  { %951 = vmatpush1.msra.mxu0 %v12114_v27  ;;  %1022 = vmatpush1.msra.mxu1 %v12115_v28  ;;  %v12168_v27 = vld [vmem:[#allocation95_spill] sm:$0xff]  ;;  %v12169_v28 = vld [vmem:[#allocation96_spill] sm:$0xff] }
 0x240   :  { %952 = vmatprep.subr.mxu0 %v12116_v30  ;;  %1023 = vmatprep.subr.mxu1 %v12117_v32  ;;  %v12171_v30 = vld [vmem:[#allocation98_spill] sm:$0xff]  ;;  %v12172_v32 = vld [vmem:[#allocation99_spill] sm:$0xff] }
 0x241   :  { %953 = vmatpush1.msra.mxu0 %v12118_v33  ;;  %1024 = vmatpush1.msra.mxu1 %v12119_v34  ;;  %v12173_v33 = vld [vmem:[#allocation100_spill] sm:$0xff]  ;;  %v12174_v34 = vld [vmem:[#allocation101_spill] sm:$0xff] }
 0x242   :  { %954 = vmatprep.subr.mxu0 %v12120_v35  ;;  %1025 = vmatprep.subr.mxu1 %v12121_v36  ;;  %v12175_v35 = vld [vmem:[#allocation102_spill] sm:$0xff]  ;;  %v12176_v36 = vld [vmem:[#allocation103_spill] sm:$0xff] }
 0x243   :  { %955 = vmatpush1.msra.mxu0 %v12122_v37  ;;  %1026 = vmatpush1.msra.mxu1 %v12123_v38  ;;  %v12177_v37 = vld [vmem:[#allocation104_spill] sm:$0xff]  ;;  %v12178_v38 = vld [vmem:[#allocation105_spill] sm:$0xff] }
 0x244   :  { %956 = vmatprep.subr.mxu0 %v12124_v39  ;;  %1027 = vmatprep.subr.mxu1 %v12125_v40  ;;  %v12179_v39 = vld [vmem:[#allocation106_spill] sm:$0xff]  ;;  %v12180_v40 = vld [vmem:[#allocation107_spill] sm:$0xff] }
 0x245   :  { %957 = vmatpush1.msra.mxu0 %v12126_v41  ;;  %1028 = vmatpush1.msra.mxu1 %v12127_v42  ;;  %v12181_v41 = vld [vmem:[#allocation108_spill] sm:$0xff]  ;;  %v12182_v42 = vld [vmem:[#allocation109_spill] sm:$0xff] }
 0x246   :  { %958 = vmatprep.subr.mxu0 %v12128_v43  ;;  %1029 = vmatprep.subr.mxu1 %v12129_v45  ;;  %v12183_v43 = vld [vmem:[#allocation110_spill] sm:$0xff]  ;;  %v12184_v45 = vld [vmem:[#allocation111_spill] sm:$0xff] }
 0x247   :  { %959 = vmatpush1.msra.mxu0 %v12130_v51  ;;  %1030 = vmatpush1.msra.mxu1 %v12131_v52  ;;  %v12185_v51 = vld [vmem:[#allocation112_spill] sm:$0xff]  ;;  %v12186_v52 = vld [vmem:[#allocation113_spill] sm:$0xff] }
 0x248   :  { %960 = vmatprep.subr.mxu0 %v12132_v61  ;;  %1031 = vmatprep.subr.mxu1 %v12133_v57  ;;  %v12187_v61 = vld [vmem:[#allocation114_spill] sm:$0xff]  ;;  %v12188_v57 = vld [vmem:[#allocation115_spill] sm:$0xff] }
 0x249   :  { %961 = vmatpush1.msra.mxu0 %v12134_v48  ;;  %1032 = vmatpush1.msra.mxu1 %v12135_v58  ;;  %v12189_v48 = vld [vmem:[#allocation116_spill] sm:$0xff]  ;;  %v12190_v58 = vld [vmem:[#allocation117_spill] sm:$0xff] }
 0x24a   :  { %962 = vmatprep.subr.mxu0 %v12136_v62  ;;  %1033 = vmatprep.subr.mxu1 %v12137_v47  ;;  %v12191_v62 = vld [vmem:[#allocation118_spill] sm:$0xff]  ;;  %v12192_v47 = vld [vmem:[#allocation119_spill] sm:$0xff] }
 0x24b   :  { %963 = vmatpush1.msra.mxu0 %v12138_v1  ;;  %1034 = vmatpush1.msra.mxu1 %v12139_v60  ;;  %v12193_v1 = vld [vmem:[#allocation120_spill] sm:$0xff]  ;;  %v12194_v60 = vld [vmem:[#allocation121_spill] sm:$0xff] }
 0x24c   :  { %964 = vmatprep.subr.mxu0 %v12140_v3  ;;  %1035 = vmatprep.subr.mxu1 %v12141_v54  ;;  %v12195_v3 = vld [vmem:[#allocation122_spill] sm:$0xff]  ;;  %v12196_v54 = vld [vmem:[#allocation123_spill] sm:$0xff] }
 0x24d   :  { %965 = vmatpush1.msra.mxu0 %v12142_v0  ;;  %1036 = vmatpush1.msra.mxu1 %v12143_v59  ;;  %v12197_v0 = vld [vmem:[#allocation124_spill] sm:$0xff]  ;;  %v12198_v59 = vld [vmem:[#allocation125_spill] sm:$0xff] }
 0x24e   :  { %966 = vmatprep.subr.mxu0 %v12144_v50  ;;  %1037 = vmatprep.subr.mxu1 %v12145_v63  ;;  %v12199_v50 = vld [vmem:[#allocation126_spill] sm:$0xff]  ;;  %v12200_v63 = vld [vmem:[#allocation127_spill] sm:$0xff] }
 0x24f   :  { %967 = vmatpush1.msra.mxu0 %v12146_v2  ;;  %1038 = vmatpush1.msra.mxu1 %v12147_v4  ;;  %v12201_v2 = vld [vmem:[#allocation128_spill] sm:$0xff]  ;;  %v12202_v4 = vld [vmem:[#allocation129_spill] sm:$0xff] }
 0x250   :  { %968 = vmatprep.subr.mxu0 %v12148_v5  ;;  %1039 = vmatprep.subr.mxu1 %v12149_v7  ;;  %v12203_v5 = vld [vmem:[#allocation130_spill] sm:$0xff]  ;;  %v12204_v7 = vld [vmem:[#allocation131_spill] sm:$0xff] }
 0x251   :  { %969 = vmatpush1.msra.mxu0 %v12150_v8  ;;  %1040 = vmatpush1.msra.mxu1 %v12151_v9  ;;  %v12205_v8 = vld [vmem:[#allocation132_spill] sm:$0xff]  ;;  %v12206_v9 = vld [vmem:[#allocation133_spill] sm:$0xff] }
 0x252   :  { %970 = vmatprep.subr.mxu0 %v12152_v10  ;;  %1041 = vmatprep.subr.mxu1 %v12153_v11  ;;  %v12207_v10 = vld [vmem:[#allocation134_spill] sm:$0xff]  ;;  %v12208_v11 = vld [vmem:[#allocation135_spill] sm:$0xff] }
 0x253   :  { %971 = vmatpush1.msra.mxu0 %v12154_v12  ;;  %1042 = vmatpush1.msra.mxu1 %v12155_v13  ;;  %v12209_v12 = vld [vmem:[#allocation136_spill] sm:$0xff]  ;;  %v12210_v13 = vld [vmem:[#allocation137_spill] sm:$0xff] }
 0x254   :  { %972 = vmatprep.subr.mxu0 %v12156_v14  ;;  %1043 = vmatprep.subr.mxu1 %v12157_v15  ;;  %v12211_v14 = vld [vmem:[#allocation138_spill] sm:$0xff]  ;;  %v12212_v15 = vld [vmem:[#allocation139_spill] sm:$0xff] }
 0x255   :  { %973 = vmatpush1.msra.mxu0 %v12158_v16  ;;  %1006 = vmatprep.mubr.f32.mxu0 %v12085_v22  ;;  %v12213_v16 = vld [vmem:[#allocation140_spill] sm:$0xff] }
 0x256   :  { %1044 = vmatpush1.msra.mxu1 %v12159_v17  ;;  %1077 = vmatprep.mubr.f32.mxu1 %v12085_v22  ;;  %v12214_v17 = vld [vmem:[#allocation141_spill] sm:$0xff] }
 0x257   :  { %1007 = vmatmul.mubr.f32.vlgmr.msra.gmra.mxu0 %v6587_v53  ;;  %1078 = vmatmul.mubr.f32.vlgmr.msra.gmra.mxu1 %v6587_v53  ;;  %v12170_v53 = vld [vmem:[#allocation97_spill] sm:$0xff] }
 0x258   :  { %1112 = vmatprep.subr.mxu0 %v12160_v18  ;;  %1183 = vmatprep.subr.mxu1 %v12161_v19  ;;  %v12215_v18 = vld [vmem:[#allocation142_spill] sm:$0xff]  ;;  %v12216_v19 = vld [vmem:[#allocation143_spill] sm:$0xff] }
 0x259   :  { %1113 = vmatpush1.msra.mxu0 %v12162_v20  ;;  %1184 = vmatpush1.msra.mxu1 %v12163_v21  ;;  %v12217_v20 = vld [vmem:[#allocation144_spill] sm:$0xff]  ;;  %v12218_v21 = vld [vmem:[#allocation145_spill] sm:$0xff] }
 0x25a   :  { %1114 = vmatprep.subr.mxu0 %v12164_v23  ;;  %1185 = vmatprep.subr.mxu1 %v12165_v24  ;;  %v12219_v23 = vld [vmem:[#allocation146_spill] sm:$0xff]  ;;  %v12220_v24 = vld [vmem:[#allocation147_spill] sm:$0xff] }
 0x25b   :  { %1115 = vmatpush1.msra.mxu0 %v12166_v25  ;;  %1186 = vmatpush1.msra.mxu1 %v12167_v26  ;;  %v12221_v25 = vld [vmem:[#allocation148_spill] sm:$0xff]  ;;  %v12222_v26 = vld [vmem:[#allocation149_spill] sm:$0xff] }
 0x25c   :  { %1116 = vmatprep.subr.mxu0 %v12168_v27  ;;  %1187 = vmatprep.subr.mxu1 %v12169_v28  ;;  %v12223_v27 = vld [vmem:[#allocation150_spill] sm:$0xff]  ;;  %v6819_v28 = vld [vmem:[%s11230_s5 + $0x1e8] sm:$0xff] }
 0x25d   :  { %1117 = vmatpush1.msra.mxu0 %v12170_v53  ;;  %1188 = vmatpush1.msra.mxu1 %v12171_v30  ;;  %v6825_v53 = vld [vmem:[%s11230_s5 + $0x1f8] sm:$0xff]  ;;  %v932_v30 = vpop.permute.xlu0 %931 }
 0x25e   :  { %1118 = vmatprep.subr.mxu0 %v12172_v32  ;;  %1189 = vmatprep.subr.mxu1 %v12173_v33  ;;  %v12224_v32 = vld [vmem:[#allocation153_spill] sm:$0xff] }
 0x25f   :  { %1119 = vmatpush1.msra.mxu0 %v12174_v34  ;;  %1190 = vmatpush1.msra.mxu1 %v12175_v35  ;;  %v934_v33 = vmul.f32 %v932_v30, %v12224_v32  ;;  %v12225_v35 = vld [vmem:[#allocation154_spill] sm:$0xff] }
 0x260   :  { %1120 = vmatprep.subr.mxu0 %v12176_v36  ;;  %1191 = vmatprep.subr.mxu1 %v12177_v37  ;;  %v935_v36 = vmul.f32 %v932_v30, %v12225_v35  ;;  %v12226_v37 = vld [vmem:[#allocation155_spill] sm:$0xff] }
 0x261   :  { %1121 = vmatpush1.msra.mxu0 %v12178_v38  ;;  %1192 = vmatpush1.msra.mxu1 %v12179_v39  ;;  %v938_v38 = vadd.f32 %v934_v33, %v12226_v37  ;;  %v6915_v33 = vld [vmem:[%s11230_s5 + $0x188] sm:$0xff] }
 0x262   :  { %1122 = vmatprep.subr.mxu0 %v12180_v40  ;;  %1193 = vmatprep.subr.mxu1 %v12181_v41  ;;  %v12227_v41 = vld [vmem:[#allocation157_spill] sm:$0xff] }
 0x263   :  { %1123 = vmatpush1.msra.mxu0 %v12182_v42  ;;  %1194 = vmatpush1.msra.mxu1 %v12183_v43  ;;  %v939_v42 = vadd.f32 %v935_v36, %v12227_v41  ;;  %v6921_v36 = vld [vmem:[%s11230_s5 + $0x198] sm:$0xff] }
 0x264   :  { %1124 = vmatprep.subr.mxu0 %v12184_v45  ;;  %1195 = vmatprep.subr.mxu1 %v12185_v51 }
 0x265   :  { %1125 = vmatpush1.msra.mxu0 %v12186_v52  ;;  %1196 = vmatpush1.msra.mxu1 %v12187_v61 }
 0x266   :  { %1126 = vmatprep.subr.mxu0 %v12188_v57  ;;  %1197 = vmatprep.subr.mxu1 %v12189_v48  ;;  %v12228_v48 = vld [vmem:[#allocation161_spill] sm:$0xff] }
 0x267   :  { %1127 = vmatpush1.msra.mxu0 %v12190_v58  ;;  %1198 = vmatpush1.msra.mxu1 %v12191_v62  ;;  %v937_v58 = vmul.f32 %v932_v30, %v12228_v48 }
 0x268   :  { %1128 = vmatprep.subr.mxu0 %v12192_v47  ;;  %1199 = vmatprep.subr.mxu1 %v12193_v1  ;;  %v12229_v1 = vld [vmem:[#allocation164_spill] sm:$0xff] }
 0x269   :  { %1129 = vmatpush1.msra.mxu0 %v12194_v60  ;;  %1200 = vmatpush1.msra.mxu1 %v12195_v3  ;;  %v941_v60 = vadd.f32 %v937_v58, %v12229_v1  ;;  %v6969_v58 = vld [vmem:[%s11230_s5 + $0x158] sm:$0xff] }
 0x26a   :  { %1130 = vmatprep.subr.mxu0 %v12196_v54  ;;  %1201 = vmatprep.subr.mxu1 %v12197_v0  ;;  %v936_v54 = vmul.f32 %v932_v30, %v6576_v55  ;;  %v6909_v30 = vld [vmem:[%s11230_s5 + $0x1b0] sm:$0xff] }
 0x26b   :  { %1131 = vmatpush1.msra.mxu0 %v12198_v59  ;;  %1202 = vmatpush1.msra.mxu1 %v12199_v50 }
 0x26c   :  { %1132 = vmatprep.subr.mxu0 %v12200_v63  ;;  %1203 = vmatprep.subr.mxu1 %v12201_v2  ;;  %v940_v59 = vadd.f32 %v936_v54, %v6580_v56  ;;  %v6999_v54 = vld [vmem:[%s11230_s5 + $0x120] sm:$0xff] }
 0x26d   :  { %1133 = vmatpush1.msra.mxu0 %v12202_v4  ;;  %1204 = vmatpush1.msra.mxu1 %v12203_v5 }
 0x26e   :  { %1134 = vmatprep.subr.mxu0 %v12204_v7  ;;  %1205 = vmatprep.subr.mxu1 %v12205_v8 }
 0x26f   :  { %1135 = vmatpush1.msra.mxu0 %v12206_v9  ;;  %1206 = vmatpush1.msra.mxu1 %v12207_v10 }
 0x270   :  { %1136 = vmatprep.subr.mxu0 %v12208_v11  ;;  %1207 = vmatprep.subr.mxu1 %v12209_v12 }
 0x271   :  { %1137 = vmatpush1.msra.mxu0 %v12210_v13  ;;  %1208 = vmatpush1.msra.mxu1 %v12211_v14 }
 0x272   :  { %1138 = vmatprep.subr.mxu0 %v12212_v15  ;;  %1209 = vmatprep.subr.mxu1 %v12213_v16 }
 0x273   :  { %1139 = vmatpush1.msra.mxu0 %v12214_v17  ;;  %1210 = vmatpush1.msra.mxu1 %v12215_v18 }
 0x274   :  { %1140 = vmatprep.subr.mxu0 %v12216_v19  ;;  %1211 = vmatprep.subr.mxu1 %v12217_v20  ;;  %v6855_v19 = vld [vmem:[%s11230_s5 + $0x1e0] sm:$0xff]  ;;  %v6867_v20 = vld [vmem:[%s11230_s5 + $0x1c8] sm:$0xff] }
 0x275   :  { %1141 = vmatpush1.msra.mxu0 %v12218_v21  ;;  %1212 = vmatpush1.msra.mxu1 %v12219_v23  ;;  %v6873_v21 = vld [vmem:[%s11230_s5 + $0x1d8] sm:$0xff]  ;;  %v6879_v23 = vld [vmem:[%s11230_s5 + $0x1c0] sm:$0xff] }
 0x276   :  { %1142 = vmatprep.subr.mxu0 %v12220_v24  ;;  %1213 = vmatprep.subr.mxu1 %v12221_v25  ;;  %v6885_v24 = vld [vmem:[%s11230_s5 + $0x1d0] sm:$0xff]  ;;  %v6891_v25 = vld [vmem:[%s11230_s5 + $0x1a8] sm:$0xff] }
 0x277   :  { %1143 = vmatpush1.msra.mxu0 %v12222_v26  ;;  %1176 = vmatprep.mubr.f32.mxu0 %v12085_v22  ;;  %v6897_v26 = vld [vmem:[%s11230_s5 + $0x1b8] sm:$0xff] }
 0x278   :  { %1214 = vmatpush1.msra.mxu1 %v12223_v27  ;;  %1247 = vmatprep.mubr.f32.mxu1 %v12085_v22  ;;  %v6903_v27 = vld [vmem:[%s11230_s5 + $0x1a0] sm:$0xff] }
 0x279   :  { %1282 = vmatprep.subr.mxu0 %v6819_v28  ;;  %1353 = vmatprep.subr.mxu1 %v6825_v53 }
 0x2f6   :  { %v6829_v34 = vpop.f32.mrf.mxu0  ;;  %v6835_v40 = vpop.f32.mrf.mxu1 }
 0x2f8   :  { %v6833_v39 = vpop.f32.mrf.mxu0  ;;  %v6838_v52 = vpop.f32.mrf.mxu1 }
 0x317   :  { %v1008_v43 = vpop.f32.mrf.mxu0  ;;  %v1079_v62 = vpop.f32.mrf.mxu1 }
 0x318   :  { %v1084_v45 = vadd.f32 %v1008_v43, %v938_v38  ;;  %v1086_v2 = vadd.f32 %v1079_v62, %v940_v59  ;;  %v6927_v38 = vld [vmem:[%s11230_s5 + $0x180] sm:$0xff]  ;;  %v6939_v43 = vld [vmem:[%s11230_s5 + $0x168] sm:$0xff] }
 0x319   :  { %v1010_v51 = vpop.f32.mrf.mxu0  ;;  %v1081_v3 = vpop.f32.mrf.mxu1  ;;  %v6975_v62 = vld [vmem:[%s11230_s5 + $0x140] sm:$0xff]  ;;  %v7011_v59 = vld [vmem:[%s11230_s5 + $0x108] sm:$0xff] }
 0x31a   :  { %v4351_v61 = vmul.f32 -1.442695, %v1084_v45  ;;  %v1085_v57 = vadd.f32 %v1010_v51, %v939_v42  ;;  %v1087_v0 = vadd.f32 %v1081_v3, %v941_v60  ;;  %v6933_v42 = vld [vmem:[%s11230_s5 + $0x190] sm:$0xff]  ;;  %v6945_v45 = vld [vmem:[%s11230_s5 + $0x178] sm:$0xff]  ;;  %v6951_v51 = vld [vmem:[%s11230_s5 + $0x160] sm:$0xff] }
 0x31b   :  { %v6987_v60 = vld [vmem:[%s11230_s5 + $0x128] sm:$0xff]  ;;  %v6993_v3 = vld [vmem:[%s11230_s5 + $0x138] sm:$0xff] }
 0x31c   :  { %4497 = vpow2.f32 %v4351_v61  ;;  %v4352_v47 = vmul.f32 -1.442695, %v1085_v57  ;;  %v4353_v50 = vmul.f32 -1.442695, %v1087_v0  ;;  %v6957_v61 = vld [vmem:[%s11230_s5 + $0x170] sm:$0xff]  ;;  %v6963_v57 = vld [vmem:[%s11230_s5 + $0x148] sm:$0xff] }
 0x31d   :  { %v7005_v0 = vld [vmem:[%s11230_s5 + $0x130] sm:$0xff] }
 0x31e   :  { %4499 = vpow2.f32 %v4352_v47  ;;  %v6981_v47 = vld [vmem:[%s11230_s5 + $0x150] sm:$0xff] }
 0x31f   :  { %4501 = vpow2.f32 %v4353_v50  ;;  %v7017_v50 = vld [vmem:[%s11230_s5 + $0x118] sm:$0xff] }
 0x329   :  { %v4498_v63 = vpop.eup %4497 }
 0x32a   :  { %v1091_v4 = vadd.f32 1.0, %v4498_v63  ;;  %v7023_v63 = vld [vmem:[%s11230_s5 + $0x100] sm:$0xff] }
 0x32b   :  { %v4500_v5 = vpop.eup %4499  ;;  %12230 = vst [vmem:[#allocation4_spill] sm:$0xff] %v7023_v63 }
 0x32c   :  { %4503 = vrcp.f32 %v1091_v4  ;;  %v1097_v7 = vadd.f32 1.0, %v4500_v5  ;;  %v4502_v8 = vpop.eup %4501  ;;  %v7035_v4 = vld [vmem:[%s11230_s5 + $0xe8] sm:$0xff]  ;;  %v7041_v5 = vld [vmem:[%s11230_s5 + $0xf8] sm:$0xff] }
 0x32d   :  { %4505 = vtanh.f32 %v1086_v2  ;;  %v1104_v12 = vadd.f32 1.0, %v4502_v8  ;;  %v7029_v2 = vld [vmem:[%s11230_s5 + $0x110] sm:$0xff]  ;;  %12232 = vst [vmem:[#allocation6_spill] sm:$0xff] %v7035_v4  ;;  %12233 = vst [vmem:[#allocation7_spill] sm:$0xff] %v7041_v5 }
 0x32e   :  { %4507 = vrcp.f32 %v1097_v7  ;;  %12231 = vst [vmem:[#allocation5_spill] sm:$0xff] %v7029_v2  ;;  %v7047_v7 = vld [vmem:[%s11230_s5 + $0xe0] sm:$0xff]  ;;  %v7053_v8 = vld [vmem:[%s11230_s5 + $0xf0] sm:$0xff] }
 0x32f   :  { %4509 = vrcp.f32 %v1104_v12  ;;  %12234 = vst [vmem:[#allocation8_spill] sm:$0xff] %v7047_v7  ;;  %12235 = vst [vmem:[#allocation9_spill] sm:$0xff] %v7053_v8  ;;  %v7077_v12 = vld [vmem:[%s11230_s5 + $0xd0] sm:$0xff] }
 0x330   :  { %12239 = vst [vmem:[#allocation13_spill] sm:$0xff] %v7077_v12 }
 0x339   :  { %v4504_v9 = vpop.eup %4503 }
 0x33a   :  { %v4506_v10 = vpop.eup %4505 }
 0x33b   :  { %v4508_v11 = vpop.eup %4507  ;;  %v1108_v13 = vmul.f32 %v4506_v10, %v4504_v9  ;;  %v7059_v9 = vld [vmem:[%s11230_s5 + $0xc8] sm:$0xff]  ;;  %v7065_v10 = vld [vmem:[%s11230_s5 + $0xd8] sm:$0xff] }
 0x33c   :  { %v1107_v14 = vmul.f32 %v4508_v11, %v6584_v49  ;;  %v4510_v16 = vpop.eup %4509  ;;  %v6861_v49 = vld [vmem:[%s11230_s5 + $0x1f0] sm:$0xff]  ;;  %12236 = vst [vmem:[#allocation10_spill] sm:$0xff] %v7059_v9  ;;  %12237 = vst [vmem:[#allocation11_spill] sm:$0xff] %v7065_v10  ;;  %v7071_v11 = vld [vmem:[%s11230_s5 + $0xc0] sm:$0xff] }
 0x33d   :  { %12238 = vst [vmem:[#allocation12_spill] sm:$0xff] %v7071_v11 }
 0x33e   :  { %v6845_v15 = vadd.f32 %v1108_v13, %v1107_v14  ;;  %v7083_v13 = vld [vmem:[%s11230_s5 + $0xa8] sm:$0xff]  ;;  %v7089_v14 = vld [vmem:[%s11230_s5 + $0xb8] sm:$0xff] }
 0x33f   :  { %12240 = vst [vmem:[#allocation14_spill] sm:$0xff] %v7083_v13  ;;  %12241 = vst [vmem:[#allocation15_spill] sm:$0xff] %v7089_v14 }
 0x340   :  { %4511 = vtanh.f32 %v6845_v15 }
 0x34d   :  { %v4512_v17 = vpop.eup %4511 }
 0x34e   :  { %v6848_v18 = vmul.f32 %v4512_v17, %v4510_v16  ;;  %v7095_v16 = vld [vmem:[%s11230_s5 + $0xa0] sm:$0xff]  ;;  %v7101_v17 = vld [vmem:[%s11230_s5 + $0xb0] sm:$0xff] }
 0x34f   :  { %12242 = vst [vmem:[#allocation16_spill] sm:$0xff] %v7095_v16  ;;  %12243 = vst [vmem:[#allocation17_spill] sm:$0xff] %v7101_v17 }
 0x350   :  { %1177 = vmatmul.mubr.f32.vlgmr.msra.gmra.mxu0 %v6848_v18  ;;  %1248 = vmatmul.mubr.f32.vlgmr.msra.gmra.mxu1 %v6848_v18 }
 0x351   :  { %1283 = vmatpush1.msra.mxu0 %v6855_v19  ;;  %1354 = vmatpush1.msra.mxu1 %v6861_v49 }
 0x352   :  { %1284 = vmatprep.subr.mxu0 %v6867_v20  ;;  %1355 = vmatprep.subr.mxu1 %v6873_v21 }
 0x353   :  { %1285 = vmatpush1.msra.mxu0 %v6879_v23  ;;  %1356 = vmatpush1.msra.mxu1 %v6885_v24 }
 0x354   :  { %1286 = vmatprep.subr.mxu0 %v6891_v25  ;;  %1357 = vmatprep.subr.mxu1 %v6897_v26 }
 0x355   :  { %1287 = vmatpush1.msra.mxu0 %v6903_v27  ;;  %1358 = vmatpush1.msra.mxu1 %v6909_v30 }
 0x356   :  { %1288 = vmatprep.subr.mxu0 %v6915_v33  ;;  %1359 = vmatprep.subr.mxu1 %v6921_v36 }
 0x357   :  { %1289 = vmatpush1.msra.mxu0 %v6927_v38  ;;  %1360 = vmatpush1.msra.mxu1 %v6933_v42 }
 0x358   :  { %1290 = vmatprep.subr.mxu0 %v6939_v43  ;;  %1361 = vmatprep.subr.mxu1 %v6945_v45 }
 0x359   :  { %1291 = vmatpush1.msra.mxu0 %v6951_v51  ;;  %1362 = vmatpush1.msra.mxu1 %v6957_v61 }
 0x35a   :  { %1292 = vmatprep.subr.mxu0 %v6963_v57  ;;  %1363 = vmatprep.subr.mxu1 %v6969_v58 }
 0x35b   :  { %1293 = vmatpush1.msra.mxu0 %v6975_v62  ;;  %1364 = vmatpush1.msra.mxu1 %v6981_v47 }
 0x35c   :  { %1294 = vmatprep.subr.mxu0 %v6987_v60  ;;  %1365 = vmatprep.subr.mxu1 %v6993_v3 }
 0x35d   :  { %1295 = vmatpush1.msra.mxu0 %v6999_v54  ;;  %1366 = vmatpush1.msra.mxu1 %v7005_v0 }
 0x35e   :  { %1296 = vmatprep.subr.mxu0 %v7011_v59  ;;  %1367 = vmatprep.subr.mxu1 %v7017_v50 }
 0x35f   :  { %1297 = vmatpush1.msra.mxu0 %v7023_v63  ;;  %1368 = vmatpush1.msra.mxu1 %v7029_v2 }
 0x360   :  { %1298 = vmatprep.subr.mxu0 %v7035_v4  ;;  %1369 = vmatprep.subr.mxu1 %v7041_v5  ;;  %v928_v4 = vadd.f32 %v6838_v52, %v6672_v44 }
 0x361   :  { %1299 = vmatpush1.msra.mxu0 %v7047_v7  ;;  %1370 = vmatpush1.msra.mxu1 %v7053_v8 }
 0x362   :  { %1300 = vmatprep.subr.mxu0 %v7059_v9  ;;  %1371 = vmatprep.subr.mxu1 %v7065_v10 }
 0x363   :  { %1301 = vmatpush1.msra.mxu0 %v7071_v11  ;;  %1372 = vmatpush1.msra.mxu1 %v7077_v12  ;;  %v855_v12 = vadd.f32 %v6829_v34, %v6662_v29  ;;  %v857_v11 = vadd.f32 %v6833_v39, %v6665_v31  ;;  %v926_v34 = vadd.f32 %v6835_v40, %v6675_v46 }
 0x364   :  { %1302 = vmatprep.subr.mxu0 %v7083_v13  ;;  %1373 = vmatprep.subr.mxu1 %v7089_v14  ;;  %v7107_v13 = vld [vmem:[%s11230_s5 + $0x88] sm:$0xff]  ;;  %v7113_v14 = vld [vmem:[%s11230_s5 + $0x98] sm:$0xff] }
 0x365   :  { %1303 = vmatpush1.msra.mxu0 %v7095_v16  ;;  %1374 = vmatpush1.msra.mxu1 %v7101_v17  ;;  %12244 = vst [vmem:[#allocation18_spill] sm:$0xff] %v7107_v13  ;;  %12245 = vst [vmem:[#allocation19_spill] sm:$0xff] %v7113_v14  ;;  %v7119_v16 = vld [vmem:[%s11230_s5 + $0x80] sm:$0xff]  ;;  %v7125_v17 = vld [vmem:[%s11230_s5 + $0x90] sm:$0xff] }
 0x366   :  { %1304 = vmatprep.subr.mxu0 %v7107_v13  ;;  %1375 = vmatprep.subr.mxu1 %v7113_v14  ;;  %12246 = vst [vmem:[#allocation20_spill] sm:$0xff] %v7119_v16  ;;  %12247 = vst [vmem:[#allocation21_spill] sm:$0xff] %v7125_v17  ;;  %v7131_v13 = vld [vmem:[%s11230_s5 + $0x68] sm:$0xff]  ;;  %v7137_v14 = vld [vmem:[%s11230_s5 + $0x78] sm:$0xff] }
 0x367   :  { %1305 = vmatpush1.msra.mxu0 %v7119_v16  ;;  %1376 = vmatpush1.msra.mxu1 %v7125_v17  ;;  %12248 = vst [vmem:[#allocation22_spill] sm:$0xff] %v7131_v13  ;;  %12249 = vst [vmem:[#allocation23_spill] sm:$0xff] %v7137_v14  ;;  %v7143_v16 = vld [vmem:[%s11230_s5 + $0x60] sm:$0xff]  ;;  %v7149_v17 = vld [vmem:[%s11230_s5 + $0x70] sm:$0xff] }
 0x368   :  { %1306 = vmatprep.subr.mxu0 %v7131_v13  ;;  %1377 = vmatprep.subr.mxu1 %v7137_v14  ;;  %12250 = vst [vmem:[#allocation86_spill] sm:$0xff] %v7143_v16  ;;  %12251 = vst [vmem:[#allocation151_spill] sm:$0xff] %v7149_v17  ;;  %v7155_v13 = vld [vmem:[%s11230_s5 + $0x48] sm:$0xff]  ;;  %v7161_v14 = vld [vmem:[%s11230_s5 + $0x58] sm:$0xff] }
 0x369   :  { %1307 = vmatpush1.msra.mxu0 %v7143_v16  ;;  %1378 = vmatpush1.msra.mxu1 %v7149_v17  ;;  %12252 = vst [vmem:[#allocation152_spill] sm:$0xff] %v7155_v13  ;;  %12253 = vst [vmem:[#allocation156_spill] sm:$0xff] %v7161_v14  ;;  %v7167_v16 = vld [vmem:[%s11230_s5 + $0x40] sm:$0xff]  ;;  %v7173_v17 = vld [vmem:[%s11230_s5 + $0x50] sm:$0xff] }
 0x36a   :  { %1308 = vmatprep.subr.mxu0 %v7155_v13  ;;  %1379 = vmatprep.subr.mxu1 %v7161_v14  ;;  %12254 = vst [vmem:[#allocation158_spill] sm:$0xff] %v7167_v16  ;;  %12255 = vst [vmem:[#allocation159_spill] sm:$0xff] %v7173_v17  ;;  %v7179_v13 = vld [vmem:[%s11230_s5 + $0x28] sm:$0xff]  ;;  %v7185_v14 = vld [vmem:[%s11230_s5 + $0x38] sm:$0xff] }
 0x36b   :  { %1309 = vmatpush1.msra.mxu0 %v7167_v16  ;;  %1380 = vmatpush1.msra.mxu1 %v7173_v17  ;;  %12256 = vst [vmem:[#allocation163_spill] sm:$0xff] %v7179_v13  ;;  %12257 = vst [vmem:[#allocation162_spill] sm:$0xff] %v7185_v14  ;;  %v7191_v16 = vld [vmem:[%s11230_s5 + $0x20] sm:$0xff]  ;;  %v7197_v17 = vld [vmem:[%s11230_s5 + $0x30] sm:$0xff] }
 0x36c   :  { %1310 = vmatprep.subr.mxu0 %v7179_v13  ;;  %1381 = vmatprep.subr.mxu1 %v7185_v14  ;;  %12258 = vst [vmem:[#allocation160_spill] sm:$0xff] %v7191_v16  ;;  %12259 = vst [vmem:[#allocation24_spill] sm:$0xff] %v7197_v17  ;;  %v7203_v13 = vld [vmem:[%s11230_s5 + $0x8] sm:$0xff]  ;;  %v7209_v14 = vld [vmem:[%s11230_s5 + $0x18] sm:$0xff] }
 0x36d   :  { %1311 = vmatpush1.msra.mxu0 %v7191_v16  ;;  %1382 = vmatpush1.msra.mxu1 %v7197_v17  ;;  %12260 = vst [vmem:[#allocation25_spill] sm:$0xff] %v7203_v13  ;;  %12261 = vst [vmem:[#allocation26_spill] sm:$0xff] %v7209_v14  ;;  %v7215_v16 = vld [vmem:[%s11230_s5] sm:$0xff]  ;;  %v7221_v17 = vld [vmem:[%s11230_s5 + $0x10] sm:$0xff] }
 0x36e   :  { %1312 = vmatprep.subr.mxu0 %v7203_v13  ;;  %1383 = vmatprep.subr.mxu1 %v7209_v14  ;;  %12262 = vst [vmem:[#allocation27_spill] sm:$0xff] %v7215_v16  ;;  %12263 = vst [vmem:[#allocation28_spill] sm:$0xff] %v7221_v17  ;;  %v7229_v14 = vld [vmem:[%s11231_s3 + $0x1e8] sm:$0xff]  ;;  %v5303_v13 = vmov 2  }
 0x36f   :  { %1313 = vmatpush1.msra.mxu0 %v7215_v16  ;;  %1384 = vmatpush1.msra.mxu1 %v7221_v17  ;;  %12264 = vst [vmem:[#allocation29_spill] sm:$0xff] %v7229_v14  ;;  %v7235_v16 = vld [vmem:[%s11231_s3 + $0x1f8] sm:$0xff]  ;;  %v7241_v17 = vld [vmem:[%s11232_s0] sm:$0x3] }
 0x370   :  { %1346 = vmatprep.mubr.f32.mxu0 %v12085_v22  ;;  %1417 = vmatprep.mubr.f32.mxu1 %v12085_v22  ;;  %12265 = vst [vmem:[#allocation30_spill] sm:$0xff] %v7235_v16  ;;  %12266 = vst [vmem:[#allocation31_spill] sm:$0xff] %v7241_v17 }
 0x371   :  { %1436 = vmatprep.subr.mxu0 %v7229_v14  ;;  %1507 = vmatprep.subr.mxu1 %v7235_v16 }
 0x372   :  { %4458 = vset.pattern.permute.xlu1 %v5303_v13 }
 0x373   :  { %1425 = vperm.xlu1 %4458, %v7241_v17  }
 0x410   :  { %v1178_v14 = vpop.f32.mrf.mxu0  ;;  %v1249_v13 = vpop.f32.mrf.mxu1 }
 0x411   :  { %v1254_v10 = vadd.f32 %v1178_v14, %v855_v12  ;;  %v1256_v29 = vadd.f32 %v1249_v13, %v926_v34  ;;  %v7283_v13 = vld [vmem:[%s11231_s3 + $0x1c0] sm:$0xff]  ;;  %v7289_v34 = vld [vmem:[%s11231_s3 + $0x1d0] sm:$0xff] }
 0x412   :  { %v1180_v9 = vpop.f32.mrf.mxu0  ;;  %v1251_v5 = vpop.f32.mrf.mxu1  ;;  %12267 = vst [vmem:[#allocation32_spill] sm:$0xff] %v7283_v13  ;;  %12268 = vst [vmem:[#allocation33_spill] sm:$0xff] %v7289_v34 }
 0x413   :  { %v4354_v8 = vmul.f32 -1.442695, %v1254_v10  ;;  %v1255_v16 = vadd.f32 %v1180_v9, %v857_v11  ;;  %v1257_v17 = vadd.f32 %v1251_v5, %v928_v4 }
 0x415   :  { %4513 = vpow2.f32 %v4354_v8  ;;  %v4355_v7 = vmul.f32 -1.442695, %v1255_v16  ;;  %v4356_v2 = vmul.f32 -1.442695, %v1257_v17  ;;  %v7271_v16 = vld [vmem:[%s11231_s3 + $0x1c8] sm:$0xff]  ;;  %v7277_v17 = vld [vmem:[%s11231_s3 + $0x1d8] sm:$0xff] }
 0x417   :  { %4515 = vpow2.f32 %v4355_v7 }
 0x418   :  { %4517 = vtanh.f32 %v1256_v29 }
 0x419   :  { %4519 = vpow2.f32 %v4356_v2  ;;  %v7259_v2 = vld [vmem:[%s11231_s3 + $0x1e0] sm:$0xff] }
 0x422   :  { %v4514_v63 = vpop.eup %4513 }
 0x423   :  { %v1261_v39 = vadd.f32 1.0, %v4514_v63 }
 0x424   :  { %v4516_v12 = vpop.eup %4515 }
 0x425   :  { %4521 = vrcp.f32 %v1261_v39  ;;  %v1267_v8 = vadd.f32 1.0, %v4516_v12  ;;  %v4518_v9 = vpop.eup %4517  ;;  %v7295_v39 = vld [vmem:[%s11231_s3 + $0x1a8] sm:$0xff]  ;;  %v7301_v12 = vld [vmem:[%s11231_s3 + $0x1b8] sm:$0xff] }
 0x426   :  { %v4520_v7 = vpop.eup %4519  ;;  %12269 = vst [vmem:[#allocation34_spill] sm:$0xff] %v7295_v39  ;;  %12270 = vst [vmem:[#allocation35_spill] sm:$0xff] %v7301_v12 }
 0x427   :  { %4523 = vrcp.f32 %v1267_v8  ;;  %v1274_v52 = vadd.f32 1.0, %v4520_v7  ;;  %v7307_v8 = vld [vmem:[%s11231_s3 + $0x1a0] sm:$0xff]  ;;  %v7319_v7 = vld [vmem:[%s11231_s3 + $0x188] sm:$0xff] }
 0x428   :  { %12271 = vst [vmem:[#allocation36_spill] sm:$0xff] %v7307_v8  ;;  %12273 = vst [vmem:[#allocation38_spill] sm:$0xff] %v7319_v7 }
 0x429   :  { %4525 = vrcp.f32 %v1274_v52  ;;  %v7343_v52 = vld [vmem:[%s11231_s3 + $0x168] sm:$0xff] }
 0x42a   :  { %12277 = vst [vmem:[#allocation42_spill] sm:$0xff] %v7343_v52 }
 0x432   :  { %v4522_v10 = vpop.eup %4521 }
 0x433   :  { %v1278_v11 = vmul.f32 %v4522_v10, %v4518_v9  ;;  %v7313_v9 = vld [vmem:[%s11231_s3 + $0x1b0] sm:$0xff]  ;;  %v7325_v10 = vld [vmem:[%s11231_s3 + $0x198] sm:$0xff] }
 0x434   :  { %v4524_v14 = vpop.eup %4523  ;;  %12272 = vst [vmem:[#allocation37_spill] sm:$0xff] %v7313_v9  ;;  %12274 = vst [vmem:[#allocation39_spill] sm:$0xff] %v7325_v10 }
 0x435   :  { %v1277_v4 = vmul.f32 %v4524_v14, %v6681_v6  ;;  %v7265_v6 = vld [vmem:[%s11231_s3 + $0x1f0] sm:$0xff] }
 0x436   :  { %v4526_v40 = vpop.eup %4525  ;;  %v7337_v14 = vld [vmem:[%s11231_s3 + $0x190] sm:$0xff] }
 0x437   :  { %v7253_v5 = vadd.f32 %v1278_v11, %v1277_v4  ;;  %v7331_v11 = vld [vmem:[%s11231_s3 + $0x180] sm:$0xff]  ;;  %12276 = vst [vmem:[#allocation41_spill] sm:$0xff] %v7337_v14  ;;  %v7349_v4 = vld [vmem:[%s11231_s3 + $0x178] sm:$0xff] }
 0x438   :  { %12275 = vst [vmem:[#allocation40_spill] sm:$0xff] %v7331_v11  ;;  %12278 = vst [vmem:[#allocation43_spill] sm:$0xff] %v7349_v4 }
 0x439   :  { %4527 = vtanh.f32 %v7253_v5 }
 0x446   :  { %v4528_v29 = vpop.eup %4527 }
 0x447   :  { %v1281_v63 = vmul.f32 %v4528_v29, %v4526_v40  ;;  %v7355_v40 = vld [vmem:[%s11231_s3 + $0x160] sm:$0xff]  ;;  %v7361_v29 = vld [vmem:[%s11231_s3 + $0x170] sm:$0xff] }
 0x448   :  { %12279 = vst [vmem:[#allocation44_spill] sm:$0xff] %v7355_v40  ;;  %12280 = vst [vmem:[#allocation45_spill] sm:$0xff] %v7361_v29 }
 0x449   :  { %1347 = vmatmul.mubr.f32.vlgmr.msra.gmra.mxu0 %v1281_v63  ;;  %1418 = vmatmul.mubr.f32.vlgmr.msra.gmra.mxu1 %v1281_v63  ;;  %v7367_v63 = vld [vmem:[%s11231_s3 + $0x148] sm:$0xff] }
 0x44a   :  { %1437 = vmatpush1.msra.mxu0 %v7259_v2  ;;  %1508 = vmatpush1.msra.mxu1 %v7265_v6  ;;  %12281 = vst [vmem:[#allocation46_spill] sm:$0xff] %v7367_v63 }
 0x44b   :  { %1438 = vmatprep.subr.mxu0 %v7271_v16  ;;  %1509 = vmatprep.subr.mxu1 %v7277_v17 }
 0x44c   :  { %1439 = vmatpush1.msra.mxu0 %v7283_v13  ;;  %1510 = vmatpush1.msra.mxu1 %v7289_v34 }
 0x44d   :  { %1440 = vmatprep.subr.mxu0 %v7295_v39  ;;  %1511 = vmatprep.subr.mxu1 %v7301_v12 }
 0x44e   :  { %1441 = vmatpush1.msra.mxu0 %v7307_v8  ;;  %1512 = vmatpush1.msra.mxu1 %v7313_v9 }
 0x44f   :  { %1442 = vmatprep.subr.mxu0 %v7319_v7  ;;  %1513 = vmatprep.subr.mxu1 %v7325_v10 }
 0x450   :  { %1443 = vmatpush1.msra.mxu0 %v7331_v11  ;;  %1514 = vmatpush1.msra.mxu1 %v7337_v14 }
 0x451   :  { %1444 = vmatprep.subr.mxu0 %v7343_v52  ;;  %1515 = vmatprep.subr.mxu1 %v7349_v4  ;;  %v7373_v4 = vld [vmem:[%s11231_s3 + $0x158] sm:$0xff] }
 0x452   :  { %1445 = vmatpush1.msra.mxu0 %v7355_v40  ;;  %1516 = vmatpush1.msra.mxu1 %v7361_v29  ;;  %12282 = vst [vmem:[#allocation47_spill] sm:$0xff] %v7373_v4  ;;  %v7379_v40 = vld [vmem:[%s11231_s3 + $0x140] sm:$0xff]  ;;  %v7385_v29 = vld [vmem:[%s11231_s3 + $0x150] sm:$0xff] }
 0x453   :  { %1446 = vmatprep.subr.mxu0 %v7367_v63  ;;  %1517 = vmatprep.subr.mxu1 %v7373_v4  ;;  %12283 = vst [vmem:[#allocation48_spill] sm:$0xff] %v7379_v40  ;;  %12284 = vst [vmem:[#allocation49_spill] sm:$0xff] %v7385_v29  ;;  %v7391_v63 = vld [vmem:[%s11231_s3 + $0x128] sm:$0xff]  ;;  %v7397_v4 = vld [vmem:[%s11231_s3 + $0x138] sm:$0xff] }
 0x454   :  { %1447 = vmatpush1.msra.mxu0 %v7379_v40  ;;  %1518 = vmatpush1.msra.mxu1 %v7385_v29  ;;  %12285 = vst [vmem:[#allocation50_spill] sm:$0xff] %v7391_v63  ;;  %12286 = vst [vmem:[#allocation51_spill] sm:$0xff] %v7397_v4  ;;  %v7403_v40 = vld [vmem:[%s11231_s3 + $0x120] sm:$0xff]  ;;  %v7409_v29 = vld [vmem:[%s11231_s3 + $0x130] sm:$0xff] }
 0x455   :  { %1448 = vmatprep.subr.mxu0 %v7391_v63  ;;  %1519 = vmatprep.subr.mxu1 %v7397_v4  ;;  %12287 = vst [vmem:[#allocation52_spill] sm:$0xff] %v7403_v40  ;;  %12288 = vst [vmem:[#allocation53_spill] sm:$0xff] %v7409_v29  ;;  %v7415_v63 = vld [vmem:[%s11231_s3 + $0x108] sm:$0xff]  ;;  %v7421_v4 = vld [vmem:[%s11231_s3 + $0x118] sm:$0xff] }
 0x456   :  { %1449 = vmatpush1.msra.mxu0 %v7403_v40  ;;  %1520 = vmatpush1.msra.mxu1 %v7409_v29  ;;  %12289 = vst [vmem:[#allocation54_spill] sm:$0xff] %v7415_v63  ;;  %12290 = vst [vmem:[#allocation55_spill] sm:$0xff] %v7421_v4  ;;  %v7427_v40 = vld [vmem:[%s11231_s3 + $0x100] sm:$0xff]  ;;  %v7433_v29 = vld [vmem:[%s11231_s3 + $0x110] sm:$0xff] }
 0x457   :  { %1450 = vmatprep.subr.mxu0 %v7415_v63  ;;  %1521 = vmatprep.subr.mxu1 %v7421_v4  ;;  %12291 = vst [vmem:[#allocation56_spill] sm:$0xff] %v7427_v40  ;;  %12292 = vst [vmem:[#allocation57_spill] sm:$0xff] %v7433_v29  ;;  %v7439_v63 = vld [vmem:[%s11231_s3 + $0xe8] sm:$0xff]  ;;  %v7445_v4 = vld [vmem:[%s11231_s3 + $0xf8] sm:$0xff] }
 0x458   :  { %1451 = vmatpush1.msra.mxu0 %v7427_v40  ;;  %1522 = vmatpush1.msra.mxu1 %v7433_v29  ;;  %12293 = vst [vmem:[#allocation58_spill] sm:$0xff] %v7439_v63  ;;  %12294 = vst [vmem:[#allocation59_spill] sm:$0xff] %v7445_v4  ;;  %v7451_v40 = vld [vmem:[%s11231_s3 + $0xe0] sm:$0xff]  ;;  %v7457_v29 = vld [vmem:[%s11231_s3 + $0xf0] sm:$0xff] }
 0x459   :  { %1452 = vmatprep.subr.mxu0 %v7439_v63  ;;  %1523 = vmatprep.subr.mxu1 %v7445_v4  ;;  %12295 = vst [vmem:[#allocation60_spill] sm:$0xff] %v7451_v40  ;;  %12296 = vst [vmem:[#allocation61_spill] sm:$0xff] %v7457_v29  ;;  %v7463_v63 = vld [vmem:[%s11231_s3 + $0xc8] sm:$0xff]  ;;  %v7469_v4 = vld [vmem:[%s11231_s3 + $0xd8] sm:$0xff] }
 0x45a   :  { %1453 = vmatpush1.msra.mxu0 %v7451_v40  ;;  %1524 = vmatpush1.msra.mxu1 %v7457_v29  ;;  %12297 = vst [vmem:[#allocation62_spill] sm:$0xff] %v7463_v63  ;;  %12298 = vst [vmem:[#allocation63_spill] sm:$0xff] %v7469_v4  ;;  %v7475_v40 = vld [vmem:[%s11231_s3 + $0xc0] sm:$0xff]  ;;  %v7481_v29 = vld [vmem:[%s11231_s3 + $0xd0] sm:$0xff] }
 0x45b   :  { %1454 = vmatprep.subr.mxu0 %v7463_v63  ;;  %1525 = vmatprep.subr.mxu1 %v7469_v4  ;;  %12299 = vst [vmem:[#allocation64_spill] sm:$0xff] %v7475_v40  ;;  %12300 = vst [vmem:[#allocation65_spill] sm:$0xff] %v7481_v29  ;;  %v7487_v63 = vld [vmem:[%s11231_s3 + $0xa8] sm:$0xff]  ;;  %v7493_v4 = vld [vmem:[%s11231_s3 + $0xb8] sm:$0xff] }
 0x45c   :  { %1455 = vmatpush1.msra.mxu0 %v7475_v40  ;;  %1526 = vmatpush1.msra.mxu1 %v7481_v29  ;;  %12301 = vst [vmem:[#allocation66_spill] sm:$0xff] %v7487_v63  ;;  %12302 = vst [vmem:[#allocation67_spill] sm:$0xff] %v7493_v4  ;;  %v7499_v40 = vld [vmem:[%s11231_s3 + $0xa0] sm:$0xff]  ;;  %v7505_v29 = vld [vmem:[%s11231_s3 + $0xb0] sm:$0xff] }
 0x45d   :  { %1456 = vmatprep.subr.mxu0 %v7487_v63  ;;  %1527 = vmatprep.subr.mxu1 %v7493_v4  ;;  %12303 = vst [vmem:[#allocation68_spill] sm:$0xff] %v7499_v40  ;;  %12304 = vst [vmem:[#allocation69_spill] sm:$0xff] %v7505_v29  ;;  %v7511_v63 = vld [vmem:[%s11231_s3 + $0x88] sm:$0xff]  ;;  %v7517_v4 = vld [vmem:[%s11231_s3 + $0x98] sm:$0xff] }
 0x45e   :  { %1457 = vmatpush1.msra.mxu0 %v7499_v40  ;;  %1528 = vmatpush1.msra.mxu1 %v7505_v29  ;;  %12305 = vst [vmem:[#allocation70_spill] sm:$0xff] %v7511_v63  ;;  %12306 = vst [vmem:[#allocation71_spill] sm:$0xff] %v7517_v4  ;;  %v7523_v40 = vld [vmem:[%s11231_s3 + $0x80] sm:$0xff]  ;;  %v7529_v29 = vld [vmem:[%s11231_s3 + $0x90] sm:$0xff] }
 0x45f   :  { %1458 = vmatprep.subr.mxu0 %v7511_v63  ;;  %1529 = vmatprep.subr.mxu1 %v7517_v4  ;;  %12307 = vst [vmem:[#allocation72_spill] sm:$0xff] %v7523_v40  ;;  %12308 = vst [vmem:[#allocation73_spill] sm:$0xff] %v7529_v29  ;;  %v7535_v63 = vld [vmem:[%s11231_s3 + $0x68] sm:$0xff]  ;;  %v7541_v4 = vld [vmem:[%s11231_s3 + $0x78] sm:$0xff] }
 0x460   :  { %1459 = vmatpush1.msra.mxu0 %v7523_v40  ;;  %1530 = vmatpush1.msra.mxu1 %v7529_v29  ;;  %12309 = vst [vmem:[#allocation74_spill] sm:$0xff] %v7535_v63  ;;  %12310 = vst [vmem:[#allocation75_spill] sm:$0xff] %v7541_v4  ;;  %v7547_v40 = vld [vmem:[%s11231_s3 + $0x60] sm:$0xff]  ;;  %v7553_v29 = vld [vmem:[%s11231_s3 + $0x70] sm:$0xff] }
 0x461   :  { %1460 = vmatprep.subr.mxu0 %v7535_v63  ;;  %1531 = vmatprep.subr.mxu1 %v7541_v4  ;;  %12311 = vst [vmem:[#allocation76_spill] sm:$0xff] %v7547_v40  ;;  %12312 = vst [vmem:[#allocation77_spill] sm:$0xff] %v7553_v29  ;;  %v7559_v63 = vld [vmem:[%s11231_s3 + $0x48] sm:$0xff]  ;;  %v7565_v4 = vld [vmem:[%s11231_s3 + $0x58] sm:$0xff] }
 0x462   :  { %1461 = vmatpush1.msra.mxu0 %v7547_v40  ;;  %1532 = vmatpush1.msra.mxu1 %v7553_v29  ;;  %12313 = vst [vmem:[#allocation78_spill] sm:$0xff] %v7559_v63  ;;  %12314 = vst [vmem:[#allocation79_spill] sm:$0xff] %v7565_v4  ;;  %v7571_v40 = vld [vmem:[%s11231_s3 + $0x40] sm:$0xff]  ;;  %v7577_v29 = vld [vmem:[%s11231_s3 + $0x50] sm:$0xff] }
 0x463   :  { %1462 = vmatprep.subr.mxu0 %v7559_v63  ;;  %1533 = vmatprep.subr.mxu1 %v7565_v4  ;;  %12315 = vst [vmem:[#allocation80_spill] sm:$0xff] %v7571_v40  ;;  %12316 = vst [vmem:[#allocation81_spill] sm:$0xff] %v7577_v29  ;;  %v7583_v63 = vld [vmem:[%s11231_s3 + $0x28] sm:$0xff]  ;;  %v7589_v4 = vld [vmem:[%s11231_s3 + $0x38] sm:$0xff] }
 0x464   :  { %1463 = vmatpush1.msra.mxu0 %v7571_v40  ;;  %1534 = vmatpush1.msra.mxu1 %v7577_v29  ;;  %12317 = vst [vmem:[#allocation82_spill] sm:$0xff] %v7583_v63  ;;  %12318 = vst [vmem:[#allocation83_spill] sm:$0xff] %v7589_v4  ;;  %v7595_v40 = vld [vmem:[%s11231_s3 + $0x20] sm:$0xff]  ;;  %v7601_v29 = vld [vmem:[%s11231_s3 + $0x30] sm:$0xff] }
 0x465   :  { %1464 = vmatprep.subr.mxu0 %v7583_v63  ;;  %1535 = vmatprep.subr.mxu1 %v7589_v4  ;;  %12319 = vst [vmem:[#allocation84_spill] sm:$0xff] %v7595_v40  ;;  %12320 = vst [vmem:[#allocation85_spill] sm:$0xff] %v7601_v29  ;;  %v7607_v63 = vld [vmem:[%s11231_s3 + $0x8] sm:$0xff]  ;;  %v7613_v4 = vld [vmem:[%s11231_s3 + $0x18] sm:$0xff] }
 0x466   :  { %1465 = vmatpush1.msra.mxu0 %v7595_v40  ;;  %1536 = vmatpush1.msra.mxu1 %v7601_v29  ;;  %12321 = vst [vmem:[#allocation87_spill] sm:$0xff] %v7607_v63  ;;  %12322 = vst [vmem:[#allocation88_spill] sm:$0xff] %v7613_v4  ;;  %v7619_v40 = vld [vmem:[%s11231_s3] sm:$0xff] }
 0x467   :  { %1466 = vmatprep.subr.mxu0 %v7607_v63  ;;  %1537 = vmatprep.subr.mxu1 %v7613_v4  ;;  %12323 = vst [vmem:[#allocation89_spill] sm:$0xff] %v7619_v40  ;;  %v7626_v63 = vld [vmem:[%s11231_s3 + $0x10] sm:$0xff]  ;;  %v7635_v4 = vld [vmem:[%s11233_s4 + $0x1e8] sm:$0xff] }
 0x468   :  { %1467 = vmatpush1.msra.mxu0 %v7619_v40  ;;  %1500 = vmatprep.mubr.f32.mxu0 %v12085_v22  ;;  %12324 = vst [vmem:[#allocation90_spill] sm:$0xff] %v7626_v63  ;;  %12325 = vst [vmem:[#allocation91_spill] sm:$0xff] %v7635_v4  ;;  %v7641_v40 = vld [vmem:[%s11233_s4 + $0x1f8] sm:$0xff] }
 0x469   :  { %1538 = vmatpush1.msra.mxu1 %v7626_v63  ;;  %1571 = vmatprep.mubr.f32.mxu1 %v12085_v22  ;;  %12326 = vst [vmem:[#allocation92_spill] sm:$0xff] %v7641_v40  ;;  %v7647_v63 = vld [vmem:[%s11233_s4 + $0x1e0] sm:$0xff] }
 0x46a   :  { %1501 = vmatmul.mubr.f32.vlgmr.msra.gmra.mxu0 %v6848_v18  ;;  %1572 = vmatmul.mubr.f32.vlgmr.msra.gmra.mxu1 %v6848_v18  ;;  %12327 = vst [vmem:[#allocation93_spill] sm:$0xff] %v7647_v63  ;;  %v7653_v18 = vld [vmem:[%s11233_s4 + $0x1f0] sm:$0xff] }
 0x46b   :  { %1606 = vmatprep.subr.mxu0 %v7635_v4  ;;  %1677 = vmatprep.subr.mxu1 %v7641_v40  ;;  %12328 = vst [vmem:[#allocation94_spill] sm:$0xff] %v7653_v18  ;;  %v7659_v4 = vld [vmem:[%s11233_s4 + $0x1c8] sm:$0xff]  ;;  %v7665_v40 = vld [vmem:[%s11233_s4 + $0x1d8] sm:$0xff] }
 0x46c   :  { %1607 = vmatpush1.msra.mxu0 %v7647_v63  ;;  %1678 = vmatpush1.msra.mxu1 %v7653_v18  ;;  %12329 = vst [vmem:[#allocation95_spill] sm:$0xff] %v7659_v4  ;;  %12330 = vst [vmem:[#allocation96_spill] sm:$0xff] %v7665_v40  ;;  %v7671_v63 = vld [vmem:[%s11233_s4 + $0x1c0] sm:$0xff]  ;;  %v7677_v18 = vld [vmem:[%s11233_s4 + $0x1d0] sm:$0xff] }
 0x46d   :  { %1608 = vmatprep.subr.mxu0 %v7659_v4  ;;  %1679 = vmatprep.subr.mxu1 %v7665_v40  ;;  %12331 = vst [vmem:[#allocation97_spill] sm:$0xff] %v7671_v63  ;;  %12332 = vst [vmem:[#allocation98_spill] sm:$0xff] %v7677_v18  ;;  %v7683_v4 = vld [vmem:[%s11233_s4 + $0x1a8] sm:$0xff]  ;;  %v7689_v40 = vld [vmem:[%s11233_s4 + $0x1b8] sm:$0xff] }
 0x46e   :  { %1609 = vmatpush1.msra.mxu0 %v7671_v63  ;;  %1680 = vmatpush1.msra.mxu1 %v7677_v18  ;;  %12333 = vst [vmem:[#allocation99_spill] sm:$0xff] %v7683_v4  ;;  %12334 = vst [vmem:[#allocation100_spill] sm:$0xff] %v7689_v40  ;;  %v7695_v63 = vld [vmem:[%s11233_s4 + $0x1a0] sm:$0xff]  ;;  %v7701_v18 = vld [vmem:[%s11233_s4 + $0x1b0] sm:$0xff] }
 0x46f   :  { %1610 = vmatprep.subr.mxu0 %v7683_v4  ;;  %1681 = vmatprep.subr.mxu1 %v7689_v40  ;;  %12335 = vst [vmem:[#allocation101_spill] sm:$0xff] %v7695_v63  ;;  %12336 = vst [vmem:[#allocation102_spill] sm:$0xff] %v7701_v18  ;;  %v7707_v4 = vld [vmem:[%s11233_s4 + $0x188] sm:$0xff]  ;;  %v7713_v40 = vld [vmem:[%s11233_s4 + $0x198] sm:$0xff] }
 0x470   :  { %1611 = vmatpush1.msra.mxu0 %v7695_v63  ;;  %1682 = vmatpush1.msra.mxu1 %v7701_v18  ;;  %12337 = vst [vmem:[#allocation103_spill] sm:$0xff] %v7707_v4  ;;  %12338 = vst [vmem:[#allocation104_spill] sm:$0xff] %v7713_v40  ;;  %v7719_v63 = vld [vmem:[%s11233_s4 + $0x180] sm:$0xff]  ;;  %v7725_v18 = vld [vmem:[%s11233_s4 + $0x190] sm:$0xff] }
 0x471   :  { %1612 = vmatprep.subr.mxu0 %v7707_v4  ;;  %1683 = vmatprep.subr.mxu1 %v7713_v40  ;;  %12339 = vst [vmem:[#allocation105_spill] sm:$0xff] %v7719_v63  ;;  %12340 = vst [vmem:[#allocation106_spill] sm:$0xff] %v7725_v18  ;;  %v7731_v4 = vld [vmem:[%s11233_s4 + $0x168] sm:$0xff]  ;;  %v7737_v40 = vld [vmem:[%s11233_s4 + $0x178] sm:$0xff] }
 0x472   :  { %1613 = vmatpush1.msra.mxu0 %v7719_v63  ;;  %1684 = vmatpush1.msra.mxu1 %v7725_v18  ;;  %12341 = vst [vmem:[#allocation107_spill] sm:$0xff] %v7731_v4  ;;  %12342 = vst [vmem:[#allocation108_spill] sm:$0xff] %v7737_v40  ;;  %v7743_v63 = vld [vmem:[%s11233_s4 + $0x160] sm:$0xff]  ;;  %v7749_v18 = vld [vmem:[%s11233_s4 + $0x170] sm:$0xff] }
 0x473   :  { %1614 = vmatprep.subr.mxu0 %v7731_v4  ;;  %1685 = vmatprep.subr.mxu1 %v7737_v40  ;;  %12343 = vst [vmem:[#allocation109_spill] sm:$0xff] %v7743_v63  ;;  %12344 = vst [vmem:[#allocation110_spill] sm:$0xff] %v7749_v18  ;;  %v7755_v4 = vld [vmem:[%s11233_s4 + $0x148] sm:$0xff]  ;;  %v7761_v40 = vld [vmem:[%s11233_s4 + $0x158] sm:$0xff] }
 0x474   :  { %1615 = vmatpush1.msra.mxu0 %v7743_v63  ;;  %1686 = vmatpush1.msra.mxu1 %v7749_v18  ;;  %12345 = vst [vmem:[#allocation111_spill] sm:$0xff] %v7755_v4  ;;  %12346 = vst [vmem:[#allocation112_spill] sm:$0xff] %v7761_v40  ;;  %v7767_v63 = vld [vmem:[%s11233_s4 + $0x140] sm:$0xff]  ;;  %v7773_v18 = vld [vmem:[%s11233_s4 + $0x150] sm:$0xff] }
 0x475   :  { %1616 = vmatprep.subr.mxu0 %v7755_v4  ;;  %1687 = vmatprep.subr.mxu1 %v7761_v40  ;;  %12347 = vst [vmem:[#allocation113_spill] sm:$0xff] %v7767_v63  ;;  %12348 = vst [vmem:[#allocation114_spill] sm:$0xff] %v7773_v18  ;;  %v7779_v4 = vld [vmem:[%s11233_s4 + $0x128] sm:$0xff]  ;;  %v7785_v40 = vld [vmem:[%s11233_s4 + $0x138] sm:$0xff] }
 0x476   :  { %1617 = vmatpush1.msra.mxu0 %v7767_v63  ;;  %1688 = vmatpush1.msra.mxu1 %v7773_v18  ;;  %12349 = vst [vmem:[#allocation115_spill] sm:$0xff] %v7779_v4  ;;  %12350 = vst [vmem:[#allocation116_spill] sm:$0xff] %v7785_v40  ;;  %v7791_v63 = vld [vmem:[%s11233_s4 + $0x120] sm:$0xff]  ;;  %v7797_v18 = vld [vmem:[%s11233_s4 + $0x130] sm:$0xff] }
 0x477   :  { %1618 = vmatprep.subr.mxu0 %v7779_v4  ;;  %1689 = vmatprep.subr.mxu1 %v7785_v40  ;;  %12351 = vst [vmem:[#allocation117_spill] sm:$0xff] %v7791_v63  ;;  %12352 = vst [vmem:[#allocation118_spill] sm:$0xff] %v7797_v18  ;;  %v7803_v4 = vld [vmem:[%s11233_s4 + $0x108] sm:$0xff]  ;;  %v7809_v40 = vld [vmem:[%s11233_s4 + $0x118] sm:$0xff] }
 0x478   :  { %1619 = vmatpush1.msra.mxu0 %v7791_v63  ;;  %1690 = vmatpush1.msra.mxu1 %v7797_v18  ;;  %12353 = vst [vmem:[#allocation119_spill] sm:$0xff] %v7803_v4  ;;  %12354 = vst [vmem:[#allocation120_spill] sm:$0xff] %v7809_v40  ;;  %v7815_v63 = vld [vmem:[%s11233_s4 + $0x100] sm:$0xff]  ;;  %v7821_v18 = vld [vmem:[%s11233_s4 + $0x110] sm:$0xff] }
 0x479   :  { %1620 = vmatprep.subr.mxu0 %v7803_v4  ;;  %1691 = vmatprep.subr.mxu1 %v7809_v40  ;;  %12355 = vst [vmem:[#allocation121_spill] sm:$0xff] %v7815_v63  ;;  %12356 = vst [vmem:[#allocation122_spill] sm:$0xff] %v7821_v18  ;;  %v7827_v4 = vld [vmem:[%s11233_s4 + $0xe8] sm:$0xff]  ;;  %v7833_v40 = vld [vmem:[%s11233_s4 + $0xf8] sm:$0xff] }
 0x47a   :  { %1621 = vmatpush1.msra.mxu0 %v7815_v63  ;;  %1692 = vmatpush1.msra.mxu1 %v7821_v18  ;;  %12357 = vst [vmem:[#allocation123_spill] sm:$0xff] %v7827_v4  ;;  %12358 = vst [vmem:[#allocation124_spill] sm:$0xff] %v7833_v40  ;;  %v7839_v63 = vld [vmem:[%s11233_s4 + $0xe0] sm:$0xff]  ;;  %v7845_v18 = vld [vmem:[%s11233_s4 + $0xf0] sm:$0xff] }
 0x47b   :  { %1622 = vmatprep.subr.mxu0 %v7827_v4  ;;  %1693 = vmatprep.subr.mxu1 %v7833_v40  ;;  %12359 = vst [vmem:[#allocation125_spill] sm:$0xff] %v7839_v63  ;;  %12360 = vst [vmem:[#allocation126_spill] sm:$0xff] %v7845_v18  ;;  %v7851_v4 = vld [vmem:[%s11233_s4 + $0xc8] sm:$0xff]  ;;  %v7857_v40 = vld [vmem:[%s11233_s4 + $0xd8] sm:$0xff] }
 0x47c   :  { %1623 = vmatpush1.msra.mxu0 %v7839_v63  ;;  %1694 = vmatpush1.msra.mxu1 %v7845_v18  ;;  %12361 = vst [vmem:[#allocation127_spill] sm:$0xff] %v7851_v4  ;;  %12362 = vst [vmem:[#allocation128_spill] sm:$0xff] %v7857_v40  ;;  %v7863_v63 = vld [vmem:[%s11233_s4 + $0xc0] sm:$0xff]  ;;  %v7869_v18 = vld [vmem:[%s11233_s4 + $0xd0] sm:$0xff] }
 0x47d   :  { %1624 = vmatprep.subr.mxu0 %v7851_v4  ;;  %1695 = vmatprep.subr.mxu1 %v7857_v40  ;;  %12363 = vst [vmem:[#allocation129_spill] sm:$0xff] %v7863_v63  ;;  %12364 = vst [vmem:[#allocation130_spill] sm:$0xff] %v7869_v18  ;;  %v7875_v4 = vld [vmem:[%s11233_s4 + $0xa8] sm:$0xff]  ;;  %v7881_v40 = vld [vmem:[%s11233_s4 + $0xb8] sm:$0xff] }
 0x47e   :  { %1625 = vmatpush1.msra.mxu0 %v7863_v63  ;;  %1696 = vmatpush1.msra.mxu1 %v7869_v18  ;;  %12365 = vst [vmem:[#allocation131_spill] sm:$0xff] %v7875_v4  ;;  %12366 = vst [vmem:[#allocation132_spill] sm:$0xff] %v7881_v40  ;;  %v7887_v63 = vld [vmem:[%s11233_s4 + $0xa0] sm:$0xff]  ;;  %v7893_v18 = vld [vmem:[%s11233_s4 + $0xb0] sm:$0xff] }
 0x47f   :  { %1626 = vmatprep.subr.mxu0 %v7875_v4  ;;  %1697 = vmatprep.subr.mxu1 %v7881_v40  ;;  %12367 = vst [vmem:[#allocation133_spill] sm:$0xff] %v7887_v63  ;;  %12368 = vst [vmem:[#allocation134_spill] sm:$0xff] %v7893_v18  ;;  %v7899_v4 = vld [vmem:[%s11233_s4 + $0x88] sm:$0xff]  ;;  %v7905_v40 = vld [vmem:[%s11233_s4 + $0x98] sm:$0xff] }
 0x480   :  { %1627 = vmatpush1.msra.mxu0 %v7887_v63  ;;  %1698 = vmatpush1.msra.mxu1 %v7893_v18  ;;  %12369 = vst [vmem:[#allocation135_spill] sm:$0xff] %v7899_v4  ;;  %12370 = vst [vmem:[#allocation136_spill] sm:$0xff] %v7905_v40  ;;  %v7911_v63 = vld [vmem:[%s11233_s4 + $0x80] sm:$0xff]  ;;  %v7917_v18 = vld [vmem:[%s11233_s4 + $0x90] sm:$0xff] }
 0x481   :  { %1628 = vmatprep.subr.mxu0 %v7899_v4  ;;  %1699 = vmatprep.subr.mxu1 %v7905_v40  ;;  %12371 = vst [vmem:[#allocation137_spill] sm:$0xff] %v7911_v63  ;;  %12372 = vst [vmem:[#allocation138_spill] sm:$0xff] %v7917_v18  ;;  %v7923_v4 = vld [vmem:[%s11233_s4 + $0x68] sm:$0xff]  ;;  %v7929_v40 = vld [vmem:[%s11233_s4 + $0x78] sm:$0xff] }
 0x482   :  { %1629 = vmatpush1.msra.mxu0 %v7911_v63  ;;  %1700 = vmatpush1.msra.mxu1 %v7917_v18  ;;  %12373 = vst [vmem:[#allocation139_spill] sm:$0xff] %v7923_v4  ;;  %12374 = vst [vmem:[#allocation140_spill] sm:$0xff] %v7929_v40  ;;  %v7935_v63 = vld [vmem:[%s11233_s4 + $0x60] sm:$0xff]  ;;  %v7941_v18 = vld [vmem:[%s11233_s4 + $0x70] sm:$0xff] }
 0x483   :  { %1630 = vmatprep.subr.mxu0 %v7923_v4  ;;  %1701 = vmatprep.subr.mxu1 %v7929_v40  ;;  %12375 = vst [vmem:[#allocation141_spill] sm:$0xff] %v7935_v63  ;;  %12376 = vst [vmem:[#allocation142_spill] sm:$0xff] %v7941_v18  ;;  %v7947_v4 = vld [vmem:[%s11233_s4 + $0x48] sm:$0xff]  ;;  %v7953_v40 = vld [vmem:[%s11233_s4 + $0x58] sm:$0xff] }
 0x484   :  { %1631 = vmatpush1.msra.mxu0 %v7935_v63  ;;  %1702 = vmatpush1.msra.mxu1 %v7941_v18  ;;  %12377 = vst [vmem:[#allocation143_spill] sm:$0xff] %v7947_v4  ;;  %12378 = vst [vmem:[#allocation144_spill] sm:$0xff] %v7953_v40  ;;  %v7959_v63 = vld [vmem:[%s11233_s4 + $0x40] sm:$0xff]  ;;  %v7965_v18 = vld [vmem:[%s11233_s4 + $0x50] sm:$0xff] }
 0x485   :  { %1632 = vmatprep.subr.mxu0 %v7947_v4  ;;  %1703 = vmatprep.subr.mxu1 %v7953_v40  ;;  %12379 = vst [vmem:[#allocation145_spill] sm:$0xff] %v7959_v63  ;;  %12380 = vst [vmem:[#allocation146_spill] sm:$0xff] %v7965_v18  ;;  %v7971_v4 = vld [vmem:[%s11233_s4 + $0x28] sm:$0xff]  ;;  %v7977_v40 = vld [vmem:[%s11233_s4 + $0x38] sm:$0xff] }
 0x486   :  { %1633 = vmatpush1.msra.mxu0 %v7959_v63  ;;  %1704 = vmatpush1.msra.mxu1 %v7965_v18  ;;  %12381 = vst [vmem:[#allocation147_spill] sm:$0xff] %v7971_v4  ;;  %12382 = vst [vmem:[#allocation148_spill] sm:$0xff] %v7977_v40  ;;  %v7983_v63 = vld [vmem:[%s11233_s4 + $0x20] sm:$0xff]  ;;  %v7989_v18 = vld [vmem:[%s11233_s4 + $0x30] sm:$0xff] }
 0x487   :  { %1634 = vmatprep.subr.mxu0 %v7971_v4  ;;  %1705 = vmatprep.subr.mxu1 %v7977_v40  ;;  %12383 = vst [vmem:[#allocation149_spill] sm:$0xff] %v7983_v63  ;;  %12384 = vst [vmem:[#allocation150_spill] sm:$0xff] %v7989_v18  ;;  %v7995_v4 = vld [vmem:[%s11233_s4 + $0x8] sm:$0xff]  ;;  %v8001_v40 = vld [vmem:[%s11233_s4 + $0x18] sm:$0xff] }
 0x488   :  { %1635 = vmatpush1.msra.mxu0 %v7983_v63  ;;  %1706 = vmatpush1.msra.mxu1 %v7989_v18  ;;  %12385 = vst [vmem:[#allocation161_spill] sm:$0xff] %v7995_v4  ;;  %12386 = vst [vmem:[#allocation165_spill] sm:$0xff] %v8001_v40  ;;  %v8007_v63 = vld [vmem:[%s11233_s4] sm:$0xff] }
 0x489   :  { %1636 = vmatprep.subr.mxu0 %v7995_v4  ;;  %1707 = vmatprep.subr.mxu1 %v8001_v40  ;;  %12387 = vst [vmem:[#allocation166_spill] sm:$0xff] %v8007_v63  ;;  %v8014_v4 = vld [vmem:[%s11233_s4 + $0x10] sm:$0xff]  ;;  %v1426_v40 = vpop.permute.xlu1 %1425 }
 0x48a   :  { %1637 = vmatpush1.msra.mxu0 %v8007_v63  ;;  %1670 = vmatprep.mubr.f32.mxu0 %v12085_v22  ;;  %12388 = vst [vmem:[#allocation167_spill] sm:$0xff] %v8014_v4  ;;  %v1428_v18 = vmul.f32 %v1426_v40, %v12224_v32  ;;  %v1429_v63 = vmul.f32 %v1426_v40, %v12225_v35 }
 0x48b   :  { %1708 = vmatpush1.msra.mxu1 %v8014_v4  ;;  %1741 = vmatprep.mubr.f32.mxu1 %v12085_v22  ;;  %v1431_v32 = vmul.f32 %v1426_v40, %v12228_v48  ;;  %v1430_v39 = vmul.f32 %v1426_v40, %v6576_v55 }
 0x48c   :  { %1776 = vmatprep.subr.mxu0 %v6819_v28  ;;  %1847 = vmatprep.subr.mxu1 %v6825_v53  ;;  %v1432_v52 = vadd.f32 %v1428_v18, %v12226_v37  ;;  %v1433_v4 = vadd.f32 %v1429_v63, %v12227_v41 }
 0x48d   :  { %v1435_v18 = vadd.f32 %v1431_v32, %v12229_v1  ;;  %v1434_v63 = vadd.f32 %v1430_v39, %v6580_v56 }
 0x509   :  { %v8021_v29 = vpop.f32.mrf.mxu0  ;;  %v8027_v11 = vpop.f32.mrf.mxu1 }
 0x50b   :  { %v8025_v14 = vpop.f32.mrf.mxu0  ;;  %v8030_v9 = vpop.f32.mrf.mxu1 }
 0x52a   :  { %v1502_v10 = vpop.f32.mrf.mxu0  ;;  %v1573_v12 = vpop.f32.mrf.mxu1 }
 0x52b   :  { %v1578_v7 = vadd.f32 %v1502_v10, %v1432_v52  ;;  %v1580_v41 = vadd.f32 %v1573_v12, %v1434_v63  ;;  %v12422_v63 = vld [vmem:[#allocation28_spill] sm:$0xff] }
 0x52c   :  { %v1504_v28 = vpop.f32.mrf.mxu0  ;;  %v1575_v37 = vpop.f32.mrf.mxu1 }
 0x52d   :  { %v4357_v53 = vmul.f32 -1.442695, %v1578_v7  ;;  %v1579_v8 = vadd.f32 %v1504_v28, %v1433_v4  ;;  %v1581_v34 = vadd.f32 %v1575_v37, %v1435_v18  ;;  %v12421_v18 = vld [vmem:[#allocation27_spill] sm:$0xff] }
 0x52f   :  { %4529 = vpow2.f32 %v4357_v53  ;;  %v4358_v35 = vmul.f32 -1.442695, %v1579_v8  ;;  %v4359_v10 = vmul.f32 -1.442695, %v1581_v34 }
 0x531   :  { %4531 = vpow2.f32 %v4358_v35 }
 0x532   :  { %4533 = vpow2.f32 %v4359_v10  ;;  %v12423_v10 = vld [vmem:[#allocation29_spill] sm:$0xff] }
 0x53c   :  { %v4530_v52 = vpop.eup %4529 }
 0x53d   :  { %v1585_v13 = vadd.f32 1.0, %v4530_v52  ;;  %v12424_v52 = vld [vmem:[#allocation30_spill] sm:$0xff] }
 0x53e   :  { %v4532_v7 = vpop.eup %4531 }
 0x53f   :  { %4535 = vrcp.f32 %v1585_v13  ;;  %v1591_v4 = vadd.f32 1.0, %v4532_v7  ;;  %v4534_v8 = vpop.eup %4533  ;;  %v12420_v13 = vld [vmem:[#allocation26_spill] sm:$0xff]  ;;  %v5304_v7 = vmov 3  }
 0x540   :  { %4537 = vtanh.f32 %v1580_v41  ;;  %v1598_v53 = vadd.f32 1.0, %v4534_v8  ;;  %v12389_v41 = vld [vmem:[#allocation4_spill] sm:$0xff]  ;;  %4459 = vset.pattern.permute.xlu1 %v5304_v7  ;;  %v12426_v8 = vld [vmem:[#allocation3_spill] sm:$0xff]  ;;  %v12449_v7 = vld [vmem:[#allocation54_spill] sm:$0xff] }
 0x541   :  { %4539 = vrcp.f32 %v1591_v4  ;;  %v12425_v4 = vld [vmem:[#allocation31_spill] sm:$0xff] }
 0x542   :  { %4541 = vrcp.f32 %v1598_v53  ;;  %1919 = vperm.xlu1 %4459, %v12425_v4   ;;  %v12450_v4 = vld [vmem:[#allocation55_spill] sm:$0xff] }
 0x54c   :  { %v4536_v35 = vpop.eup %4535 }
 0x54d   :  { %v4538_v28 = vpop.eup %4537 }
 0x54e   :  { %v4540_v32 = vpop.eup %4539  ;;  %v1602_v1 = vmul.f32 %v4538_v28, %v4536_v35  ;;  %v1349_v35 = vadd.f32 %v8021_v29, %v12426_v8  ;;  %v1420_v29 = vadd.f32 %v8027_v11, %v6675_v46 }
 0x54f   :  { %v1601_v37 = vmul.f32 %v4540_v32, %v6845_v15  ;;  %v4542_v34 = vpop.eup %4541  ;;  %v12391_v15 = vld [vmem:[#allocation6_spill] sm:$0xff]  ;;  %v1351_v32 = vadd.f32 %v8025_v14, %v6665_v31 }
 0x551   :  { %v8037_v40 = vadd.f32 %v1602_v1, %v1601_v37  ;;  %v12390_v1 = vld [vmem:[#allocation5_spill] sm:$0xff] }
 0x553   :  { %4543 = vtanh.f32 %v8037_v40 }
 0x560   :  { %v4544_v39 = vpop.eup %4543 }
 0x561   :  { %v8040_v12 = vmul.f32 %v4544_v39, %v4542_v34 }
 0x563   :  { %1671 = vmatmul.mubr.f32.vlgmr.msra.gmra.mxu0 %v8040_v12  ;;  %1742 = vmatmul.mubr.f32.vlgmr.msra.gmra.mxu1 %v8040_v12 }
 0x564   :  { %1777 = vmatpush1.msra.mxu0 %v6855_v19  ;;  %1848 = vmatpush1.msra.mxu1 %v6861_v49  ;;  %v12392_v19 = vld [vmem:[#allocation7_spill] sm:$0xff]  ;;  %v12393_v49 = vld [vmem:[#allocation8_spill] sm:$0xff] }
 0x565   :  { %1778 = vmatprep.subr.mxu0 %v6867_v20  ;;  %1849 = vmatprep.subr.mxu1 %v6873_v21  ;;  %v12394_v20 = vld [vmem:[#allocation9_spill] sm:$0xff]  ;;  %v12395_v21 = vld [vmem:[#allocation10_spill] sm:$0xff] }
 0x566   :  { %1779 = vmatpush1.msra.mxu0 %v6879_v23  ;;  %1850 = vmatpush1.msra.mxu1 %v6885_v24  ;;  %v12396_v23 = vld [vmem:[#allocation11_spill] sm:$0xff]  ;;  %v12397_v24 = vld [vmem:[#allocation12_spill] sm:$0xff] }
 0x567   :  { %1780 = vmatprep.subr.mxu0 %v6891_v25  ;;  %1851 = vmatprep.subr.mxu1 %v6897_v26  ;;  %v12398_v25 = vld [vmem:[#allocation13_spill] sm:$0xff]  ;;  %v12399_v26 = vld [vmem:[#allocation14_spill] sm:$0xff] }
 0x568   :  { %1781 = vmatpush1.msra.mxu0 %v6903_v27  ;;  %1852 = vmatpush1.msra.mxu1 %v6909_v30  ;;  %v12400_v27 = vld [vmem:[#allocation15_spill] sm:$0xff]  ;;  %v12401_v30 = vld [vmem:[#allocation16_spill] sm:$0xff] }
 0x569   :  { %1782 = vmatprep.subr.mxu0 %v6915_v33  ;;  %1853 = vmatprep.subr.mxu1 %v6921_v36  ;;  %v12402_v33 = vld [vmem:[#allocation17_spill] sm:$0xff]  ;;  %v12403_v36 = vld [vmem:[#allocation18_spill] sm:$0xff] }
 0x56a   :  { %1783 = vmatpush1.msra.mxu0 %v6927_v38  ;;  %1854 = vmatpush1.msra.mxu1 %v6933_v42  ;;  %v12404_v38 = vld [vmem:[#allocation19_spill] sm:$0xff]  ;;  %v12405_v42 = vld [vmem:[#allocation20_spill] sm:$0xff] }
 0x56b   :  { %1784 = vmatprep.subr.mxu0 %v6939_v43  ;;  %1855 = vmatprep.subr.mxu1 %v6945_v45  ;;  %v12406_v43 = vld [vmem:[#allocation21_spill] sm:$0xff]  ;;  %v12407_v45 = vld [vmem:[#allocation22_spill] sm:$0xff] }
 0x56c   :  { %1785 = vmatpush1.msra.mxu0 %v6951_v51  ;;  %1856 = vmatpush1.msra.mxu1 %v6957_v61  ;;  %v12408_v51 = vld [vmem:[#allocation23_spill] sm:$0xff]  ;;  %v12409_v61 = vld [vmem:[#allocation86_spill] sm:$0xff] }
 0x56d   :  { %1786 = vmatprep.subr.mxu0 %v6963_v57  ;;  %1857 = vmatprep.subr.mxu1 %v6969_v58  ;;  %v12410_v57 = vld [vmem:[#allocation151_spill] sm:$0xff]  ;;  %v12411_v58 = vld [vmem:[#allocation152_spill] sm:$0xff] }
 0x56e   :  { %1787 = vmatpush1.msra.mxu0 %v6975_v62  ;;  %1858 = vmatpush1.msra.mxu1 %v6981_v47  ;;  %v12412_v62 = vld [vmem:[#allocation156_spill] sm:$0xff]  ;;  %v12413_v47 = vld [vmem:[#allocation158_spill] sm:$0xff] }
 0x56f   :  { %1788 = vmatprep.subr.mxu0 %v6987_v60  ;;  %1859 = vmatprep.subr.mxu1 %v6993_v3  ;;  %v12414_v60 = vld [vmem:[#allocation159_spill] sm:$0xff] }
 0x570   :  { %1789 = vmatpush1.msra.mxu0 %v6999_v54  ;;  %1860 = vmatpush1.msra.mxu1 %v7005_v0  ;;  %v12415_v3 = vld [vmem:[#allocation163_spill] sm:$0xff]  ;;  %v12416_v54 = vld [vmem:[#allocation162_spill] sm:$0xff]  ;;  %v12417_v0 = vld [vmem:[#allocation160_spill] sm:$0xff] }
 0x571   :  { %1790 = vmatprep.subr.mxu0 %v7011_v59  ;;  %1861 = vmatprep.subr.mxu1 %v7017_v50  ;;  %v12418_v59 = vld [vmem:[#allocation24_spill] sm:$0xff]  ;;  %v12419_v50 = vld [vmem:[#allocation25_spill] sm:$0xff] }
 0x572   :  { %1791 = vmatpush1.msra.mxu0 %v12389_v41  ;;  %1862 = vmatpush1.msra.mxu1 %v12390_v1 }
 0x573   :  { %1792 = vmatprep.subr.mxu0 %v12391_v15  ;;  %1863 = vmatprep.subr.mxu1 %v12392_v19  ;;  %v1422_v19 = vadd.f32 %v8030_v9, %v6672_v44 }
 0x574   :  { %1793 = vmatpush1.msra.mxu0 %v12393_v49  ;;  %1864 = vmatpush1.msra.mxu1 %v12394_v20 }
 0x575   :  { %1794 = vmatprep.subr.mxu0 %v12395_v21  ;;  %1865 = vmatprep.subr.mxu1 %v12396_v23 }
 0x576   :  { %1795 = vmatpush1.msra.mxu0 %v12397_v24  ;;  %1866 = vmatpush1.msra.mxu1 %v12398_v25 }
 0x577   :  { %1796 = vmatprep.subr.mxu0 %v12399_v26  ;;  %1867 = vmatprep.subr.mxu1 %v12400_v27 }
 0x578   :  { %1797 = vmatpush1.msra.mxu0 %v12401_v30  ;;  %1868 = vmatpush1.msra.mxu1 %v12402_v33 }
 0x579   :  { %1798 = vmatprep.subr.mxu0 %v12403_v36  ;;  %1869 = vmatprep.subr.mxu1 %v12404_v38 }
 0x57a   :  { %1799 = vmatpush1.msra.mxu0 %v12405_v42  ;;  %1870 = vmatpush1.msra.mxu1 %v12406_v43 }
 0x57b   :  { %1800 = vmatprep.subr.mxu0 %v12407_v45  ;;  %1871 = vmatprep.subr.mxu1 %v12408_v51  ;;  %v12427_v51 = vld [vmem:[#allocation32_spill] sm:$0xff] }
 0x57c   :  { %1801 = vmatpush1.msra.mxu0 %v12409_v61  ;;  %1872 = vmatpush1.msra.mxu1 %v12410_v57  ;;  %v12429_v61 = vld [vmem:[#allocation34_spill] sm:$0xff]  ;;  %v12430_v57 = vld [vmem:[#allocation35_spill] sm:$0xff] }
 0x57d   :  { %1802 = vmatprep.subr.mxu0 %v12411_v58  ;;  %1873 = vmatprep.subr.mxu1 %v12412_v62  ;;  %v12431_v58 = vld [vmem:[#allocation36_spill] sm:$0xff]  ;;  %v12432_v62 = vld [vmem:[#allocation37_spill] sm:$0xff] }
 0x57e   :  { %1803 = vmatpush1.msra.mxu0 %v12413_v47  ;;  %1874 = vmatpush1.msra.mxu1 %v12414_v60  ;;  %v12433_v47 = vld [vmem:[#allocation38_spill] sm:$0xff]  ;;  %v12438_v60 = vld [vmem:[#allocation43_spill] sm:$0xff] }
 0x57f   :  { %1804 = vmatprep.subr.mxu0 %v12415_v3  ;;  %1875 = vmatprep.subr.mxu1 %v12416_v54  ;;  %v12439_v3 = vld [vmem:[#allocation44_spill] sm:$0xff]  ;;  %v12440_v54 = vld [vmem:[#allocation45_spill] sm:$0xff] }
 0x580   :  { %1805 = vmatpush1.msra.mxu0 %v12417_v0  ;;  %1876 = vmatpush1.msra.mxu1 %v12418_v59  ;;  %v12441_v0 = vld [vmem:[#allocation46_spill] sm:$0xff]  ;;  %v12442_v59 = vld [vmem:[#allocation47_spill] sm:$0xff] }
 0x581   :  { %1806 = vmatprep.subr.mxu0 %v12419_v50  ;;  %1877 = vmatprep.subr.mxu1 %v12420_v13  ;;  %v12443_v50 = vld [vmem:[#allocation48_spill] sm:$0xff]  ;;  %v12444_v13 = vld [vmem:[#allocation49_spill] sm:$0xff] }
 0x582   :  { %1807 = vmatpush1.msra.mxu0 %v12421_v18  ;;  %1878 = vmatpush1.msra.mxu1 %v12422_v63  ;;  %v12445_v18 = vld [vmem:[#allocation50_spill] sm:$0xff]  ;;  %v12446_v63 = vld [vmem:[#allocation51_spill] sm:$0xff] }
 0x583   :  { %1840 = vmatprep.mubr.f32.mxu0 %v12085_v22  ;;  %1911 = vmatprep.mubr.f32.mxu1 %v12085_v22 }
 0x584   :  { %1930 = vmatprep.subr.mxu0 %v12423_v10  ;;  %2001 = vmatprep.subr.mxu1 %v12424_v52  ;;  %v12447_v10 = vld [vmem:[#allocation52_spill] sm:$0xff]  ;;  %v12448_v52 = vld [vmem:[#allocation53_spill] sm:$0xff] }
 0x623   :  { %v1672_v28 = vpop.f32.mrf.mxu0  ;;  %v1743_v41 = vpop.f32.mrf.mxu1 }
 0x624   :  { %v1748_v53 = vadd.f32 %v1672_v28, %v1349_v35  ;;  %v1750_v20 = vadd.f32 %v1743_v41, %v1420_v29  ;;  %v12451_v35 = vld [vmem:[#allocation56_spill] sm:$0xff]  ;;  %v12452_v28 = vld [vmem:[#allocation57_spill] sm:$0xff]  ;;  %v12458_v41 = vld [vmem:[#allocation63_spill] sm:$0xff] }
 0x625   :  { %v1674_v37 = vpop.f32.mrf.mxu0  ;;  %v1745_v15 = vpop.f32.mrf.mxu1  ;;  %v12463_v29 = vld [vmem:[#allocation68_spill] sm:$0xff] }
 0x626   :  { %v4360_v34 = vmul.f32 -1.442695, %v1748_v53  ;;  %v1749_v39 = vadd.f32 %v1674_v37, %v1351_v32  ;;  %v1751_v49 = vadd.f32 %v1745_v15, %v1422_v19  ;;  %v12453_v32 = vld [vmem:[#allocation58_spill] sm:$0xff]  ;;  %v12454_v53 = vld [vmem:[#allocation59_spill] sm:$0xff]  ;;  %v12455_v37 = vld [vmem:[#allocation60_spill] sm:$0xff] }
 0x627   :  { %v12460_v15 = vld [vmem:[#allocation65_spill] sm:$0xff]  ;;  %v12461_v19 = vld [vmem:[#allocation66_spill] sm:$0xff] }
 0x628   :  { %4545 = vpow2.f32 %v4360_v34  ;;  %v4361_v1 = vmul.f32 -1.442695, %v1749_v39  ;;  %v4362_v21 = vmul.f32 -1.442695, %v1751_v49  ;;  %v12456_v34 = vld [vmem:[#allocation61_spill] sm:$0xff]  ;;  %v12457_v39 = vld [vmem:[#allocation62_spill] sm:$0xff] }
 0x629   :  { %v12462_v49 = vld [vmem:[#allocation67_spill] sm:$0xff] }
 0x62a   :  { %4547 = vpow2.f32 %v4361_v1  ;;  %v12459_v1 = vld [vmem:[#allocation64_spill] sm:$0xff] }
 0x62b   :  { %4549 = vtanh.f32 %v1750_v20  ;;  %v12464_v20 = vld [vmem:[#allocation69_spill] sm:$0xff] }
 0x62c   :  { %4551 = vpow2.f32 %v4362_v21  ;;  %v12465_v21 = vld [vmem:[#allocation70_spill] sm:$0xff] }
 0x635   :  { %v4546_v23 = vpop.eup %4545 }
 0x636   :  { %v1755_v14 = vadd.f32 1.0, %v4546_v23  ;;  %v12466_v23 = vld [vmem:[#allocation71_spill] sm:$0xff] }
 0x637   :  { %v4548_v24 = vpop.eup %4547 }
 0x638   :  { %4553 = vrcp.f32 %v1755_v14  ;;  %v1761_v25 = vadd.f32 1.0, %v4548_v24  ;;  %v4550_v26 = vpop.eup %4549  ;;  %v12467_v14 = vld [vmem:[#allocation72_spill] sm:$0xff]  ;;  %v12468_v24 = vld [vmem:[#allocation73_spill] sm:$0xff] }
 0x639   :  { %v4552_v27 = vpop.eup %4551 }
 0x63a   :  { %4555 = vrcp.f32 %v1761_v25  ;;  %v1768_v9 = vadd.f32 1.0, %v4552_v27  ;;  %v12469_v25 = vld [vmem:[#allocation74_spill] sm:$0xff]  ;;  %v12471_v27 = vld [vmem:[#allocation76_spill] sm:$0xff] }
 0x63c   :  { %4557 = vrcp.f32 %v1768_v9  ;;  %v12475_v9 = vld [vmem:[#allocation80_spill] sm:$0xff] }
 0x645   :  { %v4554_v30 = vpop.eup %4553 }
 0x646   :  { %v1772_v33 = vmul.f32 %v4554_v30, %v4550_v26  ;;  %v12470_v26 = vld [vmem:[#allocation75_spill] sm:$0xff]  ;;  %v12472_v30 = vld [vmem:[#allocation77_spill] sm:$0xff] }
 0x647   :  { %v4556_v36 = vpop.eup %4555 }
 0x648   :  { %v1771_v38 = vmul.f32 %v4556_v36, %v7253_v5  ;;  %v12428_v5 = vld [vmem:[#allocation33_spill] sm:$0xff]  ;;  %v12474_v36 = vld [vmem:[#allocation79_spill] sm:$0xff] }
 0x649   :  { %v4558_v11 = vpop.eup %4557 }
 0x64a   :  { %v8120_v42 = vadd.f32 %v1772_v33, %v1771_v38  ;;  %v12473_v33 = vld [vmem:[#allocation78_spill] sm:$0xff]  ;;  %v12476_v38 = vld [vmem:[#allocation81_spill] sm:$0xff] }
 0x64c   :  { %4559 = vtanh.f32 %v8120_v42 }
 0x659   :  { %v4560_v43 = vpop.eup %4559 }
 0x65a   :  { %v1775_v45 = vmul.f32 %v4560_v43, %v4558_v11  ;;  %v12477_v11 = vld [vmem:[#allocation82_spill] sm:$0xff]  ;;  %v12478_v43 = vld [vmem:[#allocation83_spill] sm:$0xff] }
 0x65c   :  { %1841 = vmatmul.mubr.f32.vlgmr.msra.gmra.mxu0 %v1775_v45  ;;  %1912 = vmatmul.mubr.f32.vlgmr.msra.gmra.mxu1 %v1775_v45  ;;  %v12479_v45 = vld [vmem:[#allocation84_spill] sm:$0xff] }
 0x65d   :  { %1931 = vmatpush1.msra.mxu0 %v7259_v2  ;;  %2002 = vmatpush1.msra.mxu1 %v7265_v6  ;;  %v12434_v2 = vld [vmem:[#allocation39_spill] sm:$0xff]  ;;  %v12435_v6 = vld [vmem:[#allocation40_spill] sm:$0xff] }
 0x65e   :  { %1932 = vmatprep.subr.mxu0 %v7271_v16  ;;  %2003 = vmatprep.subr.mxu1 %v7277_v17  ;;  %v12436_v16 = vld [vmem:[#allocation41_spill] sm:$0xff]  ;;  %v12437_v17 = vld [vmem:[#allocation42_spill] sm:$0xff] }
 0x65f   :  { %1933 = vmatpush1.msra.mxu0 %v12427_v51  ;;  %2004 = vmatpush1.msra.mxu1 %v12428_v5  ;;  %v12480_v51 = vld [vmem:[#allocation85_spill] sm:$0xff]  ;;  %v12481_v5 = vld [vmem:[#allocation87_spill] sm:$0xff] }
 0x660   :  { %1934 = vmatprep.subr.mxu0 %v12429_v61  ;;  %2005 = vmatprep.subr.mxu1 %v12430_v57  ;;  %v12482_v61 = vld [vmem:[#allocation88_spill] sm:$0xff]  ;;  %v12483_v57 = vld [vmem:[#allocation89_spill] sm:$0xff] }
 0x661   :  { %1935 = vmatpush1.msra.mxu0 %v12431_v58  ;;  %2006 = vmatpush1.msra.mxu1 %v12432_v62  ;;  %v12484_v58 = vld [vmem:[#allocation90_spill] sm:$0xff]  ;;  %v12485_v62 = vld [vmem:[#allocation91_spill] sm:$0xff] }
 0x662   :  { %1936 = vmatprep.subr.mxu0 %v12433_v47  ;;  %2007 = vmatprep.subr.mxu1 %v12434_v2  ;;  %v12486_v47 = vld [vmem:[#allocation92_spill] sm:$0xff]  ;;  %v12487_v2 = vld [vmem:[#allocation93_spill] sm:$0xff] }
 0x663   :  { %1937 = vmatpush1.msra.mxu0 %v12435_v6  ;;  %2008 = vmatpush1.msra.mxu1 %v12436_v16  ;;  %v12488_v6 = vld [vmem:[#allocation94_spill] sm:$0xff]  ;;  %v12489_v16 = vld [vmem:[#allocation95_spill] sm:$0xff] }
 0x664   :  { %1938 = vmatprep.subr.mxu0 %v12437_v17  ;;  %2009 = vmatprep.subr.mxu1 %v12438_v60  ;;  %v12490_v17 = vld [vmem:[#allocation96_spill] sm:$0xff]  ;;  %v12491_v60 = vld [vmem:[#allocation97_spill] sm:$0xff] }
 0x665   :  { %1939 = vmatpush1.msra.mxu0 %v12439_v3  ;;  %2010 = vmatpush1.msra.mxu1 %v12440_v54  ;;  %v12492_v3 = vld [vmem:[#allocation98_spill] sm:$0xff]  ;;  %v12493_v54 = vld [vmem:[#allocation99_spill] sm:$0xff] }
 0x666   :  { %1940 = vmatprep.subr.mxu0 %v12441_v0  ;;  %2011 = vmatprep.subr.mxu1 %v12442_v59  ;;  %v12494_v0 = vld [vmem:[#allocation100_spill] sm:$0xff]  ;;  %v12496_v59 = vld [vmem:[#allocation102_spill] sm:$0xff] }
 0x667   :  { %1941 = vmatpush1.msra.mxu0 %v12443_v50  ;;  %2012 = vmatpush1.msra.mxu1 %v12444_v13  ;;  %v12497_v50 = vld [vmem:[#allocation103_spill] sm:$0xff]  ;;  %v12498_v13 = vld [vmem:[#allocation104_spill] sm:$0xff] }
 0x668   :  { %1942 = vmatprep.subr.mxu0 %v12445_v18  ;;  %2013 = vmatprep.subr.mxu1 %v12446_v63  ;;  %v12499_v18 = vld [vmem:[#allocation105_spill] sm:$0xff]  ;;  %v12500_v63 = vld [vmem:[#allocation106_spill] sm:$0xff] }
 0x669   :  { %1943 = vmatpush1.msra.mxu0 %v12447_v10  ;;  %2014 = vmatpush1.msra.mxu1 %v12448_v52  ;;  %v12501_v10 = vld [vmem:[#allocation107_spill] sm:$0xff]  ;;  %v12502_v52 = vld [vmem:[#allocation108_spill] sm:$0xff] }
 0x66a   :  { %1944 = vmatprep.subr.mxu0 %v12449_v7  ;;  %2015 = vmatprep.subr.mxu1 %v12450_v4  ;;  %v12503_v7 = vld [vmem:[#allocation109_spill] sm:$0xff]  ;;  %v12504_v4 = vld [vmem:[#allocation110_spill] sm:$0xff] }
 0x66b   :  { %1945 = vmatpush1.msra.mxu0 %v12451_v35  ;;  %2016 = vmatpush1.msra.mxu1 %v12452_v28  ;;  %v12505_v35 = vld [vmem:[#allocation111_spill] sm:$0xff]  ;;  %v12506_v28 = vld [vmem:[#allocation112_spill] sm:$0xff] }
 0x66c   :  { %1946 = vmatprep.subr.mxu0 %v12453_v32  ;;  %2017 = vmatprep.subr.mxu1 %v12454_v53  ;;  %v12507_v32 = vld [vmem:[#allocation113_spill] sm:$0xff]  ;;  %v12508_v53 = vld [vmem:[#allocation114_spill] sm:$0xff] }
 0x66d   :  { %1947 = vmatpush1.msra.mxu0 %v12455_v37  ;;  %2018 = vmatpush1.msra.mxu1 %v12456_v34  ;;  %v12509_v37 = vld [vmem:[#allocation115_spill] sm:$0xff]  ;;  %v12510_v34 = vld [vmem:[#allocation116_spill] sm:$0xff] }
 0x66e   :  { %1948 = vmatprep.subr.mxu0 %v12457_v39  ;;  %2019 = vmatprep.subr.mxu1 %v12458_v41  ;;  %v12511_v39 = vld [vmem:[#allocation117_spill] sm:$0xff]  ;;  %v12512_v41 = vld [vmem:[#allocation118_spill] sm:$0xff] }
 0x66f   :  { %1949 = vmatpush1.msra.mxu0 %v12459_v1  ;;  %2020 = vmatpush1.msra.mxu1 %v12460_v15  ;;  %v12513_v1 = vld [vmem:[#allocation119_spill] sm:$0xff]  ;;  %v12514_v15 = vld [vmem:[#allocation120_spill] sm:$0xff] }
 0x670   :  { %1950 = vmatprep.subr.mxu0 %v12461_v19  ;;  %2021 = vmatprep.subr.mxu1 %v12462_v49  ;;  %v12515_v19 = vld [vmem:[#allocation121_spill] sm:$0xff]  ;;  %v12516_v49 = vld [vmem:[#allocation122_spill] sm:$0xff] }
 0x671   :  { %1951 = vmatpush1.msra.mxu0 %v12463_v29  ;;  %2022 = vmatpush1.msra.mxu1 %v12464_v20  ;;  %v12517_v29 = vld [vmem:[#allocation123_spill] sm:$0xff]  ;;  %v12518_v20 = vld [vmem:[#allocation124_spill] sm:$0xff] }
 0x672   :  { %1952 = vmatprep.subr.mxu0 %v12465_v21  ;;  %2023 = vmatprep.subr.mxu1 %v12466_v23  ;;  %v12519_v21 = vld [vmem:[#allocation125_spill] sm:$0xff]  ;;  %v12520_v23 = vld [vmem:[#allocation126_spill] sm:$0xff] }
 0x673   :  { %1953 = vmatpush1.msra.mxu0 %v12467_v14  ;;  %2024 = vmatpush1.msra.mxu1 %v12468_v24  ;;  %v12521_v14 = vld [vmem:[#allocation127_spill] sm:$0xff]  ;;  %v12522_v24 = vld [vmem:[#allocation128_spill] sm:$0xff] }
 0x674   :  { %1954 = vmatprep.subr.mxu0 %v12469_v25  ;;  %2025 = vmatprep.subr.mxu1 %v12470_v26  ;;  %v12523_v25 = vld [vmem:[#allocation129_spill] sm:$0xff]  ;;  %v12524_v26 = vld [vmem:[#allocation130_spill] sm:$0xff] }
 0x675   :  { %1955 = vmatpush1.msra.mxu0 %v12471_v27  ;;  %2026 = vmatpush1.msra.mxu1 %v12472_v30  ;;  %v12525_v27 = vld [vmem:[#allocation131_spill] sm:$0xff]  ;;  %v12526_v30 = vld [vmem:[#allocation132_spill] sm:$0xff] }
 0x676   :  { %1956 = vmatprep.subr.mxu0 %v12473_v33  ;;  %2027 = vmatprep.subr.mxu1 %v12474_v36  ;;  %v12527_v33 = vld [vmem:[#allocation133_spill] sm:$0xff]  ;;  %v12528_v36 = vld [vmem:[#allocation134_spill] sm:$0xff] }
 0x677   :  { %1957 = vmatpush1.msra.mxu0 %v12475_v9  ;;  %2028 = vmatpush1.msra.mxu1 %v12476_v38  ;;  %v12529_v9 = vld [vmem:[#allocation135_spill] sm:$0xff]  ;;  %v12530_v38 = vld [vmem:[#allocation136_spill] sm:$0xff] }
 0x678   :  { %1958 = vmatprep.subr.mxu0 %v12477_v11  ;;  %2029 = vmatprep.subr.mxu1 %v12478_v43  ;;  %v12531_v11 = vld [vmem:[#allocation137_spill] sm:$0xff]  ;;  %v12532_v43 = vld [vmem:[#allocation138_spill] sm:$0xff] }
 0x679   :  { %1959 = vmatpush1.msra.mxu0 %v12479_v45  ;;  %2030 = vmatpush1.msra.mxu1 %v12480_v51  ;;  %v12533_v45 = vld [vmem:[#allocation139_spill] sm:$0xff]  ;;  %v12534_v51 = vld [vmem:[#allocation140_spill] sm:$0xff] }
 0x67a   :  { %1960 = vmatprep.subr.mxu0 %v12481_v5  ;;  %2031 = vmatprep.subr.mxu1 %v12482_v61  ;;  %v12535_v5 = vld [vmem:[#allocation141_spill] sm:$0xff]  ;;  %v12536_v61 = vld [vmem:[#allocation142_spill] sm:$0xff] }
 0x67b   :  { %1961 = vmatpush1.msra.mxu0 %v12483_v57  ;;  %1994 = vmatprep.mubr.f32.mxu0 %v12085_v22  ;;  %v12537_v57 = vld [vmem:[#allocation143_spill] sm:$0xff] }
 0x67c   :  { %2032 = vmatpush1.msra.mxu1 %v12484_v58  ;;  %2065 = vmatprep.mubr.f32.mxu1 %v12085_v22  ;;  %v12538_v58 = vld [vmem:[#allocation144_spill] sm:$0xff] }
 0x67d   :  { %1995 = vmatmul.mubr.f32.vlgmr.msra.gmra.mxu0 %v8040_v12  ;;  %2066 = vmatmul.mubr.f32.vlgmr.msra.gmra.mxu1 %v8040_v12  ;;  %v12495_v12 = vld [vmem:[#allocation101_spill] sm:$0xff] }
 0x67e   :  { %2100 = vmatprep.subr.mxu0 %v12485_v62  ;;  %2171 = vmatprep.subr.mxu1 %v12486_v47  ;;  %v12539_v62 = vld [vmem:[#allocation145_spill] sm:$0xff]  ;;  %v12540_v47 = vld [vmem:[#allocation146_spill] sm:$0xff] }
 0x67f   :  { %2101 = vmatpush1.msra.mxu0 %v12487_v2  ;;  %2172 = vmatpush1.msra.mxu1 %v12488_v6  ;;  %v12541_v2 = vld [vmem:[#allocation147_spill] sm:$0xff]  ;;  %v12542_v6 = vld [vmem:[#allocation148_spill] sm:$0xff] }
 0x680   :  { %2102 = vmatprep.subr.mxu0 %v12489_v16  ;;  %2173 = vmatprep.subr.mxu1 %v12490_v17  ;;  %v12543_v16 = vld [vmem:[#allocation149_spill] sm:$0xff]  ;;  %v12544_v17 = vld [vmem:[#allocation150_spill] sm:$0xff] }
 0x681   :  { %2103 = vmatpush1.msra.mxu0 %v12491_v60  ;;  %2174 = vmatpush1.msra.mxu1 %v12492_v3  ;;  %v12545_v60 = vld [vmem:[#allocation161_spill] sm:$0xff] }
 0x682   :  { %2104 = vmatprep.subr.mxu0 %v12493_v54  ;;  %2175 = vmatprep.subr.mxu1 %v12494_v0  ;;  %v12546_v3 = vld [vmem:[#allocation165_spill] sm:$0xff]  ;;  %v12547_v54 = vld [vmem:[#allocation166_spill] sm:$0xff]  ;;  %v12548_v0 = vld [vmem:[#allocation167_spill] sm:$0xff] }
 0x683   :  { %2105 = vmatpush1.msra.mxu0 %v12495_v12  ;;  %2176 = vmatpush1.msra.mxu1 %v12496_v59  ;;  %v8258_v12 = vld [vmem:[%s11230_s5 + $0x1e8] sm:$0xff]  ;;  %v8264_v59 = vld [vmem:[%s11230_s5 + $0x1f8] sm:$0xff] }
 0x684   :  { %2106 = vmatprep.subr.mxu0 %v12497_v50  ;;  %2177 = vmatprep.subr.mxu1 %v12498_v13  ;;  %v1920_v50 = vpop.permute.xlu1 %1919  ;;  %v12549_v13 = vld [vmem:[#allocation153_spill] sm:$0xff] }
 0x685   :  { %2107 = vmatpush1.msra.mxu0 %v12499_v18  ;;  %2178 = vmatpush1.msra.mxu1 %v12500_v63  ;;  %v1922_v18 = vmul.f32 %v1920_v50, %v12549_v13 }
 0x686   :  { %2108 = vmatprep.subr.mxu0 %v12501_v10  ;;  %2179 = vmatprep.subr.mxu1 %v12502_v52  ;;  %v12550_v10 = vld [vmem:[#allocation154_spill] sm:$0xff] }
 0x687   :  { %2109 = vmatpush1.msra.mxu0 %v12503_v7  ;;  %2180 = vmatpush1.msra.mxu1 %v12504_v4  ;;  %v1923_v52 = vmul.f32 %v1920_v50, %v12550_v10  ;;  %v12551_v7 = vld [vmem:[#allocation155_spill] sm:$0xff] }
 0x688   :  { %2110 = vmatprep.subr.mxu0 %v12505_v35  ;;  %2181 = vmatprep.subr.mxu1 %v12506_v28  ;;  %v1926_v4 = vadd.f32 %v1922_v18, %v12551_v7  ;;  %v8354_v18 = vld [vmem:[%s11230_s5 + $0x188] sm:$0xff] }
 0x689   :  { %2111 = vmatpush1.msra.mxu0 %v12507_v32  ;;  %2182 = vmatpush1.msra.mxu1 %v12508_v53  ;;  %v12552_v32 = vld [vmem:[#allocation157_spill] sm:$0xff] }
 0x68a   :  { %2112 = vmatprep.subr.mxu0 %v12509_v37  ;;  %2183 = vmatprep.subr.mxu1 %v12510_v34  ;;  %v1927_v53 = vadd.f32 %v1923_v52, %v12552_v32  ;;  %v8360_v52 = vld [vmem:[%s11230_s5 + $0x198] sm:$0xff] }
 0x68b   :  { %2113 = vmatpush1.msra.mxu0 %v12511_v39  ;;  %2184 = vmatpush1.msra.mxu1 %v12512_v41 }
 0x68c   :  { %2114 = vmatprep.subr.mxu0 %v12513_v1  ;;  %2185 = vmatprep.subr.mxu1 %v12514_v15 }
 0x68d   :  { %2115 = vmatpush1.msra.mxu0 %v12515_v19  ;;  %2186 = vmatpush1.msra.mxu1 %v12516_v49  ;;  %v1925_v19 = vmul.f32 %v1920_v50, %v12228_v48 }
 0x68e   :  { %2116 = vmatprep.subr.mxu0 %v12517_v29  ;;  %2187 = vmatprep.subr.mxu1 %v12518_v20  ;;  %v12553_v20 = vld [vmem:[#allocation164_spill] sm:$0xff] }
 0x68f   :  { %2117 = vmatpush1.msra.mxu0 %v12519_v21  ;;  %2188 = vmatpush1.msra.mxu1 %v12520_v23  ;;  %v1929_v21 = vadd.f32 %v1925_v19, %v12553_v20  ;;  %v8408_v19 = vld [vmem:[%s11230_s5 + $0x158] sm:$0xff] }
 0x690   :  { %2118 = vmatprep.subr.mxu0 %v12521_v14  ;;  %2189 = vmatprep.subr.mxu1 %v12522_v24  ;;  %v1924_v14 = vmul.f32 %v1920_v50, %v6576_v55  ;;  %v8348_v50 = vld [vmem:[%s11230_s5 + $0x1b0] sm:$0xff] }
 0x691   :  { %2119 = vmatpush1.msra.mxu0 %v12523_v25  ;;  %2190 = vmatpush1.msra.mxu1 %v12524_v26 }
 0x692   :  { %2120 = vmatprep.subr.mxu0 %v12525_v27  ;;  %2191 = vmatprep.subr.mxu1 %v12526_v30  ;;  %v1928_v25 = vadd.f32 %v1924_v14, %v6580_v56  ;;  %v8438_v14 = vld [vmem:[%s11230_s5 + $0x120] sm:$0xff] }
 0x693   :  { %2121 = vmatpush1.msra.mxu0 %v12527_v33  ;;  %2192 = vmatpush1.msra.mxu1 %v12528_v36 }
 0x694   :  { %2122 = vmatprep.subr.mxu0 %v12529_v9  ;;  %2193 = vmatprep.subr.mxu1 %v12530_v38 }
 0x695   :  { %2123 = vmatpush1.msra.mxu0 %v12531_v11  ;;  %2194 = vmatpush1.msra.mxu1 %v12532_v43 }
 0x696   :  { %2124 = vmatprep.subr.mxu0 %v12533_v45  ;;  %2195 = vmatprep.subr.mxu1 %v12534_v51 }
 0x697   :  { %2125 = vmatpush1.msra.mxu0 %v12535_v5  ;;  %2196 = vmatpush1.msra.mxu1 %v12536_v61 }
 0x698   :  { %2126 = vmatprep.subr.mxu0 %v12537_v57  ;;  %2197 = vmatprep.subr.mxu1 %v12538_v58 }
 0x699   :  { %2127 = vmatpush1.msra.mxu0 %v12539_v62  ;;  %2198 = vmatpush1.msra.mxu1 %v12540_v47 }
 0x69a   :  { %2128 = vmatprep.subr.mxu0 %v12541_v2  ;;  %2199 = vmatprep.subr.mxu1 %v12542_v6  ;;  %v8294_v2 = vld [vmem:[%s11230_s5 + $0x1e0] sm:$0xff]  ;;  %v8306_v6 = vld [vmem:[%s11230_s5 + $0x1c8] sm:$0xff] }
 0x69b   :  { %2129 = vmatpush1.msra.mxu0 %v12543_v16  ;;  %2200 = vmatpush1.msra.mxu1 %v12544_v17  ;;  %v8312_v16 = vld [vmem:[%s11230_s5 + $0x1d8] sm:$0xff]  ;;  %v8318_v17 = vld [vmem:[%s11230_s5 + $0x1c0] sm:$0xff] }
 0x69c   :  { %2130 = vmatprep.subr.mxu0 %v12545_v60  ;;  %2201 = vmatprep.subr.mxu1 %v12546_v3  ;;  %v8324_v60 = vld [vmem:[%s11230_s5 + $0x1d0] sm:$0xff]  ;;  %v8330_v3 = vld [vmem:[%s11230_s5 + $0x1a8] sm:$0xff] }
 0x69d   :  { %2131 = vmatpush1.msra.mxu0 %v12547_v54  ;;  %2164 = vmatprep.mubr.f32.mxu0 %v12085_v22  ;;  %v8336_v54 = vld [vmem:[%s11230_s5 + $0x1b8] sm:$0xff] }
 0x69e   :  { %2202 = vmatpush1.msra.mxu1 %v12548_v0  ;;  %2235 = vmatprep.mubr.f32.mxu1 %v12085_v22  ;;  %v8342_v0 = vld [vmem:[%s11230_s5 + $0x1a0] sm:$0xff] }
 0x69f   :  { %2270 = vmatprep.subr.mxu0 %v8258_v12  ;;  %2341 = vmatprep.subr.mxu1 %v8264_v59 }
 0x71c   :  { %v8268_v63 = vpop.f32.mrf.mxu0  ;;  %v8274_v28 = vpop.f32.mrf.mxu1 }
 0x71e   :  { %v8272_v35 = vpop.f32.mrf.mxu0  ;;  %v8277_v41 = vpop.f32.mrf.mxu1 }
 0x73d   :  { %v1996_v37 = vpop.f32.mrf.mxu0  ;;  %v2067_v49 = vpop.f32.mrf.mxu1 }
 0x73e   :  { %v2072_v34 = vadd.f32 %v1996_v37, %v1926_v4  ;;  %v2074_v30 = vadd.f32 %v2067_v49, %v1928_v25  ;;  %v8366_v4 = vld [vmem:[%s11230_s5 + $0x180] sm:$0xff]  ;;  %v8378_v37 = vld [vmem:[%s11230_s5 + $0x168] sm:$0xff] }
 0x73f   :  { %v1998_v39 = vpop.f32.mrf.mxu0  ;;  %v2069_v23 = vpop.f32.mrf.mxu1  ;;  %v8414_v49 = vld [vmem:[%s11230_s5 + $0x140] sm:$0xff]  ;;  %v8450_v25 = vld [vmem:[%s11230_s5 + $0x108] sm:$0xff] }
 0x740   :  { %v4363_v1 = vmul.f32 -1.442695, %v2072_v34  ;;  %v2073_v15 = vadd.f32 %v1998_v39, %v1927_v53  ;;  %v2075_v24 = vadd.f32 %v2069_v23, %v1929_v21  ;;  %v8372_v53 = vld [vmem:[%s11230_s5 + $0x190] sm:$0xff]  ;;  %v8384_v34 = vld [vmem:[%s11230_s5 + $0x178] sm:$0xff]  ;;  %v8390_v39 = vld [vmem:[%s11230_s5 + $0x160] sm:$0xff] }
 0x741   :  { %v8426_v21 = vld [vmem:[%s11230_s5 + $0x128] sm:$0xff]  ;;  %v8432_v23 = vld [vmem:[%s11230_s5 + $0x138] sm:$0xff] }
 0x742   :  { %4561 = vpow2.f32 %v4363_v1  ;;  %v4364_v29 = vmul.f32 -1.442695, %v2073_v15  ;;  %v4365_v26 = vmul.f32 -1.442695, %v2075_v24  ;;  %v8396_v1 = vld [vmem:[%s11230_s5 + $0x170] sm:$0xff]  ;;  %v8402_v15 = vld [vmem:[%s11230_s5 + $0x148] sm:$0xff] }
 0x743   :  { %v8444_v24 = vld [vmem:[%s11230_s5 + $0x130] sm:$0xff] }
 0x744   :  { %4563 = vpow2.f32 %v4364_v29  ;;  %v8420_v29 = vld [vmem:[%s11230_s5 + $0x150] sm:$0xff] }
 0x745   :  { %4565 = vpow2.f32 %v4365_v26  ;;  %v8456_v26 = vld [vmem:[%s11230_s5 + $0x118] sm:$0xff] }
 0x74f   :  { %v4562_v27 = vpop.eup %4561 }
 0x750   :  { %v2079_v33 = vadd.f32 1.0, %v4562_v27  ;;  %v8462_v27 = vld [vmem:[%s11230_s5 + $0x100] sm:$0xff] }
 0x751   :  { %v4564_v36 = vpop.eup %4563  ;;  %12554 = vst [vmem:[#allocation4_spill] sm:$0xff] %v8462_v27 }
 0x752   :  { %4567 = vrcp.f32 %v2079_v33  ;;  %v2085_v9 = vadd.f32 1.0, %v4564_v36  ;;  %v4566_v38 = vpop.eup %4565  ;;  %v8474_v33 = vld [vmem:[%s11230_s5 + $0xe8] sm:$0xff]  ;;  %v8480_v36 = vld [vmem:[%s11230_s5 + $0xf8] sm:$0xff] }
 0x753   :  { %4569 = vtanh.f32 %v2074_v30  ;;  %v2092_v51 = vadd.f32 1.0, %v4566_v38  ;;  %v8468_v30 = vld [vmem:[%s11230_s5 + $0x110] sm:$0xff]  ;;  %12556 = vst [vmem:[#allocation6_spill] sm:$0xff] %v8474_v33  ;;  %12557 = vst [vmem:[#allocation7_spill] sm:$0xff] %v8480_v36 }
 0x754   :  { %4571 = vrcp.f32 %v2085_v9  ;;  %12555 = vst [vmem:[#allocation5_spill] sm:$0xff] %v8468_v30  ;;  %v8486_v9 = vld [vmem:[%s11230_s5 + $0xe0] sm:$0xff]  ;;  %v8492_v38 = vld [vmem:[%s11230_s5 + $0xf0] sm:$0xff] }
 0x755   :  { %4573 = vrcp.f32 %v2092_v51  ;;  %12558 = vst [vmem:[#allocation8_spill] sm:$0xff] %v8486_v9  ;;  %12559 = vst [vmem:[#allocation9_spill] sm:$0xff] %v8492_v38  ;;  %v8516_v51 = vld [vmem:[%s11230_s5 + $0xd0] sm:$0xff] }
 0x756   :  { %12563 = vst [vmem:[#allocation13_spill] sm:$0xff] %v8516_v51 }
 0x75f   :  { %v4568_v11 = vpop.eup %4567 }
 0x760   :  { %v4570_v43 = vpop.eup %4569 }
 0x761   :  { %v4572_v45 = vpop.eup %4571  ;;  %v2096_v5 = vmul.f32 %v4570_v43, %v4568_v11  ;;  %v8498_v11 = vld [vmem:[%s11230_s5 + $0xc8] sm:$0xff]  ;;  %v8504_v43 = vld [vmem:[%s11230_s5 + $0xd8] sm:$0xff] }
 0x762   :  { %v2095_v61 = vmul.f32 %v4572_v45, %v8037_v40  ;;  %v4574_v58 = vpop.eup %4573  ;;  %v8300_v40 = vld [vmem:[%s11230_s5 + $0x1f0] sm:$0xff]  ;;  %12560 = vst [vmem:[#allocation10_spill] sm:$0xff] %v8498_v11  ;;  %12561 = vst [vmem:[#allocation11_spill] sm:$0xff] %v8504_v43  ;;  %v8510_v45 = vld [vmem:[%s11230_s5 + $0xc0] sm:$0xff] }
 0x763   :  { %12562 = vst [vmem:[#allocation12_spill] sm:$0xff] %v8510_v45 }
 0x764   :  { %v8284_v57 = vadd.f32 %v2096_v5, %v2095_v61  ;;  %v8522_v5 = vld [vmem:[%s11230_s5 + $0xa8] sm:$0xff]  ;;  %v8528_v61 = vld [vmem:[%s11230_s5 + $0xb8] sm:$0xff] }
 0x765   :  { %12564 = vst [vmem:[#allocation14_spill] sm:$0xff] %v8522_v5  ;;  %12565 = vst [vmem:[#allocation15_spill] sm:$0xff] %v8528_v61 }
 0x766   :  { %4575 = vtanh.f32 %v8284_v57 }
 0x773   :  { %v4576_v62 = vpop.eup %4575 }
 0x774   :  { %v8287_v47 = vmul.f32 %v4576_v62, %v4574_v58  ;;  %v8534_v58 = vld [vmem:[%s11230_s5 + $0xa0] sm:$0xff]  ;;  %v8540_v62 = vld [vmem:[%s11230_s5 + $0xb0] sm:$0xff] }
 0x775   :  { %12566 = vst [vmem:[#allocation16_spill] sm:$0xff] %v8534_v58  ;;  %12567 = vst [vmem:[#allocation17_spill] sm:$0xff] %v8540_v62 }
 0x776   :  { %2165 = vmatmul.mubr.f32.vlgmr.msra.gmra.mxu0 %v8287_v47  ;;  %2236 = vmatmul.mubr.f32.vlgmr.msra.gmra.mxu1 %v8287_v47 }
 0x777   :  { %2271 = vmatpush1.msra.mxu0 %v8294_v2  ;;  %2342 = vmatpush1.msra.mxu1 %v8300_v40 }
 0x778   :  { %2272 = vmatprep.subr.mxu0 %v8306_v6  ;;  %2343 = vmatprep.subr.mxu1 %v8312_v16 }
 0x779   :  { %2273 = vmatpush1.msra.mxu0 %v8318_v17  ;;  %2344 = vmatpush1.msra.mxu1 %v8324_v60 }
 0x77a   :  { %2274 = vmatprep.subr.mxu0 %v8330_v3  ;;  %2345 = vmatprep.subr.mxu1 %v8336_v54 }
 0x77b   :  { %2275 = vmatpush1.msra.mxu0 %v8342_v0  ;;  %2346 = vmatpush1.msra.mxu1 %v8348_v50 }
 0x77c   :  { %2276 = vmatprep.subr.mxu0 %v8354_v18  ;;  %2347 = vmatprep.subr.mxu1 %v8360_v52 }
 0x77d   :  { %2277 = vmatpush1.msra.mxu0 %v8366_v4  ;;  %2348 = vmatpush1.msra.mxu1 %v8372_v53 }
 0x77e   :  { %2278 = vmatprep.subr.mxu0 %v8378_v37  ;;  %2349 = vmatprep.subr.mxu1 %v8384_v34 }
 0x77f   :  { %2279 = vmatpush1.msra.mxu0 %v8390_v39  ;;  %2350 = vmatpush1.msra.mxu1 %v8396_v1 }
 0x780   :  { %2280 = vmatprep.subr.mxu0 %v8402_v15  ;;  %2351 = vmatprep.subr.mxu1 %v8408_v19 }
 0x781   :  { %2281 = vmatpush1.msra.mxu0 %v8414_v49  ;;  %2352 = vmatpush1.msra.mxu1 %v8420_v29 }
 0x782   :  { %2282 = vmatprep.subr.mxu0 %v8426_v21  ;;  %2353 = vmatprep.subr.mxu1 %v8432_v23 }
 0x783   :  { %2283 = vmatpush1.msra.mxu0 %v8438_v14  ;;  %2354 = vmatpush1.msra.mxu1 %v8444_v24 }
 0x784   :  { %2284 = vmatprep.subr.mxu0 %v8450_v25  ;;  %2355 = vmatprep.subr.mxu1 %v8456_v26 }
 0x785   :  { %2285 = vmatpush1.msra.mxu0 %v8462_v27  ;;  %2356 = vmatpush1.msra.mxu1 %v8468_v30 }
 0x786   :  { %2286 = vmatprep.subr.mxu0 %v8474_v33  ;;  %2357 = vmatprep.subr.mxu1 %v8480_v36  ;;  %v1916_v33 = vadd.f32 %v8277_v41, %v6672_v44 }
 0x787   :  { %2287 = vmatpush1.msra.mxu0 %v8486_v9  ;;  %2358 = vmatpush1.msra.mxu1 %v8492_v38 }
 0x788   :  { %2288 = vmatprep.subr.mxu0 %v8498_v11  ;;  %2359 = vmatprep.subr.mxu1 %v8504_v43 }
 0x789   :  { %2289 = vmatpush1.msra.mxu0 %v8510_v45  ;;  %2360 = vmatpush1.msra.mxu1 %v8516_v51  ;;  %v1843_v51 = vadd.f32 %v8268_v63, %v12426_v8  ;;  %v1845_v45 = vadd.f32 %v8272_v35, %v6665_v31  ;;  %v1914_v63 = vadd.f32 %v8274_v28, %v6675_v46 }
 0x78a   :  { %2290 = vmatprep.subr.mxu0 %v8522_v5  ;;  %2361 = vmatprep.subr.mxu1 %v8528_v61  ;;  %v8546_v5 = vld [vmem:[%s11230_s5 + $0x88] sm:$0xff]  ;;  %v8552_v61 = vld [vmem:[%s11230_s5 + $0x98] sm:$0xff] }
 0x78b   :  { %2291 = vmatpush1.msra.mxu0 %v8534_v58  ;;  %2362 = vmatpush1.msra.mxu1 %v8540_v62  ;;  %12568 = vst [vmem:[#allocation18_spill] sm:$0xff] %v8546_v5  ;;  %12569 = vst [vmem:[#allocation19_spill] sm:$0xff] %v8552_v61  ;;  %v8558_v58 = vld [vmem:[%s11230_s5 + $0x80] sm:$0xff]  ;;  %v8564_v62 = vld [vmem:[%s11230_s5 + $0x90] sm:$0xff] }
 0x78c   :  { %2292 = vmatprep.subr.mxu0 %v8546_v5  ;;  %2363 = vmatprep.subr.mxu1 %v8552_v61  ;;  %12570 = vst [vmem:[#allocation20_spill] sm:$0xff] %v8558_v58  ;;  %12571 = vst [vmem:[#allocation21_spill] sm:$0xff] %v8564_v62  ;;  %v8570_v5 = vld [vmem:[%s11230_s5 + $0x68] sm:$0xff]  ;;  %v8576_v61 = vld [vmem:[%s11230_s5 + $0x78] sm:$0xff] }
 0x78d   :  { %2293 = vmatpush1.msra.mxu0 %v8558_v58  ;;  %2364 = vmatpush1.msra.mxu1 %v8564_v62  ;;  %12572 = vst [vmem:[#allocation22_spill] sm:$0xff] %v8570_v5  ;;  %12573 = vst [vmem:[#allocation23_spill] sm:$0xff] %v8576_v61  ;;  %v8582_v58 = vld [vmem:[%s11230_s5 + $0x60] sm:$0xff]  ;;  %v8588_v62 = vld [vmem:[%s11230_s5 + $0x70] sm:$0xff] }
 0x78e   :  { %2294 = vmatprep.subr.mxu0 %v8570_v5  ;;  %2365 = vmatprep.subr.mxu1 %v8576_v61  ;;  %12574 = vst [vmem:[#allocation86_spill] sm:$0xff] %v8582_v58  ;;  %12575 = vst [vmem:[#allocation151_spill] sm:$0xff] %v8588_v62  ;;  %v8594_v5 = vld [vmem:[%s11230_s5 + $0x48] sm:$0xff]  ;;  %v8600_v61 = vld [vmem:[%s11230_s5 + $0x58] sm:$0xff] }
 0x78f   :  { %2295 = vmatpush1.msra.mxu0 %v8582_v58  ;;  %2366 = vmatpush1.msra.mxu1 %v8588_v62  ;;  %12576 = vst [vmem:[#allocation152_spill] sm:$0xff] %v8594_v5  ;;  %12577 = vst [vmem:[#allocation156_spill] sm:$0xff] %v8600_v61  ;;  %v8606_v58 = vld [vmem:[%s11230_s5 + $0x40] sm:$0xff]  ;;  %v8612_v62 = vld [vmem:[%s11230_s5 + $0x50] sm:$0xff] }
 0x790   :  { %2296 = vmatprep.subr.mxu0 %v8594_v5  ;;  %2367 = vmatprep.subr.mxu1 %v8600_v61  ;;  %12578 = vst [vmem:[#allocation158_spill] sm:$0xff] %v8606_v58  ;;  %12579 = vst [vmem:[#allocation159_spill] sm:$0xff] %v8612_v62  ;;  %v8618_v5 = vld [vmem:[%s11230_s5 + $0x28] sm:$0xff]  ;;  %v8624_v61 = vld [vmem:[%s11230_s5 + $0x38] sm:$0xff] }
 0x791   :  { %2297 = vmatpush1.msra.mxu0 %v8606_v58  ;;  %2368 = vmatpush1.msra.mxu1 %v8612_v62  ;;  %12580 = vst [vmem:[#allocation163_spill] sm:$0xff] %v8618_v5  ;;  %12581 = vst [vmem:[#allocation162_spill] sm:$0xff] %v8624_v61  ;;  %v8630_v58 = vld [vmem:[%s11230_s5 + $0x20] sm:$0xff]  ;;  %v8636_v62 = vld [vmem:[%s11230_s5 + $0x30] sm:$0xff] }
 0x792   :  { %2298 = vmatprep.subr.mxu0 %v8618_v5  ;;  %2369 = vmatprep.subr.mxu1 %v8624_v61  ;;  %12582 = vst [vmem:[#allocation160_spill] sm:$0xff] %v8630_v58  ;;  %12583 = vst [vmem:[#allocation24_spill] sm:$0xff] %v8636_v62  ;;  %v8642_v5 = vld [vmem:[%s11230_s5 + $0x8] sm:$0xff]  ;;  %v8648_v61 = vld [vmem:[%s11230_s5 + $0x18] sm:$0xff] }
 0x793   :  { %2299 = vmatpush1.msra.mxu0 %v8630_v58  ;;  %2370 = vmatpush1.msra.mxu1 %v8636_v62  ;;  %12584 = vst [vmem:[#allocation25_spill] sm:$0xff] %v8642_v5  ;;  %12585 = vst [vmem:[#allocation26_spill] sm:$0xff] %v8648_v61  ;;  %v8654_v58 = vld [vmem:[%s11230_s5] sm:$0xff]  ;;  %v8660_v62 = vld [vmem:[%s11230_s5 + $0x10] sm:$0xff] }
 0x794   :  { %2300 = vmatprep.subr.mxu0 %v8642_v5  ;;  %2371 = vmatprep.subr.mxu1 %v8648_v61  ;;  %12586 = vst [vmem:[#allocation27_spill] sm:$0xff] %v8654_v58  ;;  %12587 = vst [vmem:[#allocation28_spill] sm:$0xff] %v8660_v62  ;;  %v8668_v61 = vld [vmem:[%s11231_s3 + $0x1e8] sm:$0xff]  ;;  %v5305_v5 = vmov 4  }
 0x795   :  { %2301 = vmatpush1.msra.mxu0 %v8654_v58  ;;  %2372 = vmatpush1.msra.mxu1 %v8660_v62  ;;  %12588 = vst [vmem:[#allocation29_spill] sm:$0xff] %v8668_v61  ;;  %v8674_v58 = vld [vmem:[%s11231_s3 + $0x1f8] sm:$0xff]  ;;  %v8680_v62 = vld [vmem:[%s11232_s0] sm:$0x3] }
 0x796   :  { %2334 = vmatprep.mubr.f32.mxu0 %v12085_v22  ;;  %2405 = vmatprep.mubr.f32.mxu1 %v12085_v22  ;;  %12589 = vst [vmem:[#allocation30_spill] sm:$0xff] %v8674_v58  ;;  %12590 = vst [vmem:[#allocation31_spill] sm:$0xff] %v8680_v62 }
 0x797   :  { %2424 = vmatprep.subr.mxu0 %v8668_v61  ;;  %2495 = vmatprep.subr.mxu1 %v8674_v58 }
 0x798   :  { %4460 = vset.pattern.permute.xlu1 %v5305_v5 }
 0x799   :  { %2413 = vperm.xlu1 %4460, %v8680_v62  }
 0x836   :  { %v2166_v61 = vpop.f32.mrf.mxu0  ;;  %v2237_v5 = vpop.f32.mrf.mxu1 }
 0x837   :  { %v2242_v43 = vadd.f32 %v2166_v61, %v1843_v51  ;;  %v2244_v8 = vadd.f32 %v2237_v5, %v1914_v63  ;;  %v8722_v5 = vld [vmem:[%s11231_s3 + $0x1c0] sm:$0xff]  ;;  %v8728_v63 = vld [vmem:[%s11231_s3 + $0x1d0] sm:$0xff] }
 0x838   :  { %v2168_v11 = vpop.f32.mrf.mxu0  ;;  %v2239_v36 = vpop.f32.mrf.mxu1  ;;  %12591 = vst [vmem:[#allocation32_spill] sm:$0xff] %v8722_v5  ;;  %12592 = vst [vmem:[#allocation33_spill] sm:$0xff] %v8728_v63 }
 0x839   :  { %v4366_v38 = vmul.f32 -1.442695, %v2242_v43  ;;  %v2243_v58 = vadd.f32 %v2168_v11, %v1845_v45  ;;  %v2245_v62 = vadd.f32 %v2239_v36, %v1916_v33 }
 0x83b   :  { %4577 = vpow2.f32 %v4366_v38  ;;  %v4367_v9 = vmul.f32 -1.442695, %v2243_v58  ;;  %v4368_v30 = vmul.f32 -1.442695, %v2245_v62  ;;  %v8710_v58 = vld [vmem:[%s11231_s3 + $0x1c8] sm:$0xff]  ;;  %v8716_v62 = vld [vmem:[%s11231_s3 + $0x1d8] sm:$0xff] }
 0x83d   :  { %4579 = vpow2.f32 %v4367_v9 }
 0x83e   :  { %4581 = vtanh.f32 %v2244_v8 }
 0x83f   :  { %4583 = vpow2.f32 %v4368_v30  ;;  %v8698_v30 = vld [vmem:[%s11231_s3 + $0x1e0] sm:$0xff] }
 0x848   :  { %v4578_v27 = vpop.eup %4577 }
 0x849   :  { %v2249_v35 = vadd.f32 1.0, %v4578_v27 }
 0x84a   :  { %v4580_v51 = vpop.eup %4579 }
 0x84b   :  { %4585 = vrcp.f32 %v2249_v35  ;;  %v2255_v38 = vadd.f32 1.0, %v4580_v51  ;;  %v4582_v11 = vpop.eup %4581  ;;  %v8734_v35 = vld [vmem:[%s11231_s3 + $0x1a8] sm:$0xff]  ;;  %v8740_v51 = vld [vmem:[%s11231_s3 + $0x1b8] sm:$0xff] }
 0x84c   :  { %v4584_v9 = vpop.eup %4583  ;;  %12593 = vst [vmem:[#allocation34_spill] sm:$0xff] %v8734_v35  ;;  %12594 = vst [vmem:[#allocation35_spill] sm:$0xff] %v8740_v51 }
 0x84d   :  { %4587 = vrcp.f32 %v2255_v38  ;;  %v2262_v41 = vadd.f32 1.0, %v4584_v9  ;;  %v8746_v38 = vld [vmem:[%s11231_s3 + $0x1a0] sm:$0xff]  ;;  %v8758_v9 = vld [vmem:[%s11231_s3 + $0x188] sm:$0xff] }
 0x84e   :  { %12595 = vst [vmem:[#allocation36_spill] sm:$0xff] %v8746_v38  ;;  %12597 = vst [vmem:[#allocation38_spill] sm:$0xff] %v8758_v9 }
 0x84f   :  { %4589 = vrcp.f32 %v2262_v41  ;;  %v8782_v41 = vld [vmem:[%s11231_s3 + $0x168] sm:$0xff] }
 0x850   :  { %12601 = vst [vmem:[#allocation42_spill] sm:$0xff] %v8782_v41 }
 0x858   :  { %v4586_v43 = vpop.eup %4585 }
 0x859   :  { %v2266_v45 = vmul.f32 %v4586_v43, %v4582_v11  ;;  %v8752_v11 = vld [vmem:[%s11231_s3 + $0x1b0] sm:$0xff]  ;;  %v8764_v43 = vld [vmem:[%s11231_s3 + $0x198] sm:$0xff] }
 0x85a   :  { %v4588_v61 = vpop.eup %4587  ;;  %12596 = vst [vmem:[#allocation37_spill] sm:$0xff] %v8752_v11  ;;  %12598 = vst [vmem:[#allocation39_spill] sm:$0xff] %v8764_v43 }
 0x85b   :  { %v2265_v33 = vmul.f32 %v4588_v61, %v8120_v42  ;;  %v8704_v42 = vld [vmem:[%s11231_s3 + $0x1f0] sm:$0xff] }
 0x85c   :  { %v4590_v28 = vpop.eup %4589  ;;  %v8776_v61 = vld [vmem:[%s11231_s3 + $0x190] sm:$0xff] }
 0x85d   :  { %v8692_v36 = vadd.f32 %v2266_v45, %v2265_v33  ;;  %v8770_v45 = vld [vmem:[%s11231_s3 + $0x180] sm:$0xff]  ;;  %12600 = vst [vmem:[#allocation41_spill] sm:$0xff] %v8776_v61  ;;  %v8788_v33 = vld [vmem:[%s11231_s3 + $0x178] sm:$0xff] }
 0x85e   :  { %12599 = vst [vmem:[#allocation40_spill] sm:$0xff] %v8770_v45  ;;  %12602 = vst [vmem:[#allocation43_spill] sm:$0xff] %v8788_v33 }
 0x85f   :  { %4591 = vtanh.f32 %v8692_v36 }
 0x86c   :  { %v4592_v8 = vpop.eup %4591 }
 0x86d   :  { %v2269_v27 = vmul.f32 %v4592_v8, %v4590_v28  ;;  %v8794_v28 = vld [vmem:[%s11231_s3 + $0x160] sm:$0xff]  ;;  %v8800_v8 = vld [vmem:[%s11231_s3 + $0x170] sm:$0xff] }
 0x86e   :  { %12603 = vst [vmem:[#allocation44_spill] sm:$0xff] %v8794_v28  ;;  %12604 = vst [vmem:[#allocation45_spill] sm:$0xff] %v8800_v8 }
 0x86f   :  { %2335 = vmatmul.mubr.f32.vlgmr.msra.gmra.mxu0 %v2269_v27  ;;  %2406 = vmatmul.mubr.f32.vlgmr.msra.gmra.mxu1 %v2269_v27  ;;  %v8806_v27 = vld [vmem:[%s11231_s3 + $0x148] sm:$0xff] }
 0x870   :  { %2425 = vmatpush1.msra.mxu0 %v8698_v30  ;;  %2496 = vmatpush1.msra.mxu1 %v8704_v42  ;;  %12605 = vst [vmem:[#allocation46_spill] sm:$0xff] %v8806_v27 }
 0x871   :  { %2426 = vmatprep.subr.mxu0 %v8710_v58  ;;  %2497 = vmatprep.subr.mxu1 %v8716_v62 }
 0x872   :  { %2427 = vmatpush1.msra.mxu0 %v8722_v5  ;;  %2498 = vmatpush1.msra.mxu1 %v8728_v63 }
 0x873   :  { %2428 = vmatprep.subr.mxu0 %v8734_v35  ;;  %2499 = vmatprep.subr.mxu1 %v8740_v51 }
 0x874   :  { %2429 = vmatpush1.msra.mxu0 %v8746_v38  ;;  %2500 = vmatpush1.msra.mxu1 %v8752_v11 }
 0x875   :  { %2430 = vmatprep.subr.mxu0 %v8758_v9  ;;  %2501 = vmatprep.subr.mxu1 %v8764_v43 }
 0x876   :  { %2431 = vmatpush1.msra.mxu0 %v8770_v45  ;;  %2502 = vmatpush1.msra.mxu1 %v8776_v61 }
 0x877   :  { %2432 = vmatprep.subr.mxu0 %v8782_v41  ;;  %2503 = vmatprep.subr.mxu1 %v8788_v33  ;;  %v8812_v33 = vld [vmem:[%s11231_s3 + $0x158] sm:$0xff] }
 0x878   :  { %2433 = vmatpush1.msra.mxu0 %v8794_v28  ;;  %2504 = vmatpush1.msra.mxu1 %v8800_v8  ;;  %12606 = vst [vmem:[#allocation47_spill] sm:$0xff] %v8812_v33  ;;  %v8818_v28 = vld [vmem:[%s11231_s3 + $0x140] sm:$0xff]  ;;  %v8824_v8 = vld [vmem:[%s11231_s3 + $0x150] sm:$0xff] }
 0x879   :  { %2434 = vmatprep.subr.mxu0 %v8806_v27  ;;  %2505 = vmatprep.subr.mxu1 %v8812_v33  ;;  %12607 = vst [vmem:[#allocation48_spill] sm:$0xff] %v8818_v28  ;;  %12608 = vst [vmem:[#allocation49_spill] sm:$0xff] %v8824_v8  ;;  %v8830_v27 = vld [vmem:[%s11231_s3 + $0x128] sm:$0xff]  ;;  %v8836_v33 = vld [vmem:[%s11231_s3 + $0x138] sm:$0xff] }
 0x87a   :  { %2435 = vmatpush1.msra.mxu0 %v8818_v28  ;;  %2506 = vmatpush1.msra.mxu1 %v8824_v8  ;;  %12609 = vst [vmem:[#allocation50_spill] sm:$0xff] %v8830_v27  ;;  %12610 = vst [vmem:[#allocation51_spill] sm:$0xff] %v8836_v33  ;;  %v8842_v28 = vld [vmem:[%s11231_s3 + $0x120] sm:$0xff]  ;;  %v8848_v8 = vld [vmem:[%s11231_s3 + $0x130] sm:$0xff] }
 0x87b   :  { %2436 = vmatprep.subr.mxu0 %v8830_v27  ;;  %2507 = vmatprep.subr.mxu1 %v8836_v33  ;;  %12611 = vst [vmem:[#allocation52_spill] sm:$0xff] %v8842_v28  ;;  %12612 = vst [vmem:[#allocation53_spill] sm:$0xff] %v8848_v8  ;;  %v8854_v27 = vld [vmem:[%s11231_s3 + $0x108] sm:$0xff]  ;;  %v8860_v33 = vld [vmem:[%s11231_s3 + $0x118] sm:$0xff] }
 0x87c   :  { %2437 = vmatpush1.msra.mxu0 %v8842_v28  ;;  %2508 = vmatpush1.msra.mxu1 %v8848_v8  ;;  %12613 = vst [vmem:[#allocation54_spill] sm:$0xff] %v8854_v27  ;;  %12614 = vst [vmem:[#allocation55_spill] sm:$0xff] %v8860_v33  ;;  %v8866_v28 = vld [vmem:[%s11231_s3 + $0x100] sm:$0xff]  ;;  %v8872_v8 = vld [vmem:[%s11231_s3 + $0x110] sm:$0xff] }
 0x87d   :  { %2438 = vmatprep.subr.mxu0 %v8854_v27  ;;  %2509 = vmatprep.subr.mxu1 %v8860_v33  ;;  %12615 = vst [vmem:[#allocation56_spill] sm:$0xff] %v8866_v28  ;;  %12616 = vst [vmem:[#allocation57_spill] sm:$0xff] %v8872_v8  ;;  %v8878_v27 = vld [vmem:[%s11231_s3 + $0xe8] sm:$0xff]  ;;  %v8884_v33 = vld [vmem:[%s11231_s3 + $0xf8] sm:$0xff] }
 0x87e   :  { %2439 = vmatpush1.msra.mxu0 %v8866_v28  ;;  %2510 = vmatpush1.msra.mxu1 %v8872_v8  ;;  %12617 = vst [vmem:[#allocation58_spill] sm:$0xff] %v8878_v27  ;;  %12618 = vst [vmem:[#allocation59_spill] sm:$0xff] %v8884_v33  ;;  %v8890_v28 = vld [vmem:[%s11231_s3 + $0xe0] sm:$0xff]  ;;  %v8896_v8 = vld [vmem:[%s11231_s3 + $0xf0] sm:$0xff] }
 0x87f   :  { %2440 = vmatprep.subr.mxu0 %v8878_v27  ;;  %2511 = vmatprep.subr.mxu1 %v8884_v33  ;;  %12619 = vst [vmem:[#allocation60_spill] sm:$0xff] %v8890_v28  ;;  %12620 = vst [vmem:[#allocation61_spill] sm:$0xff] %v8896_v8  ;;  %v8902_v27 = vld [vmem:[%s11231_s3 + $0xc8] sm:$0xff]  ;;  %v8908_v33 = vld [vmem:[%s11231_s3 + $0xd8] sm:$0xff] }
 0x880   :  { %2441 = vmatpush1.msra.mxu0 %v8890_v28  ;;  %2512 = vmatpush1.msra.mxu1 %v8896_v8  ;;  %12621 = vst [vmem:[#allocation62_spill] sm:$0xff] %v8902_v27  ;;  %12622 = vst [vmem:[#allocation63_spill] sm:$0xff] %v8908_v33  ;;  %v8914_v28 = vld [vmem:[%s11231_s3 + $0xc0] sm:$0xff]  ;;  %v8920_v8 = vld [vmem:[%s11231_s3 + $0xd0] sm:$0xff] }
 0x881   :  { %2442 = vmatprep.subr.mxu0 %v8902_v27  ;;  %2513 = vmatprep.subr.mxu1 %v8908_v33  ;;  %12623 = vst [vmem:[#allocation64_spill] sm:$0xff] %v8914_v28  ;;  %12624 = vst [vmem:[#allocation65_spill] sm:$0xff] %v8920_v8  ;;  %v8926_v27 = vld [vmem:[%s11231_s3 + $0xa8] sm:$0xff]  ;;  %v8932_v33 = vld [vmem:[%s11231_s3 + $0xb8] sm:$0xff] }
 0x882   :  { %2443 = vmatpush1.msra.mxu0 %v8914_v28  ;;  %2514 = vmatpush1.msra.mxu1 %v8920_v8  ;;  %12625 = vst [vmem:[#allocation66_spill] sm:$0xff] %v8926_v27  ;;  %12626 = vst [vmem:[#allocation67_spill] sm:$0xff] %v8932_v33  ;;  %v8938_v28 = vld [vmem:[%s11231_s3 + $0xa0] sm:$0xff]  ;;  %v8944_v8 = vld [vmem:[%s11231_s3 + $0xb0] sm:$0xff] }
 0x883   :  { %2444 = vmatprep.subr.mxu0 %v8926_v27  ;;  %2515 = vmatprep.subr.mxu1 %v8932_v33  ;;  %12627 = vst [vmem:[#allocation68_spill] sm:$0xff] %v8938_v28  ;;  %12628 = vst [vmem:[#allocation69_spill] sm:$0xff] %v8944_v8  ;;  %v8950_v27 = vld [vmem:[%s11231_s3 + $0x88] sm:$0xff]  ;;  %v8956_v33 = vld [vmem:[%s11231_s3 + $0x98] sm:$0xff] }
 0x884   :  { %2445 = vmatpush1.msra.mxu0 %v8938_v28  ;;  %2516 = vmatpush1.msra.mxu1 %v8944_v8  ;;  %12629 = vst [vmem:[#allocation70_spill] sm:$0xff] %v8950_v27  ;;  %12630 = vst [vmem:[#allocation71_spill] sm:$0xff] %v8956_v33  ;;  %v8962_v28 = vld [vmem:[%s11231_s3 + $0x80] sm:$0xff]  ;;  %v8968_v8 = vld [vmem:[%s11231_s3 + $0x90] sm:$0xff] }
 0x885   :  { %2446 = vmatprep.subr.mxu0 %v8950_v27  ;;  %2517 = vmatprep.subr.mxu1 %v8956_v33  ;;  %12631 = vst [vmem:[#allocation72_spill] sm:$0xff] %v8962_v28  ;;  %12632 = vst [vmem:[#allocation73_spill] sm:$0xff] %v8968_v8  ;;  %v8974_v27 = vld [vmem:[%s11231_s3 + $0x68] sm:$0xff]  ;;  %v8980_v33 = vld [vmem:[%s11231_s3 + $0x78] sm:$0xff] }
 0x886   :  { %2447 = vmatpush1.msra.mxu0 %v8962_v28  ;;  %2518 = vmatpush1.msra.mxu1 %v8968_v8  ;;  %12633 = vst [vmem:[#allocation74_spill] sm:$0xff] %v8974_v27  ;;  %12634 = vst [vmem:[#allocation75_spill] sm:$0xff] %v8980_v33  ;;  %v8986_v28 = vld [vmem:[%s11231_s3 + $0x60] sm:$0xff]  ;;  %v8992_v8 = vld [vmem:[%s11231_s3 + $0x70] sm:$0xff] }
 0x887   :  { %2448 = vmatprep.subr.mxu0 %v8974_v27  ;;  %2519 = vmatprep.subr.mxu1 %v8980_v33  ;;  %12635 = vst [vmem:[#allocation76_spill] sm:$0xff] %v8986_v28  ;;  %12636 = vst [vmem:[#allocation77_spill] sm:$0xff] %v8992_v8  ;;  %v8998_v27 = vld [vmem:[%s11231_s3 + $0x48] sm:$0xff]  ;;  %v9004_v33 = vld [vmem:[%s11231_s3 + $0x58] sm:$0xff] }
 0x888   :  { %2449 = vmatpush1.msra.mxu0 %v8986_v28  ;;  %2520 = vmatpush1.msra.mxu1 %v8992_v8  ;;  %12637 = vst [vmem:[#allocation78_spill] sm:$0xff] %v8998_v27  ;;  %12638 = vst [vmem:[#allocation79_spill] sm:$0xff] %v9004_v33  ;;  %v9010_v28 = vld [vmem:[%s11231_s3 + $0x40] sm:$0xff]  ;;  %v9016_v8 = vld [vmem:[%s11231_s3 + $0x50] sm:$0xff] }
 0x889   :  { %2450 = vmatprep.subr.mxu0 %v8998_v27  ;;  %2521 = vmatprep.subr.mxu1 %v9004_v33  ;;  %12639 = vst [vmem:[#allocation80_spill] sm:$0xff] %v9010_v28  ;;  %12640 = vst [vmem:[#allocation81_spill] sm:$0xff] %v9016_v8  ;;  %v9022_v27 = vld [vmem:[%s11231_s3 + $0x28] sm:$0xff]  ;;  %v9028_v33 = vld [vmem:[%s11231_s3 + $0x38] sm:$0xff] }
 0x88a   :  { %2451 = vmatpush1.msra.mxu0 %v9010_v28  ;;  %2522 = vmatpush1.msra.mxu1 %v9016_v8  ;;  %12641 = vst [vmem:[#allocation82_spill] sm:$0xff] %v9022_v27  ;;  %12642 = vst [vmem:[#allocation83_spill] sm:$0xff] %v9028_v33  ;;  %v9034_v28 = vld [vmem:[%s11231_s3 + $0x20] sm:$0xff]  ;;  %v9040_v8 = vld [vmem:[%s11231_s3 + $0x30] sm:$0xff] }
 0x88b   :  { %2452 = vmatprep.subr.mxu0 %v9022_v27  ;;  %2523 = vmatprep.subr.mxu1 %v9028_v33  ;;  %12643 = vst [vmem:[#allocation84_spill] sm:$0xff] %v9034_v28  ;;  %12644 = vst [vmem:[#allocation85_spill] sm:$0xff] %v9040_v8  ;;  %v9046_v27 = vld [vmem:[%s11231_s3 + $0x8] sm:$0xff]  ;;  %v9052_v33 = vld [vmem:[%s11231_s3 + $0x18] sm:$0xff] }
 0x88c   :  { %2453 = vmatpush1.msra.mxu0 %v9034_v28  ;;  %2524 = vmatpush1.msra.mxu1 %v9040_v8  ;;  %12645 = vst [vmem:[#allocation87_spill] sm:$0xff] %v9046_v27  ;;  %12646 = vst [vmem:[#allocation88_spill] sm:$0xff] %v9052_v33  ;;  %v9058_v28 = vld [vmem:[%s11231_s3] sm:$0xff] }
 0x88d   :  { %2454 = vmatprep.subr.mxu0 %v9046_v27  ;;  %2525 = vmatprep.subr.mxu1 %v9052_v33  ;;  %12647 = vst [vmem:[#allocation89_spill] sm:$0xff] %v9058_v28  ;;  %v9065_v27 = vld [vmem:[%s11231_s3 + $0x10] sm:$0xff]  ;;  %v9074_v33 = vld [vmem:[%s11233_s4 + $0x1e8] sm:$0xff] }
 0x88e   :  { %2455 = vmatpush1.msra.mxu0 %v9058_v28  ;;  %2488 = vmatprep.mubr.f32.mxu0 %v12085_v22  ;;  %12648 = vst [vmem:[#allocation90_spill] sm:$0xff] %v9065_v27  ;;  %12649 = vst [vmem:[#allocation91_spill] sm:$0xff] %v9074_v33  ;;  %v9080_v28 = vld [vmem:[%s11233_s4 + $0x1f8] sm:$0xff] }
 0x88f   :  { %2526 = vmatpush1.msra.mxu1 %v9065_v27  ;;  %2559 = vmatprep.mubr.f32.mxu1 %v12085_v22  ;;  %12650 = vst [vmem:[#allocation92_spill] sm:$0xff] %v9080_v28  ;;  %v9086_v27 = vld [vmem:[%s11233_s4 + $0x1e0] sm:$0xff] }
 0x890   :  { %2489 = vmatmul.mubr.f32.vlgmr.msra.gmra.mxu0 %v8287_v47  ;;  %2560 = vmatmul.mubr.f32.vlgmr.msra.gmra.mxu1 %v8287_v47  ;;  %12651 = vst [vmem:[#allocation93_spill] sm:$0xff] %v9086_v27  ;;  %v9092_v47 = vld [vmem:[%s11233_s4 + $0x1f0] sm:$0xff] }
 0x891   :  { %2594 = vmatprep.subr.mxu0 %v9074_v33  ;;  %2665 = vmatprep.subr.mxu1 %v9080_v28  ;;  %12652 = vst [vmem:[#allocation94_spill] sm:$0xff] %v9092_v47  ;;  %v9098_v33 = vld [vmem:[%s11233_s4 + $0x1c8] sm:$0xff]  ;;  %v9104_v28 = vld [vmem:[%s11233_s4 + $0x1d8] sm:$0xff] }
 0x892   :  { %2595 = vmatpush1.msra.mxu0 %v9086_v27  ;;  %2666 = vmatpush1.msra.mxu1 %v9092_v47  ;;  %12653 = vst [vmem:[#allocation95_spill] sm:$0xff] %v9098_v33  ;;  %12654 = vst [vmem:[#allocation96_spill] sm:$0xff] %v9104_v28  ;;  %v9110_v27 = vld [vmem:[%s11233_s4 + $0x1c0] sm:$0xff]  ;;  %v9116_v47 = vld [vmem:[%s11233_s4 + $0x1d0] sm:$0xff] }
 0x893   :  { %2596 = vmatprep.subr.mxu0 %v9098_v33  ;;  %2667 = vmatprep.subr.mxu1 %v9104_v28  ;;  %12655 = vst [vmem:[#allocation97_spill] sm:$0xff] %v9110_v27  ;;  %12656 = vst [vmem:[#allocation98_spill] sm:$0xff] %v9116_v47  ;;  %v9122_v33 = vld [vmem:[%s11233_s4 + $0x1a8] sm:$0xff]  ;;  %v9128_v28 = vld [vmem:[%s11233_s4 + $0x1b8] sm:$0xff] }
 0x894   :  { %2597 = vmatpush1.msra.mxu0 %v9110_v27  ;;  %2668 = vmatpush1.msra.mxu1 %v9116_v47  ;;  %12657 = vst [vmem:[#allocation99_spill] sm:$0xff] %v9122_v33  ;;  %12658 = vst [vmem:[#allocation100_spill] sm:$0xff] %v9128_v28  ;;  %v9134_v27 = vld [vmem:[%s11233_s4 + $0x1a0] sm:$0xff]  ;;  %v9140_v47 = vld [vmem:[%s11233_s4 + $0x1b0] sm:$0xff] }
 0x895   :  { %2598 = vmatprep.subr.mxu0 %v9122_v33  ;;  %2669 = vmatprep.subr.mxu1 %v9128_v28  ;;  %12659 = vst [vmem:[#allocation101_spill] sm:$0xff] %v9134_v27  ;;  %12660 = vst [vmem:[#allocation102_spill] sm:$0xff] %v9140_v47  ;;  %v9146_v33 = vld [vmem:[%s11233_s4 + $0x188] sm:$0xff]  ;;  %v9152_v28 = vld [vmem:[%s11233_s4 + $0x198] sm:$0xff] }
 0x896   :  { %2599 = vmatpush1.msra.mxu0 %v9134_v27  ;;  %2670 = vmatpush1.msra.mxu1 %v9140_v47  ;;  %12661 = vst [vmem:[#allocation103_spill] sm:$0xff] %v9146_v33  ;;  %12662 = vst [vmem:[#allocation104_spill] sm:$0xff] %v9152_v28  ;;  %v9158_v27 = vld [vmem:[%s11233_s4 + $0x180] sm:$0xff]  ;;  %v9164_v47 = vld [vmem:[%s11233_s4 + $0x190] sm:$0xff] }
 0x897   :  { %2600 = vmatprep.subr.mxu0 %v9146_v33  ;;  %2671 = vmatprep.subr.mxu1 %v9152_v28  ;;  %12663 = vst [vmem:[#allocation105_spill] sm:$0xff] %v9158_v27  ;;  %12664 = vst [vmem:[#allocation106_spill] sm:$0xff] %v9164_v47  ;;  %v9170_v33 = vld [vmem:[%s11233_s4 + $0x168] sm:$0xff]  ;;  %v9176_v28 = vld [vmem:[%s11233_s4 + $0x178] sm:$0xff] }
 0x898   :  { %2601 = vmatpush1.msra.mxu0 %v9158_v27  ;;  %2672 = vmatpush1.msra.mxu1 %v9164_v47  ;;  %12665 = vst [vmem:[#allocation107_spill] sm:$0xff] %v9170_v33  ;;  %12666 = vst [vmem:[#allocation108_spill] sm:$0xff] %v9176_v28  ;;  %v9182_v27 = vld [vmem:[%s11233_s4 + $0x160] sm:$0xff]  ;;  %v9188_v47 = vld [vmem:[%s11233_s4 + $0x170] sm:$0xff] }
 0x899   :  { %2602 = vmatprep.subr.mxu0 %v9170_v33  ;;  %2673 = vmatprep.subr.mxu1 %v9176_v28  ;;  %12667 = vst [vmem:[#allocation109_spill] sm:$0xff] %v9182_v27  ;;  %12668 = vst [vmem:[#allocation110_spill] sm:$0xff] %v9188_v47  ;;  %v9194_v33 = vld [vmem:[%s11233_s4 + $0x148] sm:$0xff]  ;;  %v9200_v28 = vld [vmem:[%s11233_s4 + $0x158] sm:$0xff] }
 0x89a   :  { %2603 = vmatpush1.msra.mxu0 %v9182_v27  ;;  %2674 = vmatpush1.msra.mxu1 %v9188_v47  ;;  %12669 = vst [vmem:[#allocation111_spill] sm:$0xff] %v9194_v33  ;;  %12670 = vst [vmem:[#allocation112_spill] sm:$0xff] %v9200_v28  ;;  %v9206_v27 = vld [vmem:[%s11233_s4 + $0x140] sm:$0xff]  ;;  %v9212_v47 = vld [vmem:[%s11233_s4 + $0x150] sm:$0xff] }
 0x89b   :  { %2604 = vmatprep.subr.mxu0 %v9194_v33  ;;  %2675 = vmatprep.subr.mxu1 %v9200_v28  ;;  %12671 = vst [vmem:[#allocation113_spill] sm:$0xff] %v9206_v27  ;;  %12672 = vst [vmem:[#allocation114_spill] sm:$0xff] %v9212_v47  ;;  %v9218_v33 = vld [vmem:[%s11233_s4 + $0x128] sm:$0xff]  ;;  %v9224_v28 = vld [vmem:[%s11233_s4 + $0x138] sm:$0xff] }
 0x89c   :  { %2605 = vmatpush1.msra.mxu0 %v9206_v27  ;;  %2676 = vmatpush1.msra.mxu1 %v9212_v47  ;;  %12673 = vst [vmem:[#allocation115_spill] sm:$0xff] %v9218_v33  ;;  %12674 = vst [vmem:[#allocation116_spill] sm:$0xff] %v9224_v28  ;;  %v9230_v27 = vld [vmem:[%s11233_s4 + $0x120] sm:$0xff]  ;;  %v9236_v47 = vld [vmem:[%s11233_s4 + $0x130] sm:$0xff] }
 0x89d   :  { %2606 = vmatprep.subr.mxu0 %v9218_v33  ;;  %2677 = vmatprep.subr.mxu1 %v9224_v28  ;;  %12675 = vst [vmem:[#allocation117_spill] sm:$0xff] %v9230_v27  ;;  %12676 = vst [vmem:[#allocation118_spill] sm:$0xff] %v9236_v47  ;;  %v9242_v33 = vld [vmem:[%s11233_s4 + $0x108] sm:$0xff]  ;;  %v9248_v28 = vld [vmem:[%s11233_s4 + $0x118] sm:$0xff] }
 0x89e   :  { %2607 = vmatpush1.msra.mxu0 %v9230_v27  ;;  %2678 = vmatpush1.msra.mxu1 %v9236_v47  ;;  %12677 = vst [vmem:[#allocation119_spill] sm:$0xff] %v9242_v33  ;;  %12678 = vst [vmem:[#allocation120_spill] sm:$0xff] %v9248_v28  ;;  %v9254_v27 = vld [vmem:[%s11233_s4 + $0x100] sm:$0xff]  ;;  %v9260_v47 = vld [vmem:[%s11233_s4 + $0x110] sm:$0xff] }
 0x89f   :  { %2608 = vmatprep.subr.mxu0 %v9242_v33  ;;  %2679 = vmatprep.subr.mxu1 %v9248_v28  ;;  %12679 = vst [vmem:[#allocation121_spill] sm:$0xff] %v9254_v27  ;;  %12680 = vst [vmem:[#allocation122_spill] sm:$0xff] %v9260_v47  ;;  %v9266_v33 = vld [vmem:[%s11233_s4 + $0xe8] sm:$0xff]  ;;  %v9272_v28 = vld [vmem:[%s11233_s4 + $0xf8] sm:$0xff] }
 0x8a0   :  { %2609 = vmatpush1.msra.mxu0 %v9254_v27  ;;  %2680 = vmatpush1.msra.mxu1 %v9260_v47  ;;  %12681 = vst [vmem:[#allocation123_spill] sm:$0xff] %v9266_v33  ;;  %12682 = vst [vmem:[#allocation124_spill] sm:$0xff] %v9272_v28  ;;  %v9278_v27 = vld [vmem:[%s11233_s4 + $0xe0] sm:$0xff]  ;;  %v9284_v47 = vld [vmem:[%s11233_s4 + $0xf0] sm:$0xff] }
 0x8a1   :  { %2610 = vmatprep.subr.mxu0 %v9266_v33  ;;  %2681 = vmatprep.subr.mxu1 %v9272_v28  ;;  %12683 = vst [vmem:[#allocation125_spill] sm:$0xff] %v9278_v27  ;;  %12684 = vst [vmem:[#allocation126_spill] sm:$0xff] %v9284_v47  ;;  %v9290_v33 = vld [vmem:[%s11233_s4 + $0xc8] sm:$0xff]  ;;  %v9296_v28 = vld [vmem:[%s11233_s4 + $0xd8] sm:$0xff] }
 0x8a2   :  { %2611 = vmatpush1.msra.mxu0 %v9278_v27  ;;  %2682 = vmatpush1.msra.mxu1 %v9284_v47  ;;  %12685 = vst [vmem:[#allocation127_spill] sm:$0xff] %v9290_v33  ;;  %12686 = vst [vmem:[#allocation128_spill] sm:$0xff] %v9296_v28  ;;  %v9302_v27 = vld [vmem:[%s11233_s4 + $0xc0] sm:$0xff]  ;;  %v9308_v47 = vld [vmem:[%s11233_s4 + $0xd0] sm:$0xff] }
 0x8a3   :  { %2612 = vmatprep.subr.mxu0 %v9290_v33  ;;  %2683 = vmatprep.subr.mxu1 %v9296_v28  ;;  %12687 = vst [vmem:[#allocation129_spill] sm:$0xff] %v9302_v27  ;;  %12688 = vst [vmem:[#allocation130_spill] sm:$0xff] %v9308_v47  ;;  %v9314_v33 = vld [vmem:[%s11233_s4 + $0xa8] sm:$0xff]  ;;  %v9320_v28 = vld [vmem:[%s11233_s4 + $0xb8] sm:$0xff] }
 0x8a4   :  { %2613 = vmatpush1.msra.mxu0 %v9302_v27  ;;  %2684 = vmatpush1.msra.mxu1 %v9308_v47  ;;  %12689 = vst [vmem:[#allocation131_spill] sm:$0xff] %v9314_v33  ;;  %12690 = vst [vmem:[#allocation132_spill] sm:$0xff] %v9320_v28  ;;  %v9326_v27 = vld [vmem:[%s11233_s4 + $0xa0] sm:$0xff]  ;;  %v9332_v47 = vld [vmem:[%s11233_s4 + $0xb0] sm:$0xff] }
 0x8a5   :  { %2614 = vmatprep.subr.mxu0 %v9314_v33  ;;  %2685 = vmatprep.subr.mxu1 %v9320_v28  ;;  %12691 = vst [vmem:[#allocation133_spill] sm:$0xff] %v9326_v27  ;;  %12692 = vst [vmem:[#allocation134_spill] sm:$0xff] %v9332_v47  ;;  %v9338_v33 = vld [vmem:[%s11233_s4 + $0x88] sm:$0xff]  ;;  %v9344_v28 = vld [vmem:[%s11233_s4 + $0x98] sm:$0xff] }
 0x8a6   :  { %2615 = vmatpush1.msra.mxu0 %v9326_v27  ;;  %2686 = vmatpush1.msra.mxu1 %v9332_v47  ;;  %12693 = vst [vmem:[#allocation135_spill] sm:$0xff] %v9338_v33  ;;  %12694 = vst [vmem:[#allocation136_spill] sm:$0xff] %v9344_v28  ;;  %v9350_v27 = vld [vmem:[%s11233_s4 + $0x80] sm:$0xff]  ;;  %v9356_v47 = vld [vmem:[%s11233_s4 + $0x90] sm:$0xff] }
 0x8a7   :  { %2616 = vmatprep.subr.mxu0 %v9338_v33  ;;  %2687 = vmatprep.subr.mxu1 %v9344_v28  ;;  %12695 = vst [vmem:[#allocation137_spill] sm:$0xff] %v9350_v27  ;;  %12696 = vst [vmem:[#allocation138_spill] sm:$0xff] %v9356_v47  ;;  %v9362_v33 = vld [vmem:[%s11233_s4 + $0x68] sm:$0xff]  ;;  %v9368_v28 = vld [vmem:[%s11233_s4 + $0x78] sm:$0xff] }
 0x8a8   :  { %2617 = vmatpush1.msra.mxu0 %v9350_v27  ;;  %2688 = vmatpush1.msra.mxu1 %v9356_v47  ;;  %12697 = vst [vmem:[#allocation139_spill] sm:$0xff] %v9362_v33  ;;  %12698 = vst [vmem:[#allocation140_spill] sm:$0xff] %v9368_v28  ;;  %v9374_v27 = vld [vmem:[%s11233_s4 + $0x60] sm:$0xff]  ;;  %v9380_v47 = vld [vmem:[%s11233_s4 + $0x70] sm:$0xff] }
 0x8a9   :  { %2618 = vmatprep.subr.mxu0 %v9362_v33  ;;  %2689 = vmatprep.subr.mxu1 %v9368_v28  ;;  %12699 = vst [vmem:[#allocation141_spill] sm:$0xff] %v9374_v27  ;;  %12700 = vst [vmem:[#allocation142_spill] sm:$0xff] %v9380_v47  ;;  %v9386_v33 = vld [vmem:[%s11233_s4 + $0x48] sm:$0xff]  ;;  %v9392_v28 = vld [vmem:[%s11233_s4 + $0x58] sm:$0xff] }
 0x8aa   :  { %2619 = vmatpush1.msra.mxu0 %v9374_v27  ;;  %2690 = vmatpush1.msra.mxu1 %v9380_v47  ;;  %12701 = vst [vmem:[#allocation143_spill] sm:$0xff] %v9386_v33  ;;  %12702 = vst [vmem:[#allocation144_spill] sm:$0xff] %v9392_v28  ;;  %v9398_v27 = vld [vmem:[%s11233_s4 + $0x40] sm:$0xff]  ;;  %v9404_v47 = vld [vmem:[%s11233_s4 + $0x50] sm:$0xff] }
 0x8ab   :  { %2620 = vmatprep.subr.mxu0 %v9386_v33  ;;  %2691 = vmatprep.subr.mxu1 %v9392_v28  ;;  %12703 = vst [vmem:[#allocation145_spill] sm:$0xff] %v9398_v27  ;;  %12704 = vst [vmem:[#allocation146_spill] sm:$0xff] %v9404_v47  ;;  %v9410_v33 = vld [vmem:[%s11233_s4 + $0x28] sm:$0xff]  ;;  %v9416_v28 = vld [vmem:[%s11233_s4 + $0x38] sm:$0xff] }
 0x8ac   :  { %2621 = vmatpush1.msra.mxu0 %v9398_v27  ;;  %2692 = vmatpush1.msra.mxu1 %v9404_v47  ;;  %12705 = vst [vmem:[#allocation147_spill] sm:$0xff] %v9410_v33  ;;  %12706 = vst [vmem:[#allocation148_spill] sm:$0xff] %v9416_v28  ;;  %v9422_v27 = vld [vmem:[%s11233_s4 + $0x20] sm:$0xff]  ;;  %v9428_v47 = vld [vmem:[%s11233_s4 + $0x30] sm:$0xff] }
 0x8ad   :  { %2622 = vmatprep.subr.mxu0 %v9410_v33  ;;  %2693 = vmatprep.subr.mxu1 %v9416_v28  ;;  %12707 = vst [vmem:[#allocation149_spill] sm:$0xff] %v9422_v27  ;;  %12708 = vst [vmem:[#allocation150_spill] sm:$0xff] %v9428_v47  ;;  %v9434_v33 = vld [vmem:[%s11233_s4 + $0x8] sm:$0xff]  ;;  %v9440_v28 = vld [vmem:[%s11233_s4 + $0x18] sm:$0xff] }
 0x8ae   :  { %2623 = vmatpush1.msra.mxu0 %v9422_v27  ;;  %2694 = vmatpush1.msra.mxu1 %v9428_v47  ;;  %12709 = vst [vmem:[#allocation161_spill] sm:$0xff] %v9434_v33  ;;  %12710 = vst [vmem:[#allocation165_spill] sm:$0xff] %v9440_v28  ;;  %v9446_v27 = vld [vmem:[%s11233_s4] sm:$0xff] }
 0x8af   :  { %2624 = vmatprep.subr.mxu0 %v9434_v33  ;;  %2695 = vmatprep.subr.mxu1 %v9440_v28  ;;  %12711 = vst [vmem:[#allocation166_spill] sm:$0xff] %v9446_v27  ;;  %v9453_v33 = vld [vmem:[%s11233_s4 + $0x10] sm:$0xff]  ;;  %v2414_v28 = vpop.permute.xlu1 %2413 }
 0x8b0   :  { %2625 = vmatpush1.msra.mxu0 %v9446_v27  ;;  %2658 = vmatprep.mubr.f32.mxu0 %v12085_v22  ;;  %12712 = vst [vmem:[#allocation167_spill] sm:$0xff] %v9453_v33  ;;  %v2416_v47 = vmul.f32 %v2414_v28, %v12549_v13  ;;  %v2417_v27 = vmul.f32 %v2414_v28, %v12550_v10 }
 0x8b1   :  { %2696 = vmatpush1.msra.mxu1 %v9453_v33  ;;  %2729 = vmatprep.mubr.f32.mxu1 %v12085_v22  ;;  %v2419_v13 = vmul.f32 %v2414_v28, %v12228_v48  ;;  %v2418_v35 = vmul.f32 %v2414_v28, %v6576_v55 }
 0x8b2   :  { %2764 = vmatprep.subr.mxu0 %v8258_v12  ;;  %2835 = vmatprep.subr.mxu1 %v8264_v59  ;;  %v2420_v41 = vadd.f32 %v2416_v47, %v12551_v7  ;;  %v2421_v33 = vadd.f32 %v2417_v27, %v12552_v32 }
 0x8b3   :  { %v2423_v47 = vadd.f32 %v2419_v13, %v12553_v20  ;;  %v2422_v27 = vadd.f32 %v2418_v35, %v6580_v56 }
 0x92f   :  { %v9460_v8 = vpop.f32.mrf.mxu0  ;;  %v9466_v45 = vpop.f32.mrf.mxu1 }
 0x931   :  { %v9464_v61 = vpop.f32.mrf.mxu0  ;;  %v9469_v11 = vpop.f32.mrf.mxu1 }
 0x950   :  { %v2490_v43 = vpop.f32.mrf.mxu0  ;;  %v2561_v51 = vpop.f32.mrf.mxu1 }
 0x951   :  { %v2566_v9 = vadd.f32 %v2490_v43, %v2420_v41  ;;  %v2568_v32 = vadd.f32 %v2561_v51, %v2422_v27  ;;  %v12746_v27 = vld [vmem:[#allocation28_spill] sm:$0xff] }
 0x952   :  { %v2492_v12 = vpop.f32.mrf.mxu0  ;;  %v2563_v7 = vpop.f32.mrf.mxu1 }
 0x953   :  { %v4369_v59 = vmul.f32 -1.442695, %v2566_v9  ;;  %v2567_v38 = vadd.f32 %v2492_v12, %v2421_v33  ;;  %v2569_v63 = vadd.f32 %v2563_v7, %v2423_v47  ;;  %v12745_v47 = vld [vmem:[#allocation27_spill] sm:$0xff] }
 0x955   :  { %4593 = vpow2.f32 %v4369_v59  ;;  %v4370_v10 = vmul.f32 -1.442695, %v2567_v38  ;;  %v4371_v43 = vmul.f32 -1.442695, %v2569_v63 }
 0x957   :  { %4595 = vpow2.f32 %v4370_v10 }
 0x958   :  { %4597 = vpow2.f32 %v4371_v43  ;;  %v12747_v43 = vld [vmem:[#allocation29_spill] sm:$0xff] }
 0x962   :  { %v4594_v41 = vpop.eup %4593 }
 0x963   :  { %v2573_v5 = vadd.f32 1.0, %v4594_v41  ;;  %v12748_v41 = vld [vmem:[#allocation30_spill] sm:$0xff] }
 0x964   :  { %v4596_v9 = vpop.eup %4595 }
 0x965   :  { %4599 = vrcp.f32 %v2573_v5  ;;  %v2579_v33 = vadd.f32 1.0, %v4596_v9  ;;  %v4598_v38 = vpop.eup %4597  ;;  %v12744_v5 = vld [vmem:[#allocation26_spill] sm:$0xff]  ;;  %v5306_v9 = vmov 5  }
 0x966   :  { %4601 = vtanh.f32 %v2568_v32  ;;  %v2586_v59 = vadd.f32 1.0, %v4598_v38  ;;  %v12713_v32 = vld [vmem:[#allocation4_spill] sm:$0xff]  ;;  %4461 = vset.pattern.permute.xlu0 %v5306_v9  ;;  %v12750_v38 = vld [vmem:[#allocation3_spill] sm:$0xff]  ;;  %v12773_v9 = vld [vmem:[#allocation54_spill] sm:$0xff] }
 0x967   :  { %4603 = vrcp.f32 %v2579_v33  ;;  %v12749_v33 = vld [vmem:[#allocation31_spill] sm:$0xff] }
 0x968   :  { %4605 = vrcp.f32 %v2586_v59  ;;  %2907 = vperm.xlu0 %4461, %v12749_v33   ;;  %v12774_v33 = vld [vmem:[#allocation55_spill] sm:$0xff] }
 0x972   :  { %v4600_v10 = vpop.eup %4599 }
 0x973   :  { %v4602_v12 = vpop.eup %4601 }
 0x974   :  { %v4604_v13 = vpop.eup %4603  ;;  %v2590_v20 = vmul.f32 %v4602_v12, %v4600_v10  ;;  %v2337_v10 = vadd.f32 %v9460_v8, %v12750_v38  ;;  %v2408_v8 = vadd.f32 %v9466_v45, %v6675_v46 }
 0x975   :  { %v2589_v7 = vmul.f32 %v4604_v13, %v8284_v57  ;;  %v4606_v63 = vpop.eup %4605  ;;  %v12715_v57 = vld [vmem:[#allocation6_spill] sm:$0xff]  ;;  %v2339_v13 = vadd.f32 %v9464_v61, %v6665_v31 }
 0x977   :  { %v9476_v28 = vadd.f32 %v2590_v20, %v2589_v7  ;;  %v12714_v20 = vld [vmem:[#allocation5_spill] sm:$0xff] }
 0x979   :  { %4607 = vtanh.f32 %v9476_v28 }
 0x986   :  { %v4608_v35 = vpop.eup %4607 }
 0x987   :  { %v9479_v51 = vmul.f32 %v4608_v35, %v4606_v63 }
 0x989   :  { %2659 = vmatmul.mubr.f32.vlgmr.msra.gmra.mxu0 %v9479_v51  ;;  %2730 = vmatmul.mubr.f32.vlgmr.msra.gmra.mxu1 %v9479_v51 }
 0x98a   :  { %2765 = vmatpush1.msra.mxu0 %v8294_v2  ;;  %2836 = vmatpush1.msra.mxu1 %v8300_v40  ;;  %v12716_v2 = vld [vmem:[#allocation7_spill] sm:$0xff]  ;;  %v12717_v40 = vld [vmem:[#allocation8_spill] sm:$0xff] }
 0x98b   :  { %2766 = vmatprep.subr.mxu0 %v8306_v6  ;;  %2837 = vmatprep.subr.mxu1 %v8312_v16  ;;  %v12718_v6 = vld [vmem:[#allocation9_spill] sm:$0xff]  ;;  %v12719_v16 = vld [vmem:[#allocation10_spill] sm:$0xff] }
 0x98c   :  { %2767 = vmatpush1.msra.mxu0 %v8318_v17  ;;  %2838 = vmatpush1.msra.mxu1 %v8324_v60  ;;  %v12720_v17 = vld [vmem:[#allocation11_spill] sm:$0xff]  ;;  %v12721_v60 = vld [vmem:[#allocation12_spill] sm:$0xff] }
 0x98d   :  { %2768 = vmatprep.subr.mxu0 %v8330_v3  ;;  %2839 = vmatprep.subr.mxu1 %v8336_v54  ;;  %v12722_v3 = vld [vmem:[#allocation13_spill] sm:$0xff]  ;;  %v12723_v54 = vld [vmem:[#allocation14_spill] sm:$0xff] }
 0x98e   :  { %2769 = vmatpush1.msra.mxu0 %v8342_v0  ;;  %2840 = vmatpush1.msra.mxu1 %v8348_v50  ;;  %v12724_v0 = vld [vmem:[#allocation15_spill] sm:$0xff]  ;;  %v12725_v50 = vld [vmem:[#allocation16_spill] sm:$0xff] }
 0x98f   :  { %2770 = vmatprep.subr.mxu0 %v8354_v18  ;;  %2841 = vmatprep.subr.mxu1 %v8360_v52  ;;  %v12726_v18 = vld [vmem:[#allocation17_spill] sm:$0xff]  ;;  %v12727_v52 = vld [vmem:[#allocation18_spill] sm:$0xff] }
 0x990   :  { %2771 = vmatpush1.msra.mxu0 %v8366_v4  ;;  %2842 = vmatpush1.msra.mxu1 %v8372_v53  ;;  %v12728_v4 = vld [vmem:[#allocation19_spill] sm:$0xff]  ;;  %v12729_v53 = vld [vmem:[#allocation20_spill] sm:$0xff] }
 0x991   :  { %2772 = vmatprep.subr.mxu0 %v8378_v37  ;;  %2843 = vmatprep.subr.mxu1 %v8384_v34  ;;  %v12730_v37 = vld [vmem:[#allocation21_spill] sm:$0xff]  ;;  %v12731_v34 = vld [vmem:[#allocation22_spill] sm:$0xff] }
 0x992   :  { %2773 = vmatpush1.msra.mxu0 %v8390_v39  ;;  %2844 = vmatpush1.msra.mxu1 %v8396_v1  ;;  %v12732_v39 = vld [vmem:[#allocation23_spill] sm:$0xff]  ;;  %v12733_v1 = vld [vmem:[#allocation86_spill] sm:$0xff] }
 0x993   :  { %2774 = vmatprep.subr.mxu0 %v8402_v15  ;;  %2845 = vmatprep.subr.mxu1 %v8408_v19  ;;  %v12734_v15 = vld [vmem:[#allocation151_spill] sm:$0xff]  ;;  %v12735_v19 = vld [vmem:[#allocation152_spill] sm:$0xff] }
 0x994   :  { %2775 = vmatpush1.msra.mxu0 %v8414_v49  ;;  %2846 = vmatpush1.msra.mxu1 %v8420_v29  ;;  %v12736_v49 = vld [vmem:[#allocation156_spill] sm:$0xff]  ;;  %v12737_v29 = vld [vmem:[#allocation158_spill] sm:$0xff] }
 0x995   :  { %2776 = vmatprep.subr.mxu0 %v8426_v21  ;;  %2847 = vmatprep.subr.mxu1 %v8432_v23  ;;  %v12738_v21 = vld [vmem:[#allocation159_spill] sm:$0xff] }
 0x996   :  { %2777 = vmatpush1.msra.mxu0 %v8438_v14  ;;  %2848 = vmatpush1.msra.mxu1 %v8444_v24  ;;  %v12739_v23 = vld [vmem:[#allocation163_spill] sm:$0xff]  ;;  %v12740_v14 = vld [vmem:[#allocation162_spill] sm:$0xff]  ;;  %v12741_v24 = vld [vmem:[#allocation160_spill] sm:$0xff] }
 0x997   :  { %2778 = vmatprep.subr.mxu0 %v8450_v25  ;;  %2849 = vmatprep.subr.mxu1 %v8456_v26  ;;  %v12742_v25 = vld [vmem:[#allocation24_spill] sm:$0xff]  ;;  %v12743_v26 = vld [vmem:[#allocation25_spill] sm:$0xff] }
 0x998   :  { %2779 = vmatpush1.msra.mxu0 %v12713_v32  ;;  %2850 = vmatpush1.msra.mxu1 %v12714_v20 }
 0x999   :  { %2780 = vmatprep.subr.mxu0 %v12715_v57  ;;  %2851 = vmatprep.subr.mxu1 %v12716_v2  ;;  %v2410_v2 = vadd.f32 %v9469_v11, %v6672_v44 }
 0x99a   :  { %2781 = vmatpush1.msra.mxu0 %v12717_v40  ;;  %2852 = vmatpush1.msra.mxu1 %v12718_v6 }
 0x99b   :  { %2782 = vmatprep.subr.mxu0 %v12719_v16  ;;  %2853 = vmatprep.subr.mxu1 %v12720_v17 }
 0x99c   :  { %2783 = vmatpush1.msra.mxu0 %v12721_v60  ;;  %2854 = vmatpush1.msra.mxu1 %v12722_v3 }
 0x99d   :  { %2784 = vmatprep.subr.mxu0 %v12723_v54  ;;  %2855 = vmatprep.subr.mxu1 %v12724_v0 }
 0x99e   :  { %2785 = vmatpush1.msra.mxu0 %v12725_v50  ;;  %2856 = vmatpush1.msra.mxu1 %v12726_v18 }
 0x99f   :  { %2786 = vmatprep.subr.mxu0 %v12727_v52  ;;  %2857 = vmatprep.subr.mxu1 %v12728_v4 }
 0x9a0   :  { %2787 = vmatpush1.msra.mxu0 %v12729_v53  ;;  %2858 = vmatpush1.msra.mxu1 %v12730_v37 }
 0x9a1   :  { %2788 = vmatprep.subr.mxu0 %v12731_v34  ;;  %2859 = vmatprep.subr.mxu1 %v12732_v39  ;;  %v12751_v39 = vld [vmem:[#allocation32_spill] sm:$0xff] }
 0x9a2   :  { %2789 = vmatpush1.msra.mxu0 %v12733_v1  ;;  %2860 = vmatpush1.msra.mxu1 %v12734_v15  ;;  %v12753_v1 = vld [vmem:[#allocation34_spill] sm:$0xff]  ;;  %v12754_v15 = vld [vmem:[#allocation35_spill] sm:$0xff] }
 0x9a3   :  { %2790 = vmatprep.subr.mxu0 %v12735_v19  ;;  %2861 = vmatprep.subr.mxu1 %v12736_v49  ;;  %v12755_v19 = vld [vmem:[#allocation36_spill] sm:$0xff]  ;;  %v12756_v49 = vld [vmem:[#allocation37_spill] sm:$0xff] }
 0x9a4   :  { %2791 = vmatpush1.msra.mxu0 %v12737_v29  ;;  %2862 = vmatpush1.msra.mxu1 %v12738_v21  ;;  %v12757_v29 = vld [vmem:[#allocation38_spill] sm:$0xff]  ;;  %v12762_v21 = vld [vmem:[#allocation43_spill] sm:$0xff] }
 0x9a5   :  { %2792 = vmatprep.subr.mxu0 %v12739_v23  ;;  %2863 = vmatprep.subr.mxu1 %v12740_v14  ;;  %v12763_v23 = vld [vmem:[#allocation44_spill] sm:$0xff]  ;;  %v12764_v14 = vld [vmem:[#allocation45_spill] sm:$0xff] }
 0x9a6   :  { %2793 = vmatpush1.msra.mxu0 %v12741_v24  ;;  %2864 = vmatpush1.msra.mxu1 %v12742_v25  ;;  %v12765_v24 = vld [vmem:[#allocation46_spill] sm:$0xff]  ;;  %v12766_v25 = vld [vmem:[#allocation47_spill] sm:$0xff] }
 0x9a7   :  { %2794 = vmatprep.subr.mxu0 %v12743_v26  ;;  %2865 = vmatprep.subr.mxu1 %v12744_v5  ;;  %v12767_v26 = vld [vmem:[#allocation48_spill] sm:$0xff]  ;;  %v12768_v5 = vld [vmem:[#allocation49_spill] sm:$0xff] }
 0x9a8   :  { %2795 = vmatpush1.msra.mxu0 %v12745_v47  ;;  %2866 = vmatpush1.msra.mxu1 %v12746_v27  ;;  %v12769_v47 = vld [vmem:[#allocation50_spill] sm:$0xff]  ;;  %v12770_v27 = vld [vmem:[#allocation51_spill] sm:$0xff] }
 0x9a9   :  { %2828 = vmatprep.mubr.f32.mxu0 %v12085_v22  ;;  %2899 = vmatprep.mubr.f32.mxu1 %v12085_v22 }
 0x9aa   :  { %2918 = vmatprep.subr.mxu0 %v12747_v43  ;;  %2989 = vmatprep.subr.mxu1 %v12748_v41  ;;  %v12771_v43 = vld [vmem:[#allocation52_spill] sm:$0xff]  ;;  %v12772_v41 = vld [vmem:[#allocation53_spill] sm:$0xff] }
 0xa49   :  { %v2660_v12 = vpop.f32.mrf.mxu0  ;;  %v2731_v32 = vpop.f32.mrf.mxu1 }
 0xa4a   :  { %v2736_v59 = vadd.f32 %v2660_v12, %v2337_v10  ;;  %v2738_v6 = vadd.f32 %v2731_v32, %v2408_v8  ;;  %v12775_v10 = vld [vmem:[#allocation56_spill] sm:$0xff]  ;;  %v12776_v12 = vld [vmem:[#allocation57_spill] sm:$0xff]  ;;  %v12782_v32 = vld [vmem:[#allocation63_spill] sm:$0xff] }
 0xa4b   :  { %v2662_v7 = vpop.f32.mrf.mxu0  ;;  %v2733_v57 = vpop.f32.mrf.mxu1  ;;  %v12787_v8 = vld [vmem:[#allocation68_spill] sm:$0xff] }
 0xa4c   :  { %v4372_v63 = vmul.f32 -1.442695, %v2736_v59  ;;  %v2737_v35 = vadd.f32 %v2662_v7, %v2339_v13  ;;  %v2739_v40 = vadd.f32 %v2733_v57, %v2410_v2  ;;  %v12777_v13 = vld [vmem:[#allocation58_spill] sm:$0xff]  ;;  %v12778_v59 = vld [vmem:[#allocation59_spill] sm:$0xff]  ;;  %v12779_v7 = vld [vmem:[#allocation60_spill] sm:$0xff] }
 0xa4d   :  { %v12784_v57 = vld [vmem:[#allocation65_spill] sm:$0xff]  ;;  %v12785_v2 = vld [vmem:[#allocation66_spill] sm:$0xff] }
 0xa4e   :  { %4609 = vpow2.f32 %v4372_v63  ;;  %v4373_v20 = vmul.f32 -1.442695, %v2737_v35  ;;  %v4374_v16 = vmul.f32 -1.442695, %v2739_v40  ;;  %v12780_v63 = vld [vmem:[#allocation61_spill] sm:$0xff]  ;;  %v12781_v35 = vld [vmem:[#allocation62_spill] sm:$0xff] }
 0xa4f   :  { %v12786_v40 = vld [vmem:[#allocation67_spill] sm:$0xff] }
 0xa50   :  { %4611 = vpow2.f32 %v4373_v20  ;;  %v12783_v20 = vld [vmem:[#allocation64_spill] sm:$0xff] }
 0xa51   :  { %4613 = vtanh.f32 %v2738_v6  ;;  %v12788_v6 = vld [vmem:[#allocation69_spill] sm:$0xff] }
 0xa52   :  { %4615 = vpow2.f32 %v4374_v16  ;;  %v12789_v16 = vld [vmem:[#allocation70_spill] sm:$0xff] }
 0xa5b   :  { %v4610_v17 = vpop.eup %4609 }
 0xa5c   :  { %v2743_v61 = vadd.f32 1.0, %v4610_v17  ;;  %v12790_v17 = vld [vmem:[#allocation71_spill] sm:$0xff] }
 0xa5d   :  { %v4612_v60 = vpop.eup %4611 }
 0xa5e   :  { %4617 = vrcp.f32 %v2743_v61  ;;  %v2749_v3 = vadd.f32 1.0, %v4612_v60  ;;  %v4614_v54 = vpop.eup %4613  ;;  %v12791_v61 = vld [vmem:[#allocation72_spill] sm:$0xff]  ;;  %v12792_v60 = vld [vmem:[#allocation73_spill] sm:$0xff] }
 0xa5f   :  { %v4616_v0 = vpop.eup %4615 }
 0xa60   :  { %4619 = vrcp.f32 %v2749_v3  ;;  %v2756_v11 = vadd.f32 1.0, %v4616_v0  ;;  %v12793_v3 = vld [vmem:[#allocation74_spill] sm:$0xff]  ;;  %v12795_v0 = vld [vmem:[#allocation76_spill] sm:$0xff] }
 0xa62   :  { %4621 = vrcp.f32 %v2756_v11  ;;  %v12799_v11 = vld [vmem:[#allocation80_spill] sm:$0xff] }
 0xa6b   :  { %v4618_v50 = vpop.eup %4617 }
 0xa6c   :  { %v2760_v18 = vmul.f32 %v4618_v50, %v4614_v54  ;;  %v12794_v54 = vld [vmem:[#allocation75_spill] sm:$0xff]  ;;  %v12796_v50 = vld [vmem:[#allocation77_spill] sm:$0xff] }
 0xa6d   :  { %v4620_v52 = vpop.eup %4619 }
 0xa6e   :  { %v2759_v4 = vmul.f32 %v4620_v52, %v8692_v36  ;;  %v12752_v36 = vld [vmem:[#allocation33_spill] sm:$0xff]  ;;  %v12798_v52 = vld [vmem:[#allocation79_spill] sm:$0xff] }
 0xa6f   :  { %v4622_v45 = vpop.eup %4621 }
 0xa70   :  { %v9559_v53 = vadd.f32 %v2760_v18, %v2759_v4  ;;  %v12797_v18 = vld [vmem:[#allocation78_spill] sm:$0xff]  ;;  %v12800_v4 = vld [vmem:[#allocation81_spill] sm:$0xff] }
 0xa72   :  { %4623 = vtanh.f32 %v9559_v53 }
 0xa7f   :  { %v4624_v37 = vpop.eup %4623 }
 0xa80   :  { %v2763_v34 = vmul.f32 %v4624_v37, %v4622_v45  ;;  %v12801_v45 = vld [vmem:[#allocation82_spill] sm:$0xff]  ;;  %v12802_v37 = vld [vmem:[#allocation83_spill] sm:$0xff] }
 0xa82   :  { %2829 = vmatmul.mubr.f32.vlgmr.msra.gmra.mxu0 %v2763_v34  ;;  %2900 = vmatmul.mubr.f32.vlgmr.msra.gmra.mxu1 %v2763_v34  ;;  %v12803_v34 = vld [vmem:[#allocation84_spill] sm:$0xff] }
 0xa83   :  { %2919 = vmatpush1.msra.mxu0 %v8698_v30  ;;  %2990 = vmatpush1.msra.mxu1 %v8704_v42  ;;  %v12758_v30 = vld [vmem:[#allocation39_spill] sm:$0xff]  ;;  %v12759_v42 = vld [vmem:[#allocation40_spill] sm:$0xff] }
 0xa84   :  { %2920 = vmatprep.subr.mxu0 %v8710_v58  ;;  %2991 = vmatprep.subr.mxu1 %v8716_v62  ;;  %v12760_v58 = vld [vmem:[#allocation41_spill] sm:$0xff]  ;;  %v12761_v62 = vld [vmem:[#allocation42_spill] sm:$0xff] }
 0xa85   :  { %2921 = vmatpush1.msra.mxu0 %v12751_v39  ;;  %2992 = vmatpush1.msra.mxu1 %v12752_v36  ;;  %v12804_v39 = vld [vmem:[#allocation85_spill] sm:$0xff]  ;;  %v12805_v36 = vld [vmem:[#allocation87_spill] sm:$0xff] }
 0xa86   :  { %2922 = vmatprep.subr.mxu0 %v12753_v1  ;;  %2993 = vmatprep.subr.mxu1 %v12754_v15  ;;  %v12806_v1 = vld [vmem:[#allocation88_spill] sm:$0xff]  ;;  %v12807_v15 = vld [vmem:[#allocation89_spill] sm:$0xff] }
 0xa87   :  { %2923 = vmatpush1.msra.mxu0 %v12755_v19  ;;  %2994 = vmatpush1.msra.mxu1 %v12756_v49  ;;  %v12808_v19 = vld [vmem:[#allocation90_spill] sm:$0xff]  ;;  %v12809_v49 = vld [vmem:[#allocation91_spill] sm:$0xff] }
 0xa88   :  { %2924 = vmatprep.subr.mxu0 %v12757_v29  ;;  %2995 = vmatprep.subr.mxu1 %v12758_v30  ;;  %v12810_v29 = vld [vmem:[#allocation92_spill] sm:$0xff]  ;;  %v12811_v30 = vld [vmem:[#allocation93_spill] sm:$0xff] }
 0xa89   :  { %2925 = vmatpush1.msra.mxu0 %v12759_v42  ;;  %2996 = vmatpush1.msra.mxu1 %v12760_v58  ;;  %v12812_v42 = vld [vmem:[#allocation94_spill] sm:$0xff]  ;;  %v12813_v58 = vld [vmem:[#allocation95_spill] sm:$0xff] }
 0xa8a   :  { %2926 = vmatprep.subr.mxu0 %v12761_v62  ;;  %2997 = vmatprep.subr.mxu1 %v12762_v21  ;;  %v12814_v62 = vld [vmem:[#allocation96_spill] sm:$0xff]  ;;  %v12815_v21 = vld [vmem:[#allocation97_spill] sm:$0xff] }
 0xa8b   :  { %2927 = vmatpush1.msra.mxu0 %v12763_v23  ;;  %2998 = vmatpush1.msra.mxu1 %v12764_v14  ;;  %v12816_v23 = vld [vmem:[#allocation98_spill] sm:$0xff]  ;;  %v12817_v14 = vld [vmem:[#allocation99_spill] sm:$0xff] }
 0xa8c   :  { %2928 = vmatprep.subr.mxu0 %v12765_v24  ;;  %2999 = vmatprep.subr.mxu1 %v12766_v25  ;;  %v12818_v24 = vld [vmem:[#allocation100_spill] sm:$0xff]  ;;  %v12820_v25 = vld [vmem:[#allocation102_spill] sm:$0xff] }
 0xa8d   :  { %2929 = vmatpush1.msra.mxu0 %v12767_v26  ;;  %3000 = vmatpush1.msra.mxu1 %v12768_v5  ;;  %v12821_v26 = vld [vmem:[#allocation103_spill] sm:$0xff]  ;;  %v12822_v5 = vld [vmem:[#allocation104_spill] sm:$0xff] }
 0xa8e   :  { %2930 = vmatprep.subr.mxu0 %v12769_v47  ;;  %3001 = vmatprep.subr.mxu1 %v12770_v27  ;;  %v12823_v47 = vld [vmem:[#allocation105_spill] sm:$0xff]  ;;  %v12824_v27 = vld [vmem:[#allocation106_spill] sm:$0xff] }
 0xa8f   :  { %2931 = vmatpush1.msra.mxu0 %v12771_v43  ;;  %3002 = vmatpush1.msra.mxu1 %v12772_v41  ;;  %v12825_v43 = vld [vmem:[#allocation107_spill] sm:$0xff]  ;;  %v12826_v41 = vld [vmem:[#allocation108_spill] sm:$0xff] }
 0xa90   :  { %2932 = vmatprep.subr.mxu0 %v12773_v9  ;;  %3003 = vmatprep.subr.mxu1 %v12774_v33  ;;  %v12827_v9 = vld [vmem:[#allocation109_spill] sm:$0xff]  ;;  %v12828_v33 = vld [vmem:[#allocation110_spill] sm:$0xff] }
 0xa91   :  { %2933 = vmatpush1.msra.mxu0 %v12775_v10  ;;  %3004 = vmatpush1.msra.mxu1 %v12776_v12  ;;  %v12829_v10 = vld [vmem:[#allocation111_spill] sm:$0xff]  ;;  %v12830_v12 = vld [vmem:[#allocation112_spill] sm:$0xff] }
 0xa92   :  { %2934 = vmatprep.subr.mxu0 %v12777_v13  ;;  %3005 = vmatprep.subr.mxu1 %v12778_v59  ;;  %v12831_v13 = vld [vmem:[#allocation113_spill] sm:$0xff]  ;;  %v12832_v59 = vld [vmem:[#allocation114_spill] sm:$0xff] }
 0xa93   :  { %2935 = vmatpush1.msra.mxu0 %v12779_v7  ;;  %3006 = vmatpush1.msra.mxu1 %v12780_v63  ;;  %v12833_v7 = vld [vmem:[#allocation115_spill] sm:$0xff]  ;;  %v12834_v63 = vld [vmem:[#allocation116_spill] sm:$0xff] }
 0xa94   :  { %2936 = vmatprep.subr.mxu0 %v12781_v35  ;;  %3007 = vmatprep.subr.mxu1 %v12782_v32  ;;  %v12835_v35 = vld [vmem:[#allocation117_spill] sm:$0xff]  ;;  %v12836_v32 = vld [vmem:[#allocation118_spill] sm:$0xff] }
 0xa95   :  { %2937 = vmatpush1.msra.mxu0 %v12783_v20  ;;  %3008 = vmatpush1.msra.mxu1 %v12784_v57  ;;  %v12837_v20 = vld [vmem:[#allocation119_spill] sm:$0xff]  ;;  %v12838_v57 = vld [vmem:[#allocation120_spill] sm:$0xff] }
 0xa96   :  { %2938 = vmatprep.subr.mxu0 %v12785_v2  ;;  %3009 = vmatprep.subr.mxu1 %v12786_v40  ;;  %v12839_v2 = vld [vmem:[#allocation121_spill] sm:$0xff]  ;;  %v12840_v40 = vld [vmem:[#allocation122_spill] sm:$0xff] }
 0xa97   :  { %2939 = vmatpush1.msra.mxu0 %v12787_v8  ;;  %3010 = vmatpush1.msra.mxu1 %v12788_v6  ;;  %v12841_v8 = vld [vmem:[#allocation123_spill] sm:$0xff]  ;;  %v12842_v6 = vld [vmem:[#allocation124_spill] sm:$0xff] }
 0xa98   :  { %2940 = vmatprep.subr.mxu0 %v12789_v16  ;;  %3011 = vmatprep.subr.mxu1 %v12790_v17  ;;  %v12843_v16 = vld [vmem:[#allocation125_spill] sm:$0xff]  ;;  %v12844_v17 = vld [vmem:[#allocation126_spill] sm:$0xff] }
 0xa99   :  { %2941 = vmatpush1.msra.mxu0 %v12791_v61  ;;  %3012 = vmatpush1.msra.mxu1 %v12792_v60  ;;  %v12845_v61 = vld [vmem:[#allocation127_spill] sm:$0xff]  ;;  %v12846_v60 = vld [vmem:[#allocation128_spill] sm:$0xff] }
 0xa9a   :  { %2942 = vmatprep.subr.mxu0 %v12793_v3  ;;  %3013 = vmatprep.subr.mxu1 %v12794_v54  ;;  %v12847_v3 = vld [vmem:[#allocation129_spill] sm:$0xff]  ;;  %v12848_v54 = vld [vmem:[#allocation130_spill] sm:$0xff] }
 0xa9b   :  { %2943 = vmatpush1.msra.mxu0 %v12795_v0  ;;  %3014 = vmatpush1.msra.mxu1 %v12796_v50  ;;  %v12849_v0 = vld [vmem:[#allocation131_spill] sm:$0xff]  ;;  %v12850_v50 = vld [vmem:[#allocation132_spill] sm:$0xff] }
 0xa9c   :  { %2944 = vmatprep.subr.mxu0 %v12797_v18  ;;  %3015 = vmatprep.subr.mxu1 %v12798_v52  ;;  %v12851_v18 = vld [vmem:[#allocation133_spill] sm:$0xff]  ;;  %v12852_v52 = vld [vmem:[#allocation134_spill] sm:$0xff] }
 0xa9d   :  { %2945 = vmatpush1.msra.mxu0 %v12799_v11  ;;  %3016 = vmatpush1.msra.mxu1 %v12800_v4  ;;  %v12853_v11 = vld [vmem:[#allocation135_spill] sm:$0xff]  ;;  %v12854_v4 = vld [vmem:[#allocation136_spill] sm:$0xff] }
 0xa9e   :  { %2946 = vmatprep.subr.mxu0 %v12801_v45  ;;  %3017 = vmatprep.subr.mxu1 %v12802_v37  ;;  %v12855_v45 = vld [vmem:[#allocation137_spill] sm:$0xff]  ;;  %v12856_v37 = vld [vmem:[#allocation138_spill] sm:$0xff] }
 0xa9f   :  { %2947 = vmatpush1.msra.mxu0 %v12803_v34  ;;  %3018 = vmatpush1.msra.mxu1 %v12804_v39  ;;  %v12857_v34 = vld [vmem:[#allocation139_spill] sm:$0xff]  ;;  %v12858_v39 = vld [vmem:[#allocation140_spill] sm:$0xff] }
 0xaa0   :  { %2948 = vmatprep.subr.mxu0 %v12805_v36  ;;  %3019 = vmatprep.subr.mxu1 %v12806_v1  ;;  %v12859_v36 = vld [vmem:[#allocation141_spill] sm:$0xff]  ;;  %v12860_v1 = vld [vmem:[#allocation142_spill] sm:$0xff] }
 0xaa1   :  { %2949 = vmatpush1.msra.mxu0 %v12807_v15  ;;  %2982 = vmatprep.mubr.f32.mxu0 %v12085_v22  ;;  %v12861_v15 = vld [vmem:[#allocation143_spill] sm:$0xff] }
 0xaa2   :  { %3020 = vmatpush1.msra.mxu1 %v12808_v19  ;;  %3053 = vmatprep.mubr.f32.mxu1 %v12085_v22  ;;  %v12862_v19 = vld [vmem:[#allocation144_spill] sm:$0xff] }
 0xaa3   :  { %2983 = vmatmul.mubr.f32.vlgmr.msra.gmra.mxu0 %v9479_v51  ;;  %3054 = vmatmul.mubr.f32.vlgmr.msra.gmra.mxu1 %v9479_v51  ;;  %v12819_v51 = vld [vmem:[#allocation101_spill] sm:$0xff] }
 0xaa4   :  { %3088 = vmatprep.subr.mxu0 %v12809_v49  ;;  %3159 = vmatprep.subr.mxu1 %v12810_v29  ;;  %v12863_v49 = vld [vmem:[#allocation145_spill] sm:$0xff]  ;;  %v12864_v29 = vld [vmem:[#allocation146_spill] sm:$0xff] }
 0xaa5   :  { %3089 = vmatpush1.msra.mxu0 %v12811_v30  ;;  %3160 = vmatpush1.msra.mxu1 %v12812_v42  ;;  %v12865_v30 = vld [vmem:[#allocation147_spill] sm:$0xff]  ;;  %v12866_v42 = vld [vmem:[#allocation148_spill] sm:$0xff] }
 0xaa6   :  { %3090 = vmatprep.subr.mxu0 %v12813_v58  ;;  %3161 = vmatprep.subr.mxu1 %v12814_v62  ;;  %v12867_v58 = vld [vmem:[#allocation149_spill] sm:$0xff]  ;;  %v12868_v62 = vld [vmem:[#allocation150_spill] sm:$0xff] }
 0xaa7   :  { %3091 = vmatpush1.msra.mxu0 %v12815_v21  ;;  %3162 = vmatpush1.msra.mxu1 %v12816_v23  ;;  %v12869_v21 = vld [vmem:[#allocation161_spill] sm:$0xff] }
 0xaa8   :  { %3092 = vmatprep.subr.mxu0 %v12817_v14  ;;  %3163 = vmatprep.subr.mxu1 %v12818_v24  ;;  %v12870_v23 = vld [vmem:[#allocation165_spill] sm:$0xff]  ;;  %v12871_v14 = vld [vmem:[#allocation166_spill] sm:$0xff]  ;;  %v12872_v24 = vld [vmem:[#allocation167_spill] sm:$0xff] }
 0xaa9   :  { %3093 = vmatpush1.msra.mxu0 %v12819_v51  ;;  %3164 = vmatpush1.msra.mxu1 %v12820_v25  ;;  %v9697_v51 = vld [vmem:[%s11230_s5 + $0x1e8] sm:$0xff]  ;;  %v9703_v25 = vld [vmem:[%s11230_s5 + $0x1f8] sm:$0xff] }
 0xaaa   :  { %3094 = vmatprep.subr.mxu0 %v12821_v26  ;;  %3165 = vmatprep.subr.mxu1 %v12822_v5  ;;  %v2908_v26 = vpop.permute.xlu0 %2907  ;;  %v12873_v5 = vld [vmem:[#allocation153_spill] sm:$0xff] }
 0xaab   :  { %3095 = vmatpush1.msra.mxu0 %v12823_v47  ;;  %3166 = vmatpush1.msra.mxu1 %v12824_v27  ;;  %v2910_v47 = vmul.f32 %v2908_v26, %v12873_v5 }
 0xaac   :  { %3096 = vmatprep.subr.mxu0 %v12825_v43  ;;  %3167 = vmatprep.subr.mxu1 %v12826_v41  ;;  %v12874_v43 = vld [vmem:[#allocation154_spill] sm:$0xff] }
 0xaad   :  { %3097 = vmatpush1.msra.mxu0 %v12827_v9  ;;  %3168 = vmatpush1.msra.mxu1 %v12828_v33  ;;  %v2911_v41 = vmul.f32 %v2908_v26, %v12874_v43  ;;  %v12875_v9 = vld [vmem:[#allocation155_spill] sm:$0xff] }
 0xaae   :  { %3098 = vmatprep.subr.mxu0 %v12829_v10  ;;  %3169 = vmatprep.subr.mxu1 %v12830_v12  ;;  %v2914_v33 = vadd.f32 %v2910_v47, %v12875_v9  ;;  %v9793_v47 = vld [vmem:[%s11230_s5 + $0x188] sm:$0xff] }
 0xaaf   :  { %3099 = vmatpush1.msra.mxu0 %v12831_v13  ;;  %3170 = vmatpush1.msra.mxu1 %v12832_v59  ;;  %v12876_v13 = vld [vmem:[#allocation157_spill] sm:$0xff] }
 0xab0   :  { %3100 = vmatprep.subr.mxu0 %v12833_v7  ;;  %3171 = vmatprep.subr.mxu1 %v12834_v63  ;;  %v2915_v59 = vadd.f32 %v2911_v41, %v12876_v13  ;;  %v9799_v41 = vld [vmem:[%s11230_s5 + $0x198] sm:$0xff] }
 0xab1   :  { %3101 = vmatpush1.msra.mxu0 %v12835_v35  ;;  %3172 = vmatpush1.msra.mxu1 %v12836_v32 }
 0xab2   :  { %3102 = vmatprep.subr.mxu0 %v12837_v20  ;;  %3173 = vmatprep.subr.mxu1 %v12838_v57 }
 0xab3   :  { %3103 = vmatpush1.msra.mxu0 %v12839_v2  ;;  %3174 = vmatpush1.msra.mxu1 %v12840_v40  ;;  %v2913_v2 = vmul.f32 %v2908_v26, %v12228_v48 }
 0xab4   :  { %3104 = vmatprep.subr.mxu0 %v12841_v8  ;;  %3175 = vmatprep.subr.mxu1 %v12842_v6  ;;  %v12877_v6 = vld [vmem:[#allocation164_spill] sm:$0xff] }
 0xab5   :  { %3105 = vmatpush1.msra.mxu0 %v12843_v16  ;;  %3176 = vmatpush1.msra.mxu1 %v12844_v17  ;;  %v2917_v16 = vadd.f32 %v2913_v2, %v12877_v6  ;;  %v9847_v2 = vld [vmem:[%s11230_s5 + $0x158] sm:$0xff] }
 0xab6   :  { %3106 = vmatprep.subr.mxu0 %v12845_v61  ;;  %3177 = vmatprep.subr.mxu1 %v12846_v60  ;;  %v2912_v61 = vmul.f32 %v2908_v26, %v6576_v55  ;;  %v9787_v26 = vld [vmem:[%s11230_s5 + $0x1b0] sm:$0xff] }
 0xab7   :  { %3107 = vmatpush1.msra.mxu0 %v12847_v3  ;;  %3178 = vmatpush1.msra.mxu1 %v12848_v54 }
 0xab8   :  { %3108 = vmatprep.subr.mxu0 %v12849_v0  ;;  %3179 = vmatprep.subr.mxu1 %v12850_v50  ;;  %v2916_v3 = vadd.f32 %v2912_v61, %v6580_v56  ;;  %v9877_v61 = vld [vmem:[%s11230_s5 + $0x120] sm:$0xff] }
 0xab9   :  { %3109 = vmatpush1.msra.mxu0 %v12851_v18  ;;  %3180 = vmatpush1.msra.mxu1 %v12852_v52 }
 0xaba   :  { %3110 = vmatprep.subr.mxu0 %v12853_v11  ;;  %3181 = vmatprep.subr.mxu1 %v12854_v4 }
 0xabb   :  { %3111 = vmatpush1.msra.mxu0 %v12855_v45  ;;  %3182 = vmatpush1.msra.mxu1 %v12856_v37 }
 0xabc   :  { %3112 = vmatprep.subr.mxu0 %v12857_v34  ;;  %3183 = vmatprep.subr.mxu1 %v12858_v39 }
 0xabd   :  { %3113 = vmatpush1.msra.mxu0 %v12859_v36  ;;  %3184 = vmatpush1.msra.mxu1 %v12860_v1 }
 0xabe   :  { %3114 = vmatprep.subr.mxu0 %v12861_v15  ;;  %3185 = vmatprep.subr.mxu1 %v12862_v19 }
 0xabf   :  { %3115 = vmatpush1.msra.mxu0 %v12863_v49  ;;  %3186 = vmatpush1.msra.mxu1 %v12864_v29 }
 0xac0   :  { %3116 = vmatprep.subr.mxu0 %v12865_v30  ;;  %3187 = vmatprep.subr.mxu1 %v12866_v42  ;;  %v9733_v30 = vld [vmem:[%s11230_s5 + $0x1e0] sm:$0xff]  ;;  %v9745_v42 = vld [vmem:[%s11230_s5 + $0x1c8] sm:$0xff] }
 0xac1   :  { %3117 = vmatpush1.msra.mxu0 %v12867_v58  ;;  %3188 = vmatpush1.msra.mxu1 %v12868_v62  ;;  %v9751_v58 = vld [vmem:[%s11230_s5 + $0x1d8] sm:$0xff]  ;;  %v9757_v62 = vld [vmem:[%s11230_s5 + $0x1c0] sm:$0xff] }
 0xac2   :  { %3118 = vmatprep.subr.mxu0 %v12869_v21  ;;  %3189 = vmatprep.subr.mxu1 %v12870_v23  ;;  %v9763_v21 = vld [vmem:[%s11230_s5 + $0x1d0] sm:$0xff]  ;;  %v9769_v23 = vld [vmem:[%s11230_s5 + $0x1a8] sm:$0xff] }
 0xac3   :  { %3119 = vmatpush1.msra.mxu0 %v12871_v14  ;;  %3152 = vmatprep.mubr.f32.mxu0 %v12085_v22  ;;  %v9775_v14 = vld [vmem:[%s11230_s5 + $0x1b8] sm:$0xff] }
 0xac4   :  { %3190 = vmatpush1.msra.mxu1 %v12872_v24  ;;  %3223 = vmatprep.mubr.f32.mxu1 %v12085_v22  ;;  %v9781_v24 = vld [vmem:[%s11230_s5 + $0x1a0] sm:$0xff] }
 0xac5   :  { %3258 = vmatprep.subr.mxu0 %v9697_v51  ;;  %3329 = vmatprep.subr.mxu1 %v9703_v25 }
 0xb42   :  { %v9707_v27 = vpop.f32.mrf.mxu0  ;;  %v9713_v12 = vpop.f32.mrf.mxu1 }
 0xb44   :  { %v9711_v10 = vpop.f32.mrf.mxu0  ;;  %v9716_v32 = vpop.f32.mrf.mxu1 }
 0xb63   :  { %v2984_v7 = vpop.f32.mrf.mxu0  ;;  %v3055_v40 = vpop.f32.mrf.mxu1 }
 0xb64   :  { %v3060_v63 = vadd.f32 %v2984_v7, %v2914_v33  ;;  %v3062_v50 = vadd.f32 %v3055_v40, %v2916_v3  ;;  %v9805_v33 = vld [vmem:[%s11230_s5 + $0x180] sm:$0xff]  ;;  %v9817_v7 = vld [vmem:[%s11230_s5 + $0x168] sm:$0xff] }
 0xb65   :  { %v2986_v35 = vpop.f32.mrf.mxu0  ;;  %v3057_v17 = vpop.f32.mrf.mxu1  ;;  %v9853_v40 = vld [vmem:[%s11230_s5 + $0x140] sm:$0xff]  ;;  %v9889_v3 = vld [vmem:[%s11230_s5 + $0x108] sm:$0xff] }
 0xb66   :  { %v4375_v20 = vmul.f32 -1.442695, %v3060_v63  ;;  %v3061_v57 = vadd.f32 %v2986_v35, %v2915_v59  ;;  %v3063_v60 = vadd.f32 %v3057_v17, %v2917_v16  ;;  %v9811_v59 = vld [vmem:[%s11230_s5 + $0x190] sm:$0xff]  ;;  %v9823_v63 = vld [vmem:[%s11230_s5 + $0x178] sm:$0xff]  ;;  %v9829_v35 = vld [vmem:[%s11230_s5 + $0x160] sm:$0xff] }
 0xb67   :  { %v9865_v16 = vld [vmem:[%s11230_s5 + $0x128] sm:$0xff]  ;;  %v9871_v17 = vld [vmem:[%s11230_s5 + $0x138] sm:$0xff] }
 0xb68   :  { %4625 = vpow2.f32 %v4375_v20  ;;  %v4376_v8 = vmul.f32 -1.442695, %v3061_v57  ;;  %v4377_v54 = vmul.f32 -1.442695, %v3063_v60  ;;  %v9835_v20 = vld [vmem:[%s11230_s5 + $0x170] sm:$0xff]  ;;  %v9841_v57 = vld [vmem:[%s11230_s5 + $0x148] sm:$0xff] }
 0xb69   :  { %v9883_v60 = vld [vmem:[%s11230_s5 + $0x130] sm:$0xff] }
 0xb6a   :  { %4627 = vpow2.f32 %v4376_v8  ;;  %v9859_v8 = vld [vmem:[%s11230_s5 + $0x150] sm:$0xff] }
 0xb6b   :  { %4629 = vpow2.f32 %v4377_v54  ;;  %v9895_v54 = vld [vmem:[%s11230_s5 + $0x118] sm:$0xff] }
 0xb75   :  { %v4626_v0 = vpop.eup %4625 }
 0xb76   :  { %v3067_v18 = vadd.f32 1.0, %v4626_v0  ;;  %v9901_v0 = vld [vmem:[%s11230_s5 + $0x100] sm:$0xff] }
 0xb77   :  { %v4628_v52 = vpop.eup %4627  ;;  %12878 = vst [vmem:[#allocation4_spill] sm:$0xff] %v9901_v0 }
 0xb78   :  { %4631 = vrcp.f32 %v3067_v18  ;;  %v3073_v11 = vadd.f32 1.0, %v4628_v52  ;;  %v4630_v4 = vpop.eup %4629  ;;  %v9913_v18 = vld [vmem:[%s11230_s5 + $0xe8] sm:$0xff]  ;;  %v9919_v52 = vld [vmem:[%s11230_s5 + $0xf8] sm:$0xff] }
 0xb79   :  { %4633 = vtanh.f32 %v3062_v50  ;;  %v3080_v39 = vadd.f32 1.0, %v4630_v4  ;;  %v9907_v50 = vld [vmem:[%s11230_s5 + $0x110] sm:$0xff]  ;;  %12880 = vst [vmem:[#allocation6_spill] sm:$0xff] %v9913_v18  ;;  %12881 = vst [vmem:[#allocation7_spill] sm:$0xff] %v9919_v52 }
 0xb7a   :  { %4635 = vrcp.f32 %v3073_v11  ;;  %12879 = vst [vmem:[#allocation5_spill] sm:$0xff] %v9907_v50  ;;  %v9925_v11 = vld [vmem:[%s11230_s5 + $0xe0] sm:$0xff]  ;;  %v9931_v4 = vld [vmem:[%s11230_s5 + $0xf0] sm:$0xff] }
 0xb7b   :  { %4637 = vrcp.f32 %v3080_v39  ;;  %12882 = vst [vmem:[#allocation8_spill] sm:$0xff] %v9925_v11  ;;  %12883 = vst [vmem:[#allocation9_spill] sm:$0xff] %v9931_v4  ;;  %v9955_v39 = vld [vmem:[%s11230_s5 + $0xd0] sm:$0xff] }
 0xb7c   :  { %12887 = vst [vmem:[#allocation13_spill] sm:$0xff] %v9955_v39 }
 0xb85   :  { %v4632_v45 = vpop.eup %4631 }
 0xb86   :  { %v4634_v37 = vpop.eup %4633 }
 0xb87   :  { %v4636_v34 = vpop.eup %4635  ;;  %v3084_v36 = vmul.f32 %v4634_v37, %v4632_v45  ;;  %v9937_v45 = vld [vmem:[%s11230_s5 + $0xc8] sm:$0xff]  ;;  %v9943_v37 = vld [vmem:[%s11230_s5 + $0xd8] sm:$0xff] }
 0xb88   :  { %v3083_v1 = vmul.f32 %v4636_v34, %v9476_v28  ;;  %v4638_v19 = vpop.eup %4637  ;;  %v9739_v28 = vld [vmem:[%s11230_s5 + $0x1f0] sm:$0xff]  ;;  %12884 = vst [vmem:[#allocation10_spill] sm:$0xff] %v9937_v45  ;;  %12885 = vst [vmem:[#allocation11_spill] sm:$0xff] %v9943_v37  ;;  %v9949_v34 = vld [vmem:[%s11230_s5 + $0xc0] sm:$0xff] }
 0xb89   :  { %12886 = vst [vmem:[#allocation12_spill] sm:$0xff] %v9949_v34 }
 0xb8a   :  { %v9723_v15 = vadd.f32 %v3084_v36, %v3083_v1  ;;  %v9961_v36 = vld [vmem:[%s11230_s5 + $0xa8] sm:$0xff]  ;;  %v9967_v1 = vld [vmem:[%s11230_s5 + $0xb8] sm:$0xff] }
 0xb8b   :  { %12888 = vst [vmem:[#allocation14_spill] sm:$0xff] %v9961_v36  ;;  %12889 = vst [vmem:[#allocation15_spill] sm:$0xff] %v9967_v1 }
 0xb8c   :  { %4639 = vtanh.f32 %v9723_v15 }
 0xb99   :  { %v4640_v49 = vpop.eup %4639 }
 0xb9a   :  { %v9726_v29 = vmul.f32 %v4640_v49, %v4638_v19  ;;  %v9973_v19 = vld [vmem:[%s11230_s5 + $0xa0] sm:$0xff]  ;;  %v9979_v49 = vld [vmem:[%s11230_s5 + $0xb0] sm:$0xff] }
 0xb9b   :  { %12890 = vst [vmem:[#allocation16_spill] sm:$0xff] %v9973_v19  ;;  %12891 = vst [vmem:[#allocation17_spill] sm:$0xff] %v9979_v49 }
 0xb9c   :  { %3153 = vmatmul.mubr.f32.vlgmr.msra.gmra.mxu0 %v9726_v29  ;;  %3224 = vmatmul.mubr.f32.vlgmr.msra.gmra.mxu1 %v9726_v29 }
 0xb9d   :  { %3259 = vmatpush1.msra.mxu0 %v9733_v30  ;;  %3330 = vmatpush1.msra.mxu1 %v9739_v28 }
 0xb9e   :  { %3260 = vmatprep.subr.mxu0 %v9745_v42  ;;  %3331 = vmatprep.subr.mxu1 %v9751_v58 }
 0xb9f   :  { %3261 = vmatpush1.msra.mxu0 %v9757_v62  ;;  %3332 = vmatpush1.msra.mxu1 %v9763_v21 }
 0xba0   :  { %3262 = vmatprep.subr.mxu0 %v9769_v23  ;;  %3333 = vmatprep.subr.mxu1 %v9775_v14 }
 0xba1   :  { %3263 = vmatpush1.msra.mxu0 %v9781_v24  ;;  %3334 = vmatpush1.msra.mxu1 %v9787_v26 }
 0xba2   :  { %3264 = vmatprep.subr.mxu0 %v9793_v47  ;;  %3335 = vmatprep.subr.mxu1 %v9799_v41 }
 0xba3   :  { %3265 = vmatpush1.msra.mxu0 %v9805_v33  ;;  %3336 = vmatpush1.msra.mxu1 %v9811_v59 }
 0xba4   :  { %3266 = vmatprep.subr.mxu0 %v9817_v7  ;;  %3337 = vmatprep.subr.mxu1 %v9823_v63 }
 0xba5   :  { %3267 = vmatpush1.msra.mxu0 %v9829_v35  ;;  %3338 = vmatpush1.msra.mxu1 %v9835_v20 }
 0xba6   :  { %3268 = vmatprep.subr.mxu0 %v9841_v57  ;;  %3339 = vmatprep.subr.mxu1 %v9847_v2 }
 0xba7   :  { %3269 = vmatpush1.msra.mxu0 %v9853_v40  ;;  %3340 = vmatpush1.msra.mxu1 %v9859_v8 }
 0xba8   :  { %3270 = vmatprep.subr.mxu0 %v9865_v16  ;;  %3341 = vmatprep.subr.mxu1 %v9871_v17 }
 0xba9   :  { %3271 = vmatpush1.msra.mxu0 %v9877_v61  ;;  %3342 = vmatpush1.msra.mxu1 %v9883_v60 }
 0xbaa   :  { %3272 = vmatprep.subr.mxu0 %v9889_v3  ;;  %3343 = vmatprep.subr.mxu1 %v9895_v54 }
 0xbab   :  { %3273 = vmatpush1.msra.mxu0 %v9901_v0  ;;  %3344 = vmatpush1.msra.mxu1 %v9907_v50 }
 0xbac   :  { %3274 = vmatprep.subr.mxu0 %v9913_v18  ;;  %3345 = vmatprep.subr.mxu1 %v9919_v52  ;;  %v2904_v18 = vadd.f32 %v9716_v32, %v6672_v44 }
 0xbad   :  { %3275 = vmatpush1.msra.mxu0 %v9925_v11  ;;  %3346 = vmatpush1.msra.mxu1 %v9931_v4 }
 0xbae   :  { %3276 = vmatprep.subr.mxu0 %v9937_v45  ;;  %3347 = vmatprep.subr.mxu1 %v9943_v37 }
 0xbaf   :  { %3277 = vmatpush1.msra.mxu0 %v9949_v34  ;;  %3348 = vmatpush1.msra.mxu1 %v9955_v39  ;;  %v2831_v39 = vadd.f32 %v9707_v27, %v12750_v38  ;;  %v2833_v34 = vadd.f32 %v9711_v10, %v6665_v31  ;;  %v2902_v27 = vadd.f32 %v9713_v12, %v6675_v46 }
 0xbb0   :  { %3278 = vmatprep.subr.mxu0 %v9961_v36  ;;  %3349 = vmatprep.subr.mxu1 %v9967_v1  ;;  %v9985_v36 = vld [vmem:[%s11230_s5 + $0x88] sm:$0xff]  ;;  %v9991_v1 = vld [vmem:[%s11230_s5 + $0x98] sm:$0xff] }
 0xbb1   :  { %3279 = vmatpush1.msra.mxu0 %v9973_v19  ;;  %3350 = vmatpush1.msra.mxu1 %v9979_v49  ;;  %12892 = vst [vmem:[#allocation18_spill] sm:$0xff] %v9985_v36  ;;  %12893 = vst [vmem:[#allocation19_spill] sm:$0xff] %v9991_v1  ;;  %v9997_v19 = vld [vmem:[%s11230_s5 + $0x80] sm:$0xff]  ;;  %v10003_v49 = vld [vmem:[%s11230_s5 + $0x90] sm:$0xff] }
 0xbb2   :  { %3280 = vmatprep.subr.mxu0 %v9985_v36  ;;  %3351 = vmatprep.subr.mxu1 %v9991_v1  ;;  %12894 = vst [vmem:[#allocation20_spill] sm:$0xff] %v9997_v19  ;;  %12895 = vst [vmem:[#allocation21_spill] sm:$0xff] %v10003_v49  ;;  %v10009_v36 = vld [vmem:[%s11230_s5 + $0x68] sm:$0xff]  ;;  %v10015_v1 = vld [vmem:[%s11230_s5 + $0x78] sm:$0xff] }
 0xbb3   :  { %3281 = vmatpush1.msra.mxu0 %v9997_v19  ;;  %3352 = vmatpush1.msra.mxu1 %v10003_v49  ;;  %12896 = vst [vmem:[#allocation22_spill] sm:$0xff] %v10009_v36  ;;  %12897 = vst [vmem:[#allocation23_spill] sm:$0xff] %v10015_v1  ;;  %v10021_v19 = vld [vmem:[%s11230_s5 + $0x60] sm:$0xff]  ;;  %v10027_v49 = vld [vmem:[%s11230_s5 + $0x70] sm:$0xff] }
 0xbb4   :  { %3282 = vmatprep.subr.mxu0 %v10009_v36  ;;  %3353 = vmatprep.subr.mxu1 %v10015_v1  ;;  %12898 = vst [vmem:[#allocation86_spill] sm:$0xff] %v10021_v19  ;;  %12899 = vst [vmem:[#allocation151_spill] sm:$0xff] %v10027_v49  ;;  %v10033_v36 = vld [vmem:[%s11230_s5 + $0x48] sm:$0xff]  ;;  %v10039_v1 = vld [vmem:[%s11230_s5 + $0x58] sm:$0xff] }
 0xbb5   :  { %3283 = vmatpush1.msra.mxu0 %v10021_v19  ;;  %3354 = vmatpush1.msra.mxu1 %v10027_v49  ;;  %12900 = vst [vmem:[#allocation152_spill] sm:$0xff] %v10033_v36  ;;  %12901 = vst [vmem:[#allocation156_spill] sm:$0xff] %v10039_v1  ;;  %v10045_v19 = vld [vmem:[%s11230_s5 + $0x40] sm:$0xff]  ;;  %v10051_v49 = vld [vmem:[%s11230_s5 + $0x50] sm:$0xff] }
 0xbb6   :  { %3284 = vmatprep.subr.mxu0 %v10033_v36  ;;  %3355 = vmatprep.subr.mxu1 %v10039_v1  ;;  %12902 = vst [vmem:[#allocation158_spill] sm:$0xff] %v10045_v19  ;;  %12903 = vst [vmem:[#allocation159_spill] sm:$0xff] %v10051_v49  ;;  %v10057_v36 = vld [vmem:[%s11230_s5 + $0x28] sm:$0xff]  ;;  %v10063_v1 = vld [vmem:[%s11230_s5 + $0x38] sm:$0xff] }
 0xbb7   :  { %3285 = vmatpush1.msra.mxu0 %v10045_v19  ;;  %3356 = vmatpush1.msra.mxu1 %v10051_v49  ;;  %12904 = vst [vmem:[#allocation163_spill] sm:$0xff] %v10057_v36  ;;  %12905 = vst [vmem:[#allocation162_spill] sm:$0xff] %v10063_v1  ;;  %v10069_v19 = vld [vmem:[%s11230_s5 + $0x20] sm:$0xff]  ;;  %v10075_v49 = vld [vmem:[%s11230_s5 + $0x30] sm:$0xff] }
 0xbb8   :  { %3286 = vmatprep.subr.mxu0 %v10057_v36  ;;  %3357 = vmatprep.subr.mxu1 %v10063_v1  ;;  %12906 = vst [vmem:[#allocation160_spill] sm:$0xff] %v10069_v19  ;;  %12907 = vst [vmem:[#allocation24_spill] sm:$0xff] %v10075_v49  ;;  %v10081_v36 = vld [vmem:[%s11230_s5 + $0x8] sm:$0xff]  ;;  %v10087_v1 = vld [vmem:[%s11230_s5 + $0x18] sm:$0xff] }
 0xbb9   :  { %3287 = vmatpush1.msra.mxu0 %v10069_v19  ;;  %3358 = vmatpush1.msra.mxu1 %v10075_v49  ;;  %12908 = vst [vmem:[#allocation25_spill] sm:$0xff] %v10081_v36  ;;  %12909 = vst [vmem:[#allocation26_spill] sm:$0xff] %v10087_v1  ;;  %v10093_v19 = vld [vmem:[%s11230_s5] sm:$0xff]  ;;  %v10099_v49 = vld [vmem:[%s11230_s5 + $0x10] sm:$0xff] }
 0xbba   :  { %3288 = vmatprep.subr.mxu0 %v10081_v36  ;;  %3359 = vmatprep.subr.mxu1 %v10087_v1  ;;  %12910 = vst [vmem:[#allocation27_spill] sm:$0xff] %v10093_v19  ;;  %12911 = vst [vmem:[#allocation28_spill] sm:$0xff] %v10099_v49  ;;  %v10107_v1 = vld [vmem:[%s11231_s3 + $0x1e8] sm:$0xff]  ;;  %v5307_v36 = vmov 6  }
 0xbbb   :  { %3289 = vmatpush1.msra.mxu0 %v10093_v19  ;;  %3360 = vmatpush1.msra.mxu1 %v10099_v49  ;;  %12912 = vst [vmem:[#allocation29_spill] sm:$0xff] %v10107_v1  ;;  %v10113_v19 = vld [vmem:[%s11231_s3 + $0x1f8] sm:$0xff]  ;;  %v10119_v49 = vld [vmem:[%s11232_s0] sm:$0x3] }
 0xbbc   :  { %3322 = vmatprep.mubr.f32.mxu0 %v12085_v22  ;;  %3393 = vmatprep.mubr.f32.mxu1 %v12085_v22  ;;  %12913 = vst [vmem:[#allocation30_spill] sm:$0xff] %v10113_v19  ;;  %12914 = vst [vmem:[#allocation31_spill] sm:$0xff] %v10119_v49 }
 0xbbd   :  { %3412 = vmatprep.subr.mxu0 %v10107_v1  ;;  %3483 = vmatprep.subr.mxu1 %v10113_v19 }
 0xbbe   :  { %4462 = vset.pattern.permute.xlu1 %v5307_v36 }
 0xbbf   :  { %3401 = vperm.xlu1 %4462, %v10119_v49  }
 0xc5c   :  { %v3154_v1 = vpop.f32.mrf.mxu0  ;;  %v3225_v36 = vpop.f32.mrf.mxu1 }
 0xc5d   :  { %v3230_v37 = vadd.f32 %v3154_v1, %v2831_v39  ;;  %v3232_v38 = vadd.f32 %v3225_v36, %v2902_v27  ;;  %v10161_v36 = vld [vmem:[%s11231_s3 + $0x1c0] sm:$0xff]  ;;  %v10167_v27 = vld [vmem:[%s11231_s3 + $0x1d0] sm:$0xff] }
 0xc5e   :  { %v3156_v45 = vpop.f32.mrf.mxu0  ;;  %v3227_v52 = vpop.f32.mrf.mxu1  ;;  %12915 = vst [vmem:[#allocation32_spill] sm:$0xff] %v10161_v36  ;;  %12916 = vst [vmem:[#allocation33_spill] sm:$0xff] %v10167_v27 }
 0xc5f   :  { %v4378_v4 = vmul.f32 -1.442695, %v3230_v37  ;;  %v3231_v19 = vadd.f32 %v3156_v45, %v2833_v34  ;;  %v3233_v49 = vadd.f32 %v3227_v52, %v2904_v18 }
 0xc61   :  { %4641 = vpow2.f32 %v4378_v4  ;;  %v4379_v11 = vmul.f32 -1.442695, %v3231_v19  ;;  %v4380_v50 = vmul.f32 -1.442695, %v3233_v49  ;;  %v10149_v19 = vld [vmem:[%s11231_s3 + $0x1c8] sm:$0xff]  ;;  %v10155_v49 = vld [vmem:[%s11231_s3 + $0x1d8] sm:$0xff] }
 0xc63   :  { %4643 = vpow2.f32 %v4379_v11 }
 0xc64   :  { %4645 = vtanh.f32 %v3232_v38 }
 0xc65   :  { %4647 = vpow2.f32 %v4380_v50  ;;  %v10137_v50 = vld [vmem:[%s11231_s3 + $0x1e0] sm:$0xff] }
 0xc6e   :  { %v4642_v0 = vpop.eup %4641 }
 0xc6f   :  { %v3237_v10 = vadd.f32 1.0, %v4642_v0 }
 0xc70   :  { %v4644_v39 = vpop.eup %4643 }
 0xc71   :  { %4649 = vrcp.f32 %v3237_v10  ;;  %v3243_v4 = vadd.f32 1.0, %v4644_v39  ;;  %v4646_v45 = vpop.eup %4645  ;;  %v10173_v10 = vld [vmem:[%s11231_s3 + $0x1a8] sm:$0xff]  ;;  %v10179_v39 = vld [vmem:[%s11231_s3 + $0x1b8] sm:$0xff] }
 0xc72   :  { %v4648_v11 = vpop.eup %4647  ;;  %12917 = vst [vmem:[#allocation34_spill] sm:$0xff] %v10173_v10  ;;  %12918 = vst [vmem:[#allocation35_spill] sm:$0xff] %v10179_v39 }
 0xc73   :  { %4651 = vrcp.f32 %v3243_v4  ;;  %v3250_v32 = vadd.f32 1.0, %v4648_v11  ;;  %v10185_v4 = vld [vmem:[%s11231_s3 + $0x1a0] sm:$0xff]  ;;  %v10197_v11 = vld [vmem:[%s11231_s3 + $0x188] sm:$0xff] }
 0xc74   :  { %12919 = vst [vmem:[#allocation36_spill] sm:$0xff] %v10185_v4  ;;  %12921 = vst [vmem:[#allocation38_spill] sm:$0xff] %v10197_v11 }
 0xc75   :  { %4653 = vrcp.f32 %v3250_v32  ;;  %v10221_v32 = vld [vmem:[%s11231_s3 + $0x168] sm:$0xff] }
 0xc76   :  { %12925 = vst [vmem:[#allocation42_spill] sm:$0xff] %v10221_v32 }
 0xc7e   :  { %v4650_v37 = vpop.eup %4649 }
 0xc7f   :  { %v3254_v34 = vmul.f32 %v4650_v37, %v4646_v45  ;;  %v10191_v45 = vld [vmem:[%s11231_s3 + $0x1b0] sm:$0xff]  ;;  %v10203_v37 = vld [vmem:[%s11231_s3 + $0x198] sm:$0xff] }
 0xc80   :  { %v4652_v1 = vpop.eup %4651  ;;  %12920 = vst [vmem:[#allocation37_spill] sm:$0xff] %v10191_v45  ;;  %12922 = vst [vmem:[#allocation39_spill] sm:$0xff] %v10203_v37 }
 0xc81   :  { %v3253_v18 = vmul.f32 %v4652_v1, %v9559_v53  ;;  %v10143_v53 = vld [vmem:[%s11231_s3 + $0x1f0] sm:$0xff] }
 0xc82   :  { %v4654_v12 = vpop.eup %4653  ;;  %v10215_v1 = vld [vmem:[%s11231_s3 + $0x190] sm:$0xff] }
 0xc83   :  { %v10131_v52 = vadd.f32 %v3254_v34, %v3253_v18  ;;  %v10209_v34 = vld [vmem:[%s11231_s3 + $0x180] sm:$0xff]  ;;  %12924 = vst [vmem:[#allocation41_spill] sm:$0xff] %v10215_v1  ;;  %v10227_v18 = vld [vmem:[%s11231_s3 + $0x178] sm:$0xff] }
 0xc84   :  { %12923 = vst [vmem:[#allocation40_spill] sm:$0xff] %v10209_v34  ;;  %12926 = vst [vmem:[#allocation43_spill] sm:$0xff] %v10227_v18 }
 0xc85   :  { %4655 = vtanh.f32 %v10131_v52 }
 0xc92   :  { %v4656_v38 = vpop.eup %4655 }
 0xc93   :  { %v3257_v0 = vmul.f32 %v4656_v38, %v4654_v12  ;;  %v10233_v12 = vld [vmem:[%s11231_s3 + $0x160] sm:$0xff]  ;;  %v10239_v38 = vld [vmem:[%s11231_s3 + $0x170] sm:$0xff] }
 0xc94   :  { %12927 = vst [vmem:[#allocation44_spill] sm:$0xff] %v10233_v12  ;;  %12928 = vst [vmem:[#allocation45_spill] sm:$0xff] %v10239_v38 }
 0xc95   :  { %3323 = vmatmul.mubr.f32.vlgmr.msra.gmra.mxu0 %v3257_v0  ;;  %3394 = vmatmul.mubr.f32.vlgmr.msra.gmra.mxu1 %v3257_v0  ;;  %v10245_v0 = vld [vmem:[%s11231_s3 + $0x148] sm:$0xff] }
 0xc96   :  { %3413 = vmatpush1.msra.mxu0 %v10137_v50  ;;  %3484 = vmatpush1.msra.mxu1 %v10143_v53  ;;  %12929 = vst [vmem:[#allocation46_spill] sm:$0xff] %v10245_v0 }
 0xc97   :  { %3414 = vmatprep.subr.mxu0 %v10149_v19  ;;  %3485 = vmatprep.subr.mxu1 %v10155_v49 }
 0xc98   :  { %3415 = vmatpush1.msra.mxu0 %v10161_v36  ;;  %3486 = vmatpush1.msra.mxu1 %v10167_v27 }
 0xc99   :  { %3416 = vmatprep.subr.mxu0 %v10173_v10  ;;  %3487 = vmatprep.subr.mxu1 %v10179_v39 }
 0xc9a   :  { %3417 = vmatpush1.msra.mxu0 %v10185_v4  ;;  %3488 = vmatpush1.msra.mxu1 %v10191_v45 }
 0xc9b   :  { %3418 = vmatprep.subr.mxu0 %v10197_v11  ;;  %3489 = vmatprep.subr.mxu1 %v10203_v37 }
 0xc9c   :  { %3419 = vmatpush1.msra.mxu0 %v10209_v34  ;;  %3490 = vmatpush1.msra.mxu1 %v10215_v1 }
 0xc9d   :  { %3420 = vmatprep.subr.mxu0 %v10221_v32  ;;  %3491 = vmatprep.subr.mxu1 %v10227_v18  ;;  %v10251_v18 = vld [vmem:[%s11231_s3 + $0x158] sm:$0xff] }
 0xc9e   :  { %3421 = vmatpush1.msra.mxu0 %v10233_v12  ;;  %3492 = vmatpush1.msra.mxu1 %v10239_v38  ;;  %12930 = vst [vmem:[#allocation47_spill] sm:$0xff] %v10251_v18  ;;  %v10257_v12 = vld [vmem:[%s11231_s3 + $0x140] sm:$0xff]  ;;  %v10263_v38 = vld [vmem:[%s11231_s3 + $0x150] sm:$0xff] }
 0xc9f   :  { %3422 = vmatprep.subr.mxu0 %v10245_v0  ;;  %3493 = vmatprep.subr.mxu1 %v10251_v18  ;;  %12931 = vst [vmem:[#allocation48_spill] sm:$0xff] %v10257_v12  ;;  %12932 = vst [vmem:[#allocation49_spill] sm:$0xff] %v10263_v38  ;;  %v10269_v0 = vld [vmem:[%s11231_s3 + $0x128] sm:$0xff]  ;;  %v10275_v18 = vld [vmem:[%s11231_s3 + $0x138] sm:$0xff] }
 0xca0   :  { %3423 = vmatpush1.msra.mxu0 %v10257_v12  ;;  %3494 = vmatpush1.msra.mxu1 %v10263_v38  ;;  %12933 = vst [vmem:[#allocation50_spill] sm:$0xff] %v10269_v0  ;;  %12934 = vst [vmem:[#allocation51_spill] sm:$0xff] %v10275_v18  ;;  %v10281_v12 = vld [vmem:[%s11231_s3 + $0x120] sm:$0xff]  ;;  %v10287_v38 = vld [vmem:[%s11231_s3 + $0x130] sm:$0xff] }
 0xca1   :  { %3424 = vmatprep.subr.mxu0 %v10269_v0  ;;  %3495 = vmatprep.subr.mxu1 %v10275_v18  ;;  %12935 = vst [vmem:[#allocation52_spill] sm:$0xff] %v10281_v12  ;;  %12936 = vst [vmem:[#allocation53_spill] sm:$0xff] %v10287_v38  ;;  %v10293_v0 = vld [vmem:[%s11231_s3 + $0x108] sm:$0xff]  ;;  %v10299_v18 = vld [vmem:[%s11231_s3 + $0x118] sm:$0xff] }
 0xca2   :  { %3425 = vmatpush1.msra.mxu0 %v10281_v12  ;;  %3496 = vmatpush1.msra.mxu1 %v10287_v38  ;;  %12937 = vst [vmem:[#allocation54_spill] sm:$0xff] %v10293_v0  ;;  %12938 = vst [vmem:[#allocation55_spill] sm:$0xff] %v10299_v18  ;;  %v10305_v12 = vld [vmem:[%s11231_s3 + $0x100] sm:$0xff]  ;;  %v10311_v38 = vld [vmem:[%s11231_s3 + $0x110] sm:$0xff] }
 0xca3   :  { %3426 = vmatprep.subr.mxu0 %v10293_v0  ;;  %3497 = vmatprep.subr.mxu1 %v10299_v18  ;;  %12939 = vst [vmem:[#allocation56_spill] sm:$0xff] %v10305_v12  ;;  %12940 = vst [vmem:[#allocation57_spill] sm:$0xff] %v10311_v38  ;;  %v10317_v0 = vld [vmem:[%s11231_s3 + $0xe8] sm:$0xff]  ;;  %v10323_v18 = vld [vmem:[%s11231_s3 + $0xf8] sm:$0xff] }
 0xca4   :  { %3427 = vmatpush1.msra.mxu0 %v10305_v12  ;;  %3498 = vmatpush1.msra.mxu1 %v10311_v38  ;;  %12941 = vst [vmem:[#allocation58_spill] sm:$0xff] %v10317_v0  ;;  %12942 = vst [vmem:[#allocation59_spill] sm:$0xff] %v10323_v18  ;;  %v10329_v12 = vld [vmem:[%s11231_s3 + $0xe0] sm:$0xff]  ;;  %v10335_v38 = vld [vmem:[%s11231_s3 + $0xf0] sm:$0xff] }
 0xca5   :  { %3428 = vmatprep.subr.mxu0 %v10317_v0  ;;  %3499 = vmatprep.subr.mxu1 %v10323_v18  ;;  %12943 = vst [vmem:[#allocation60_spill] sm:$0xff] %v10329_v12  ;;  %12944 = vst [vmem:[#allocation61_spill] sm:$0xff] %v10335_v38  ;;  %v10341_v0 = vld [vmem:[%s11231_s3 + $0xc8] sm:$0xff]  ;;  %v10347_v18 = vld [vmem:[%s11231_s3 + $0xd8] sm:$0xff] }
 0xca6   :  { %3429 = vmatpush1.msra.mxu0 %v10329_v12  ;;  %3500 = vmatpush1.msra.mxu1 %v10335_v38  ;;  %12945 = vst [vmem:[#allocation62_spill] sm:$0xff] %v10341_v0  ;;  %12946 = vst [vmem:[#allocation63_spill] sm:$0xff] %v10347_v18  ;;  %v10353_v12 = vld [vmem:[%s11231_s3 + $0xc0] sm:$0xff]  ;;  %v10359_v38 = vld [vmem:[%s11231_s3 + $0xd0] sm:$0xff] }
 0xca7   :  { %3430 = vmatprep.subr.mxu0 %v10341_v0  ;;  %3501 = vmatprep.subr.mxu1 %v10347_v18  ;;  %12947 = vst [vmem:[#allocation64_spill] sm:$0xff] %v10353_v12  ;;  %12948 = vst [vmem:[#allocation65_spill] sm:$0xff] %v10359_v38  ;;  %v10365_v0 = vld [vmem:[%s11231_s3 + $0xa8] sm:$0xff]  ;;  %v10371_v18 = vld [vmem:[%s11231_s3 + $0xb8] sm:$0xff] }
 0xca8   :  { %3431 = vmatpush1.msra.mxu0 %v10353_v12  ;;  %3502 = vmatpush1.msra.mxu1 %v10359_v38  ;;  %12949 = vst [vmem:[#allocation66_spill] sm:$0xff] %v10365_v0  ;;  %12950 = vst [vmem:[#allocation67_spill] sm:$0xff] %v10371_v18  ;;  %v10377_v12 = vld [vmem:[%s11231_s3 + $0xa0] sm:$0xff]  ;;  %v10383_v38 = vld [vmem:[%s11231_s3 + $0xb0] sm:$0xff] }
 0xca9   :  { %3432 = vmatprep.subr.mxu0 %v10365_v0  ;;  %3503 = vmatprep.subr.mxu1 %v10371_v18  ;;  %12951 = vst [vmem:[#allocation68_spill] sm:$0xff] %v10377_v12  ;;  %12952 = vst [vmem:[#allocation69_spill] sm:$0xff] %v10383_v38  ;;  %v10389_v0 = vld [vmem:[%s11231_s3 + $0x88] sm:$0xff]  ;;  %v10395_v18 = vld [vmem:[%s11231_s3 + $0x98] sm:$0xff] }
 0xcaa   :  { %3433 = vmatpush1.msra.mxu0 %v10377_v12  ;;  %3504 = vmatpush1.msra.mxu1 %v10383_v38  ;;  %12953 = vst [vmem:[#allocation70_spill] sm:$0xff] %v10389_v0  ;;  %12954 = vst [vmem:[#allocation71_spill] sm:$0xff] %v10395_v18  ;;  %v10401_v12 = vld [vmem:[%s11231_s3 + $0x80] sm:$0xff]  ;;  %v10407_v38 = vld [vmem:[%s11231_s3 + $0x90] sm:$0xff] }
 0xcab   :  { %3434 = vmatprep.subr.mxu0 %v10389_v0  ;;  %3505 = vmatprep.subr.mxu1 %v10395_v18  ;;  %12955 = vst [vmem:[#allocation72_spill] sm:$0xff] %v10401_v12  ;;  %12956 = vst [vmem:[#allocation73_spill] sm:$0xff] %v10407_v38  ;;  %v10413_v0 = vld [vmem:[%s11231_s3 + $0x68] sm:$0xff]  ;;  %v10419_v18 = vld [vmem:[%s11231_s3 + $0x78] sm:$0xff] }
 0xcac   :  { %3435 = vmatpush1.msra.mxu0 %v10401_v12  ;;  %3506 = vmatpush1.msra.mxu1 %v10407_v38  ;;  %12957 = vst [vmem:[#allocation74_spill] sm:$0xff] %v10413_v0  ;;  %12958 = vst [vmem:[#allocation75_spill] sm:$0xff] %v10419_v18  ;;  %v10425_v12 = vld [vmem:[%s11231_s3 + $0x60] sm:$0xff]  ;;  %v10431_v38 = vld [vmem:[%s11231_s3 + $0x70] sm:$0xff] }
 0xcad   :  { %3436 = vmatprep.subr.mxu0 %v10413_v0  ;;  %3507 = vmatprep.subr.mxu1 %v10419_v18  ;;  %12959 = vst [vmem:[#allocation76_spill] sm:$0xff] %v10425_v12  ;;  %12960 = vst [vmem:[#allocation77_spill] sm:$0xff] %v10431_v38  ;;  %v10437_v0 = vld [vmem:[%s11231_s3 + $0x48] sm:$0xff]  ;;  %v10443_v18 = vld [vmem:[%s11231_s3 + $0x58] sm:$0xff] }
 0xcae   :  { %3437 = vmatpush1.msra.mxu0 %v10425_v12  ;;  %3508 = vmatpush1.msra.mxu1 %v10431_v38  ;;  %12961 = vst [vmem:[#allocation78_spill] sm:$0xff] %v10437_v0  ;;  %12962 = vst [vmem:[#allocation79_spill] sm:$0xff] %v10443_v18  ;;  %v10449_v12 = vld [vmem:[%s11231_s3 + $0x40] sm:$0xff]  ;;  %v10455_v38 = vld [vmem:[%s11231_s3 + $0x50] sm:$0xff] }
 0xcaf   :  { %3438 = vmatprep.subr.mxu0 %v10437_v0  ;;  %3509 = vmatprep.subr.mxu1 %v10443_v18  ;;  %12963 = vst [vmem:[#allocation80_spill] sm:$0xff] %v10449_v12  ;;  %12964 = vst [vmem:[#allocation81_spill] sm:$0xff] %v10455_v38  ;;  %v10461_v0 = vld [vmem:[%s11231_s3 + $0x28] sm:$0xff]  ;;  %v10467_v18 = vld [vmem:[%s11231_s3 + $0x38] sm:$0xff] }
 0xcb0   :  { %3439 = vmatpush1.msra.mxu0 %v10449_v12  ;;  %3510 = vmatpush1.msra.mxu1 %v10455_v38  ;;  %12965 = vst [vmem:[#allocation82_spill] sm:$0xff] %v10461_v0  ;;  %12966 = vst [vmem:[#allocation83_spill] sm:$0xff] %v10467_v18  ;;  %v10473_v12 = vld [vmem:[%s11231_s3 + $0x20] sm:$0xff]  ;;  %v10479_v38 = vld [vmem:[%s11231_s3 + $0x30] sm:$0xff] }
 0xcb1   :  { %3440 = vmatprep.subr.mxu0 %v10461_v0  ;;  %3511 = vmatprep.subr.mxu1 %v10467_v18  ;;  %12967 = vst [vmem:[#allocation84_spill] sm:$0xff] %v10473_v12  ;;  %12968 = vst [vmem:[#allocation85_spill] sm:$0xff] %v10479_v38  ;;  %v10485_v0 = vld [vmem:[%s11231_s3 + $0x8] sm:$0xff]  ;;  %v10491_v18 = vld [vmem:[%s11231_s3 + $0x18] sm:$0xff] }
 0xcb2   :  { %3441 = vmatpush1.msra.mxu0 %v10473_v12  ;;  %3512 = vmatpush1.msra.mxu1 %v10479_v38  ;;  %12969 = vst [vmem:[#allocation87_spill] sm:$0xff] %v10485_v0  ;;  %12970 = vst [vmem:[#allocation88_spill] sm:$0xff] %v10491_v18  ;;  %v10497_v12 = vld [vmem:[%s11231_s3] sm:$0xff] }
 0xcb3   :  { %3442 = vmatprep.subr.mxu0 %v10485_v0  ;;  %3513 = vmatprep.subr.mxu1 %v10491_v18  ;;  %12971 = vst [vmem:[#allocation89_spill] sm:$0xff] %v10497_v12  ;;  %v10504_v0 = vld [vmem:[%s11231_s3 + $0x10] sm:$0xff]  ;;  %v10513_v18 = vld [vmem:[%s11233_s4 + $0x1e8] sm:$0xff] }
 0xcb4   :  { %3443 = vmatpush1.msra.mxu0 %v10497_v12  ;;  %3476 = vmatprep.mubr.f32.mxu0 %v12085_v22  ;;  %12972 = vst [vmem:[#allocation90_spill] sm:$0xff] %v10504_v0  ;;  %12973 = vst [vmem:[#allocation91_spill] sm:$0xff] %v10513_v18  ;;  %v10519_v12 = vld [vmem:[%s11233_s4 + $0x1f8] sm:$0xff] }
 0xcb5   :  { %3514 = vmatpush1.msra.mxu1 %v10504_v0  ;;  %3547 = vmatprep.mubr.f32.mxu1 %v12085_v22  ;;  %12974 = vst [vmem:[#allocation92_spill] sm:$0xff] %v10519_v12  ;;  %v10525_v0 = vld [vmem:[%s11233_s4 + $0x1e0] sm:$0xff] }
 0xcb6   :  { %3477 = vmatmul.mubr.f32.vlgmr.msra.gmra.mxu0 %v9726_v29  ;;  %3548 = vmatmul.mubr.f32.vlgmr.msra.gmra.mxu1 %v9726_v29  ;;  %12975 = vst [vmem:[#allocation93_spill] sm:$0xff] %v10525_v0  ;;  %v10531_v29 = vld [vmem:[%s11233_s4 + $0x1f0] sm:$0xff] }
 0xcb7   :  { %3582 = vmatprep.subr.mxu0 %v10513_v18  ;;  %3653 = vmatprep.subr.mxu1 %v10519_v12  ;;  %12976 = vst [vmem:[#allocation94_spill] sm:$0xff] %v10531_v29  ;;  %v10537_v18 = vld [vmem:[%s11233_s4 + $0x1c8] sm:$0xff]  ;;  %v10543_v12 = vld [vmem:[%s11233_s4 + $0x1d8] sm:$0xff] }
 0xcb8   :  { %3583 = vmatpush1.msra.mxu0 %v10525_v0  ;;  %3654 = vmatpush1.msra.mxu1 %v10531_v29  ;;  %12977 = vst [vmem:[#allocation95_spill] sm:$0xff] %v10537_v18  ;;  %12978 = vst [vmem:[#allocation96_spill] sm:$0xff] %v10543_v12  ;;  %v10549_v0 = vld [vmem:[%s11233_s4 + $0x1c0] sm:$0xff]  ;;  %v10555_v29 = vld [vmem:[%s11233_s4 + $0x1d0] sm:$0xff] }
 0xcb9   :  { %3584 = vmatprep.subr.mxu0 %v10537_v18  ;;  %3655 = vmatprep.subr.mxu1 %v10543_v12  ;;  %12979 = vst [vmem:[#allocation97_spill] sm:$0xff] %v10549_v0  ;;  %12980 = vst [vmem:[#allocation98_spill] sm:$0xff] %v10555_v29  ;;  %v10561_v18 = vld [vmem:[%s11233_s4 + $0x1a8] sm:$0xff]  ;;  %v10567_v12 = vld [vmem:[%s11233_s4 + $0x1b8] sm:$0xff] }
 0xcba   :  { %3585 = vmatpush1.msra.mxu0 %v10549_v0  ;;  %3656 = vmatpush1.msra.mxu1 %v10555_v29  ;;  %12981 = vst [vmem:[#allocation99_spill] sm:$0xff] %v10561_v18  ;;  %12982 = vst [vmem:[#allocation100_spill] sm:$0xff] %v10567_v12  ;;  %v10573_v0 = vld [vmem:[%s11233_s4 + $0x1a0] sm:$0xff]  ;;  %v10579_v29 = vld [vmem:[%s11233_s4 + $0x1b0] sm:$0xff] }
 0xcbb   :  { %3586 = vmatprep.subr.mxu0 %v10561_v18  ;;  %3657 = vmatprep.subr.mxu1 %v10567_v12  ;;  %12983 = vst [vmem:[#allocation101_spill] sm:$0xff] %v10573_v0  ;;  %12984 = vst [vmem:[#allocation102_spill] sm:$0xff] %v10579_v29  ;;  %v10585_v18 = vld [vmem:[%s11233_s4 + $0x188] sm:$0xff]  ;;  %v10591_v12 = vld [vmem:[%s11233_s4 + $0x198] sm:$0xff] }
 0xcbc   :  { %3587 = vmatpush1.msra.mxu0 %v10573_v0  ;;  %3658 = vmatpush1.msra.mxu1 %v10579_v29  ;;  %12985 = vst [vmem:[#allocation103_spill] sm:$0xff] %v10585_v18  ;;  %12986 = vst [vmem:[#allocation104_spill] sm:$0xff] %v10591_v12  ;;  %v10597_v0 = vld [vmem:[%s11233_s4 + $0x180] sm:$0xff]  ;;  %v10603_v29 = vld [vmem:[%s11233_s4 + $0x190] sm:$0xff] }
 0xcbd   :  { %3588 = vmatprep.subr.mxu0 %v10585_v18  ;;  %3659 = vmatprep.subr.mxu1 %v10591_v12  ;;  %12987 = vst [vmem:[#allocation105_spill] sm:$0xff] %v10597_v0  ;;  %12988 = vst [vmem:[#allocation106_spill] sm:$0xff] %v10603_v29  ;;  %v10609_v18 = vld [vmem:[%s11233_s4 + $0x168] sm:$0xff]  ;;  %v10615_v12 = vld [vmem:[%s11233_s4 + $0x178] sm:$0xff] }
 0xcbe   :  { %3589 = vmatpush1.msra.mxu0 %v10597_v0  ;;  %3660 = vmatpush1.msra.mxu1 %v10603_v29  ;;  %12989 = vst [vmem:[#allocation107_spill] sm:$0xff] %v10609_v18  ;;  %12990 = vst [vmem:[#allocation108_spill] sm:$0xff] %v10615_v12  ;;  %v10621_v0 = vld [vmem:[%s11233_s4 + $0x160] sm:$0xff]  ;;  %v10627_v29 = vld [vmem:[%s11233_s4 + $0x170] sm:$0xff] }
 0xcbf   :  { %3590 = vmatprep.subr.mxu0 %v10609_v18  ;;  %3661 = vmatprep.subr.mxu1 %v10615_v12  ;;  %12991 = vst [vmem:[#allocation109_spill] sm:$0xff] %v10621_v0  ;;  %12992 = vst [vmem:[#allocation110_spill] sm:$0xff] %v10627_v29  ;;  %v10633_v18 = vld [vmem:[%s11233_s4 + $0x148] sm:$0xff]  ;;  %v10639_v12 = vld [vmem:[%s11233_s4 + $0x158] sm:$0xff] }
 0xcc0   :  { %3591 = vmatpush1.msra.mxu0 %v10621_v0  ;;  %3662 = vmatpush1.msra.mxu1 %v10627_v29  ;;  %12993 = vst [vmem:[#allocation111_spill] sm:$0xff] %v10633_v18  ;;  %12994 = vst [vmem:[#allocation112_spill] sm:$0xff] %v10639_v12  ;;  %v10645_v0 = vld [vmem:[%s11233_s4 + $0x140] sm:$0xff]  ;;  %v10651_v29 = vld [vmem:[%s11233_s4 + $0x150] sm:$0xff] }
 0xcc1   :  { %3592 = vmatprep.subr.mxu0 %v10633_v18  ;;  %3663 = vmatprep.subr.mxu1 %v10639_v12  ;;  %12995 = vst [vmem:[#allocation113_spill] sm:$0xff] %v10645_v0  ;;  %12996 = vst [vmem:[#allocation114_spill] sm:$0xff] %v10651_v29  ;;  %v10657_v18 = vld [vmem:[%s11233_s4 + $0x128] sm:$0xff]  ;;  %v10663_v12 = vld [vmem:[%s11233_s4 + $0x138] sm:$0xff] }
 0xcc2   :  { %3593 = vmatpush1.msra.mxu0 %v10645_v0  ;;  %3664 = vmatpush1.msra.mxu1 %v10651_v29  ;;  %12997 = vst [vmem:[#allocation115_spill] sm:$0xff] %v10657_v18  ;;  %12998 = vst [vmem:[#allocation116_spill] sm:$0xff] %v10663_v12  ;;  %v10669_v0 = vld [vmem:[%s11233_s4 + $0x120] sm:$0xff]  ;;  %v10675_v29 = vld [vmem:[%s11233_s4 + $0x130] sm:$0xff] }
 0xcc3   :  { %3594 = vmatprep.subr.mxu0 %v10657_v18  ;;  %3665 = vmatprep.subr.mxu1 %v10663_v12  ;;  %12999 = vst [vmem:[#allocation117_spill] sm:$0xff] %v10669_v0  ;;  %13000 = vst [vmem:[#allocation118_spill] sm:$0xff] %v10675_v29  ;;  %v10681_v18 = vld [vmem:[%s11233_s4 + $0x108] sm:$0xff]  ;;  %v10687_v12 = vld [vmem:[%s11233_s4 + $0x118] sm:$0xff] }
 0xcc4   :  { %3595 = vmatpush1.msra.mxu0 %v10669_v0  ;;  %3666 = vmatpush1.msra.mxu1 %v10675_v29  ;;  %13001 = vst [vmem:[#allocation119_spill] sm:$0xff] %v10681_v18  ;;  %13002 = vst [vmem:[#allocation120_spill] sm:$0xff] %v10687_v12  ;;  %v10693_v0 = vld [vmem:[%s11233_s4 + $0x100] sm:$0xff]  ;;  %v10699_v29 = vld [vmem:[%s11233_s4 + $0x110] sm:$0xff] }
 0xcc5   :  { %3596 = vmatprep.subr.mxu0 %v10681_v18  ;;  %3667 = vmatprep.subr.mxu1 %v10687_v12  ;;  %13003 = vst [vmem:[#allocation121_spill] sm:$0xff] %v10693_v0  ;;  %13004 = vst [vmem:[#allocation122_spill] sm:$0xff] %v10699_v29  ;;  %v10705_v18 = vld [vmem:[%s11233_s4 + $0xe8] sm:$0xff]  ;;  %v10711_v12 = vld [vmem:[%s11233_s4 + $0xf8] sm:$0xff] }
 0xcc6   :  { %3597 = vmatpush1.msra.mxu0 %v10693_v0  ;;  %3668 = vmatpush1.msra.mxu1 %v10699_v29  ;;  %13005 = vst [vmem:[#allocation123_spill] sm:$0xff] %v10705_v18  ;;  %13006 = vst [vmem:[#allocation124_spill] sm:$0xff] %v10711_v12  ;;  %v10717_v0 = vld [vmem:[%s11233_s4 + $0xe0] sm:$0xff]  ;;  %v10723_v29 = vld [vmem:[%s11233_s4 + $0xf0] sm:$0xff] }
 0xcc7   :  { %3598 = vmatprep.subr.mxu0 %v10705_v18  ;;  %3669 = vmatprep.subr.mxu1 %v10711_v12  ;;  %13007 = vst [vmem:[#allocation125_spill] sm:$0xff] %v10717_v0  ;;  %13008 = vst [vmem:[#allocation126_spill] sm:$0xff] %v10723_v29  ;;  %v10729_v18 = vld [vmem:[%s11233_s4 + $0xc8] sm:$0xff]  ;;  %v10735_v12 = vld [vmem:[%s11233_s4 + $0xd8] sm:$0xff] }
 0xcc8   :  { %3599 = vmatpush1.msra.mxu0 %v10717_v0  ;;  %3670 = vmatpush1.msra.mxu1 %v10723_v29  ;;  %13009 = vst [vmem:[#allocation127_spill] sm:$0xff] %v10729_v18  ;;  %13010 = vst [vmem:[#allocation128_spill] sm:$0xff] %v10735_v12  ;;  %v10741_v0 = vld [vmem:[%s11233_s4 + $0xc0] sm:$0xff]  ;;  %v10747_v29 = vld [vmem:[%s11233_s4 + $0xd0] sm:$0xff] }
 0xcc9   :  { %3600 = vmatprep.subr.mxu0 %v10729_v18  ;;  %3671 = vmatprep.subr.mxu1 %v10735_v12  ;;  %13011 = vst [vmem:[#allocation129_spill] sm:$0xff] %v10741_v0  ;;  %13012 = vst [vmem:[#allocation130_spill] sm:$0xff] %v10747_v29  ;;  %v10753_v18 = vld [vmem:[%s11233_s4 + $0xa8] sm:$0xff]  ;;  %v10759_v12 = vld [vmem:[%s11233_s4 + $0xb8] sm:$0xff] }
 0xcca   :  { %3601 = vmatpush1.msra.mxu0 %v10741_v0  ;;  %3672 = vmatpush1.msra.mxu1 %v10747_v29  ;;  %13013 = vst [vmem:[#allocation131_spill] sm:$0xff] %v10753_v18  ;;  %13014 = vst [vmem:[#allocation132_spill] sm:$0xff] %v10759_v12  ;;  %v10765_v0 = vld [vmem:[%s11233_s4 + $0xa0] sm:$0xff]  ;;  %v10771_v29 = vld [vmem:[%s11233_s4 + $0xb0] sm:$0xff] }
 0xccb   :  { %3602 = vmatprep.subr.mxu0 %v10753_v18  ;;  %3673 = vmatprep.subr.mxu1 %v10759_v12  ;;  %13015 = vst [vmem:[#allocation133_spill] sm:$0xff] %v10765_v0  ;;  %13016 = vst [vmem:[#allocation134_spill] sm:$0xff] %v10771_v29  ;;  %v10777_v18 = vld [vmem:[%s11233_s4 + $0x88] sm:$0xff]  ;;  %v10783_v12 = vld [vmem:[%s11233_s4 + $0x98] sm:$0xff] }
 0xccc   :  { %3603 = vmatpush1.msra.mxu0 %v10765_v0  ;;  %3674 = vmatpush1.msra.mxu1 %v10771_v29  ;;  %13017 = vst [vmem:[#allocation135_spill] sm:$0xff] %v10777_v18  ;;  %13018 = vst [vmem:[#allocation136_spill] sm:$0xff] %v10783_v12  ;;  %v10789_v0 = vld [vmem:[%s11233_s4 + $0x80] sm:$0xff]  ;;  %v10795_v29 = vld [vmem:[%s11233_s4 + $0x90] sm:$0xff] }
 0xccd   :  { %3604 = vmatprep.subr.mxu0 %v10777_v18  ;;  %3675 = vmatprep.subr.mxu1 %v10783_v12  ;;  %13019 = vst [vmem:[#allocation137_spill] sm:$0xff] %v10789_v0  ;;  %13020 = vst [vmem:[#allocation138_spill] sm:$0xff] %v10795_v29  ;;  %v10801_v18 = vld [vmem:[%s11233_s4 + $0x68] sm:$0xff]  ;;  %v10807_v12 = vld [vmem:[%s11233_s4 + $0x78] sm:$0xff] }
 0xcce   :  { %3605 = vmatpush1.msra.mxu0 %v10789_v0  ;;  %3676 = vmatpush1.msra.mxu1 %v10795_v29  ;;  %13021 = vst [vmem:[#allocation139_spill] sm:$0xff] %v10801_v18  ;;  %13022 = vst [vmem:[#allocation140_spill] sm:$0xff] %v10807_v12  ;;  %v10813_v0 = vld [vmem:[%s11233_s4 + $0x60] sm:$0xff]  ;;  %v10819_v29 = vld [vmem:[%s11233_s4 + $0x70] sm:$0xff] }
 0xccf   :  { %3606 = vmatprep.subr.mxu0 %v10801_v18  ;;  %3677 = vmatprep.subr.mxu1 %v10807_v12  ;;  %13023 = vst [vmem:[#allocation141_spill] sm:$0xff] %v10813_v0  ;;  %13024 = vst [vmem:[#allocation142_spill] sm:$0xff] %v10819_v29  ;;  %v10825_v18 = vld [vmem:[%s11233_s4 + $0x48] sm:$0xff]  ;;  %v10831_v12 = vld [vmem:[%s11233_s4 + $0x58] sm:$0xff] }
 0xcd0   :  { %3607 = vmatpush1.msra.mxu0 %v10813_v0  ;;  %3678 = vmatpush1.msra.mxu1 %v10819_v29  ;;  %13025 = vst [vmem:[#allocation143_spill] sm:$0xff] %v10825_v18  ;;  %13026 = vst [vmem:[#allocation144_spill] sm:$0xff] %v10831_v12  ;;  %v10837_v0 = vld [vmem:[%s11233_s4 + $0x40] sm:$0xff]  ;;  %v10843_v29 = vld [vmem:[%s11233_s4 + $0x50] sm:$0xff] }
 0xcd1   :  { %3608 = vmatprep.subr.mxu0 %v10825_v18  ;;  %3679 = vmatprep.subr.mxu1 %v10831_v12  ;;  %13027 = vst [vmem:[#allocation145_spill] sm:$0xff] %v10837_v0  ;;  %13028 = vst [vmem:[#allocation146_spill] sm:$0xff] %v10843_v29  ;;  %v10849_v18 = vld [vmem:[%s11233_s4 + $0x28] sm:$0xff]  ;;  %v10855_v12 = vld [vmem:[%s11233_s4 + $0x38] sm:$0xff] }
 0xcd2   :  { %3609 = vmatpush1.msra.mxu0 %v10837_v0  ;;  %3680 = vmatpush1.msra.mxu1 %v10843_v29  ;;  %13029 = vst [vmem:[#allocation147_spill] sm:$0xff] %v10849_v18  ;;  %13030 = vst [vmem:[#allocation148_spill] sm:$0xff] %v10855_v12  ;;  %v10861_v0 = vld [vmem:[%s11233_s4 + $0x20] sm:$0xff]  ;;  %v10867_v29 = vld [vmem:[%s11233_s4 + $0x30] sm:$0xff] }
 0xcd3   :  { %3610 = vmatprep.subr.mxu0 %v10849_v18  ;;  %3681 = vmatprep.subr.mxu1 %v10855_v12  ;;  %13031 = vst [vmem:[#allocation149_spill] sm:$0xff] %v10861_v0  ;;  %13032 = vst [vmem:[#allocation150_spill] sm:$0xff] %v10867_v29  ;;  %v10873_v18 = vld [vmem:[%s11233_s4 + $0x8] sm:$0xff]  ;;  %v10879_v12 = vld [vmem:[%s11233_s4 + $0x18] sm:$0xff] }
 0xcd4   :  { %3611 = vmatpush1.msra.mxu0 %v10861_v0  ;;  %3682 = vmatpush1.msra.mxu1 %v10867_v29  ;;  %13033 = vst [vmem:[#allocation161_spill] sm:$0xff] %v10873_v18  ;;  %13034 = vst [vmem:[#allocation165_spill] sm:$0xff] %v10879_v12  ;;  %v10885_v0 = vld [vmem:[%s11233_s4] sm:$0xff] }
 0xcd5   :  { %3612 = vmatprep.subr.mxu0 %v10873_v18  ;;  %3683 = vmatprep.subr.mxu1 %v10879_v12  ;;  %13035 = vst [vmem:[#allocation166_spill] sm:$0xff] %v10885_v0  ;;  %v10892_v18 = vld [vmem:[%s11233_s4 + $0x10] sm:$0xff]  ;;  %v3402_v12 = vpop.permute.xlu1 %3401 }
 0xcd6   :  { %3613 = vmatpush1.msra.mxu0 %v10885_v0  ;;  %3646 = vmatprep.mubr.f32.mxu0 %v12085_v22  ;;  %13036 = vst [vmem:[#allocation167_spill] sm:$0xff] %v10892_v18  ;;  %v3404_v29 = vmul.f32 %v3402_v12, %v12873_v5  ;;  %v3405_v0 = vmul.f32 %v3402_v12, %v12874_v43 }
 0xcd7   :  { %3684 = vmatpush1.msra.mxu1 %v10892_v18  ;;  %3717 = vmatprep.mubr.f32.mxu1 %v12085_v22  ;;  %v3407_v5 = vmul.f32 %v3402_v12, %v12228_v48  ;;  %v3406_v10 = vmul.f32 %v3402_v12, %v6576_v55 }
 0xcd8   :  { %3752 = vmatprep.subr.mxu0 %v9697_v51  ;;  %3823 = vmatprep.subr.mxu1 %v9703_v25  ;;  %v3408_v32 = vadd.f32 %v3404_v29, %v12875_v9  ;;  %v3409_v18 = vadd.f32 %v3405_v0, %v12876_v13 }
 0xcd9   :  { %v3411_v29 = vadd.f32 %v3407_v5, %v12877_v6  ;;  %v3410_v0 = vadd.f32 %v3406_v10, %v6580_v56 }
 0xd55   :  { %v10899_v38 = vpop.f32.mrf.mxu0  ;;  %v10905_v34 = vpop.f32.mrf.mxu1 }
 0xd57   :  { %v10903_v1 = vpop.f32.mrf.mxu0  ;;  %v10908_v45 = vpop.f32.mrf.mxu1 }
 0xd76   :  { %v3478_v37 = vpop.f32.mrf.mxu0  ;;  %v3549_v39 = vpop.f32.mrf.mxu1 }
 0xd77   :  { %v3554_v11 = vadd.f32 %v3478_v37, %v3408_v32  ;;  %v3556_v13 = vadd.f32 %v3549_v39, %v3410_v0  ;;  %v13070_v0 = vld [vmem:[#allocation28_spill] sm:$0xff] }
 0xd78   :  { %v3480_v51 = vpop.f32.mrf.mxu0  ;;  %v3551_v9 = vpop.f32.mrf.mxu1 }
 0xd79   :  { %v4381_v25 = vmul.f32 -1.442695, %v3554_v11  ;;  %v3555_v4 = vadd.f32 %v3480_v51, %v3409_v18  ;;  %v3557_v27 = vadd.f32 %v3551_v9, %v3411_v29  ;;  %v13069_v29 = vld [vmem:[#allocation27_spill] sm:$0xff] }
 0xd7b   :  { %4657 = vpow2.f32 %v4381_v25  ;;  %v4382_v43 = vmul.f32 -1.442695, %v3555_v4  ;;  %v4383_v37 = vmul.f32 -1.442695, %v3557_v27 }
 0xd7d   :  { %4659 = vpow2.f32 %v4382_v43 }
 0xd7e   :  { %4661 = vpow2.f32 %v4383_v37  ;;  %v13071_v37 = vld [vmem:[#allocation29_spill] sm:$0xff] }
 0xd88   :  { %v4658_v32 = vpop.eup %4657 }
 0xd89   :  { %v3561_v36 = vadd.f32 1.0, %v4658_v32  ;;  %v13072_v32 = vld [vmem:[#allocation30_spill] sm:$0xff] }
 0xd8a   :  { %v4660_v11 = vpop.eup %4659 }
 0xd8b   :  { %4663 = vrcp.f32 %v3561_v36  ;;  %v3567_v18 = vadd.f32 1.0, %v4660_v11  ;;  %v4662_v4 = vpop.eup %4661  ;;  %v13068_v36 = vld [vmem:[#allocation26_spill] sm:$0xff]  ;;  %v5308_v11 = vmov 7  }
 0xd8c   :  { %4665 = vtanh.f32 %v3556_v13  ;;  %v3574_v25 = vadd.f32 1.0, %v4662_v4  ;;  %v13037_v13 = vld [vmem:[#allocation4_spill] sm:$0xff]  ;;  %4463 = vset.pattern.permute.xlu1 %v5308_v11  ;;  %4464 = vset.pattern.permute.xlu0 %v5308_v11  ;;  %v13074_v4 = vld [vmem:[#allocation3_spill] sm:$0xff]  ;;  %v13097_v11 = vld [vmem:[#allocation54_spill] sm:$0xff] }
 0xd8d   :  { %4667 = vrcp.f32 %v3567_v18  ;;  %v13073_v18 = vld [vmem:[#allocation31_spill] sm:$0xff] }
 0xd8e   :  { %4669 = vrcp.f32 %v3574_v25  ;;  %3895 = vperm.xlu1 %4463, %v13073_v18   ;;  %v13098_v18 = vld [vmem:[#allocation55_spill] sm:$0xff] }
 0xd98   :  { %v4664_v43 = vpop.eup %4663 }
 0xd99   :  { %v4666_v51 = vpop.eup %4665 }
 0xd9a   :  { %v4668_v5 = vpop.eup %4667  ;;  %v3578_v6 = vmul.f32 %v4666_v51, %v4664_v43  ;;  %v3325_v43 = vadd.f32 %v10899_v38, %v13074_v4  ;;  %v3396_v38 = vadd.f32 %v10905_v34, %v6675_v46 }
 0xd9b   :  { %v3577_v9 = vmul.f32 %v4668_v5, %v9723_v15  ;;  %v4670_v27 = vpop.eup %4669  ;;  %v13039_v15 = vld [vmem:[#allocation6_spill] sm:$0xff]  ;;  %v3327_v5 = vadd.f32 %v10903_v1, %v6665_v31 }
 0xd9d   :  { %v10915_v12 = vadd.f32 %v3578_v6, %v3577_v9  ;;  %v13038_v6 = vld [vmem:[#allocation5_spill] sm:$0xff] }
 0xd9f   :  { %4671 = vtanh.f32 %v10915_v12 }
 0xdac   :  { %v4672_v10 = vpop.eup %4671 }
 0xdad   :  { %v10918_v39 = vmul.f32 %v4672_v10, %v4670_v27 }
 0xdaf   :  { %3647 = vmatmul.mubr.f32.vlgmr.msra.gmra.mxu0 %v10918_v39  ;;  %3718 = vmatmul.mubr.f32.vlgmr.msra.gmra.mxu1 %v10918_v39 }
 0xdb0   :  { %3753 = vmatpush1.msra.mxu0 %v9733_v30  ;;  %3824 = vmatpush1.msra.mxu1 %v9739_v28  ;;  %v13040_v30 = vld [vmem:[#allocation7_spill] sm:$0xff]  ;;  %v13041_v28 = vld [vmem:[#allocation8_spill] sm:$0xff] }
 0xdb1   :  { %3754 = vmatprep.subr.mxu0 %v9745_v42  ;;  %3825 = vmatprep.subr.mxu1 %v9751_v58  ;;  %v13042_v42 = vld [vmem:[#allocation9_spill] sm:$0xff]  ;;  %v13043_v58 = vld [vmem:[#allocation10_spill] sm:$0xff] }
 0xdb2   :  { %3755 = vmatpush1.msra.mxu0 %v9757_v62  ;;  %3826 = vmatpush1.msra.mxu1 %v9763_v21  ;;  %v13044_v62 = vld [vmem:[#allocation11_spill] sm:$0xff]  ;;  %v13045_v21 = vld [vmem:[#allocation12_spill] sm:$0xff] }
 0xdb3   :  { %3756 = vmatprep.subr.mxu0 %v9769_v23  ;;  %3827 = vmatprep.subr.mxu1 %v9775_v14  ;;  %v13046_v23 = vld [vmem:[#allocation13_spill] sm:$0xff]  ;;  %v13047_v14 = vld [vmem:[#allocation14_spill] sm:$0xff] }
 0xdb4   :  { %3757 = vmatpush1.msra.mxu0 %v9781_v24  ;;  %3828 = vmatpush1.msra.mxu1 %v9787_v26  ;;  %v13048_v24 = vld [vmem:[#allocation15_spill] sm:$0xff]  ;;  %v13049_v26 = vld [vmem:[#allocation16_spill] sm:$0xff] }
 0xdb5   :  { %3758 = vmatprep.subr.mxu0 %v9793_v47  ;;  %3829 = vmatprep.subr.mxu1 %v9799_v41  ;;  %v13050_v47 = vld [vmem:[#allocation17_spill] sm:$0xff]  ;;  %v13051_v41 = vld [vmem:[#allocation18_spill] sm:$0xff] }
 0xdb6   :  { %3759 = vmatpush1.msra.mxu0 %v9805_v33  ;;  %3830 = vmatpush1.msra.mxu1 %v9811_v59  ;;  %v13052_v33 = vld [vmem:[#allocation19_spill] sm:$0xff]  ;;  %v13053_v59 = vld [vmem:[#allocation20_spill] sm:$0xff] }
 0xdb7   :  { %3760 = vmatprep.subr.mxu0 %v9817_v7  ;;  %3831 = vmatprep.subr.mxu1 %v9823_v63  ;;  %v13054_v7 = vld [vmem:[#allocation21_spill] sm:$0xff]  ;;  %v13055_v63 = vld [vmem:[#allocation22_spill] sm:$0xff] }
 0xdb8   :  { %3761 = vmatpush1.msra.mxu0 %v9829_v35  ;;  %3832 = vmatpush1.msra.mxu1 %v9835_v20  ;;  %v13056_v35 = vld [vmem:[#allocation23_spill] sm:$0xff]  ;;  %v13057_v20 = vld [vmem:[#allocation86_spill] sm:$0xff] }
 0xdb9   :  { %3762 = vmatprep.subr.mxu0 %v9841_v57  ;;  %3833 = vmatprep.subr.mxu1 %v9847_v2  ;;  %v13058_v57 = vld [vmem:[#allocation151_spill] sm:$0xff]  ;;  %v13059_v2 = vld [vmem:[#allocation152_spill] sm:$0xff] }
 0xdba   :  { %3763 = vmatpush1.msra.mxu0 %v9853_v40  ;;  %3834 = vmatpush1.msra.mxu1 %v9859_v8  ;;  %v13060_v40 = vld [vmem:[#allocation156_spill] sm:$0xff]  ;;  %v13061_v8 = vld [vmem:[#allocation158_spill] sm:$0xff] }
 0xdbb   :  { %3764 = vmatprep.subr.mxu0 %v9865_v16  ;;  %3835 = vmatprep.subr.mxu1 %v9871_v17  ;;  %v13062_v16 = vld [vmem:[#allocation159_spill] sm:$0xff] }
 0xdbc   :  { %3765 = vmatpush1.msra.mxu0 %v9877_v61  ;;  %3836 = vmatpush1.msra.mxu1 %v9883_v60  ;;  %v13063_v17 = vld [vmem:[#allocation163_spill] sm:$0xff]  ;;  %v13064_v61 = vld [vmem:[#allocation162_spill] sm:$0xff]  ;;  %v13065_v60 = vld [vmem:[#allocation160_spill] sm:$0xff] }
 0xdbd   :  { %3766 = vmatprep.subr.mxu0 %v9889_v3  ;;  %3837 = vmatprep.subr.mxu1 %v9895_v54  ;;  %v13066_v3 = vld [vmem:[#allocation24_spill] sm:$0xff]  ;;  %v13067_v54 = vld [vmem:[#allocation25_spill] sm:$0xff] }
 0xdbe   :  { %3767 = vmatpush1.msra.mxu0 %v13037_v13  ;;  %3838 = vmatpush1.msra.mxu1 %v13038_v6 }
 0xdbf   :  { %3768 = vmatprep.subr.mxu0 %v13039_v15  ;;  %3839 = vmatprep.subr.mxu1 %v13040_v30  ;;  %v3398_v30 = vadd.f32 %v10908_v45, %v6672_v44 }
 0xdc0   :  { %3769 = vmatpush1.msra.mxu0 %v13041_v28  ;;  %3840 = vmatpush1.msra.mxu1 %v13042_v42 }
 0xdc1   :  { %3770 = vmatprep.subr.mxu0 %v13043_v58  ;;  %3841 = vmatprep.subr.mxu1 %v13044_v62 }
 0xdc2   :  { %3771 = vmatpush1.msra.mxu0 %v13045_v21  ;;  %3842 = vmatpush1.msra.mxu1 %v13046_v23 }
 0xdc3   :  { %3772 = vmatprep.subr.mxu0 %v13047_v14  ;;  %3843 = vmatprep.subr.mxu1 %v13048_v24 }
 0xdc4   :  { %3773 = vmatpush1.msra.mxu0 %v13049_v26  ;;  %3844 = vmatpush1.msra.mxu1 %v13050_v47 }
 0xdc5   :  { %3774 = vmatprep.subr.mxu0 %v13051_v41  ;;  %3845 = vmatprep.subr.mxu1 %v13052_v33 }
 0xdc6   :  { %3775 = vmatpush1.msra.mxu0 %v13053_v59  ;;  %3846 = vmatpush1.msra.mxu1 %v13054_v7 }
 0xdc7   :  { %3776 = vmatprep.subr.mxu0 %v13055_v63  ;;  %3847 = vmatprep.subr.mxu1 %v13056_v35  ;;  %v13075_v35 = vld [vmem:[#allocation32_spill] sm:$0xff] }
 0xdc8   :  { %3777 = vmatpush1.msra.mxu0 %v13057_v20  ;;  %3848 = vmatpush1.msra.mxu1 %v13058_v57  ;;  %v13077_v20 = vld [vmem:[#allocation34_spill] sm:$0xff]  ;;  %v13078_v57 = vld [vmem:[#allocation35_spill] sm:$0xff] }
 0xdc9   :  { %3778 = vmatprep.subr.mxu0 %v13059_v2  ;;  %3849 = vmatprep.subr.mxu1 %v13060_v40  ;;  %v13079_v2 = vld [vmem:[#allocation36_spill] sm:$0xff]  ;;  %v13080_v40 = vld [vmem:[#allocation37_spill] sm:$0xff] }
 0xdca   :  { %3779 = vmatpush1.msra.mxu0 %v13061_v8  ;;  %3850 = vmatpush1.msra.mxu1 %v13062_v16  ;;  %v13081_v8 = vld [vmem:[#allocation38_spill] sm:$0xff]  ;;  %v13086_v16 = vld [vmem:[#allocation43_spill] sm:$0xff] }
 0xdcb   :  { %3780 = vmatprep.subr.mxu0 %v13063_v17  ;;  %3851 = vmatprep.subr.mxu1 %v13064_v61  ;;  %v13087_v17 = vld [vmem:[#allocation44_spill] sm:$0xff]  ;;  %v13088_v61 = vld [vmem:[#allocation45_spill] sm:$0xff] }
 0xdcc   :  { %3781 = vmatpush1.msra.mxu0 %v13065_v60  ;;  %3852 = vmatpush1.msra.mxu1 %v13066_v3  ;;  %v13089_v60 = vld [vmem:[#allocation46_spill] sm:$0xff]  ;;  %v13090_v3 = vld [vmem:[#allocation47_spill] sm:$0xff] }
 0xdcd   :  { %3782 = vmatprep.subr.mxu0 %v13067_v54  ;;  %3853 = vmatprep.subr.mxu1 %v13068_v36  ;;  %v13091_v54 = vld [vmem:[#allocation48_spill] sm:$0xff]  ;;  %v13092_v36 = vld [vmem:[#allocation49_spill] sm:$0xff] }
 0xdce   :  { %3783 = vmatpush1.msra.mxu0 %v13069_v29  ;;  %3854 = vmatpush1.msra.mxu1 %v13070_v0  ;;  %v13093_v29 = vld [vmem:[#allocation50_spill] sm:$0xff]  ;;  %v13094_v0 = vld [vmem:[#allocation51_spill] sm:$0xff] }
 0xdcf   :  { %3816 = vmatprep.mubr.f32.mxu0 %v12085_v22  ;;  %3887 = vmatprep.mubr.f32.mxu1 %v12085_v22 }
 0xdd0   :  { %3906 = vmatprep.subr.mxu0 %v13071_v37  ;;  %3977 = vmatprep.subr.mxu1 %v13072_v32  ;;  %v13095_v37 = vld [vmem:[#allocation52_spill] sm:$0xff]  ;;  %v13096_v32 = vld [vmem:[#allocation53_spill] sm:$0xff] }
 0xe6f   :  { %v3648_v51 = vpop.f32.mrf.mxu0  ;;  %v3719_v13 = vpop.f32.mrf.mxu1 }
 0xe70   :  { %v3724_v25 = vadd.f32 %v3648_v51, %v3325_v43  ;;  %v3726_v42 = vadd.f32 %v3719_v13, %v3396_v38  ;;  %v13099_v43 = vld [vmem:[#allocation56_spill] sm:$0xff]  ;;  %v13100_v51 = vld [vmem:[#allocation57_spill] sm:$0xff]  ;;  %v13106_v13 = vld [vmem:[#allocation63_spill] sm:$0xff] }
 0xe71   :  { %v3650_v9 = vpop.f32.mrf.mxu0  ;;  %v3721_v15 = vpop.f32.mrf.mxu1  ;;  %v13111_v38 = vld [vmem:[#allocation68_spill] sm:$0xff] }
 0xe72   :  { %v4384_v27 = vmul.f32 -1.442695, %v3724_v25  ;;  %v3725_v10 = vadd.f32 %v3650_v9, %v3327_v5  ;;  %v3727_v28 = vadd.f32 %v3721_v15, %v3398_v30  ;;  %v13101_v5 = vld [vmem:[#allocation58_spill] sm:$0xff]  ;;  %v13102_v25 = vld [vmem:[#allocation59_spill] sm:$0xff]  ;;  %v13103_v9 = vld [vmem:[#allocation60_spill] sm:$0xff] }
 0xe73   :  { %v13108_v15 = vld [vmem:[#allocation65_spill] sm:$0xff]  ;;  %v13109_v30 = vld [vmem:[#allocation66_spill] sm:$0xff] }
 0xe74   :  { %4673 = vpow2.f32 %v4384_v27  ;;  %v4385_v6 = vmul.f32 -1.442695, %v3725_v10  ;;  %v4386_v58 = vmul.f32 -1.442695, %v3727_v28  ;;  %v13104_v27 = vld [vmem:[#allocation61_spill] sm:$0xff]  ;;  %v13105_v10 = vld [vmem:[#allocation62_spill] sm:$0xff] }
 0xe75   :  { %v13110_v28 = vld [vmem:[#allocation67_spill] sm:$0xff] }
 0xe76   :  { %4675 = vpow2.f32 %v4385_v6  ;;  %v13107_v6 = vld [vmem:[#allocation64_spill] sm:$0xff] }
 0xe77   :  { %4677 = vtanh.f32 %v3726_v42  ;;  %v13112_v42 = vld [vmem:[#allocation69_spill] sm:$0xff] }
 0xe78   :  { %4679 = vpow2.f32 %v4386_v58  ;;  %v13113_v58 = vld [vmem:[#allocation70_spill] sm:$0xff] }
 0xe81   :  { %v4674_v62 = vpop.eup %4673 }
 0xe82   :  { %v3731_v1 = vadd.f32 1.0, %v4674_v62  ;;  %v13114_v62 = vld [vmem:[#allocation71_spill] sm:$0xff] }
 0xe83   :  { %v4676_v21 = vpop.eup %4675 }
 0xe84   :  { %4681 = vrcp.f32 %v3731_v1  ;;  %v3737_v23 = vadd.f32 1.0, %v4676_v21  ;;  %v4678_v14 = vpop.eup %4677  ;;  %v13115_v1 = vld [vmem:[#allocation72_spill] sm:$0xff]  ;;  %v13116_v21 = vld [vmem:[#allocation73_spill] sm:$0xff] }
 0xe85   :  { %v4680_v24 = vpop.eup %4679 }
 0xe86   :  { %4683 = vrcp.f32 %v3737_v23  ;;  %v3744_v45 = vadd.f32 1.0, %v4680_v24  ;;  %v13117_v23 = vld [vmem:[#allocation74_spill] sm:$0xff]  ;;  %v13119_v24 = vld [vmem:[#allocation76_spill] sm:$0xff] }
 0xe88   :  { %4685 = vrcp.f32 %v3744_v45  ;;  %v13123_v45 = vld [vmem:[#allocation80_spill] sm:$0xff] }
 0xe91   :  { %v4682_v26 = vpop.eup %4681 }
 0xe92   :  { %v3748_v47 = vmul.f32 %v4682_v26, %v4678_v14  ;;  %v13118_v14 = vld [vmem:[#allocation75_spill] sm:$0xff]  ;;  %v13120_v26 = vld [vmem:[#allocation77_spill] sm:$0xff] }
 0xe93   :  { %v4684_v41 = vpop.eup %4683 }
 0xe94   :  { %v3747_v33 = vmul.f32 %v4684_v41, %v10131_v52  ;;  %v13076_v52 = vld [vmem:[#allocation33_spill] sm:$0xff]  ;;  %v13122_v41 = vld [vmem:[#allocation79_spill] sm:$0xff] }
 0xe95   :  { %v4686_v34 = vpop.eup %4685 }
 0xe96   :  { %v10998_v59 = vadd.f32 %v3748_v47, %v3747_v33  ;;  %v13121_v47 = vld [vmem:[#allocation78_spill] sm:$0xff]  ;;  %v13124_v33 = vld [vmem:[#allocation81_spill] sm:$0xff] }
 0xe98   :  { %4687 = vtanh.f32 %v10998_v59 }
 0xea5   :  { %v4688_v7 = vpop.eup %4687 }
 0xea6   :  { %v3751_v63 = vmul.f32 %v4688_v7, %v4686_v34  ;;  %v13125_v34 = vld [vmem:[#allocation82_spill] sm:$0xff]  ;;  %v13126_v7 = vld [vmem:[#allocation83_spill] sm:$0xff] }
 0xea8   :  { %3817 = vmatmul.mubr.f32.vlgmr.msra.gmra.mxu0 %v3751_v63  ;;  %3888 = vmatmul.mubr.f32.vlgmr.msra.gmra.mxu1 %v3751_v63  ;;  %v13127_v63 = vld [vmem:[#allocation84_spill] sm:$0xff] }
 0xea9   :  { %3907 = vmatpush1.msra.mxu0 %v10137_v50  ;;  %3978 = vmatpush1.msra.mxu1 %v10143_v53  ;;  %v13082_v50 = vld [vmem:[#allocation39_spill] sm:$0xff]  ;;  %v13083_v53 = vld [vmem:[#allocation40_spill] sm:$0xff] }
 0xeaa   :  { %3908 = vmatprep.subr.mxu0 %v10149_v19  ;;  %3979 = vmatprep.subr.mxu1 %v10155_v49  ;;  %v13084_v19 = vld [vmem:[#allocation41_spill] sm:$0xff]  ;;  %v13085_v49 = vld [vmem:[#allocation42_spill] sm:$0xff] }
 0xeab   :  { %3909 = vmatpush1.msra.mxu0 %v13075_v35  ;;  %3980 = vmatpush1.msra.mxu1 %v13076_v52  ;;  %v13128_v35 = vld [vmem:[#allocation85_spill] sm:$0xff]  ;;  %v13129_v52 = vld [vmem:[#allocation87_spill] sm:$0xff] }
 0xeac   :  { %3910 = vmatprep.subr.mxu0 %v13077_v20  ;;  %3981 = vmatprep.subr.mxu1 %v13078_v57  ;;  %v13130_v20 = vld [vmem:[#allocation88_spill] sm:$0xff]  ;;  %v13131_v57 = vld [vmem:[#allocation89_spill] sm:$0xff] }
 0xead   :  { %3911 = vmatpush1.msra.mxu0 %v13079_v2  ;;  %3982 = vmatpush1.msra.mxu1 %v13080_v40  ;;  %v13132_v2 = vld [vmem:[#allocation90_spill] sm:$0xff]  ;;  %v13133_v40 = vld [vmem:[#allocation91_spill] sm:$0xff] }
 0xeae   :  { %3912 = vmatprep.subr.mxu0 %v13081_v8  ;;  %3983 = vmatprep.subr.mxu1 %v13082_v50  ;;  %v13134_v8 = vld [vmem:[#allocation92_spill] sm:$0xff]  ;;  %v13135_v50 = vld [vmem:[#allocation93_spill] sm:$0xff] }
 0xeaf   :  { %3913 = vmatpush1.msra.mxu0 %v13083_v53  ;;  %3984 = vmatpush1.msra.mxu1 %v13084_v19  ;;  %v13136_v53 = vld [vmem:[#allocation94_spill] sm:$0xff]  ;;  %v13137_v19 = vld [vmem:[#allocation95_spill] sm:$0xff] }
 0xeb0   :  { %3914 = vmatprep.subr.mxu0 %v13085_v49  ;;  %3985 = vmatprep.subr.mxu1 %v13086_v16  ;;  %v13138_v49 = vld [vmem:[#allocation96_spill] sm:$0xff]  ;;  %v13139_v16 = vld [vmem:[#allocation97_spill] sm:$0xff] }
 0xeb1   :  { %3915 = vmatpush1.msra.mxu0 %v13087_v17  ;;  %3986 = vmatpush1.msra.mxu1 %v13088_v61  ;;  %v13140_v17 = vld [vmem:[#allocation98_spill] sm:$0xff]  ;;  %v13141_v61 = vld [vmem:[#allocation99_spill] sm:$0xff] }
 0xeb2   :  { %3916 = vmatprep.subr.mxu0 %v13089_v60  ;;  %3987 = vmatprep.subr.mxu1 %v13090_v3  ;;  %v13142_v60 = vld [vmem:[#allocation100_spill] sm:$0xff]  ;;  %v13144_v3 = vld [vmem:[#allocation102_spill] sm:$0xff] }
 0xeb3   :  { %3917 = vmatpush1.msra.mxu0 %v13091_v54  ;;  %3988 = vmatpush1.msra.mxu1 %v13092_v36  ;;  %v13145_v54 = vld [vmem:[#allocation103_spill] sm:$0xff]  ;;  %v13146_v36 = vld [vmem:[#allocation104_spill] sm:$0xff] }
 0xeb4   :  { %3918 = vmatprep.subr.mxu0 %v13093_v29  ;;  %3989 = vmatprep.subr.mxu1 %v13094_v0  ;;  %v13147_v29 = vld [vmem:[#allocation105_spill] sm:$0xff]  ;;  %v13148_v0 = vld [vmem:[#allocation106_spill] sm:$0xff] }
 0xeb5   :  { %3919 = vmatpush1.msra.mxu0 %v13095_v37  ;;  %3990 = vmatpush1.msra.mxu1 %v13096_v32  ;;  %v13149_v37 = vld [vmem:[#allocation107_spill] sm:$0xff]  ;;  %v13150_v32 = vld [vmem:[#allocation108_spill] sm:$0xff] }
 0xeb6   :  { %3920 = vmatprep.subr.mxu0 %v13097_v11  ;;  %3991 = vmatprep.subr.mxu1 %v13098_v18  ;;  %v13151_v11 = vld [vmem:[#allocation109_spill] sm:$0xff]  ;;  %v13152_v18 = vld [vmem:[#allocation110_spill] sm:$0xff] }
 0xeb7   :  { %3921 = vmatpush1.msra.mxu0 %v13099_v43  ;;  %3992 = vmatpush1.msra.mxu1 %v13100_v51  ;;  %v13153_v43 = vld [vmem:[#allocation111_spill] sm:$0xff]  ;;  %v13154_v51 = vld [vmem:[#allocation112_spill] sm:$0xff] }
 0xeb8   :  { %3922 = vmatprep.subr.mxu0 %v13101_v5  ;;  %3993 = vmatprep.subr.mxu1 %v13102_v25  ;;  %v13155_v5 = vld [vmem:[#allocation113_spill] sm:$0xff]  ;;  %v13156_v25 = vld [vmem:[#allocation114_spill] sm:$0xff] }
 0xeb9   :  { %3923 = vmatpush1.msra.mxu0 %v13103_v9  ;;  %3994 = vmatpush1.msra.mxu1 %v13104_v27  ;;  %v13157_v9 = vld [vmem:[#allocation115_spill] sm:$0xff]  ;;  %v13158_v27 = vld [vmem:[#allocation116_spill] sm:$0xff] }
 0xeba   :  { %3924 = vmatprep.subr.mxu0 %v13105_v10  ;;  %3995 = vmatprep.subr.mxu1 %v13106_v13  ;;  %v13159_v10 = vld [vmem:[#allocation117_spill] sm:$0xff]  ;;  %v13160_v13 = vld [vmem:[#allocation118_spill] sm:$0xff] }
 0xebb   :  { %3925 = vmatpush1.msra.mxu0 %v13107_v6  ;;  %3996 = vmatpush1.msra.mxu1 %v13108_v15  ;;  %v13161_v6 = vld [vmem:[#allocation119_spill] sm:$0xff]  ;;  %v13162_v15 = vld [vmem:[#allocation120_spill] sm:$0xff] }
 0xebc   :  { %3926 = vmatprep.subr.mxu0 %v13109_v30  ;;  %3997 = vmatprep.subr.mxu1 %v13110_v28  ;;  %v13163_v30 = vld [vmem:[#allocation121_spill] sm:$0xff]  ;;  %v13164_v28 = vld [vmem:[#allocation122_spill] sm:$0xff] }
 0xebd   :  { %3927 = vmatpush1.msra.mxu0 %v13111_v38  ;;  %3998 = vmatpush1.msra.mxu1 %v13112_v42  ;;  %v13165_v38 = vld [vmem:[#allocation123_spill] sm:$0xff]  ;;  %v13166_v42 = vld [vmem:[#allocation124_spill] sm:$0xff] }
 0xebe   :  { %3928 = vmatprep.subr.mxu0 %v13113_v58  ;;  %3999 = vmatprep.subr.mxu1 %v13114_v62  ;;  %v13167_v58 = vld [vmem:[#allocation125_spill] sm:$0xff]  ;;  %v13168_v62 = vld [vmem:[#allocation126_spill] sm:$0xff] }
 0xebf   :  { %3929 = vmatpush1.msra.mxu0 %v13115_v1  ;;  %4000 = vmatpush1.msra.mxu1 %v13116_v21  ;;  %v13169_v1 = vld [vmem:[#allocation127_spill] sm:$0xff]  ;;  %v13170_v21 = vld [vmem:[#allocation128_spill] sm:$0xff] }
 0xec0   :  { %3930 = vmatprep.subr.mxu0 %v13117_v23  ;;  %4001 = vmatprep.subr.mxu1 %v13118_v14  ;;  %v13171_v23 = vld [vmem:[#allocation129_spill] sm:$0xff]  ;;  %v13172_v14 = vld [vmem:[#allocation130_spill] sm:$0xff] }
 0xec1   :  { %3931 = vmatpush1.msra.mxu0 %v13119_v24  ;;  %4002 = vmatpush1.msra.mxu1 %v13120_v26  ;;  %v13173_v24 = vld [vmem:[#allocation131_spill] sm:$0xff]  ;;  %v13174_v26 = vld [vmem:[#allocation132_spill] sm:$0xff] }
 0xec2   :  { %3932 = vmatprep.subr.mxu0 %v13121_v47  ;;  %4003 = vmatprep.subr.mxu1 %v13122_v41  ;;  %v13175_v47 = vld [vmem:[#allocation133_spill] sm:$0xff]  ;;  %v13176_v41 = vld [vmem:[#allocation134_spill] sm:$0xff] }
 0xec3   :  { %3933 = vmatpush1.msra.mxu0 %v13123_v45  ;;  %4004 = vmatpush1.msra.mxu1 %v13124_v33  ;;  %v13177_v45 = vld [vmem:[#allocation135_spill] sm:$0xff]  ;;  %v13178_v33 = vld [vmem:[#allocation136_spill] sm:$0xff] }
 0xec4   :  { %3934 = vmatprep.subr.mxu0 %v13125_v34  ;;  %4005 = vmatprep.subr.mxu1 %v13126_v7  ;;  %v13179_v34 = vld [vmem:[#allocation137_spill] sm:$0xff]  ;;  %v13180_v7 = vld [vmem:[#allocation138_spill] sm:$0xff] }
 0xec5   :  { %3935 = vmatpush1.msra.mxu0 %v13127_v63  ;;  %4006 = vmatpush1.msra.mxu1 %v13128_v35  ;;  %v13181_v63 = vld [vmem:[#allocation139_spill] sm:$0xff]  ;;  %v13182_v35 = vld [vmem:[#allocation140_spill] sm:$0xff] }
 0xec6   :  { %3936 = vmatprep.subr.mxu0 %v13129_v52  ;;  %4007 = vmatprep.subr.mxu1 %v13130_v20  ;;  %v13183_v52 = vld [vmem:[#allocation141_spill] sm:$0xff]  ;;  %v13184_v20 = vld [vmem:[#allocation142_spill] sm:$0xff] }
 0xec7   :  { %3937 = vmatpush1.msra.mxu0 %v13131_v57  ;;  %3970 = vmatprep.mubr.f32.mxu0 %v12085_v22  ;;  %v13185_v57 = vld [vmem:[#allocation143_spill] sm:$0xff] }
 0xec8   :  { %4008 = vmatpush1.msra.mxu1 %v13132_v2  ;;  %4041 = vmatprep.mubr.f32.mxu1 %v12085_v22  ;;  %v13186_v2 = vld [vmem:[#allocation144_spill] sm:$0xff] }
 0xec9   :  { %3971 = vmatmul.mubr.f32.vlgmr.msra.gmra.mxu0 %v10918_v39  ;;  %4042 = vmatmul.mubr.f32.vlgmr.msra.gmra.mxu1 %v10918_v39  ;;  %v13143_v39 = vld [vmem:[#allocation101_spill] sm:$0xff] }
 0xeca   :  { %4076 = vmatprep.subr.mxu0 %v13133_v40  ;;  %4147 = vmatprep.subr.mxu1 %v13134_v8  ;;  %v13187_v40 = vld [vmem:[#allocation145_spill] sm:$0xff]  ;;  %v13188_v8 = vld [vmem:[#allocation146_spill] sm:$0xff] }
 0xecb   :  { %4077 = vmatpush1.msra.mxu0 %v13135_v50  ;;  %4148 = vmatpush1.msra.mxu1 %v13136_v53  ;;  %v13189_v50 = vld [vmem:[#allocation147_spill] sm:$0xff]  ;;  %v13190_v53 = vld [vmem:[#allocation148_spill] sm:$0xff] }
 0xecc   :  { %4078 = vmatprep.subr.mxu0 %v13137_v19  ;;  %4149 = vmatprep.subr.mxu1 %v13138_v49  ;;  %v13191_v19 = vld [vmem:[#allocation149_spill] sm:$0xff]  ;;  %v13192_v49 = vld [vmem:[#allocation150_spill] sm:$0xff] }
 0xecd   :  { %4079 = vmatpush1.msra.mxu0 %v13139_v16  ;;  %4150 = vmatpush1.msra.mxu1 %v13140_v17  ;;  %v13193_v16 = vld [vmem:[#allocation161_spill] sm:$0xff] }
 0xece   :  { %4080 = vmatprep.subr.mxu0 %v13141_v61  ;;  %4151 = vmatprep.subr.mxu1 %v13142_v60  ;;  %v13194_v17 = vld [vmem:[#allocation165_spill] sm:$0xff]  ;;  %v13195_v61 = vld [vmem:[#allocation166_spill] sm:$0xff]  ;;  %v13196_v60 = vld [vmem:[#allocation167_spill] sm:$0xff] }
 0xecf   :  { %4081 = vmatpush1.msra.mxu0 %v13143_v39  ;;  %4152 = vmatpush1.msra.mxu1 %v13144_v3  ;;  %v3896_v39 = vpop.permute.xlu1 %3895  ;;  %v13197_v3 = vld [vmem:[#allocation153_spill] sm:$0xff] }
 0xed0   :  { %4082 = vmatprep.subr.mxu0 %v13145_v54  ;;  %4153 = vmatprep.subr.mxu1 %v13146_v36  ;;  %v3898_v54 = vmul.f32 %v3896_v39, %v13197_v3  ;;  %v4246_v3 = vld [vmem:[%s11237_s7] sm:$0xff] }
 0xed1   :  { %4083 = vmatpush1.msra.mxu0 %v13147_v29  ;;  %4154 = vmatpush1.msra.mxu1 %v13148_v0  ;;  %v13198_v29 = vld [vmem:[#allocation154_spill] sm:$0xff] }
 0xed2   :  { %4084 = vmatprep.subr.mxu0 %v13149_v37  ;;  %4155 = vmatprep.subr.mxu1 %v13150_v32  ;;  %v3899_v0 = vmul.f32 %v3896_v39, %v13198_v29  ;;  %v13199_v37 = vld [vmem:[#allocation155_spill] sm:$0xff] }
 0xed3   :  { %4085 = vmatpush1.msra.mxu0 %v13151_v11  ;;  %4156 = vmatpush1.msra.mxu1 %v13152_v18  ;;  %v3902_v32 = vadd.f32 %v3898_v54, %v13199_v37  ;;  %v14_v54 = vstv %s11238_s8 }
 0xed4   :  { %4086 = vmatprep.subr.mxu0 %v13153_v43  ;;  %4157 = vmatprep.subr.mxu1 %v13154_v51  ;;  %v13200_v43 = vld [vmem:[#allocation157_spill] sm:$0xff]  ;;  %15 = vst [vmem:[#allocation2] sm:$0x1] %v14_v54 }
 0xed5   :  { %4087 = vmatpush1.msra.mxu0 %v13155_v5  ;;  %4158 = vmatpush1.msra.mxu1 %v13156_v25  ;;  %v3903_v51 = vadd.f32 %v3899_v0, %v13200_v43 }
 0xed6   :  { %4088 = vmatprep.subr.mxu0 %v13157_v9  ;;  %4159 = vmatprep.subr.mxu1 %v13158_v27 }
 0xed7   :  { %4089 = vmatpush1.msra.mxu0 %v13159_v10  ;;  %4160 = vmatpush1.msra.mxu1 %v13160_v13 }
 0xed8   :  { %4090 = vmatprep.subr.mxu0 %v13161_v6  ;;  %4161 = vmatprep.subr.mxu1 %v13162_v15  ;;  %v3901_v6 = vmul.f32 %v3896_v39, %v12228_v48 }
 0xed9   :  { %4091 = vmatpush1.msra.mxu0 %v13163_v30  ;;  %4162 = vmatpush1.msra.mxu1 %v13164_v28  ;;  %v13201_v28 = vld [vmem:[#allocation164_spill] sm:$0xff] }
 0xeda   :  { %4092 = vmatprep.subr.mxu0 %v13165_v38  ;;  %4163 = vmatprep.subr.mxu1 %v13166_v42  ;;  %v3905_v38 = vadd.f32 %v3901_v6, %v13201_v28 }
 0xedb   :  { %4093 = vmatpush1.msra.mxu0 %v13167_v58  ;;  %4164 = vmatpush1.msra.mxu1 %v13168_v62  ;;  %v3900_v58 = vmul.f32 %v3896_v39, %v6576_v55  ;;  %v4247_v39 = vld [vmem:[%s11237_s7 + $0x8] sm:$0xff] }
 0xedc   :  { %4094 = vmatprep.subr.mxu0 %v13169_v1  ;;  %4165 = vmatprep.subr.mxu1 %v13170_v21 }
 0xedd   :  { %4095 = vmatpush1.msra.mxu0 %v13171_v23  ;;  %4166 = vmatpush1.msra.mxu1 %v13172_v14  ;;  %v3904_v1 = vadd.f32 %v3900_v58, %v6580_v56 }
 0xede   :  { %4096 = vmatprep.subr.mxu0 %v13173_v24  ;;  %4167 = vmatprep.subr.mxu1 %v13174_v26 }
 0xedf   :  { %4097 = vmatpush1.msra.mxu0 %v13175_v47  ;;  %4168 = vmatpush1.msra.mxu1 %v13176_v41 }
 0xee0   :  { %4098 = vmatprep.subr.mxu0 %v13177_v45  ;;  %4169 = vmatprep.subr.mxu1 %v13178_v33 }
 0xee1   :  { %4099 = vmatpush1.msra.mxu0 %v13179_v34  ;;  %4170 = vmatpush1.msra.mxu1 %v13180_v7 }
 0xee2   :  { %4100 = vmatprep.subr.mxu0 %v13181_v63  ;;  %4171 = vmatprep.subr.mxu1 %v13182_v35 }
 0xee3   :  { %4101 = vmatpush1.msra.mxu0 %v13183_v52  ;;  %4172 = vmatpush1.msra.mxu1 %v13184_v20  ;;  %v4261_v20 = vld [vmem:[%s11237_s7 + $0x78] sm:$0xff] }
 0xee4   :  { %4102 = vmatprep.subr.mxu0 %v13185_v57  ;;  %4173 = vmatprep.subr.mxu1 %v13186_v2  ;;  %v4260_v57 = vld [vmem:[%s11237_s7 + $0x70] sm:$0xff]  ;;  %v4258_v2 = vld [vmem:[%s11237_s7 + $0x60] sm:$0xff] }
 0xee5   :  { %4103 = vmatpush1.msra.mxu0 %v13187_v40  ;;  %4174 = vmatpush1.msra.mxu1 %v13188_v8  ;;  %v4257_v40 = vld [vmem:[%s11237_s7 + $0x58] sm:$0xff]  ;;  %v4256_v8 = vld [vmem:[%s11237_s7 + $0x50] sm:$0xff] }
 0xee6   :  { %4104 = vmatprep.subr.mxu0 %v13189_v50  ;;  %4175 = vmatprep.subr.mxu1 %v13190_v53  ;;  %v4255_v50 = vld [vmem:[%s11237_s7 + $0x48] sm:$0xff]  ;;  %v4254_v53 = vld [vmem:[%s11237_s7 + $0x40] sm:$0xff] }
 0xee7   :  { %4105 = vmatpush1.msra.mxu0 %v13191_v19  ;;  %4176 = vmatpush1.msra.mxu1 %v13192_v49  ;;  %v4253_v19 = vld [vmem:[%s11237_s7 + $0x38] sm:$0xff]  ;;  %v4252_v49 = vld [vmem:[%s11237_s7 + $0x30] sm:$0xff] }
 0xee8   :  { %4106 = vmatprep.subr.mxu0 %v13193_v16  ;;  %4177 = vmatprep.subr.mxu1 %v13194_v17  ;;  %v4251_v16 = vld [vmem:[%s11237_s7 + $0x28] sm:$0xff]  ;;  %v4250_v17 = vld [vmem:[%s11237_s7 + $0x20] sm:$0xff] }
 0xee9   :  { %4107 = vmatpush1.msra.mxu0 %v13195_v61  ;;  %4140 = vmatprep.mubr.f32.mxu0 %v12085_v22  ;;  %v4249_v61 = vld [vmem:[%s11237_s7 + $0x18] sm:$0xff] }
 0xeea   :  { %4178 = vmatpush1.msra.mxu1 %v13196_v60  ;;  %4211 = vmatprep.mubr.f32.mxu1 %v12085_v22  ;;  %v4248_v60 = vld [vmem:[%s11237_s7 + $0x10] sm:$0xff] }
 0xeeb   :  { %4411 = vmatprep.subr.mxu0 %v12085_v22 }
 0xf68   :  { %v11135_v36 = vpop.f32.mrf.mxu0  ;;  %v11141_v18 = vpop.f32.mrf.mxu1 }
 0xf69   :  { %v3819_v29 = vadd.f32 %v11135_v36, %v13074_v4  ;;  %v3890_v4 = vadd.f32 %v11141_v18, %v6675_v46 }
 0xf6a   :  { %v11139_v11 = vpop.f32.mrf.mxu0  ;;  %v11144_v27 = vpop.f32.mrf.mxu1 }
 0xf6b   :  { %v3821_v37 = vadd.f32 %v11139_v11, %v6665_v31 }
 0xf89   :  { %v3972_v5 = vpop.f32.mrf.mxu0  ;;  %v4043_v15 = vpop.f32.mrf.mxu1 }
 0xf8a   :  { %v4048_v25 = vadd.f32 %v3972_v5, %v3902_v32  ;;  %v4050_v14 = vadd.f32 %v4043_v15, %v3904_v1 }
 0xf8b   :  { %v3974_v9 = vpop.f32.mrf.mxu0  ;;  %v4045_v42 = vpop.f32.mrf.mxu1 }
 0xf8c   :  { %v4387_v10 = vmul.f32 -1.442695, %v4048_v25  ;;  %v4049_v13 = vadd.f32 %v3974_v9, %v3903_v51  ;;  %v4051_v62 = vadd.f32 %v4045_v42, %v3905_v38 }
 0xf8e   :  { %4689 = vpow2.f32 %v4387_v10  ;;  %v4388_v30 = vmul.f32 -1.442695, %v4049_v13  ;;  %v4389_v21 = vmul.f32 -1.442695, %v4051_v62  ;;  %v3892_v10 = vadd.f32 %v11144_v27, %v6672_v44 }
 0xf90   :  { %4691 = vpow2.f32 %v4388_v30 }
 0xf91   :  { %4693 = vpow2.f32 %v4389_v21 }
 0xf9b   :  { %v4690_v23 = vpop.eup %4689 }
 0xf9c   :  { %v4055_v24 = vadd.f32 1.0, %v4690_v23  ;;  %v4393_v23 = vld [vmem:[#allocation2] ss:$0 sm:$0xff] }
 0xf9d   :  { %v4692_v26 = vpop.eup %4691 }
 0xf9e   :  { %4695 = vrcp.f32 %v4055_v24  ;;  %v4061_v48 = vadd.f32 1.0, %v4692_v26  ;;  %v4694_v47 = vpop.eup %4693 }
 0xf9f   :  { %4697 = vtanh.f32 %v4050_v14  ;;  %v4068_v34 = vadd.f32 1.0, %v4694_v47 }
 0xfa0   :  { %4699 = vrcp.f32 %v4061_v48 }
 0xfa1   :  { %4701 = vrcp.f32 %v4068_v34 }
 0xfab   :  { %v4696_v41 = vpop.eup %4695 }
 0xfac   :  { %v4698_v45 = vpop.eup %4697 }
 0xfad   :  { %v4700_v33 = vpop.eup %4699  ;;  %v4072_v7 = vmul.f32 %v4698_v45, %v4696_v41 }
 0xfae   :  { %v4071_v55 = vmul.f32 %v4700_v33, %v10915_v12  ;;  %v4702_v56 = vpop.eup %4701  ;;  %v4259_v12 = vld [vmem:[%s11237_s7 + $0x68] sm:$0xff] }
 0xfb0   :  { %v4073_v63 = vadd.f32 %v4072_v7, %v4071_v55 }
 0xfb2   :  { %4703 = vtanh.f32 %v4073_v63 }
 0xfbf   :  { %v4704_v35 = vpop.eup %4703 }
 0xfc0   :  { %v4075_v52 = vmul.f32 %v4704_v35, %v4702_v56 }
 0xfc2   :  { %4141 = vmatmul.mubr.f32.vlgmr.msra.gmra.mxu0 %v4075_v52  ;;  %4212 = vmatmul.mubr.f32.vlgmr.msra.gmra.mxu1 %v4075_v52 }
 0xfc3   :  { %4412 = vmatpush3.msra.mxu0 %v4261_v20  ;;  %4443 = vmatprep.mubr.msk.f32.mxu0 %vm5309_vm0, %v12085_v22 }
 0xfc4   :  { %4413 = vmatprep.subr.mxu0 %v12085_v22 }
 0xfc5   :  { %4414 = vmatpush3.msra.mxu0 %v4260_v57 }
 0xfc6   :  { %4415 = vmatprep.subr.mxu0 %v12085_v22 }
 0xfc7   :  { %4416 = vmatpush3.msra.mxu0 %v4259_v12 }
 0xfc8   :  { %4417 = vmatprep.subr.mxu0 %v12085_v22 }
 0xfc9   :  { %4418 = vmatpush3.msra.mxu0 %v4258_v2 }
 0xfca   :  { %4419 = vmatprep.subr.mxu0 %v12085_v22 }
 0xfcb   :  { %4420 = vmatpush3.msra.mxu0 %v4257_v40 }
 0xfcc   :  { %4421 = vmatprep.subr.mxu0 %v12085_v22 }
 0xfcd   :  { %4422 = vmatpush3.msra.mxu0 %v4256_v8 }
 0xfce   :  { %4423 = vmatprep.subr.mxu0 %v12085_v22 }
 0xfcf   :  { %4424 = vmatpush3.msra.mxu0 %v4255_v50 }
 0xfd0   :  { %4425 = vmatprep.subr.mxu0 %v12085_v22 }
 0xfd1   :  { %4426 = vmatpush3.msra.mxu0 %v4254_v53 }
 0xfd2   :  { %4427 = vmatprep.subr.mxu0 %v12085_v22 }
 0xfd3   :  { %4428 = vmatpush3.msra.mxu0 %v4253_v19 }
 0xfd4   :  { %4429 = vmatprep.subr.mxu0 %v12085_v22 }
 0xfd5   :  { %4430 = vmatpush3.msra.mxu0 %v4252_v49 }
 0xfd6   :  { %4431 = vmatprep.subr.mxu0 %v12085_v22 }
 0xfd7   :  { %4432 = vmatpush3.msra.mxu0 %v4251_v16 }
 0xfd8   :  { %4433 = vmatprep.subr.mxu0 %v12085_v22 }
 0xfd9   :  { %4434 = vmatpush3.msra.mxu0 %v4250_v17 }
 0xfda   :  { %4435 = vmatprep.subr.mxu0 %v12085_v22 }
 0xfdb   :  { %4436 = vmatpush3.msra.mxu0 %v4249_v61 }
 0xfdc   :  { %4437 = vmatprep.subr.mxu0 %v12085_v22 }
 0xfdd   :  { %4438 = vmatpush3.msra.mxu0 %v4248_v60 }
 0xfde   :  { %4439 = vmatprep.subr.mxu0 %v12085_v22 }
 0xfdf   :  { %4440 = vmatpush3.msra.mxu0 %v4247_v39 }
 0xfe0   :  { %4441 = vmatprep.subr.mxu0 %v12085_v22 }
 0xfe1   :  { %4442 = vmatpush3.msra.mxu0 %v4246_v3 }
0x1082   :  { %v4142_v0 = vpop.f32.mrf.mxu0  ;;  %v4213_v25 = vpop.f32.mrf.mxu1 }
0x1083   :  { %v4218_v32 = vadd.f32 %v4142_v0, %v3819_v29  ;;  %v4220_v36 = vadd.f32 %v4213_v25, %v3890_v4 }
0x1084   :  { %v4144_v43 = vpop.f32.mrf.mxu0  ;;  %v4215_v9 = vpop.f32.mrf.mxu1 }
0x1085   :  { %v4390_v51 = vmul.f32 -1.442695, %v4218_v32  ;;  %v4219_v5 = vadd.f32 %v4144_v43, %v3821_v37  ;;  %v4221_v13 = vadd.f32 %v4215_v9, %v3892_v10 }
0x1087   :  { %4705 = vpow2.f32 %v4390_v51  ;;  %v4391_v22 = vmul.f32 -1.442695, %v4219_v5  ;;  %v4392_v6 = vmul.f32 -1.442695, %v4221_v13 }
0x1089   :  { %4707 = vpow2.f32 %v4391_v22 }
0x108a   :  { %4709 = vtanh.f32 %v4220_v36 }
0x108b   :  { %4711 = vpow2.f32 %v4392_v6 }
0x1094   :  { %v4706_v15 = vpop.eup %4705 }
0x1095   :  { %v4225_v31 = vadd.f32 1.0, %v4706_v15 }
0x1096   :  { %v4708_v11 = vpop.eup %4707 }
0x1097   :  { %4713 = vrcp.f32 %v4225_v31  ;;  %v4231_v30 = vadd.f32 1.0, %v4708_v11  ;;  %v4710_v28 = vpop.eup %4709 }
0x1098   :  { %v4712_v38 = vpop.eup %4711 }
0x1099   :  { %4715 = vrcp.f32 %v4231_v30  ;;  %v4238_v44 = vadd.f32 1.0, %v4712_v38 }
0x109b   :  { %4717 = vrcp.f32 %v4238_v44 }
0x10a4   :  { %v4714_v42 = vpop.eup %4713 }
0x10a5   :  { %v4242_v58 = vmul.f32 %v4714_v42, %v4710_v28 }
0x10a6   :  { %v4716_v62 = vpop.eup %4715 }
0x10a7   :  { %v4241_v27 = vmul.f32 %v4716_v62, %v10998_v59 }
0x10a8   :  { %v4718_v46 = vpop.eup %4717 }
0x10a9   :  { %v4243_v1 = vadd.f32 %v4242_v58, %v4241_v27 }
0x10ab   :  { %4719 = vtanh.f32 %v4243_v1 }
0x10b8   :  { %v4720_v18 = vpop.eup %4719 }
0x10b9   :  { %v4245_v21 = vmul.f32 %v4720_v18, %v4718_v46 }
0x10bb   :  { %4444 = vmatmul.mubr.f32.vlgmr.msra.gmra.mxu0 %v4245_v21 }
0x117b   :  { %v4335_v14 = vpop.f32.mrf.mxu0 }
0x117c   :  { %v4336_v24 = vadd.f32 %v4393_v23, %v4335_v14 }
0x117d   :  { %v4445_v26 = vpop.f32.mrf.mxu0 }
0x117e   :  { %4340 = vst.msk [vmem:[%s11239_s9] sm:$0x3] %vm4339_vm1, %v4336_v24 }

</bundles_post_ra>
